<compile_context>
chip_gen: v7x
topology: tpu7x:2x2x1
jax: 0.10.0
libtpu: 0.0.40
codegen_flags: <defaults>
</compile_context>

<pallas_src>
import functools

import jax
import jax.numpy as jnp
from jax.experimental import pallas as pl
from jax.experimental.pallas import tpu as pltpu

PRELU_ALPHA = 0.25                 # nn.PReLU() default single shared parameter
TM_MAX = 1024                      # row tile for the generic matmul kernel
VMEM_LIMIT = 32 * 1024 * 1024      # explicit scoped-VMEM budget (fits all gens)
ACT_DTYPE = jnp.bfloat16           # inter-layer activation dtype in HBM


# ----------------------------------------------------------------------------
# Kernel 1: fused 3x3 "same" conv + bias + PReLU (+ optional residual add/sub)
# ----------------------------------------------------------------------------
def _conv3x3_kernel(xp_ref, w_ref, b_ref, alpha_ref, *rest, H, W, res_mode):
    """xp_ref: (1, H+2, W+2, Cin) bf16 padded tile; w_ref: (9, Cin, Cout) f32;
    b_ref: (1, Cout) f32; alpha_ref: (1,) SMEM; rest = [res_ref] + [o_ref]."""
    if res_mode:
        res_ref, o_ref = rest
    else:
        (o_ref,) = rest
    Cin = xp_ref.shape[-1]
    Cout = o_ref.shape[-1]

    # Single load + cast of the whole padded tile; the nine shifted windows
    # below replace the old 9x-wide im2col intermediate in HBM.
    x = xp_ref[0].astype(jnp.float32)                      # (H+2, W+2, Cin)
    acc = jnp.zeros((H * W, Cout), jnp.float32)
    t = 0
    for dy in range(3):
        for dx in range(3):
            xt = x[dy:dy + H, dx:dx + W, :].reshape(H * W, Cin)
            acc = acc + jnp.dot(xt, w_ref[t],
                                preferred_element_type=jnp.float32)
            t += 1
    acc = acc + b_ref[...]                                 # (1, Cout) broadcast
    a = alpha_ref[0]                                       # PReLU slope (SMEM)
    y = jnp.where(acc >= 0.0, acc, a * acc)
    if res_mode == 1:      # out = res + PReLU(conv(x))
        y = res_ref[0].astype(jnp.float32).reshape(H * W, Cout) + y
    elif res_mode == 2:    # out = res - PReLU(conv(x))
        y = res_ref[0].astype(jnp.float32).reshape(H * W, Cout) - y
    o_ref[0] = y.reshape(H, W, Cout).astype(o_ref.dtype)


def conv3x3_prelu(x, w, b, alpha=PRELU_ALPHA, res=None, res_mode=0):
    """Conv2d(k=3, s=1, p=1) + PReLU (+ fused residual).  x: (N,H,W,Cin) NHWC."""
    N, H, W, Cin = x.shape
    Cout = w.shape[-1]
    xp = jnp.pad(x.astype(ACT_DTYPE), ((0, 0), (1, 1), (1, 1), (0, 0)))
    kernel = functools.partial(_conv3x3_kernel, H=H, W=W, res_mode=res_mode)
    in_specs = [
        pl.BlockSpec((1, H + 2, W + 2, Cin), lambda n: (n, 0, 0, 0)),
        pl.BlockSpec((9, Cin, Cout), lambda n: (0, 0, 0)),
        pl.BlockSpec((1, Cout), lambda n: (0, 0)),
        pl.BlockSpec(memory_space=pltpu.MemorySpace.SMEM),
    ]
    args = [
        xp,
        w.reshape(9, Cin, Cout).astype(jnp.float32),
        b.reshape(1, Cout).astype(jnp.float32),
        jnp.asarray(alpha, jnp.float32).reshape(1),
    ]
    if res_mode:
        in_specs.append(pl.BlockSpec((1, H, W, Cout), lambda n: (n, 0, 0, 0)))
        args.append(res.astype(ACT_DTYPE))
    return pl.pallas_call(
        kernel,
        out_shape=jax.ShapeDtypeStruct((N, H, W, Cout), ACT_DTYPE),
        grid=(N,),
        in_specs=in_specs,
        out_specs=pl.BlockSpec((1, H, W, Cout), lambda n: (n, 0, 0, 0)),
        compiler_params=pltpu.CompilerParams(
            dimension_semantics=("parallel",),
            vmem_limit_bytes=VMEM_LIMIT),
    )(*args)


# ----------------------------------------------------------------------------
# Kernel 2: generic fused matmul + bias + PReLU (+ optional residual add/sub)
# (used for the stride-`scale` down conv and the stride-`scale` transposed conv)
# ----------------------------------------------------------------------------
def _matmul_kernel(x_ref, w_ref, b_ref, alpha_ref, *rest, res_mode):
    if res_mode:
        res_ref, o_ref = rest
    else:
        (o_ref,) = rest
    acc = jnp.dot(x_ref[...], w_ref[...], preferred_element_type=jnp.float32)
    acc = acc + b_ref[...]
    a = alpha_ref[0]
    y = jnp.where(acc >= 0.0, acc, a * acc)
    if res_mode == 1:
        y = res_ref[...].astype(jnp.float32) + y
    elif res_mode == 2:
        y = res_ref[...].astype(jnp.float32) - y
    o_ref[...] = y.astype(o_ref.dtype)


def matmul_bias_prelu(x, w, b, alpha=PRELU_ALPHA, res=None, res_mode=0):
    """x: (M, K), w: (K, N), b: (N,) -> PReLU(x @ w + b) [+/- residual]."""
    M, K = x.shape
    Nc = w.shape[1]
    tm = M if M <= TM_MAX else TM_MAX
    Mpad = ((M + tm - 1) // tm) * tm
    x = x.astype(ACT_DTYPE)
    if res is not None:
        res = res.astype(ACT_DTYPE)
    if Mpad != M:   # only hit for very large images; never in this test
        x = jnp.pad(x, ((0, Mpad - M), (0, 0)))
        if res is not None:
            res = jnp.pad(res, ((0, Mpad - M), (0, 0)))
    kernel = functools.partial(_matmul_kernel, res_mode=res_mode)
    in_specs = [
        pl.BlockSpec((tm, K), lambda i: (i, 0)),
        pl.BlockSpec((K, Nc), lambda i: (0, 0)),
        pl.BlockSpec((1, Nc), lambda i: (0, 0)),
        pl.BlockSpec(memory_space=pltpu.MemorySpace.SMEM),
    ]
    args = [
        x,
        w.astype(ACT_DTYPE),
        b.reshape(1, Nc).astype(jnp.float32),
        jnp.asarray(alpha, jnp.float32).reshape(1),
    ]
    if res_mode:
        in_specs.append(pl.BlockSpec((tm, Nc), lambda i: (i, 0)))
        args.append(res)
    out = pl.pallas_call(
        kernel,
        out_shape=jax.ShapeDtypeStruct((Mpad, Nc), ACT_DTYPE),
        grid=(Mpad // tm,),
        in_specs=in_specs,
        out_specs=pl.BlockSpec((tm, Nc), lambda i: (i, 0)),
        compiler_params=pltpu.CompilerParams(
            dimension_semantics=("parallel",),
            vmem_limit_bytes=VMEM_LIMIT),
    )(*args)
    return out if Mpad == M else out[:M]


# ----------------------------------------------------------------------------
# Conv wrappers for the scale-changing layers (layout glue stays in XLA)
# ----------------------------------------------------------------------------
def convT_up_prelu(x, w, b, s, alpha=PRELU_ALPHA):
    """ConvTranspose2d(k=s, stride=s, pad=0) + PReLU.  w: (Cin, s, s, Cout)."""
    N, H, W, Cin = x.shape
    Cout = w.shape[-1]
    y = matmul_bias_prelu(x.reshape(N * H * W, Cin),
                          w.reshape(Cin, s * s * Cout),
                          jnp.tile(b, s * s), alpha)
    y = y.reshape(N, H, W, s, s, Cout).transpose(0, 1, 3, 2, 4, 5)
    return y.reshape(N, H * s, W * s, Cout)


def conv_down_prelu(x, w, b, s, alpha=PRELU_ALPHA, res=None, res_mode=0):
    """Conv2d(k=s, stride=s, pad=0) + PReLU (+ fused residual).  w: (s,s,Cin,Cout)."""
    N, H, W, Cin = x.shape
    Cout = w.shape[-1]
    Ho, Wo = H // s, W // s
    xr = x.reshape(N, Ho, s, Wo, s, Cin).transpose(0, 1, 3, 2, 4, 5)
    xr = xr.reshape(N * Ho * Wo, s * s * Cin)
    res_flat = None if res is None else res.reshape(N * Ho * Wo, Cout)
    y = matmul_bias_prelu(xr, w.reshape(s * s * Cin, Cout), b, alpha,
                          res=res_flat, res_mode=res_mode)
    return y.reshape(N, Ho, Wo, Cout)


# ----------------------------------------------------------------------------
# Deterministic parameter construction (synthetic weights, PyTorch shapes)
# ----------------------------------------------------------------------------
def _init_conv(key, k, cin, cout, gain=0.05):
    kw, kb = jax.random.split(key)
    w = jax.random.normal(kw, (k, k, cin, cout), jnp.float32) * gain
    b = jax.random.normal(kb, (cout,), jnp.float32) * gain
    return w, b


def make_params(key, n_colors, feat, scale, n_blocks):
    keys = iter(jax.random.split(key, 4 + n_blocks * 16 + n_blocks + 4))
    params = {}
    params["head"] = [_init_conv(next(keys), 3, n_colors, feat * 4),
                      _init_conv(next(keys), 3, feat * 4, feat),
                      _init_conv(next(keys), 3, feat, feat)]
    blocks = []
    for _ in range(n_blocks):
        blk = {}
        kw, kb = jax.random.split(next(keys))
        blk["up_w"] = jax.random.normal(kw, (feat, scale, scale, feat),
                                        jnp.float32) * 0.05
        blk["up_b"] = jax.random.normal(kb, (feat,), jnp.float32) * 0.05
        blk["up_conv"] = [_init_conv(next(keys), 3, feat, feat) for _ in range(3)]
        blk["down"] = _init_conv(next(keys), scale, feat, feat)
        blk["down_conv"] = [_init_conv(next(keys), 3, feat, feat) for _ in range(3)]
        blocks.append(blk)
    params["brm"] = blocks
    params["conv"] = [_init_conv(next(keys), 3, feat, feat)
                      for _ in range(n_blocks - 1)]
    params["tail"] = _init_conv(next(keys), 3, n_blocks * feat, n_colors)
    return params


# ----------------------------------------------------------------------------
# EBRN forward (mirrors the PyTorch module structure)
# ----------------------------------------------------------------------------
def _brm_block(x, blk, scale):
    up_out = convT_up_prelu(x, blk["up_w"], blk["up_b"], scale)
    up = up_out
    for (w, b) in blk["up_conv"]:
        up = conv3x3_prelu(up, w, b)
    dw, db = blk["down"]
    # out = x - PReLU(down(up_out))  -- residual subtraction fused in-kernel
    out = conv_down_prelu(up_out, dw, db, scale, res=x, res_mode=2)
    # down branch: 3 convs; the `out += down` residual fused into the last one
    (w0, b0), (w1, b1), (w2, b2) = blk["down_conv"]
    d = conv3x3_prelu(out, w0, b0)
    d = conv3x3_prelu(d, w1, b1)
    out = conv3x3_prelu(d, w2, b2, res=out, res_mode=1)
    return up, out


def ebrn_forward(params, x, scale, n_blocks, rgb_range=1.0):
    # MeanShift (identity 1x1 conv, std = 1): sub/add the DIV2K RGB mean.
    rgb_mean = jnp.array([0.4488, 0.4371, 0.4040], jnp.float32)
    x = x - rgb_range * rgb_mean
    x = x.astype(ACT_DTYPE)
    for (w, b) in params["head"]:
        x = conv3x3_prelu(x, w, b)
    up = []
    x2 = x
    for blk in params["brm"]:
        x1, x2 = _brm_block(x2, blk, scale)
        up.append(x1)
    out = [up[-1]]
    acc = None
    for i in range(n_blocks - 1):
        if i == 0:
            acc = up[-1] + up[-2]
        else:
            acc = acc + up[-i - 2]
        w, b = params["conv"][i]
        acc = conv3x3_prelu(acc, w, b)
        out.append(acc)
    cat = jnp.concatenate(out, axis=-1)          # channel concat (NHWC)
    tw, tb = params["tail"]
    y = conv3x3_prelu(cat, tw, tb)               # tail conv + PReLU (as in ref)
    return y.astype(jnp.float32) + rgb_range * rgb_mean   # add_mean


if __name__ == "__main__":
    n_colors, feat, scale, n_blocks = 3, 8, 2, 3
    N, H, W = 2, 8, 8
    key = jax.random.PRNGKey(0)
    kp, kx = jax.random.split(key)
    params = make_params(kp, n_colors, feat, scale, n_blocks)
    x = jax.random.uniform(kx, (N, H, W, n_colors), jnp.float32)

    fwd = jax.jit(functools.partial(ebrn_forward, scale=scale,
                                    n_blocks=n_blocks, rgb_range=1.0))
    out = fwd(params, x)
    out = jax.block_until_ready(out)
    assert out.shape == (N, H * scale, W * scale, n_colors), out.shape
    assert jnp.all(jnp.isfinite(out))
    print("KERNEL_OK")
</pallas_src>

<mosaic_0001>
module attributes {stable_mosaic.version = 11 : i64} {
  func.func @_conv3x3_kernel(%arg0: i32, %arg1: memref<1x10x10x3xbf16, #tpu.memory_space<vmem>>, %arg2: memref<9x3x32xf32, #tpu.memory_space<vmem>>, %arg3: memref<1x32xf32, #tpu.memory_space<vmem>>, %arg4: memref<1xf32, #tpu.memory_space<smem>>, %arg5: memref<1x8x8x32xbf16, #tpu.memory_space<vmem>>) attributes {dimension_semantics = [#tpu.dimension_semantics<parallel>], iteration_bounds = array<i64: 2>, scalar_prefetch = 0 : i64, scratch_operands = 0 : i64, tpu.core_type = #tpu.core_type<tc>, window_params = [{transform_indices = @transform_0, window_bounds = array<i64: 1, 10, 10, 3>}, {pipeline_mode = #tpu.pipeline_mode<synchronous>, transform_indices = @transform_1, window_bounds = array<i64: 9, 3, 32>}, {pipeline_mode = #tpu.pipeline_mode<synchronous>, transform_indices = @transform_2, window_bounds = array<i64: 1, 32>}, {transform_indices = @transform_3, window_bounds = array<i64: 1>}, {transform_indices = @transform_4, window_bounds = array<i64: 1, 8, 8, 32>}]} {
    %c0 = arith.constant 0 : index
    %c0_0 = arith.constant 0 : index
    %c0_1 = arith.constant 0 : index
    %c0_2 = arith.constant 0 : index
    %0 = vector.load %arg1[%c0, %c0_0, %c0_1, %c0_2] : memref<1x10x10x3xbf16, #tpu.memory_space<vmem>>, vector<1x10x10x3xbf16>
    %1 = vector.shape_cast %0 : vector<1x10x10x3xbf16> to vector<10x10x3xbf16>
    %2 = arith.extf %1 : vector<10x10x3xbf16> to vector<10x10x3xf32>
    %cst = arith.constant 0.000000e+00 : f32
    %3 = vector.broadcast %cst : f32 to vector<64x32xf32>
    %4 = vector.extract_strided_slice %2 {offsets = [0, 0, 0], sizes = [8, 8, 3], strides = [1, 1, 1]} : vector<10x10x3xf32> to vector<8x8x3xf32>
    %5 = vector.shape_cast %4 : vector<8x8x3xf32> to vector<64x3xf32>
    %c0_3 = arith.constant 0 : index
    %c0_4 = arith.constant 0 : index
    %c0_5 = arith.constant 0 : index
    %6 = vector.load %arg2[%c0_3, %c0_4, %c0_5] : memref<9x3x32xf32, #tpu.memory_space<vmem>>, vector<1x3x32xf32>
    %7 = vector.shape_cast %6 : vector<1x3x32xf32> to vector<3x32xf32>
    %cst_6 = arith.constant dense<0.000000e+00> : vector<64x32xf32>
    %8 = tpu.matmul %5, %7, %cst_6 {dimension_numbers = #tpu.dot_dimension_numbers<[1], [0], [0], [1], [0, 0, 1, 1], [], []>} : vector<64x3xf32>, vector<3x32xf32>, vector<64x32xf32> -> vector<64x32xf32>
    %9 = arith.addf %3, %8 : vector<64x32xf32>
    %10 = vector.extract_strided_slice %2 {offsets = [0, 1, 0], sizes = [8, 8, 3], strides = [1, 1, 1]} : vector<10x10x3xf32> to vector<8x8x3xf32>
    %11 = vector.shape_cast %10 : vector<8x8x3xf32> to vector<64x3xf32>
    %c1 = arith.constant 1 : index
    %c0_7 = arith.constant 0 : index
    %c0_8 = arith.constant 0 : index
    %12 = vector.load %arg2[%c1, %c0_7, %c0_8] : memref<9x3x32xf32, #tpu.memory_space<vmem>>, vector<1x3x32xf32>
    %13 = vector.shape_cast %12 : vector<1x3x32xf32> to vector<3x32xf32>
    %cst_9 = arith.constant dense<0.000000e+00> : vector<64x32xf32>
    %14 = tpu.matmul %11, %13, %cst_9 {dimension_numbers = #tpu.dot_dimension_numbers<[1], [0], [0], [1], [0, 0, 1, 1], [], []>} : vector<64x3xf32>, vector<3x32xf32>, vector<64x32xf32> -> vector<64x32xf32>
    %15 = arith.addf %9, %14 : vector<64x32xf32>
    %16 = vector.extract_strided_slice %2 {offsets = [0, 2, 0], sizes = [8, 8, 3], strides = [1, 1, 1]} : vector<10x10x3xf32> to vector<8x8x3xf32>
    %17 = vector.shape_cast %16 : vector<8x8x3xf32> to vector<64x3xf32>
    %c2 = arith.constant 2 : index
    %c0_10 = arith.constant 0 : index
    %c0_11 = arith.constant 0 : index
    %18 = vector.load %arg2[%c2, %c0_10, %c0_11] : memref<9x3x32xf32, #tpu.memory_space<vmem>>, vector<1x3x32xf32>
    %19 = vector.shape_cast %18 : vector<1x3x32xf32> to vector<3x32xf32>
    %cst_12 = arith.constant dense<0.000000e+00> : vector<64x32xf32>
    %20 = tpu.matmul %17, %19, %cst_12 {dimension_numbers = #tpu.dot_dimension_numbers<[1], [0], [0], [1], [0, 0, 1, 1], [], []>} : vector<64x3xf32>, vector<3x32xf32>, vector<64x32xf32> -> vector<64x32xf32>
    %21 = arith.addf %15, %20 : vector<64x32xf32>
    %22 = vector.extract_strided_slice %2 {offsets = [1, 0, 0], sizes = [8, 8, 3], strides = [1, 1, 1]} : vector<10x10x3xf32> to vector<8x8x3xf32>
    %23 = vector.shape_cast %22 : vector<8x8x3xf32> to vector<64x3xf32>
    %c3 = arith.constant 3 : index
    %c0_13 = arith.constant 0 : index
    %c0_14 = arith.constant 0 : index
    %24 = vector.load %arg2[%c3, %c0_13, %c0_14] : memref<9x3x32xf32, #tpu.memory_space<vmem>>, vector<1x3x32xf32>
    %25 = vector.shape_cast %24 : vector<1x3x32xf32> to vector<3x32xf32>
    %cst_15 = arith.constant dense<0.000000e+00> : vector<64x32xf32>
    %26 = tpu.matmul %23, %25, %cst_15 {dimension_numbers = #tpu.dot_dimension_numbers<[1], [0], [0], [1], [0, 0, 1, 1], [], []>} : vector<64x3xf32>, vector<3x32xf32>, vector<64x32xf32> -> vector<64x32xf32>
    %27 = arith.addf %21, %26 : vector<64x32xf32>
    %28 = vector.extract_strided_slice %2 {offsets = [1, 1, 0], sizes = [8, 8, 3], strides = [1, 1, 1]} : vector<10x10x3xf32> to vector<8x8x3xf32>
    %29 = vector.shape_cast %28 : vector<8x8x3xf32> to vector<64x3xf32>
    %c4 = arith.constant 4 : index
    %c0_16 = arith.constant 0 : index
    %c0_17 = arith.constant 0 : index
    %30 = vector.load %arg2[%c4, %c0_16, %c0_17] : memref<9x3x32xf32, #tpu.memory_space<vmem>>, vector<1x3x32xf32>
    %31 = vector.shape_cast %30 : vector<1x3x32xf32> to vector<3x32xf32>
    %cst_18 = arith.constant dense<0.000000e+00> : vector<64x32xf32>
    %32 = tpu.matmul %29, %31, %cst_18 {dimension_numbers = #tpu.dot_dimension_numbers<[1], [0], [0], [1], [0, 0, 1, 1], [], []>} : vector<64x3xf32>, vector<3x32xf32>, vector<64x32xf32> -> vector<64x32xf32>
    %33 = arith.addf %27, %32 : vector<64x32xf32>
    %34 = vector.extract_strided_slice %2 {offsets = [1, 2, 0], sizes = [8, 8, 3], strides = [1, 1, 1]} : vector<10x10x3xf32> to vector<8x8x3xf32>
    %35 = vector.shape_cast %34 : vector<8x8x3xf32> to vector<64x3xf32>
    %c5 = arith.constant 5 : index
    %c0_19 = arith.constant 0 : index
    %c0_20 = arith.constant 0 : index
    %36 = vector.load %arg2[%c5, %c0_19, %c0_20] : memref<9x3x32xf32, #tpu.memory_space<vmem>>, vector<1x3x32xf32>
    %37 = vector.shape_cast %36 : vector<1x3x32xf32> to vector<3x32xf32>
    %cst_21 = arith.constant dense<0.000000e+00> : vector<64x32xf32>
    %38 = tpu.matmul %35, %37, %cst_21 {dimension_numbers = #tpu.dot_dimension_numbers<[1], [0], [0], [1], [0, 0, 1, 1], [], []>} : vector<64x3xf32>, vector<3x32xf32>, vector<64x32xf32> -> vector<64x32xf32>
    %39 = arith.addf %33, %38 : vector<64x32xf32>
    %40 = vector.extract_strided_slice %2 {offsets = [2, 0, 0], sizes = [8, 8, 3], strides = [1, 1, 1]} : vector<10x10x3xf32> to vector<8x8x3xf32>
    %41 = vector.shape_cast %40 : vector<8x8x3xf32> to vector<64x3xf32>
    %c6 = arith.constant 6 : index
    %c0_22 = arith.constant 0 : index
    %c0_23 = arith.constant 0 : index
    %42 = vector.load %arg2[%c6, %c0_22, %c0_23] : memref<9x3x32xf32, #tpu.memory_space<vmem>>, vector<1x3x32xf32>
    %43 = vector.shape_cast %42 : vector<1x3x32xf32> to vector<3x32xf32>
    %cst_24 = arith.constant dense<0.000000e+00> : vector<64x32xf32>
    %44 = tpu.matmul %41, %43, %cst_24 {dimension_numbers = #tpu.dot_dimension_numbers<[1], [0], [0], [1], [0, 0, 1, 1], [], []>} : vector<64x3xf32>, vector<3x32xf32>, vector<64x32xf32> -> vector<64x32xf32>
    %45 = arith.addf %39, %44 : vector<64x32xf32>
    %46 = vector.extract_strided_slice %2 {offsets = [2, 1, 0], sizes = [8, 8, 3], strides = [1, 1, 1]} : vector<10x10x3xf32> to vector<8x8x3xf32>
    %47 = vector.shape_cast %46 : vector<8x8x3xf32> to vector<64x3xf32>
    %c7 = arith.constant 7 : index
    %c0_25 = arith.constant 0 : index
    %c0_26 = arith.constant 0 : index
    %48 = vector.load %arg2[%c7, %c0_25, %c0_26] : memref<9x3x32xf32, #tpu.memory_space<vmem>>, vector<1x3x32xf32>
    %49 = vector.shape_cast %48 : vector<1x3x32xf32> to vector<3x32xf32>
    %cst_27 = arith.constant dense<0.000000e+00> : vector<64x32xf32>
    %50 = tpu.matmul %47, %49, %cst_27 {dimension_numbers = #tpu.dot_dimension_numbers<[1], [0], [0], [1], [0, 0, 1, 1], [], []>} : vector<64x3xf32>, vector<3x32xf32>, vector<64x32xf32> -> vector<64x32xf32>
    %51 = arith.addf %45, %50 : vector<64x32xf32>
    %52 = vector.extract_strided_slice %2 {offsets = [2, 2, 0], sizes = [8, 8, 3], strides = [1, 1, 1]} : vector<10x10x3xf32> to vector<8x8x3xf32>
    %53 = vector.shape_cast %52 : vector<8x8x3xf32> to vector<64x3xf32>
    %c8 = arith.constant 8 : index
    %c0_28 = arith.constant 0 : index
    %c0_29 = arith.constant 0 : index
    %54 = vector.load %arg2[%c8, %c0_28, %c0_29] : memref<9x3x32xf32, #tpu.memory_space<vmem>>, vector<1x3x32xf32>
    %55 = vector.shape_cast %54 : vector<1x3x32xf32> to vector<3x32xf32>
    %cst_30 = arith.constant dense<0.000000e+00> : vector<64x32xf32>
    %56 = tpu.matmul %53, %55, %cst_30 {dimension_numbers = #tpu.dot_dimension_numbers<[1], [0], [0], [1], [0, 0, 1, 1], [], []>} : vector<64x3xf32>, vector<3x32xf32>, vector<64x32xf32> -> vector<64x32xf32>
    %57 = arith.addf %51, %56 : vector<64x32xf32>
    %c0_31 = arith.constant 0 : index
    %c0_32 = arith.constant 0 : index
    %58 = vector.load %arg3[%c0_31, %c0_32] : memref<1x32xf32, #tpu.memory_space<vmem>>, vector<1x32xf32>
    %59 = vector.broadcast %58 : vector<1x32xf32> to vector<64x32xf32>
    %60 = arith.addf %57, %59 : vector<64x32xf32>
    %c0_33 = arith.constant 0 : index
    %61 = memref.load %arg4[%c0_33] : memref<1xf32, #tpu.memory_space<smem>>
    %cst_34 = arith.constant 0.000000e+00 : f32
    %62 = vector.broadcast %cst_34 : f32 to vector<64x32xf32>
    %63 = arith.cmpf oge, %60, %62 : vector<64x32xf32>
    %64 = vector.broadcast %61 : f32 to vector<64x32xf32>
    %65 = arith.mulf %64, %60 : vector<64x32xf32>
    %66 = arith.select %63, %60, %65 : vector<64x32xi1>, vector<64x32xf32>
    %67 = vector.shape_cast %66 : vector<64x32xf32> to vector<8x8x32xf32>
    %68 = arith.truncf %67 : vector<8x8x32xf32> to vector<8x8x32xbf16>
    %c0_35 = arith.constant 0 : index
    %c0_36 = arith.constant 0 : index
    %c0_37 = arith.constant 0 : index
    %c0_38 = arith.constant 0 : index
    %69 = vector.load %arg5[%c0_35, %c0_36, %c0_37, %c0_38] : memref<1x8x8x32xbf16, #tpu.memory_space<vmem>>, vector<1x8x8x32xbf16>
    %70 = vector.shape_cast %69 : vector<1x8x8x32xbf16> to vector<8x8x32xbf16>
    %71 = vector.shape_cast %68 : vector<8x8x32xbf16> to vector<1x8x8x32xbf16>
    tpu.vector_store %arg5[%c0_35, %c0_36, %c0_37, %c0_38], %71 {strides = array<i32>} : memref<1x8x8x32xbf16, #tpu.memory_space<vmem>>, vector<1x8x8x32xbf16>,
    return
  }
  func.func @transform_0(%arg0: i32) -> (i32, i32, i32, i32) {
    %c0_i32 = arith.constant 0 : i32
    %c0_i32_0 = arith.constant 0 : i32
    %c0_i32_1 = arith.constant 0 : i32
    %c0_i32_2 = arith.constant 0 : i32
    return %arg0, %c0_i32, %c0_i32_0, %c0_i32_1 : i32, i32, i32, i32
  }
  func.func @transform_1(%arg0: i32) -> (i32, i32, i32) {
    %c0_i32 = arith.constant 0 : i32
    %c0_i32_0 = arith.constant 0 : i32
    %c0_i32_1 = arith.constant 0 : i32
    %c0_i32_2 = arith.constant 0 : i32
    return %c0_i32, %c0_i32_0, %c0_i32_1 : i32, i32, i32
  }
  func.func @transform_2(%arg0: i32) -> (i32, i32) {
    %c0_i32 = arith.constant 0 : i32
    %c0_i32_0 = arith.constant 0 : i32
    %c0_i32_1 = arith.constant 0 : i32
    return %c0_i32, %c0_i32_0 : i32, i32
  }
  func.func @transform_3(%arg0: i32) -> i32 {
    %c0_i32 = arith.constant 0 : i32
    %c0_i32_0 = arith.constant 0 : i32
    return %c0_i32 : i32
  }
  func.func @transform_4(%arg0: i32) -> (i32, i32, i32, i32) {
    %c0_i32 = arith.constant 0 : i32
    %c0_i32_0 = arith.constant 0 : i32
    %c0_i32_1 = arith.constant 0 : i32
    %c0_i32_2 = arith.constant 0 : i32
    return %arg0, %c0_i32, %c0_i32_0, %c0_i32_1 : i32, i32, i32, i32
  }
}

module attributes {stable_mosaic.version = 11 : i64} {
  func.func @_conv3x3_kernel(%arg0: i32, %arg1: memref<1x10x10x32xbf16, #tpu.memory_space<vmem>>, %arg2: memref<9x32x8xf32, #tpu.memory_space<vmem>>, %arg3: memref<1x8xf32, #tpu.memory_space<vmem>>, %arg4: memref<1xf32, #tpu.memory_space<smem>>, %arg5: memref<1x8x8x8xbf16, #tpu.memory_space<vmem>>) attributes {dimension_semantics = [#tpu.dimension_semantics<parallel>], iteration_bounds = array<i64: 2>, scalar_prefetch = 0 : i64, scratch_operands = 0 : i64, tpu.core_type = #tpu.core_type<tc>, window_params = [{transform_indices = @transform_0, window_bounds = array<i64: 1, 10, 10, 32>}, {pipeline_mode = #tpu.pipeline_mode<synchronous>, transform_indices = @transform_1, window_bounds = array<i64: 9, 32, 8>}, {pipeline_mode = #tpu.pipeline_mode<synchronous>, transform_indices = @transform_2, window_bounds = array<i64: 1, 8>}, {transform_indices = @transform_3, window_bounds = array<i64: 1>}, {transform_indices = @transform_4, window_bounds = array<i64: 1, 8, 8, 8>}]} {
    %c0 = arith.constant 0 : index
    %c0_0 = arith.constant 0 : index
    %c0_1 = arith.constant 0 : index
    %c0_2 = arith.constant 0 : index
    %0 = vector.load %arg1[%c0, %c0_0, %c0_1, %c0_2] : memref<1x10x10x32xbf16, #tpu.memory_space<vmem>>, vector<1x10x10x32xbf16>
    %1 = vector.shape_cast %0 : vector<1x10x10x32xbf16> to vector<10x10x32xbf16>
    %2 = arith.extf %1 : vector<10x10x32xbf16> to vector<10x10x32xf32>
    %cst = arith.constant 0.000000e+00 : f32
    %3 = vector.broadcast %cst : f32 to vector<64x8xf32>
    %4 = vector.extract_strided_slice %2 {offsets = [0, 0, 0], sizes = [8, 8, 32], strides = [1, 1, 1]} : vector<10x10x32xf32> to vector<8x8x32xf32>
    %5 = vector.shape_cast %4 : vector<8x8x32xf32> to vector<64x32xf32>
    %c0_3 = arith.constant 0 : index
    %c0_4 = arith.constant 0 : index
    %c0_5 = arith.constant 0 : index
    %6 = vector.load %arg2[%c0_3, %c0_4, %c0_5] : memref<9x32x8xf32, #tpu.memory_space<vmem>>, vector<1x32x8xf32>
    %7 = vector.shape_cast %6 : vector<1x32x8xf32> to vector<32x8xf32>
    %cst_6 = arith.constant dense<0.000000e+00> : vector<64x8xf32>
    %8 = tpu.matmul %5, %7, %cst_6 {dimension_numbers = #tpu.dot_dimension_numbers<[1], [0], [0], [1], [0, 0, 1, 1], [], []>} : vector<64x32xf32>, vector<32x8xf32>, vector<64x8xf32> -> vector<64x8xf32>
    %9 = arith.addf %3, %8 : vector<64x8xf32>
    %10 = vector.extract_strided_slice %2 {offsets = [0, 1, 0], sizes = [8, 8, 32], strides = [1, 1, 1]} : vector<10x10x32xf32> to vector<8x8x32xf32>
    %11 = vector.shape_cast %10 : vector<8x8x32xf32> to vector<64x32xf32>
    %c1 = arith.constant 1 : index
    %c0_7 = arith.constant 0 : index
    %c0_8 = arith.constant 0 : index
    %12 = vector.load %arg2[%c1, %c0_7, %c0_8] : memref<9x32x8xf32, #tpu.memory_space<vmem>>, vector<1x32x8xf32>
    %13 = vector.shape_cast %12 : vector<1x32x8xf32> to vector<32x8xf32>
    %cst_9 = arith.constant dense<0.000000e+00> : vector<64x8xf32>
    %14 = tpu.matmul %11, %13, %cst_9 {dimension_numbers = #tpu.dot_dimension_numbers<[1], [0], [0], [1], [0, 0, 1, 1], [], []>} : vector<64x32xf32>, vector<32x8xf32>, vector<64x8xf32> -> vector<64x8xf32>
    %15 = arith.addf %9, %14 : vector<64x8xf32>
    %16 = vector.extract_strided_slice %2 {offsets = [0, 2, 0], sizes = [8, 8, 32], strides = [1, 1, 1]} : vector<10x10x32xf32> to vector<8x8x32xf32>
    %17 = vector.shape_cast %16 : vector<8x8x32xf32> to vector<64x32xf32>
    %c2 = arith.constant 2 : index
    %c0_10 = arith.constant 0 : index
    %c0_11 = arith.constant 0 : index
    %18 = vector.load %arg2[%c2, %c0_10, %c0_11] : memref<9x32x8xf32, #tpu.memory_space<vmem>>, vector<1x32x8xf32>
    %19 = vector.shape_cast %18 : vector<1x32x8xf32> to vector<32x8xf32>
    %cst_12 = arith.constant dense<0.000000e+00> : vector<64x8xf32>
    %20 = tpu.matmul %17, %19, %cst_12 {dimension_numbers = #tpu.dot_dimension_numbers<[1], [0], [0], [1], [0, 0, 1, 1], [], []>} : vector<64x32xf32>, vector<32x8xf32>, vector<64x8xf32> -> vector<64x8xf32>
    %21 = arith.addf %15, %20 : vector<64x8xf32>
    %22 = vector.extract_strided_slice %2 {offsets = [1, 0, 0], sizes = [8, 8, 32], strides = [1, 1, 1]} : vector<10x10x32xf32> to vector<8x8x32xf32>
    %23 = vector.shape_cast %22 : vector<8x8x32xf32> to vector<64x32xf32>
    %c3 = arith.constant 3 : index
    %c0_13 = arith.constant 0 : index
    %c0_14 = arith.constant 0 : index
    %24 = vector.load %arg2[%c3, %c0_13, %c0_14] : memref<9x32x8xf32, #tpu.memory_space<vmem>>, vector<1x32x8xf32>
    %25 = vector.shape_cast %24 : vector<1x32x8xf32> to vector<32x8xf32>
    %cst_15 = arith.constant dense<0.000000e+00> : vector<64x8xf32>
    %26 = tpu.matmul %23, %25, %cst_15 {dimension_numbers = #tpu.dot_dimension_numbers<[1], [0], [0], [1], [0, 0, 1, 1], [], []>} : vector<64x32xf32>, vector<32x8xf32>, vector<64x8xf32> -> vector<64x8xf32>
    %27 = arith.addf %21, %26 : vector<64x8xf32>
    %28 = vector.extract_strided_slice %2 {offsets = [1, 1, 0], sizes = [8, 8, 32], strides = [1, 1, 1]} : vector<10x10x32xf32> to vector<8x8x32xf32>
    %29 = vector.shape_cast %28 : vector<8x8x32xf32> to vector<64x32xf32>
    %c4 = arith.constant 4 : index
    %c0_16 = arith.constant 0 : index
    %c0_17 = arith.constant 0 : index
    %30 = vector.load %arg2[%c4, %c0_16, %c0_17] : memref<9x32x8xf32, #tpu.memory_space<vmem>>, vector<1x32x8xf32>
    %31 = vector.shape_cast %30 : vector<1x32x8xf32> to vector<32x8xf32>
    %cst_18 = arith.constant dense<0.000000e+00> : vector<64x8xf32>
    %32 = tpu.matmul %29, %31, %cst_18 {dimension_numbers = #tpu.dot_dimension_numbers<[1], [0], [0], [1], [0, 0, 1, 1], [], []>} : vector<64x32xf32>, vector<32x8xf32>, vector<64x8xf32> -> vector<64x8xf32>
    %33 = arith.addf %27, %32 : vector<64x8xf32>
    %34 = vector.extract_strided_slice %2 {offsets = [1, 2, 0], sizes = [8, 8, 32], strides = [1, 1, 1]} : vector<10x10x32xf32> to vector<8x8x32xf32>
    %35 = vector.shape_cast %34 : vector<8x8x32xf32> to vector<64x32xf32>
    %c5 = arith.constant 5 : index
    %c0_19 = arith.constant 0 : index
    %c0_20 = arith.constant 0 : index
    %36 = vector.load %arg2[%c5, %c0_19, %c0_20] : memref<9x32x8xf32, #tpu.memory_space<vmem>>, vector<1x32x8xf32>
    %37 = vector.shape_cast %36 : vector<1x32x8xf32> to vector<32x8xf32>
    %cst_21 = arith.constant dense<0.000000e+00> : vector<64x8xf32>
    %38 = tpu.matmul %35, %37, %cst_21 {dimension_numbers = #tpu.dot_dimension_numbers<[1], [0], [0], [1], [0, 0, 1, 1], [], []>} : vector<64x32xf32>, vector<32x8xf32>, vector<64x8xf32> -> vector<64x8xf32>
    %39 = arith.addf %33, %38 : vector<64x8xf32>
    %40 = vector.extract_strided_slice %2 {offsets = [2, 0, 0], sizes = [8, 8, 32], strides = [1, 1, 1]} : vector<10x10x32xf32> to vector<8x8x32xf32>
    %41 = vector.shape_cast %40 : vector<8x8x32xf32> to vector<64x32xf32>
    %c6 = arith.constant 6 : index
    %c0_22 = arith.constant 0 : index
    %c0_23 = arith.constant 0 : index
    %42 = vector.load %arg2[%c6, %c0_22, %c0_23] : memref<9x32x8xf32, #tpu.memory_space<vmem>>, vector<1x32x8xf32>
    %43 = vector.shape_cast %42 : vector<1x32x8xf32> to vector<32x8xf32>
    %cst_24 = arith.constant dense<0.000000e+00> : vector<64x8xf32>
    %44 = tpu.matmul %41, %43, %cst_24 {dimension_numbers = #tpu.dot_dimension_numbers<[1], [0], [0], [1], [0, 0, 1, 1], [], []>} : vector<64x32xf32>, vector<32x8xf32>, vector<64x8xf32> -> vector<64x8xf32>
    %45 = arith.addf %39, %44 : vector<64x8xf32>
    %46 = vector.extract_strided_slice %2 {offsets = [2, 1, 0], sizes = [8, 8, 32], strides = [1, 1, 1]} : vector<10x10x32xf32> to vector<8x8x32xf32>
    %47 = vector.shape_cast %46 : vector<8x8x32xf32> to vector<64x32xf32>
    %c7 = arith.constant 7 : index
    %c0_25 = arith.constant 0 : index
    %c0_26 = arith.constant 0 : index
    %48 = vector.load %arg2[%c7, %c0_25, %c0_26] : memref<9x32x8xf32, #tpu.memory_space<vmem>>, vector<1x32x8xf32>
    %49 = vector.shape_cast %48 : vector<1x32x8xf32> to vector<32x8xf32>
    %cst_27 = arith.constant dense<0.000000e+00> : vector<64x8xf32>
    %50 = tpu.matmul %47, %49, %cst_27 {dimension_numbers = #tpu.dot_dimension_numbers<[1], [0], [0], [1], [0, 0, 1, 1], [], []>} : vector<64x32xf32>, vector<32x8xf32>, vector<64x8xf32> -> vector<64x8xf32>
    %51 = arith.addf %45, %50 : vector<64x8xf32>
    %52 = vector.extract_strided_slice %2 {offsets = [2, 2, 0], sizes = [8, 8, 32], strides = [1, 1, 1]} : vector<10x10x32xf32> to vector<8x8x32xf32>
    %53 = vector.shape_cast %52 : vector<8x8x32xf32> to vector<64x32xf32>
    %c8 = arith.constant 8 : index
    %c0_28 = arith.constant 0 : index
    %c0_29 = arith.constant 0 : index
    %54 = vector.load %arg2[%c8, %c0_28, %c0_29] : memref<9x32x8xf32, #tpu.memory_space<vmem>>, vector<1x32x8xf32>
    %55 = vector.shape_cast %54 : vector<1x32x8xf32> to vector<32x8xf32>
    %cst_30 = arith.constant dense<0.000000e+00> : vector<64x8xf32>
    %56 = tpu.matmul %53, %55, %cst_30 {dimension_numbers = #tpu.dot_dimension_numbers<[1], [0], [0], [1], [0, 0, 1, 1], [], []>} : vector<64x32xf32>, vector<32x8xf32>, vector<64x8xf32> -> vector<64x8xf32>
    %57 = arith.addf %51, %56 : vector<64x8xf32>
    %c0_31 = arith.constant 0 : index
    %c0_32 = arith.constant 0 : index
    %58 = vector.load %arg3[%c0_31, %c0_32] : memref<1x8xf32, #tpu.memory_space<vmem>>, vector<1x8xf32>
    %59 = vector.broadcast %58 : vector<1x8xf32> to vector<64x8xf32>
    %60 = arith.addf %57, %59 : vector<64x8xf32>
    %c0_33 = arith.constant 0 : index
    %61 = memref.load %arg4[%c0_33] : memref<1xf32, #tpu.memory_space<smem>>
    %cst_34 = arith.constant 0.000000e+00 : f32
    %62 = vector.broadcast %cst_34 : f32 to vector<64x8xf32>
    %63 = arith.cmpf oge, %60, %62 : vector<64x8xf32>
    %64 = vector.broadcast %61 : f32 to vector<64x8xf32>
    %65 = arith.mulf %64, %60 : vector<64x8xf32>
    %66 = arith.select %63, %60, %65 : vector<64x8xi1>, vector<64x8xf32>
    %67 = vector.shape_cast %66 : vector<64x8xf32> to vector<8x8x8xf32>
    %68 = arith.truncf %67 : vector<8x8x8xf32> to vector<8x8x8xbf16>
    %c0_35 = arith.constant 0 : index
    %c0_36 = arith.constant 0 : index
    %c0_37 = arith.constant 0 : index
    %c0_38 = arith.constant 0 : index
    %69 = vector.load %arg5[%c0_35, %c0_36, %c0_37, %c0_38] : memref<1x8x8x8xbf16, #tpu.memory_space<vmem>>, vector<1x8x8x8xbf16>
    %70 = vector.shape_cast %69 : vector<1x8x8x8xbf16> to vector<8x8x8xbf16>
    %71 = vector.shape_cast %68 : vector<8x8x8xbf16> to vector<1x8x8x8xbf16>
    tpu.vector_store %arg5[%c0_35, %c0_36, %c0_37, %c0_38], %71 {strides = array<i32>} : memref<1x8x8x8xbf16, #tpu.memory_space<vmem>>, vector<1x8x8x8xbf16>,
    return
  }
  func.func @transform_0(%arg0: i32) -> (i32, i32, i32, i32) {
    %c0_i32 = arith.constant 0 : i32
    %c0_i32_0 = arith.constant 0 : i32
    %c0_i32_1 = arith.constant 0 : i32
    %c0_i32_2 = arith.constant 0 : i32
    return %arg0, %c0_i32, %c0_i32_0, %c0_i32_1 : i32, i32, i32, i32
  }
  func.func @transform_1(%arg0: i32) -> (i32, i32, i32) {
    %c0_i32 = arith.constant 0 : i32
    %c0_i32_0 = arith.constant 0 : i32
    %c0_i32_1 = arith.constant 0 : i32
    %c0_i32_2 = arith.constant 0 : i32
    return %c0_i32, %c0_i32_0, %c0_i32_1 : i32, i32, i32
  }
  func.func @transform_2(%arg0: i32) -> (i32, i32) {
    %c0_i32 = arith.constant 0 : i32
    %c0_i32_0 = arith.constant 0 : i32
    %c0_i32_1 = arith.constant 0 : i32
    return %c0_i32, %c0_i32_0 : i32, i32
  }
  func.func @transform_3(%arg0: i32) -> i32 {
    %c0_i32 = arith.constant 0 : i32
    %c0_i32_0 = arith.constant 0 : i32
    return %c0_i32 : i32
  }
  func.func @transform_4(%arg0: i32) -> (i32, i32, i32, i32) {
    %c0_i32 = arith.constant 0 : i32
    %c0_i32_0 = arith.constant 0 : i32
    %c0_i32_1 = arith.constant 0 : i32
    %c0_i32_2 = arith.constant 0 : i32
    return %arg0, %c0_i32, %c0_i32_0, %c0_i32_1 : i32, i32, i32, i32
  }
}

module attributes {stable_mosaic.version = 11 : i64} {
  func.func @_conv3x3_kernel(%arg0: i32, %arg1: memref<1x10x10x8xbf16, #tpu.memory_space<vmem>>, %arg2: memref<9x8x8xf32, #tpu.memory_space<vmem>>, %arg3: memref<1x8xf32, #tpu.memory_space<vmem>>, %arg4: memref<1xf32, #tpu.memory_space<smem>>, %arg5: memref<1x8x8x8xbf16, #tpu.memory_space<vmem>>) attributes {dimension_semantics = [#tpu.dimension_semantics<parallel>], iteration_bounds = array<i64: 2>, scalar_prefetch = 0 : i64, scratch_operands = 0 : i64, tpu.core_type = #tpu.core_type<tc>, window_params = [{transform_indices = @transform_0, window_bounds = array<i64: 1, 10, 10, 8>}, {pipeline_mode = #tpu.pipeline_mode<synchronous>, transform_indices = @transform_1, window_bounds = array<i64: 9, 8, 8>}, {pipeline_mode = #tpu.pipeline_mode<synchronous>, transform_indices = @transform_2, window_bounds = array<i64: 1, 8>}, {transform_indices = @transform_3, window_bounds = array<i64: 1>}, {transform_indices = @transform_4, window_bounds = array<i64: 1, 8, 8, 8>}]} {
    %c0 = arith.constant 0 : index
    %c0_0 = arith.constant 0 : index
    %c0_1 = arith.constant 0 : index
    %c0_2 = arith.constant 0 : index
    %0 = vector.load %arg1[%c0, %c0_0, %c0_1, %c0_2] : memref<1x10x10x8xbf16, #tpu.memory_space<vmem>>, vector<1x10x10x8xbf16>
    %1 = vector.shape_cast %0 : vector<1x10x10x8xbf16> to vector<10x10x8xbf16>
    %2 = arith.extf %1 : vector<10x10x8xbf16> to vector<10x10x8xf32>
    %cst = arith.constant 0.000000e+00 : f32
    %3 = vector.broadcast %cst : f32 to vector<64x8xf32>
    %4 = vector.extract_strided_slice %2 {offsets = [0, 0, 0], sizes = [8, 8, 8], strides = [1, 1, 1]} : vector<10x10x8xf32> to vector<8x8x8xf32>
    %5 = vector.shape_cast %4 : vector<8x8x8xf32> to vector<64x8xf32>
    %c0_3 = arith.constant 0 : index
    %c0_4 = arith.constant 0 : index
    %c0_5 = arith.constant 0 : index
    %6 = vector.load %arg2[%c0_3, %c0_4, %c0_5] : memref<9x8x8xf32, #tpu.memory_space<vmem>>, vector<1x8x8xf32>
    %7 = vector.shape_cast %6 : vector<1x8x8xf32> to vector<8x8xf32>
    %cst_6 = arith.constant dense<0.000000e+00> : vector<64x8xf32>
    %8 = tpu.matmul %5, %7, %cst_6 {dimension_numbers = #tpu.dot_dimension_numbers<[1], [0], [0], [1], [0, 0, 1, 1], [], []>} : vector<64x8xf32>, vector<8x8xf32>, vector<64x8xf32> -> vector<64x8xf32>
    %9 = arith.addf %3, %8 : vector<64x8xf32>
    %10 = vector.extract_strided_slice %2 {offsets = [0, 1, 0], sizes = [8, 8, 8], strides = [1, 1, 1]} : vector<10x10x8xf32> to vector<8x8x8xf32>
    %11 = vector.shape_cast %10 : vector<8x8x8xf32> to vector<64x8xf32>
    %c1 = arith.constant 1 : index
    %c0_7 = arith.constant 0 : index
    %c0_8 = arith.constant 0 : index
    %12 = vector.load %arg2[%c1, %c0_7, %c0_8] : memref<9x8x8xf32, #tpu.memory_space<vmem>>, vector<1x8x8xf32>
    %13 = vector.shape_cast %12 : vector<1x8x8xf32> to vector<8x8xf32>
    %cst_9 = arith.constant dense<0.000000e+00> : vector<64x8xf32>
    %14 = tpu.matmul %11, %13, %cst_9 {dimension_numbers = #tpu.dot_dimension_numbers<[1], [0], [0], [1], [0, 0, 1, 1], [], []>} : vector<64x8xf32>, vector<8x8xf32>, vector<64x8xf32> -> vector<64x8xf32>
    %15 = arith.addf %9, %14 : vector<64x8xf32>
    %16 = vector.extract_strided_slice %2 {offsets = [0, 2, 0], sizes = [8, 8, 8], strides = [1, 1, 1]} : vector<10x10x8xf32> to vector<8x8x8xf32>
    %17 = vector.shape_cast %16 : vector<8x8x8xf32> to vector<64x8xf32>
    %c2 = arith.constant 2 : index
    %c0_10 = arith.constant 0 : index
    %c0_11 = arith.constant 0 : index
    %18 = vector.load %arg2[%c2, %c0_10, %c0_11] : memref<9x8x8xf32, #tpu.memory_space<vmem>>, vector<1x8x8xf32>
    %19 = vector.shape_cast %18 : vector<1x8x8xf32> to vector<8x8xf32>
    %cst_12 = arith.constant dense<0.000000e+00> : vector<64x8xf32>
    %20 = tpu.matmul %17, %19, %cst_12 {dimension_numbers = #tpu.dot_dimension_numbers<[1], [0], [0], [1], [0, 0, 1, 1], [], []>} : vector<64x8xf32>, vector<8x8xf32>, vector<64x8xf32> -> vector<64x8xf32>
    %21 = arith.addf %15, %20 : vector<64x8xf32>
    %22 = vector.extract_strided_slice %2 {offsets = [1, 0, 0], sizes = [8, 8, 8], strides = [1, 1, 1]} : vector<10x10x8xf32> to vector<8x8x8xf32>
    %23 = vector.shape_cast %22 : vector<8x8x8xf32> to vector<64x8xf32>
    %c3 = arith.constant 3 : index
    %c0_13 = arith.constant 0 : index
    %c0_14 = arith.constant 0 : index
    %24 = vector.load %arg2[%c3, %c0_13, %c0_14] : memref<9x8x8xf32, #tpu.memory_space<vmem>>, vector<1x8x8xf32>
    %25 = vector.shape_cast %24 : vector<1x8x8xf32> to vector<8x8xf32>
    %cst_15 = arith.constant dense<0.000000e+00> : vector<64x8xf32>
    %26 = tpu.matmul %23, %25, %cst_15 {dimension_numbers = #tpu.dot_dimension_numbers<[1], [0], [0], [1], [0, 0, 1, 1], [], []>} : vector<64x8xf32>, vector<8x8xf32>, vector<64x8xf32> -> vector<64x8xf32>
    %27 = arith.addf %21, %26 : vector<64x8xf32>
    %28 = vector.extract_strided_slice %2 {offsets = [1, 1, 0], sizes = [8, 8, 8], strides = [1, 1, 1]} : vector<10x10x8xf32> to vector<8x8x8xf32>
    %29 = vector.shape_cast %28 : vector<8x8x8xf32> to vector<64x8xf32>
    %c4 = arith.constant 4 : index
    %c0_16 = arith.constant 0 : index
    %c0_17 = arith.constant 0 : index
    %30 = vector.load %arg2[%c4, %c0_16, %c0_17] : memref<9x8x8xf32, #tpu.memory_space<vmem>>, vector<1x8x8xf32>
    %31 = vector.shape_cast %30 : vector<1x8x8xf32> to vector<8x8xf32>
    %cst_18 = arith.constant dense<0.000000e+00> : vector<64x8xf32>
    %32 = tpu.matmul %29, %31, %cst_18 {dimension_numbers = #tpu.dot_dimension_numbers<[1], [0], [0], [1], [0, 0, 1, 1], [], []>} : vector<64x8xf32>, vector<8x8xf32>, vector<64x8xf32> -> vector<64x8xf32>
    %33 = arith.addf %27, %32 : vector<64x8xf32>
    %34 = vector.extract_strided_slice %2 {offsets = [1, 2, 0], sizes = [8, 8, 8], strides = [1, 1, 1]} : vector<10x10x8xf32> to vector<8x8x8xf32>
    %35 = vector.shape_cast %34 : vector<8x8x8xf32> to vector<64x8xf32>
    %c5 = arith.constant 5 : index
    %c0_19 = arith.constant 0 : index
    %c0_20 = arith.constant 0 : index
    %36 = vector.load %arg2[%c5, %c0_19, %c0_20] : memref<9x8x8xf32, #tpu.memory_space<vmem>>, vector<1x8x8xf32>
    %37 = vector.shape_cast %36 : vector<1x8x8xf32> to vector<8x8xf32>
    %cst_21 = arith.constant dense<0.000000e+00> : vector<64x8xf32>
    %38 = tpu.matmul %35, %37, %cst_21 {dimension_numbers = #tpu.dot_dimension_numbers<[1], [0], [0], [1], [0, 0, 1, 1], [], []>} : vector<64x8xf32>, vector<8x8xf32>, vector<64x8xf32> -> vector<64x8xf32>
    %39 = arith.addf %33, %38 : vector<64x8xf32>
    %40 = vector.extract_strided_slice %2 {offsets = [2, 0, 0], sizes = [8, 8, 8], strides = [1, 1, 1]} : vector<10x10x8xf32> to vector<8x8x8xf32>
    %41 = vector.shape_cast %40 : vector<8x8x8xf32> to vector<64x8xf32>
    %c6 = arith.constant 6 : index
    %c0_22 = arith.constant 0 : index
    %c0_23 = arith.constant 0 : index
    %42 = vector.load %arg2[%c6, %c0_22, %c0_23] : memref<9x8x8xf32, #tpu.memory_space<vmem>>, vector<1x8x8xf32>
    %43 = vector.shape_cast %42 : vector<1x8x8xf32> to vector<8x8xf32>
    %cst_24 = arith.constant dense<0.000000e+00> : vector<64x8xf32>
    %44 = tpu.matmul %41, %43, %cst_24 {dimension_numbers = #tpu.dot_dimension_numbers<[1], [0], [0], [1], [0, 0, 1, 1], [], []>} : vector<64x8xf32>, vector<8x8xf32>, vector<64x8xf32> -> vector<64x8xf32>
    %45 = arith.addf %39, %44 : vector<64x8xf32>
    %46 = vector.extract_strided_slice %2 {offsets = [2, 1, 0], sizes = [8, 8, 8], strides = [1, 1, 1]} : vector<10x10x8xf32> to vector<8x8x8xf32>
    %47 = vector.shape_cast %46 : vector<8x8x8xf32> to vector<64x8xf32>
    %c7 = arith.constant 7 : index
    %c0_25 = arith.constant 0 : index
    %c0_26 = arith.constant 0 : index
    %48 = vector.load %arg2[%c7, %c0_25, %c0_26] : memref<9x8x8xf32, #tpu.memory_space<vmem>>, vector<1x8x8xf32>
    %49 = vector.shape_cast %48 : vector<1x8x8xf32> to vector<8x8xf32>
    %cst_27 = arith.constant dense<0.000000e+00> : vector<64x8xf32>
    %50 = tpu.matmul %47, %49, %cst_27 {dimension_numbers = #tpu.dot_dimension_numbers<[1], [0], [0], [1], [0, 0, 1, 1], [], []>} : vector<64x8xf32>, vector<8x8xf32>, vector<64x8xf32> -> vector<64x8xf32>
    %51 = arith.addf %45, %50 : vector<64x8xf32>
    %52 = vector.extract_strided_slice %2 {offsets = [2, 2, 0], sizes = [8, 8, 8], strides = [1, 1, 1]} : vector<10x10x8xf32> to vector<8x8x8xf32>
    %53 = vector.shape_cast %52 : vector<8x8x8xf32> to vector<64x8xf32>
    %c8 = arith.constant 8 : index
    %c0_28 = arith.constant 0 : index
    %c0_29 = arith.constant 0 : index
    %54 = vector.load %arg2[%c8, %c0_28, %c0_29] : memref<9x8x8xf32, #tpu.memory_space<vmem>>, vector<1x8x8xf32>
    %55 = vector.shape_cast %54 : vector<1x8x8xf32> to vector<8x8xf32>
    %cst_30 = arith.constant dense<0.000000e+00> : vector<64x8xf32>
    %56 = tpu.matmul %53, %55, %cst_30 {dimension_numbers = #tpu.dot_dimension_numbers<[1], [0], [0], [1], [0, 0, 1, 1], [], []>} : vector<64x8xf32>, vector<8x8xf32>, vector<64x8xf32> -> vector<64x8xf32>
    %57 = arith.addf %51, %56 : vector<64x8xf32>
    %c0_31 = arith.constant 0 : index
    %c0_32 = arith.constant 0 : index
    %58 = vector.load %arg3[%c0_31, %c0_32] : memref<1x8xf32, #tpu.memory_space<vmem>>, vector<1x8xf32>
    %59 = vector.broadcast %58 : vector<1x8xf32> to vector<64x8xf32>
    %60 = arith.addf %57, %59 : vector<64x8xf32>
    %c0_33 = arith.constant 0 : index
    %61 = memref.load %arg4[%c0_33] : memref<1xf32, #tpu.memory_space<smem>>
    %cst_34 = arith.constant 0.000000e+00 : f32
    %62 = vector.broadcast %cst_34 : f32 to vector<64x8xf32>
    %63 = arith.cmpf oge, %60, %62 : vector<64x8xf32>
    %64 = vector.broadcast %61 : f32 to vector<64x8xf32>
    %65 = arith.mulf %64, %60 : vector<64x8xf32>
    %66 = arith.select %63, %60, %65 : vector<64x8xi1>, vector<64x8xf32>
    %67 = vector.shape_cast %66 : vector<64x8xf32> to vector<8x8x8xf32>
    %68 = arith.truncf %67 : vector<8x8x8xf32> to vector<8x8x8xbf16>
    %c0_35 = arith.constant 0 : index
    %c0_36 = arith.constant 0 : index
    %c0_37 = arith.constant 0 : index
    %c0_38 = arith.constant 0 : index
    %69 = vector.load %arg5[%c0_35, %c0_36, %c0_37, %c0_38] : memref<1x8x8x8xbf16, #tpu.memory_space<vmem>>, vector<1x8x8x8xbf16>
    %70 = vector.shape_cast %69 : vector<1x8x8x8xbf16> to vector<8x8x8xbf16>
    %71 = vector.shape_cast %68 : vector<8x8x8xbf16> to vector<1x8x8x8xbf16>
    tpu.vector_store %arg5[%c0_35, %c0_36, %c0_37, %c0_38], %71 {strides = array<i32>} : memref<1x8x8x8xbf16, #tpu.memory_space<vmem>>, vector<1x8x8x8xbf16>,
    return
  }
  func.func @transform_0(%arg0: i32) -> (i32, i32, i32, i32) {
    %c0_i32 = arith.constant 0 : i32
    %c0_i32_0 = arith.constant 0 : i32
    %c0_i32_1 = arith.constant 0 : i32
    %c0_i32_2 = arith.constant 0 : i32
    return %arg0, %c0_i32, %c0_i32_0, %c0_i32_1 : i32, i32, i32, i32
  }
  func.func @transform_1(%arg0: i32) -> (i32, i32, i32) {
    %c0_i32 = arith.constant 0 : i32
    %c0_i32_0 = arith.constant 0 : i32
    %c0_i32_1 = arith.constant 0 : i32
    %c0_i32_2 = arith.constant 0 : i32
    return %c0_i32, %c0_i32_0, %c0_i32_1 : i32, i32, i32
  }
  func.func @transform_2(%arg0: i32) -> (i32, i32) {
    %c0_i32 = arith.constant 0 : i32
    %c0_i32_0 = arith.constant 0 : i32
    %c0_i32_1 = arith.constant 0 : i32
    return %c0_i32, %c0_i32_0 : i32, i32
  }
  func.func @transform_3(%arg0: i32) -> i32 {
    %c0_i32 = arith.constant 0 : i32
    %c0_i32_0 = arith.constant 0 : i32
    return %c0_i32 : i32
  }
  func.func @transform_4(%arg0: i32) -> (i32, i32, i32, i32) {
    %c0_i32 = arith.constant 0 : i32
    %c0_i32_0 = arith.constant 0 : i32
    %c0_i32_1 = arith.constant 0 : i32
    %c0_i32_2 = arith.constant 0 : i32
    return %arg0, %c0_i32, %c0_i32_0, %c0_i32_1 : i32, i32, i32, i32
  }
}

module attributes {stable_mosaic.version = 11 : i64} {
  func.func @_matmul_kernel(%arg0: i32, %arg1: memref<128x8xbf16, #tpu.memory_space<vmem>>, %arg2: memref<8x32xbf16, #tpu.memory_space<vmem>>, %arg3: memref<1x32xf32, #tpu.memory_space<vmem>>, %arg4: memref<1xf32, #tpu.memory_space<smem>>, %arg5: memref<128x32xbf16, #tpu.memory_space<vmem>>) attributes {dimension_semantics = [#tpu.dimension_semantics<parallel>], iteration_bounds = array<i64: 1>, scalar_prefetch = 0 : i64, scratch_operands = 0 : i64, tpu.core_type = #tpu.core_type<tc>, window_params = [{transform_indices = @transform_0, window_bounds = array<i64: 128, 8>}, {pipeline_mode = #tpu.pipeline_mode<synchronous>, transform_indices = @transform_1, window_bounds = array<i64: 8, 32>}, {pipeline_mode = #tpu.pipeline_mode<synchronous>, transform_indices = @transform_2, window_bounds = array<i64: 1, 32>}, {transform_indices = @transform_3, window_bounds = array<i64: 1>}, {transform_indices = @transform_4, window_bounds = array<i64: 128, 32>}]} {
    %c0 = arith.constant 0 : index
    %c0_0 = arith.constant 0 : index
    %0 = vector.load %arg1[%c0, %c0_0] : memref<128x8xbf16, #tpu.memory_space<vmem>>, vector<128x8xbf16>
    %c0_1 = arith.constant 0 : index
    %c0_2 = arith.constant 0 : index
    %1 = vector.load %arg2[%c0_1, %c0_2] : memref<8x32xbf16, #tpu.memory_space<vmem>>, vector<8x32xbf16>
    %cst = arith.constant dense<0.000000e+00> : vector<128x32xf32>
    %2 = tpu.matmul %0, %1, %cst {dimension_numbers = #tpu.dot_dimension_numbers<[1], [0], [0], [1], [0, 0, 1, 1], [], []>} : vector<128x8xbf16>, vector<8x32xbf16>, vector<128x32xf32> -> vector<128x32xf32>
    %c0_3 = arith.constant 0 : index
    %c0_4 = arith.constant 0 : index
    %3 = vector.load %arg3[%c0_3, %c0_4] : memref<1x32xf32, #tpu.memory_space<vmem>>, vector<1x32xf32>
    %4 = vector.broadcast %3 : vector<1x32xf32> to vector<128x32xf32>
    %5 = arith.addf %2, %4 : vector<128x32xf32>
    %c0_5 = arith.constant 0 : index
    %6 = memref.load %arg4[%c0_5] : memref<1xf32, #tpu.memory_space<smem>>
    %cst_6 = arith.constant 0.000000e+00 : f32
    %7 = vector.broadcast %cst_6 : f32 to vector<128x32xf32>
    %8 = arith.cmpf oge, %5, %7 : vector<128x32xf32>
    %9 = vector.broadcast %6 : f32 to vector<128x32xf32>
    %10 = arith.mulf %9, %5 : vector<128x32xf32>
    %11 = arith.select %8, %5, %10 : vector<128x32xi1>, vector<128x32xf32>
    %12 = arith.truncf %11 : vector<128x32xf32> to vector<128x32xbf16>
    %c0_7 = arith.constant 0 : index
    %c0_8 = arith.constant 0 : index
    %13 = vector.load %arg5[%c0_7, %c0_8] : memref<128x32xbf16, #tpu.memory_space<vmem>>, vector<128x32xbf16>
    tpu.vector_store %arg5[%c0_7, %c0_8], %12 {strides = array<i32>} : memref<128x32xbf16, #tpu.memory_space<vmem>>, vector<128x32xbf16>,
    return
  }
  func.func @transform_0(%arg0: i32) -> (i32, i32) {
    %c0_i32 = arith.constant 0 : i32
    %c0_i32_0 = arith.constant 0 : i32
    return %arg0, %c0_i32 : i32, i32
  }
  func.func @transform_1(%arg0: i32) -> (i32, i32) {
    %c0_i32 = arith.constant 0 : i32
    %c0_i32_0 = arith.constant 0 : i32
    %c0_i32_1 = arith.constant 0 : i32
    return %c0_i32, %c0_i32_0 : i32, i32
  }
  func.func @transform_2(%arg0: i32) -> (i32, i32) {
    %c0_i32 = arith.constant 0 : i32
    %c0_i32_0 = arith.constant 0 : i32
    %c0_i32_1 = arith.constant 0 : i32
    return %c0_i32, %c0_i32_0 : i32, i32
  }
  func.func @transform_3(%arg0: i32) -> i32 {
    %c0_i32 = arith.constant 0 : i32
    %c0_i32_0 = arith.constant 0 : i32
    return %c0_i32 : i32
  }
  func.func @transform_4(%arg0: i32) -> (i32, i32) {
    %c0_i32 = arith.constant 0 : i32
    %c0_i32_0 = arith.constant 0 : i32
    return %arg0, %c0_i32 : i32, i32
  }
}

module attributes {stable_mosaic.version = 11 : i64} {
  func.func @_matmul_kernel(%arg0: i32, %arg1: memref<128x32xbf16, #tpu.memory_space<vmem>>, %arg2: memref<32x8xbf16, #tpu.memory_space<vmem>>, %arg3: memref<1x8xf32, #tpu.memory_space<vmem>>, %arg4: memref<1xf32, #tpu.memory_space<smem>>, %arg5: memref<128x8xbf16, #tpu.memory_space<vmem>>, %arg6: memref<128x8xbf16, #tpu.memory_space<vmem>>) attributes {dimension_semantics = [#tpu.dimension_semantics<parallel>], iteration_bounds = array<i64: 1>, scalar_prefetch = 0 : i64, scratch_operands = 0 : i64, tpu.core_type = #tpu.core_type<tc>, window_params = [{transform_indices = @transform_0, window_bounds = array<i64: 128, 32>}, {pipeline_mode = #tpu.pipeline_mode<synchronous>, transform_indices = @transform_1, window_bounds = array<i64: 32, 8>}, {pipeline_mode = #tpu.pipeline_mode<synchronous>, transform_indices = @transform_2, window_bounds = array<i64: 1, 8>}, {transform_indices = @transform_3, window_bounds = array<i64: 1>}, {transform_indices = @transform_4, window_bounds = array<i64: 128, 8>}, {transform_indices = @transform_5, window_bounds = array<i64: 128, 8>}]} {
    %c0 = arith.constant 0 : index
    %c0_0 = arith.constant 0 : index
    %0 = vector.load %arg1[%c0, %c0_0] : memref<128x32xbf16, #tpu.memory_space<vmem>>, vector<128x32xbf16>
    %c0_1 = arith.constant 0 : index
    %c0_2 = arith.constant 0 : index
    %1 = vector.load %arg2[%c0_1, %c0_2] : memref<32x8xbf16, #tpu.memory_space<vmem>>, vector<32x8xbf16>
    %cst = arith.constant dense<0.000000e+00> : vector<128x8xf32>
    %2 = tpu.matmul %0, %1, %cst {dimension_numbers = #tpu.dot_dimension_numbers<[1], [0], [0], [1], [0, 0, 1, 1], [], []>} : vector<128x32xbf16>, vector<32x8xbf16>, vector<128x8xf32> -> vector<128x8xf32>
    %c0_3 = arith.constant 0 : index
    %c0_4 = arith.constant 0 : index
    %3 = vector.load %arg3[%c0_3, %c0_4] : memref<1x8xf32, #tpu.memory_space<vmem>>, vector<1x8xf32>
    %4 = vector.broadcast %3 : vector<1x8xf32> to vector<128x8xf32>
    %5 = arith.addf %2, %4 : vector<128x8xf32>
    %c0_5 = arith.constant 0 : index
    %6 = memref.load %arg4[%c0_5] : memref<1xf32, #tpu.memory_space<smem>>
    %cst_6 = arith.constant 0.000000e+00 : f32
    %7 = vector.broadcast %cst_6 : f32 to vector<128x8xf32>
    %8 = arith.cmpf oge, %5, %7 : vector<128x8xf32>
    %9 = vector.broadcast %6 : f32 to vector<128x8xf32>
    %10 = arith.mulf %9, %5 : vector<128x8xf32>
    %11 = arith.select %8, %5, %10 : vector<128x8xi1>, vector<128x8xf32>
    %c0_7 = arith.constant 0 : index
    %c0_8 = arith.constant 0 : index
    %12 = vector.load %arg5[%c0_7, %c0_8] : memref<128x8xbf16, #tpu.memory_space<vmem>>, vector<128x8xbf16>
    %13 = arith.extf %12 : vector<128x8xbf16> to vector<128x8xf32>
    %14 = arith.subf %13, %11 : vector<128x8xf32>
    %15 = arith.truncf %14 : vector<128x8xf32> to vector<128x8xbf16>
    %c0_9 = arith.constant 0 : index
    %c0_10 = arith.constant 0 : index
    %16 = vector.load %arg6[%c0_9, %c0_10] : memref<128x8xbf16, #tpu.memory_space<vmem>>, vector<128x8xbf16>
    tpu.vector_store %arg6[%c0_9, %c0_10], %15 {strides = array<i32>} : memref<128x8xbf16, #tpu.memory_space<vmem>>, vector<128x8xbf16>,
    return
  }
  func.func @transform_0(%arg0: i32) -> (i32, i32) {
    %c0_i32 = arith.constant 0 : i32
    %c0_i32_0 = arith.constant 0 : i32
    return %arg0, %c0_i32 : i32, i32
  }
  func.func @transform_1(%arg0: i32) -> (i32, i32) {
    %c0_i32 = arith.constant 0 : i32
    %c0_i32_0 = arith.constant 0 : i32
    %c0_i32_1 = arith.constant 0 : i32
    return %c0_i32, %c0_i32_0 : i32, i32
  }
  func.func @transform_2(%arg0: i32) -> (i32, i32) {
    %c0_i32 = arith.constant 0 : i32
    %c0_i32_0 = arith.constant 0 : i32
    %c0_i32_1 = arith.constant 0 : i32
    return %c0_i32, %c0_i32_0 : i32, i32
  }
  func.func @transform_3(%arg0: i32) -> i32 {
    %c0_i32 = arith.constant 0 : i32
    %c0_i32_0 = arith.constant 0 : i32
    return %c0_i32 : i32
  }
  func.func @transform_4(%arg0: i32) -> (i32, i32) {
    %c0_i32 = arith.constant 0 : i32
    %c0_i32_0 = arith.constant 0 : i32
    return %arg0, %c0_i32 : i32, i32
  }
  func.func @transform_5(%arg0: i32) -> (i32, i32) {
    %c0_i32 = arith.constant 0 : i32
    %c0_i32_0 = arith.constant 0 : i32
    return %arg0, %c0_i32 : i32, i32
  }
}

module attributes {stable_mosaic.version = 11 : i64} {
  func.func @_conv3x3_kernel(%arg0: i32, %arg1: memref<1x10x10x8xbf16, #tpu.memory_space<vmem>>, %arg2: memref<9x8x8xf32, #tpu.memory_space<vmem>>, %arg3: memref<1x8xf32, #tpu.memory_space<vmem>>, %arg4: memref<1xf32, #tpu.memory_space<smem>>, %arg5: memref<1x8x8x8xbf16, #tpu.memory_space<vmem>>, %arg6: memref<1x8x8x8xbf16, #tpu.memory_space<vmem>>) attributes {dimension_semantics = [#tpu.dimension_semantics<parallel>], iteration_bounds = array<i64: 2>, scalar_prefetch = 0 : i64, scratch_operands = 0 : i64, tpu.core_type = #tpu.core_type<tc>, window_params = [{transform_indices = @transform_0, window_bounds = array<i64: 1, 10, 10, 8>}, {pipeline_mode = #tpu.pipeline_mode<synchronous>, transform_indices = @transform_1, window_bounds = array<i64: 9, 8, 8>}, {pipeline_mode = #tpu.pipeline_mode<synchronous>, transform_indices = @transform_2, window_bounds = array<i64: 1, 8>}, {transform_indices = @transform_3, window_bounds = array<i64: 1>}, {transform_indices = @transform_4, window_bounds = array<i64: 1, 8, 8, 8>}, {transform_indices = @transform_5, window_bounds = array<i64: 1, 8, 8, 8>}]} {
    %c0 = arith.constant 0 : index
    %c0_0 = arith.constant 0 : index
    %c0_1 = arith.constant 0 : index
    %c0_2 = arith.constant 0 : index
    %0 = vector.load %arg1[%c0, %c0_0, %c0_1, %c0_2] : memref<1x10x10x8xbf16, #tpu.memory_space<vmem>>, vector<1x10x10x8xbf16>
    %1 = vector.shape_cast %0 : vector<1x10x10x8xbf16> to vector<10x10x8xbf16>
    %2 = arith.extf %1 : vector<10x10x8xbf16> to vector<10x10x8xf32>
    %cst = arith.constant 0.000000e+00 : f32
    %3 = vector.broadcast %cst : f32 to vector<64x8xf32>
    %4 = vector.extract_strided_slice %2 {offsets = [0, 0, 0], sizes = [8, 8, 8], strides = [1, 1, 1]} : vector<10x10x8xf32> to vector<8x8x8xf32>
    %5 = vector.shape_cast %4 : vector<8x8x8xf32> to vector<64x8xf32>
    %c0_3 = arith.constant 0 : index
    %c0_4 = arith.constant 0 : index
    %c0_5 = arith.constant 0 : index
    %6 = vector.load %arg2[%c0_3, %c0_4, %c0_5] : memref<9x8x8xf32, #tpu.memory_space<vmem>>, vector<1x8x8xf32>
    %7 = vector.shape_cast %6 : vector<1x8x8xf32> to vector<8x8xf32>
    %cst_6 = arith.constant dense<0.000000e+00> : vector<64x8xf32>
    %8 = tpu.matmul %5, %7, %cst_6 {dimension_numbers = #tpu.dot_dimension_numbers<[1], [0], [0], [1], [0, 0, 1, 1], [], []>} : vector<64x8xf32>, vector<8x8xf32>, vector<64x8xf32> -> vector<64x8xf32>
    %9 = arith.addf %3, %8 : vector<64x8xf32>
    %10 = vector.extract_strided_slice %2 {offsets = [0, 1, 0], sizes = [8, 8, 8], strides = [1, 1, 1]} : vector<10x10x8xf32> to vector<8x8x8xf32>
    %11 = vector.shape_cast %10 : vector<8x8x8xf32> to vector<64x8xf32>
    %c1 = arith.constant 1 : index
    %c0_7 = arith.constant 0 : index
    %c0_8 = arith.constant 0 : index
    %12 = vector.load %arg2[%c1, %c0_7, %c0_8] : memref<9x8x8xf32, #tpu.memory_space<vmem>>, vector<1x8x8xf32>
    %13 = vector.shape_cast %12 : vector<1x8x8xf32> to vector<8x8xf32>
    %cst_9 = arith.constant dense<0.000000e+00> : vector<64x8xf32>
    %14 = tpu.matmul %11, %13, %cst_9 {dimension_numbers = #tpu.dot_dimension_numbers<[1], [0], [0], [1], [0, 0, 1, 1], [], []>} : vector<64x8xf32>, vector<8x8xf32>, vector<64x8xf32> -> vector<64x8xf32>
    %15 = arith.addf %9, %14 : vector<64x8xf32>
    %16 = vector.extract_strided_slice %2 {offsets = [0, 2, 0], sizes = [8, 8, 8], strides = [1, 1, 1]} : vector<10x10x8xf32> to vector<8x8x8xf32>
    %17 = vector.shape_cast %16 : vector<8x8x8xf32> to vector<64x8xf32>
    %c2 = arith.constant 2 : index
    %c0_10 = arith.constant 0 : index
    %c0_11 = arith.constant 0 : index
    %18 = vector.load %arg2[%c2, %c0_10, %c0_11] : memref<9x8x8xf32, #tpu.memory_space<vmem>>, vector<1x8x8xf32>
    %19 = vector.shape_cast %18 : vector<1x8x8xf32> to vector<8x8xf32>
    %cst_12 = arith.constant dense<0.000000e+00> : vector<64x8xf32>
    %20 = tpu.matmul %17, %19, %cst_12 {dimension_numbers = #tpu.dot_dimension_numbers<[1], [0], [0], [1], [0, 0, 1, 1], [], []>} : vector<64x8xf32>, vector<8x8xf32>, vector<64x8xf32> -> vector<64x8xf32>
    %21 = arith.addf %15, %20 : vector<64x8xf32>
    %22 = vector.extract_strided_slice %2 {offsets = [1, 0, 0], sizes = [8, 8, 8], strides = [1, 1, 1]} : vector<10x10x8xf32> to vector<8x8x8xf32>
    %23 = vector.shape_cast %22 : vector<8x8x8xf32> to vector<64x8xf32>
    %c3 = arith.constant 3 : index
    %c0_13 = arith.constant 0 : index
    %c0_14 = arith.constant 0 : index
    %24 = vector.load %arg2[%c3, %c0_13, %c0_14] : memref<9x8x8xf32, #tpu.memory_space<vmem>>, vector<1x8x8xf32>
    %25 = vector.shape_cast %24 : vector<1x8x8xf32> to vector<8x8xf32>
    %cst_15 = arith.constant dense<0.000000e+00> : vector<64x8xf32>
    %26 = tpu.matmul %23, %25, %cst_15 {dimension_numbers = #tpu.dot_dimension_numbers<[1], [0], [0], [1], [0, 0, 1, 1], [], []>} : vector<64x8xf32>, vector<8x8xf32>, vector<64x8xf32> -> vector<64x8xf32>
    %27 = arith.addf %21, %26 : vector<64x8xf32>
    %28 = vector.extract_strided_slice %2 {offsets = [1, 1, 0], sizes = [8, 8, 8], strides = [1, 1, 1]} : vector<10x10x8xf32> to vector<8x8x8xf32>
    %29 = vector.shape_cast %28 : vector<8x8x8xf32> to vector<64x8xf32>
    %c4 = arith.constant 4 : index
    %c0_16 = arith.constant 0 : index
    %c0_17 = arith.constant 0 : index
    %30 = vector.load %arg2[%c4, %c0_16, %c0_17] : memref<9x8x8xf32, #tpu.memory_space<vmem>>, vector<1x8x8xf32>
    %31 = vector.shape_cast %30 : vector<1x8x8xf32> to vector<8x8xf32>
    %cst_18 = arith.constant dense<0.000000e+00> : vector<64x8xf32>
    %32 = tpu.matmul %29, %31, %cst_18 {dimension_numbers = #tpu.dot_dimension_numbers<[1], [0], [0], [1], [0, 0, 1, 1], [], []>} : vector<64x8xf32>, vector<8x8xf32>, vector<64x8xf32> -> vector<64x8xf32>
    %33 = arith.addf %27, %32 : vector<64x8xf32>
    %34 = vector.extract_strided_slice %2 {offsets = [1, 2, 0], sizes = [8, 8, 8], strides = [1, 1, 1]} : vector<10x10x8xf32> to vector<8x8x8xf32>
    %35 = vector.shape_cast %34 : vector<8x8x8xf32> to vector<64x8xf32>
    %c5 = arith.constant 5 : index
    %c0_19 = arith.constant 0 : index
    %c0_20 = arith.constant 0 : index
    %36 = vector.load %arg2[%c5, %c0_19, %c0_20] : memref<9x8x8xf32, #tpu.memory_space<vmem>>, vector<1x8x8xf32>
    %37 = vector.shape_cast %36 : vector<1x8x8xf32> to vector<8x8xf32>
    %cst_21 = arith.constant dense<0.000000e+00> : vector<64x8xf32>
    %38 = tpu.matmul %35, %37, %cst_21 {dimension_numbers = #tpu.dot_dimension_numbers<[1], [0], [0], [1], [0, 0, 1, 1], [], []>} : vector<64x8xf32>, vector<8x8xf32>, vector<64x8xf32> -> vector<64x8xf32>
    %39 = arith.addf %33, %38 : vector<64x8xf32>
    %40 = vector.extract_strided_slice %2 {offsets = [2, 0, 0], sizes = [8, 8, 8], strides = [1, 1, 1]} : vector<10x10x8xf32> to vector<8x8x8xf32>
    %41 = vector.shape_cast %40 : vector<8x8x8xf32> to vector<64x8xf32>
    %c6 = arith.constant 6 : index
    %c0_22 = arith.constant 0 : index
    %c0_23 = arith.constant 0 : index
    %42 = vector.load %arg2[%c6, %c0_22, %c0_23] : memref<9x8x8xf32, #tpu.memory_space<vmem>>, vector<1x8x8xf32>
    %43 = vector.shape_cast %42 : vector<1x8x8xf32> to vector<8x8xf32>
    %cst_24 = arith.constant dense<0.000000e+00> : vector<64x8xf32>
    %44 = tpu.matmul %41, %43, %cst_24 {dimension_numbers = #tpu.dot_dimension_numbers<[1], [0], [0], [1], [0, 0, 1, 1], [], []>} : vector<64x8xf32>, vector<8x8xf32>, vector<64x8xf32> -> vector<64x8xf32>
    %45 = arith.addf %39, %44 : vector<64x8xf32>
    %46 = vector.extract_strided_slice %2 {offsets = [2, 1, 0], sizes = [8, 8, 8], strides = [1, 1, 1]} : vector<10x10x8xf32> to vector<8x8x8xf32>
    %47 = vector.shape_cast %46 : vector<8x8x8xf32> to vector<64x8xf32>
    %c7 = arith.constant 7 : index
    %c0_25 = arith.constant 0 : index
    %c0_26 = arith.constant 0 : index
    %48 = vector.load %arg2[%c7, %c0_25, %c0_26] : memref<9x8x8xf32, #tpu.memory_space<vmem>>, vector<1x8x8xf32>
    %49 = vector.shape_cast %48 : vector<1x8x8xf32> to vector<8x8xf32>
    %cst_27 = arith.constant dense<0.000000e+00> : vector<64x8xf32>
    %50 = tpu.matmul %47, %49, %cst_27 {dimension_numbers = #tpu.dot_dimension_numbers<[1], [0], [0], [1], [0, 0, 1, 1], [], []>} : vector<64x8xf32>, vector<8x8xf32>, vector<64x8xf32> -> vector<64x8xf32>
    %51 = arith.addf %45, %50 : vector<64x8xf32>
    %52 = vector.extract_strided_slice %2 {offsets = [2, 2, 0], sizes = [8, 8, 8], strides = [1, 1, 1]} : vector<10x10x8xf32> to vector<8x8x8xf32>
    %53 = vector.shape_cast %52 : vector<8x8x8xf32> to vector<64x8xf32>
    %c8 = arith.constant 8 : index
    %c0_28 = arith.constant 0 : index
    %c0_29 = arith.constant 0 : index
    %54 = vector.load %arg2[%c8, %c0_28, %c0_29] : memref<9x8x8xf32, #tpu.memory_space<vmem>>, vector<1x8x8xf32>
    %55 = vector.shape_cast %54 : vector<1x8x8xf32> to vector<8x8xf32>
    %cst_30 = arith.constant dense<0.000000e+00> : vector<64x8xf32>
    %56 = tpu.matmul %53, %55, %cst_30 {dimension_numbers = #tpu.dot_dimension_numbers<[1], [0], [0], [1], [0, 0, 1, 1], [], []>} : vector<64x8xf32>, vector<8x8xf32>, vector<64x8xf32> -> vector<64x8xf32>
    %57 = arith.addf %51, %56 : vector<64x8xf32>
    %c0_31 = arith.constant 0 : index
    %c0_32 = arith.constant 0 : index
    %58 = vector.load %arg3[%c0_31, %c0_32] : memref<1x8xf32, #tpu.memory_space<vmem>>, vector<1x8xf32>
    %59 = vector.broadcast %58 : vector<1x8xf32> to vector<64x8xf32>
    %60 = arith.addf %57, %59 : vector<64x8xf32>
    %c0_33 = arith.constant 0 : index
    %61 = memref.load %arg4[%c0_33] : memref<1xf32, #tpu.memory_space<smem>>
    %cst_34 = arith.constant 0.000000e+00 : f32
    %62 = vector.broadcast %cst_34 : f32 to vector<64x8xf32>
    %63 = arith.cmpf oge, %60, %62 : vector<64x8xf32>
    %64 = vector.broadcast %61 : f32 to vector<64x8xf32>
    %65 = arith.mulf %64, %60 : vector<64x8xf32>
    %66 = arith.select %63, %60, %65 : vector<64x8xi1>, vector<64x8xf32>
    %c0_35 = arith.constant 0 : index
    %c0_36 = arith.constant 0 : index
    %c0_37 = arith.constant 0 : index
    %c0_38 = arith.constant 0 : index
    %67 = vector.load %arg5[%c0_35, %c0_36, %c0_37, %c0_38] : memref<1x8x8x8xbf16, #tpu.memory_space<vmem>>, vector<1x8x8x8xbf16>
    %68 = vector.shape_cast %67 : vector<1x8x8x8xbf16> to vector<8x8x8xbf16>
    %69 = arith.extf %68 : vector<8x8x8xbf16> to vector<8x8x8xf32>
    %70 = vector.shape_cast %69 : vector<8x8x8xf32> to vector<64x8xf32>
    %71 = arith.addf %70, %66 : vector<64x8xf32>
    %72 = vector.shape_cast %71 : vector<64x8xf32> to vector<8x8x8xf32>
    %73 = arith.truncf %72 : vector<8x8x8xf32> to vector<8x8x8xbf16>
    %c0_39 = arith.constant 0 : index
    %c0_40 = arith.constant 0 : index
    %c0_41 = arith.constant 0 : index
    %c0_42 = arith.constant 0 : index
    %74 = vector.load %arg6[%c0_39, %c0_40, %c0_41, %c0_42] : memref<1x8x8x8xbf16, #tpu.memory_space<vmem>>, vector<1x8x8x8xbf16>
    %75 = vector.shape_cast %74 : vector<1x8x8x8xbf16> to vector<8x8x8xbf16>
    %76 = vector.shape_cast %73 : vector<8x8x8xbf16> to vector<1x8x8x8xbf16>
    tpu.vector_store %arg6[%c0_39, %c0_40, %c0_41, %c0_42], %76 {strides = array<i32>} : memref<1x8x8x8xbf16, #tpu.memory_space<vmem>>, vector<1x8x8x8xbf16>,
    return
  }
  func.func @transform_0(%arg0: i32) -> (i32, i32, i32, i32) {
    %c0_i32 = arith.constant 0 : i32
    %c0_i32_0 = arith.constant 0 : i32
    %c0_i32_1 = arith.constant 0 : i32
    %c0_i32_2 = arith.constant 0 : i32
    return %arg0, %c0_i32, %c0_i32_0, %c0_i32_1 : i32, i32, i32, i32
  }
  func.func @transform_1(%arg0: i32) -> (i32, i32, i32) {
    %c0_i32 = arith.constant 0 : i32
    %c0_i32_0 = arith.constant 0 : i32
    %c0_i32_1 = arith.constant 0 : i32
    %c0_i32_2 = arith.constant 0 : i32
    return %c0_i32, %c0_i32_0, %c0_i32_1 : i32, i32, i32
  }
  func.func @transform_2(%arg0: i32) -> (i32, i32) {
    %c0_i32 = arith.constant 0 : i32
    %c0_i32_0 = arith.constant 0 : i32
    %c0_i32_1 = arith.constant 0 : i32
    return %c0_i32, %c0_i32_0 : i32, i32
  }
  func.func @transform_3(%arg0: i32) -> i32 {
    %c0_i32 = arith.constant 0 : i32
    %c0_i32_0 = arith.constant 0 : i32
    return %c0_i32 : i32
  }
  func.func @transform_4(%arg0: i32) -> (i32, i32, i32, i32) {
    %c0_i32 = arith.constant 0 : i32
    %c0_i32_0 = arith.constant 0 : i32
    %c0_i32_1 = arith.constant 0 : i32
    %c0_i32_2 = arith.constant 0 : i32
    return %arg0, %c0_i32, %c0_i32_0, %c0_i32_1 : i32, i32, i32, i32
  }
  func.func @transform_5(%arg0: i32) -> (i32, i32, i32, i32) {
    %c0_i32 = arith.constant 0 : i32
    %c0_i32_0 = arith.constant 0 : i32
    %c0_i32_1 = arith.constant 0 : i32
    %c0_i32_2 = arith.constant 0 : i32
    return %arg0, %c0_i32, %c0_i32_0, %c0_i32_1 : i32, i32, i32, i32
  }
}

module attributes {stable_mosaic.version = 11 : i64} {
  func.func @_conv3x3_kernel(%arg0: i32, %arg1: memref<1x18x18x8xbf16, #tpu.memory_space<vmem>>, %arg2: memref<9x8x8xf32, #tpu.memory_space<vmem>>, %arg3: memref<1x8xf32, #tpu.memory_space<vmem>>, %arg4: memref<1xf32, #tpu.memory_space<smem>>, %arg5: memref<1x16x16x8xbf16, #tpu.memory_space<vmem>>) attributes {dimension_semantics = [#tpu.dimension_semantics<parallel>], iteration_bounds = array<i64: 2>, scalar_prefetch = 0 : i64, scratch_operands = 0 : i64, tpu.core_type = #tpu.core_type<tc>, window_params = [{transform_indices = @transform_0, window_bounds = array<i64: 1, 18, 18, 8>}, {pipeline_mode = #tpu.pipeline_mode<synchronous>, transform_indices = @transform_1, window_bounds = array<i64: 9, 8, 8>}, {pipeline_mode = #tpu.pipeline_mode<synchronous>, transform_indices = @transform_2, window_bounds = array<i64: 1, 8>}, {transform_indices = @transform_3, window_bounds = array<i64: 1>}, {transform_indices = @transform_4, window_bounds = array<i64: 1, 16, 16, 8>}]} {
    %c0 = arith.constant 0 : index
    %c0_0 = arith.constant 0 : index
    %c0_1 = arith.constant 0 : index
    %c0_2 = arith.constant 0 : index
    %0 = vector.load %arg1[%c0, %c0_0, %c0_1, %c0_2] : memref<1x18x18x8xbf16, #tpu.memory_space<vmem>>, vector<1x18x18x8xbf16>
    %1 = vector.shape_cast %0 : vector<1x18x18x8xbf16> to vector<18x18x8xbf16>
    %2 = arith.extf %1 : vector<18x18x8xbf16> to vector<18x18x8xf32>
    %cst = arith.constant 0.000000e+00 : f32
    %3 = vector.broadcast %cst : f32 to vector<256x8xf32>
    %4 = vector.extract_strided_slice %2 {offsets = [0, 0, 0], sizes = [16, 16, 8], strides = [1, 1, 1]} : vector<18x18x8xf32> to vector<16x16x8xf32>
    %5 = vector.shape_cast %4 : vector<16x16x8xf32> to vector<256x8xf32>
    %c0_3 = arith.constant 0 : index
    %c0_4 = arith.constant 0 : index
    %c0_5 = arith.constant 0 : index
    %6 = vector.load %arg2[%c0_3, %c0_4, %c0_5] : memref<9x8x8xf32, #tpu.memory_space<vmem>>, vector<1x8x8xf32>
    %7 = vector.shape_cast %6 : vector<1x8x8xf32> to vector<8x8xf32>
    %cst_6 = arith.constant dense<0.000000e+00> : vector<256x8xf32>
    %8 = tpu.matmul %5, %7, %cst_6 {dimension_numbers = #tpu.dot_dimension_numbers<[1], [0], [0], [1], [0, 0, 1, 1], [], []>} : vector<256x8xf32>, vector<8x8xf32>, vector<256x8xf32> -> vector<256x8xf32>
    %9 = arith.addf %3, %8 : vector<256x8xf32>
    %10 = vector.extract_strided_slice %2 {offsets = [0, 1, 0], sizes = [16, 16, 8], strides = [1, 1, 1]} : vector<18x18x8xf32> to vector<16x16x8xf32>
    %11 = vector.shape_cast %10 : vector<16x16x8xf32> to vector<256x8xf32>
    %c1 = arith.constant 1 : index
    %c0_7 = arith.constant 0 : index
    %c0_8 = arith.constant 0 : index
    %12 = vector.load %arg2[%c1, %c0_7, %c0_8] : memref<9x8x8xf32, #tpu.memory_space<vmem>>, vector<1x8x8xf32>
    %13 = vector.shape_cast %12 : vector<1x8x8xf32> to vector<8x8xf32>
    %cst_9 = arith.constant dense<0.000000e+00> : vector<256x8xf32>
    %14 = tpu.matmul %11, %13, %cst_9 {dimension_numbers = #tpu.dot_dimension_numbers<[1], [0], [0], [1], [0, 0, 1, 1], [], []>} : vector<256x8xf32>, vector<8x8xf32>, vector<256x8xf32> -> vector<256x8xf32>
    %15 = arith.addf %9, %14 : vector<256x8xf32>
    %16 = vector.extract_strided_slice %2 {offsets = [0, 2, 0], sizes = [16, 16, 8], strides = [1, 1, 1]} : vector<18x18x8xf32> to vector<16x16x8xf32>
    %17 = vector.shape_cast %16 : vector<16x16x8xf32> to vector<256x8xf32>
    %c2 = arith.constant 2 : index
    %c0_10 = arith.constant 0 : index
    %c0_11 = arith.constant 0 : index
    %18 = vector.load %arg2[%c2, %c0_10, %c0_11] : memref<9x8x8xf32, #tpu.memory_space<vmem>>, vector<1x8x8xf32>
    %19 = vector.shape_cast %18 : vector<1x8x8xf32> to vector<8x8xf32>
    %cst_12 = arith.constant dense<0.000000e+00> : vector<256x8xf32>
    %20 = tpu.matmul %17, %19, %cst_12 {dimension_numbers = #tpu.dot_dimension_numbers<[1], [0], [0], [1], [0, 0, 1, 1], [], []>} : vector<256x8xf32>, vector<8x8xf32>, vector<256x8xf32> -> vector<256x8xf32>
    %21 = arith.addf %15, %20 : vector<256x8xf32>
    %22 = vector.extract_strided_slice %2 {offsets = [1, 0, 0], sizes = [16, 16, 8], strides = [1, 1, 1]} : vector<18x18x8xf32> to vector<16x16x8xf32>
    %23 = vector.shape_cast %22 : vector<16x16x8xf32> to vector<256x8xf32>
    %c3 = arith.constant 3 : index
    %c0_13 = arith.constant 0 : index
    %c0_14 = arith.constant 0 : index
    %24 = vector.load %arg2[%c3, %c0_13, %c0_14] : memref<9x8x8xf32, #tpu.memory_space<vmem>>, vector<1x8x8xf32>
    %25 = vector.shape_cast %24 : vector<1x8x8xf32> to vector<8x8xf32>
    %cst_15 = arith.constant dense<0.000000e+00> : vector<256x8xf32>
    %26 = tpu.matmul %23, %25, %cst_15 {dimension_numbers = #tpu.dot_dimension_numbers<[1], [0], [0], [1], [0, 0, 1, 1], [], []>} : vector<256x8xf32>, vector<8x8xf32>, vector<256x8xf32> -> vector<256x8xf32>
    %27 = arith.addf %21, %26 : vector<256x8xf32>
    %28 = vector.extract_strided_slice %2 {offsets = [1, 1, 0], sizes = [16, 16, 8], strides = [1, 1, 1]} : vector<18x18x8xf32> to vector<16x16x8xf32>
    %29 = vector.shape_cast %28 : vector<16x16x8xf32> to vector<256x8xf32>
    %c4 = arith.constant 4 : index
    %c0_16 = arith.constant 0 : index
    %c0_17 = arith.constant 0 : index
    %30 = vector.load %arg2[%c4, %c0_16, %c0_17] : memref<9x8x8xf32, #tpu.memory_space<vmem>>, vector<1x8x8xf32>
    %31 = vector.shape_cast %30 : vector<1x8x8xf32> to vector<8x8xf32>
    %cst_18 = arith.constant dense<0.000000e+00> : vector<256x8xf32>
    %32 = tpu.matmul %29, %31, %cst_18 {dimension_numbers = #tpu.dot_dimension_numbers<[1], [0], [0], [1], [0, 0, 1, 1], [], []>} : vector<256x8xf32>, vector<8x8xf32>, vector<256x8xf32> -> vector<256x8xf32>
    %33 = arith.addf %27, %32 : vector<256x8xf32>
    %34 = vector.extract_strided_slice %2 {offsets = [1, 2, 0], sizes = [16, 16, 8], strides = [1, 1, 1]} : vector<18x18x8xf32> to vector<16x16x8xf32>
    %35 = vector.shape_cast %34 : vector<16x16x8xf32> to vector<256x8xf32>
    %c5 = arith.constant 5 : index
    %c0_19 = arith.constant 0 : index
    %c0_20 = arith.constant 0 : index
    %36 = vector.load %arg2[%c5, %c0_19, %c0_20] : memref<9x8x8xf32, #tpu.memory_space<vmem>>, vector<1x8x8xf32>
    %37 = vector.shape_cast %36 : vector<1x8x8xf32> to vector<8x8xf32>
    %cst_21 = arith.constant dense<0.000000e+00> : vector<256x8xf32>
    %38 = tpu.matmul %35, %37, %cst_21 {dimension_numbers = #tpu.dot_dimension_numbers<[1], [0], [0], [1], [0, 0, 1, 1], [], []>} : vector<256x8xf32>, vector<8x8xf32>, vector<256x8xf32> -> vector<256x8xf32>
    %39 = arith.addf %33, %38 : vector<256x8xf32>
    %40 = vector.extract_strided_slice %2 {offsets = [2, 0, 0], sizes = [16, 16, 8], strides = [1, 1, 1]} : vector<18x18x8xf32> to vector<16x16x8xf32>
    %41 = vector.shape_cast %40 : vector<16x16x8xf32> to vector<256x8xf32>
    %c6 = arith.constant 6 : index
    %c0_22 = arith.constant 0 : index
    %c0_23 = arith.constant 0 : index
    %42 = vector.load %arg2[%c6, %c0_22, %c0_23] : memref<9x8x8xf32, #tpu.memory_space<vmem>>, vector<1x8x8xf32>
    %43 = vector.shape_cast %42 : vector<1x8x8xf32> to vector<8x8xf32>
    %cst_24 = arith.constant dense<0.000000e+00> : vector<256x8xf32>
    %44 = tpu.matmul %41, %43, %cst_24 {dimension_numbers = #tpu.dot_dimension_numbers<[1], [0], [0], [1], [0, 0, 1, 1], [], []>} : vector<256x8xf32>, vector<8x8xf32>, vector<256x8xf32> -> vector<256x8xf32>
    %45 = arith.addf %39, %44 : vector<256x8xf32>
    %46 = vector.extract_strided_slice %2 {offsets = [2, 1, 0], sizes = [16, 16, 8], strides = [1, 1, 1]} : vector<18x18x8xf32> to vector<16x16x8xf32>
    %47 = vector.shape_cast %46 : vector<16x16x8xf32> to vector<256x8xf32>
    %c7 = arith.constant 7 : index
    %c0_25 = arith.constant 0 : index
    %c0_26 = arith.constant 0 : index
    %48 = vector.load %arg2[%c7, %c0_25, %c0_26] : memref<9x8x8xf32, #tpu.memory_space<vmem>>, vector<1x8x8xf32>
    %49 = vector.shape_cast %48 : vector<1x8x8xf32> to vector<8x8xf32>
    %cst_27 = arith.constant dense<0.000000e+00> : vector<256x8xf32>
    %50 = tpu.matmul %47, %49, %cst_27 {dimension_numbers = #tpu.dot_dimension_numbers<[1], [0], [0], [1], [0, 0, 1, 1], [], []>} : vector<256x8xf32>, vector<8x8xf32>, vector<256x8xf32> -> vector<256x8xf32>
    %51 = arith.addf %45, %50 : vector<256x8xf32>
    %52 = vector.extract_strided_slice %2 {offsets = [2, 2, 0], sizes = [16, 16, 8], strides = [1, 1, 1]} : vector<18x18x8xf32> to vector<16x16x8xf32>
    %53 = vector.shape_cast %52 : vector<16x16x8xf32> to vector<256x8xf32>
    %c8 = arith.constant 8 : index
    %c0_28 = arith.constant 0 : index
    %c0_29 = arith.constant 0 : index
    %54 = vector.load %arg2[%c8, %c0_28, %c0_29] : memref<9x8x8xf32, #tpu.memory_space<vmem>>, vector<1x8x8xf32>
    %55 = vector.shape_cast %54 : vector<1x8x8xf32> to vector<8x8xf32>
    %cst_30 = arith.constant dense<0.000000e+00> : vector<256x8xf32>
    %56 = tpu.matmul %53, %55, %cst_30 {dimension_numbers = #tpu.dot_dimension_numbers<[1], [0], [0], [1], [0, 0, 1, 1], [], []>} : vector<256x8xf32>, vector<8x8xf32>, vector<256x8xf32> -> vector<256x8xf32>
    %57 = arith.addf %51, %56 : vector<256x8xf32>
    %c0_31 = arith.constant 0 : index
    %c0_32 = arith.constant 0 : index
    %58 = vector.load %arg3[%c0_31, %c0_32] : memref<1x8xf32, #tpu.memory_space<vmem>>, vector<1x8xf32>
    %59 = vector.broadcast %58 : vector<1x8xf32> to vector<256x8xf32>
    %60 = arith.addf %57, %59 : vector<256x8xf32>
    %c0_33 = arith.constant 0 : index
    %61 = memref.load %arg4[%c0_33] : memref<1xf32, #tpu.memory_space<smem>>
    %cst_34 = arith.constant 0.000000e+00 : f32
    %62 = vector.broadcast %cst_34 : f32 to vector<256x8xf32>
    %63 = arith.cmpf oge, %60, %62 : vector<256x8xf32>
    %64 = vector.broadcast %61 : f32 to vector<256x8xf32>
    %65 = arith.mulf %64, %60 : vector<256x8xf32>
    %66 = arith.select %63, %60, %65 : vector<256x8xi1>, vector<256x8xf32>
    %67 = vector.shape_cast %66 : vector<256x8xf32> to vector<16x16x8xf32>
    %68 = arith.truncf %67 : vector<16x16x8xf32> to vector<16x16x8xbf16>
    %c0_35 = arith.constant 0 : index
    %c0_36 = arith.constant 0 : index
    %c0_37 = arith.constant 0 : index
    %c0_38 = arith.constant 0 : index
    %69 = vector.load %arg5[%c0_35, %c0_36, %c0_37, %c0_38] : memref<1x16x16x8xbf16, #tpu.memory_space<vmem>>, vector<1x16x16x8xbf16>
    %70 = vector.shape_cast %69 : vector<1x16x16x8xbf16> to vector<16x16x8xbf16>
    %71 = vector.shape_cast %68 : vector<16x16x8xbf16> to vector<1x16x16x8xbf16>
    tpu.vector_store %arg5[%c0_35, %c0_36, %c0_37, %c0_38], %71 {strides = array<i32>} : memref<1x16x16x8xbf16, #tpu.memory_space<vmem>>, vector<1x16x16x8xbf16>,
    return
  }
  func.func @transform_0(%arg0: i32) -> (i32, i32, i32, i32) {
    %c0_i32 = arith.constant 0 : i32
    %c0_i32_0 = arith.constant 0 : i32
    %c0_i32_1 = arith.constant 0 : i32
    %c0_i32_2 = arith.constant 0 : i32
    return %arg0, %c0_i32, %c0_i32_0, %c0_i32_1 : i32, i32, i32, i32
  }
  func.func @transform_1(%arg0: i32) -> (i32, i32, i32) {
    %c0_i32 = arith.constant 0 : i32
    %c0_i32_0 = arith.constant 0 : i32
    %c0_i32_1 = arith.constant 0 : i32
    %c0_i32_2 = arith.constant 0 : i32
    return %c0_i32, %c0_i32_0, %c0_i32_1 : i32, i32, i32
  }
  func.func @transform_2(%arg0: i32) -> (i32, i32) {
    %c0_i32 = arith.constant 0 : i32
    %c0_i32_0 = arith.constant 0 : i32
    %c0_i32_1 = arith.constant 0 : i32
    return %c0_i32, %c0_i32_0 : i32, i32
  }
  func.func @transform_3(%arg0: i32) -> i32 {
    %c0_i32 = arith.constant 0 : i32
    %c0_i32_0 = arith.constant 0 : i32
    return %c0_i32 : i32
  }
  func.func @transform_4(%arg0: i32) -> (i32, i32, i32, i32) {
    %c0_i32 = arith.constant 0 : i32
    %c0_i32_0 = arith.constant 0 : i32
    %c0_i32_1 = arith.constant 0 : i32
    %c0_i32_2 = arith.constant 0 : i32
    return %arg0, %c0_i32, %c0_i32_0, %c0_i32_1 : i32, i32, i32, i32
  }
}

module attributes {stable_mosaic.version = 11 : i64} {
  func.func @_conv3x3_kernel(%arg0: i32, %arg1: memref<1x18x18x24xbf16, #tpu.memory_space<vmem>>, %arg2: memref<9x24x3xf32, #tpu.memory_space<vmem>>, %arg3: memref<1x3xf32, #tpu.memory_space<vmem>>, %arg4: memref<1xf32, #tpu.memory_space<smem>>, %arg5: memref<1x16x16x3xbf16, #tpu.memory_space<vmem>>) attributes {dimension_semantics = [#tpu.dimension_semantics<parallel>], iteration_bounds = array<i64: 2>, scalar_prefetch = 0 : i64, scratch_operands = 0 : i64, tpu.core_type = #tpu.core_type<tc>, window_params = [{transform_indices = @transform_0, window_bounds = array<i64: 1, 18, 18, 24>}, {pipeline_mode = #tpu.pipeline_mode<synchronous>, transform_indices = @transform_1, window_bounds = array<i64: 9, 24, 3>}, {pipeline_mode = #tpu.pipeline_mode<synchronous>, transform_indices = @transform_2, window_bounds = array<i64: 1, 3>}, {transform_indices = @transform_3, window_bounds = array<i64: 1>}, {transform_indices = @transform_4, window_bounds = array<i64: 1, 16, 16, 3>}]} {
    %c0 = arith.constant 0 : index
    %c0_0 = arith.constant 0 : index
    %c0_1 = arith.constant 0 : index
    %c0_2 = arith.constant 0 : index
    %0 = vector.load %arg1[%c0, %c0_0, %c0_1, %c0_2] : memref<1x18x18x24xbf16, #tpu.memory_space<vmem>>, vector<1x18x18x24xbf16>
    %1 = vector.shape_cast %0 : vector<1x18x18x24xbf16> to vector<18x18x24xbf16>
    %2 = arith.extf %1 : vector<18x18x24xbf16> to vector<18x18x24xf32>
    %cst = arith.constant 0.000000e+00 : f32
    %3 = vector.broadcast %cst : f32 to vector<256x3xf32>
    %4 = vector.extract_strided_slice %2 {offsets = [0, 0, 0], sizes = [16, 16, 24], strides = [1, 1, 1]} : vector<18x18x24xf32> to vector<16x16x24xf32>
    %5 = vector.shape_cast %4 : vector<16x16x24xf32> to vector<256x24xf32>
    %c0_3 = arith.constant 0 : index
    %c0_4 = arith.constant 0 : index
    %c0_5 = arith.constant 0 : index
    %6 = vector.load %arg2[%c0_3, %c0_4, %c0_5] : memref<9x24x3xf32, #tpu.memory_space<vmem>>, vector<1x24x3xf32>
    %7 = vector.shape_cast %6 : vector<1x24x3xf32> to vector<24x3xf32>
    %cst_6 = arith.constant dense<0.000000e+00> : vector<256x3xf32>
    %8 = tpu.matmul %5, %7, %cst_6 {dimension_numbers = #tpu.dot_dimension_numbers<[1], [0], [0], [1], [0, 0, 1, 1], [], []>} : vector<256x24xf32>, vector<24x3xf32>, vector<256x3xf32> -> vector<256x3xf32>
    %9 = arith.addf %3, %8 : vector<256x3xf32>
    %10 = vector.extract_strided_slice %2 {offsets = [0, 1, 0], sizes = [16, 16, 24], strides = [1, 1, 1]} : vector<18x18x24xf32> to vector<16x16x24xf32>
    %11 = vector.shape_cast %10 : vector<16x16x24xf32> to vector<256x24xf32>
    %c1 = arith.constant 1 : index
    %c0_7 = arith.constant 0 : index
    %c0_8 = arith.constant 0 : index
    %12 = vector.load %arg2[%c1, %c0_7, %c0_8] : memref<9x24x3xf32, #tpu.memory_space<vmem>>, vector<1x24x3xf32>
    %13 = vector.shape_cast %12 : vector<1x24x3xf32> to vector<24x3xf32>
    %cst_9 = arith.constant dense<0.000000e+00> : vector<256x3xf32>
    %14 = tpu.matmul %11, %13, %cst_9 {dimension_numbers = #tpu.dot_dimension_numbers<[1], [0], [0], [1], [0, 0, 1, 1], [], []>} : vector<256x24xf32>, vector<24x3xf32>, vector<256x3xf32> -> vector<256x3xf32>
    %15 = arith.addf %9, %14 : vector<256x3xf32>
    %16 = vector.extract_strided_slice %2 {offsets = [0, 2, 0], sizes = [16, 16, 24], strides = [1, 1, 1]} : vector<18x18x24xf32> to vector<16x16x24xf32>
    %17 = vector.shape_cast %16 : vector<16x16x24xf32> to vector<256x24xf32>
    %c2 = arith.constant 2 : index
    %c0_10 = arith.constant 0 : index
    %c0_11 = arith.constant 0 : index
    %18 = vector.load %arg2[%c2, %c0_10, %c0_11] : memref<9x24x3xf32, #tpu.memory_space<vmem>>, vector<1x24x3xf32>
    %19 = vector.shape_cast %18 : vector<1x24x3xf32> to vector<24x3xf32>
    %cst_12 = arith.constant dense<0.000000e+00> : vector<256x3xf32>
    %20 = tpu.matmul %17, %19, %cst_12 {dimension_numbers = #tpu.dot_dimension_numbers<[1], [0], [0], [1], [0, 0, 1, 1], [], []>} : vector<256x24xf32>, vector<24x3xf32>, vector<256x3xf32> -> vector<256x3xf32>
    %21 = arith.addf %15, %20 : vector<256x3xf32>
    %22 = vector.extract_strided_slice %2 {offsets = [1, 0, 0], sizes = [16, 16, 24], strides = [1, 1, 1]} : vector<18x18x24xf32> to vector<16x16x24xf32>
    %23 = vector.shape_cast %22 : vector<16x16x24xf32> to vector<256x24xf32>
    %c3 = arith.constant 3 : index
    %c0_13 = arith.constant 0 : index
    %c0_14 = arith.constant 0 : index
    %24 = vector.load %arg2[%c3, %c0_13, %c0_14] : memref<9x24x3xf32, #tpu.memory_space<vmem>>, vector<1x24x3xf32>
    %25 = vector.shape_cast %24 : vector<1x24x3xf32> to vector<24x3xf32>
    %cst_15 = arith.constant dense<0.000000e+00> : vector<256x3xf32>
    %26 = tpu.matmul %23, %25, %cst_15 {dimension_numbers = #tpu.dot_dimension_numbers<[1], [0], [0], [1], [0, 0, 1, 1], [], []>} : vector<256x24xf32>, vector<24x3xf32>, vector<256x3xf32> -> vector<256x3xf32>
    %27 = arith.addf %21, %26 : vector<256x3xf32>
    %28 = vector.extract_strided_slice %2 {offsets = [1, 1, 0], sizes = [16, 16, 24], strides = [1, 1, 1]} : vector<18x18x24xf32> to vector<16x16x24xf32>
    %29 = vector.shape_cast %28 : vector<16x16x24xf32> to vector<256x24xf32>
    %c4 = arith.constant 4 : index
    %c0_16 = arith.constant 0 : index
    %c0_17 = arith.constant 0 : index
    %30 = vector.load %arg2[%c4, %c0_16, %c0_17] : memref<9x24x3xf32, #tpu.memory_space<vmem>>, vector<1x24x3xf32>
    %31 = vector.shape_cast %30 : vector<1x24x3xf32> to vector<24x3xf32>
    %cst_18 = arith.constant dense<0.000000e+00> : vector<256x3xf32>
    %32 = tpu.matmul %29, %31, %cst_18 {dimension_numbers = #tpu.dot_dimension_numbers<[1], [0], [0], [1], [0, 0, 1, 1], [], []>} : vector<256x24xf32>, vector<24x3xf32>, vector<256x3xf32> -> vector<256x3xf32>
    %33 = arith.addf %27, %32 : vector<256x3xf32>
    %34 = vector.extract_strided_slice %2 {offsets = [1, 2, 0], sizes = [16, 16, 24], strides = [1, 1, 1]} : vector<18x18x24xf32> to vector<16x16x24xf32>
    %35 = vector.shape_cast %34 : vector<16x16x24xf32> to vector<256x24xf32>
    %c5 = arith.constant 5 : index
    %c0_19 = arith.constant 0 : index
    %c0_20 = arith.constant 0 : index
    %36 = vector.load %arg2[%c5, %c0_19, %c0_20] : memref<9x24x3xf32, #tpu.memory_space<vmem>>, vector<1x24x3xf32>
    %37 = vector.shape_cast %36 : vector<1x24x3xf32> to vector<24x3xf32>
    %cst_21 = arith.constant dense<0.000000e+00> : vector<256x3xf32>
    %38 = tpu.matmul %35, %37, %cst_21 {dimension_numbers = #tpu.dot_dimension_numbers<[1], [0], [0], [1], [0, 0, 1, 1], [], []>} : vector<256x24xf32>, vector<24x3xf32>, vector<256x3xf32> -> vector<256x3xf32>
    %39 = arith.addf %33, %38 : vector<256x3xf32>
    %40 = vector.extract_strided_slice %2 {offsets = [2, 0, 0], sizes = [16, 16, 24], strides = [1, 1, 1]} : vector<18x18x24xf32> to vector<16x16x24xf32>
    %41 = vector.shape_cast %40 : vector<16x16x24xf32> to vector<256x24xf32>
    %c6 = arith.constant 6 : index
    %c0_22 = arith.constant 0 : index
    %c0_23 = arith.constant 0 : index
    %42 = vector.load %arg2[%c6, %c0_22, %c0_23] : memref<9x24x3xf32, #tpu.memory_space<vmem>>, vector<1x24x3xf32>
    %43 = vector.shape_cast %42 : vector<1x24x3xf32> to vector<24x3xf32>
    %cst_24 = arith.constant dense<0.000000e+00> : vector<256x3xf32>
    %44 = tpu.matmul %41, %43, %cst_24 {dimension_numbers = #tpu.dot_dimension_numbers<[1], [0], [0], [1], [0, 0, 1, 1], [], []>} : vector<256x24xf32>, vector<24x3xf32>, vector<256x3xf32> -> vector<256x3xf32>
    %45 = arith.addf %39, %44 : vector<256x3xf32>
    %46 = vector.extract_strided_slice %2 {offsets = [2, 1, 0], sizes = [16, 16, 24], strides = [1, 1, 1]} : vector<18x18x24xf32> to vector<16x16x24xf32>
    %47 = vector.shape_cast %46 : vector<16x16x24xf32> to vector<256x24xf32>
    %c7 = arith.constant 7 : index
    %c0_25 = arith.constant 0 : index
    %c0_26 = arith.constant 0 : index
    %48 = vector.load %arg2[%c7, %c0_25, %c0_26] : memref<9x24x3xf32, #tpu.memory_space<vmem>>, vector<1x24x3xf32>
    %49 = vector.shape_cast %48 : vector<1x24x3xf32> to vector<24x3xf32>
    %cst_27 = arith.constant dense<0.000000e+00> : vector<256x3xf32>
    %50 = tpu.matmul %47, %49, %cst_27 {dimension_numbers = #tpu.dot_dimension_numbers<[1], [0], [0], [1], [0, 0, 1, 1], [], []>} : vector<256x24xf32>, vector<24x3xf32>, vector<256x3xf32> -> vector<256x3xf32>
    %51 = arith.addf %45, %50 : vector<256x3xf32>
    %52 = vector.extract_strided_slice %2 {offsets = [2, 2, 0], sizes = [16, 16, 24], strides = [1, 1, 1]} : vector<18x18x24xf32> to vector<16x16x24xf32>
    %53 = vector.shape_cast %52 : vector<16x16x24xf32> to vector<256x24xf32>
    %c8 = arith.constant 8 : index
    %c0_28 = arith.constant 0 : index
    %c0_29 = arith.constant 0 : index
    %54 = vector.load %arg2[%c8, %c0_28, %c0_29] : memref<9x24x3xf32, #tpu.memory_space<vmem>>, vector<1x24x3xf32>
    %55 = vector.shape_cast %54 : vector<1x24x3xf32> to vector<24x3xf32>
    %cst_30 = arith.constant dense<0.000000e+00> : vector<256x3xf32>
    %56 = tpu.matmul %53, %55, %cst_30 {dimension_numbers = #tpu.dot_dimension_numbers<[1], [0], [0], [1], [0, 0, 1, 1], [], []>} : vector<256x24xf32>, vector<24x3xf32>, vector<256x3xf32> -> vector<256x3xf32>
    %57 = arith.addf %51, %56 : vector<256x3xf32>
    %c0_31 = arith.constant 0 : index
    %c0_32 = arith.constant 0 : index
    %58 = vector.load %arg3[%c0_31, %c0_32] : memref<1x3xf32, #tpu.memory_space<vmem>>, vector<1x3xf32>
    %59 = vector.broadcast %58 : vector<1x3xf32> to vector<256x3xf32>
    %60 = arith.addf %57, %59 : vector<256x3xf32>
    %c0_33 = arith.constant 0 : index
    %61 = memref.load %arg4[%c0_33] : memref<1xf32, #tpu.memory_space<smem>>
    %cst_34 = arith.constant 0.000000e+00 : f32
    %62 = vector.broadcast %cst_34 : f32 to vector<256x3xf32>
    %63 = arith.cmpf oge, %60, %62 : vector<256x3xf32>
    %64 = vector.broadcast %61 : f32 to vector<256x3xf32>
    %65 = arith.mulf %64, %60 : vector<256x3xf32>
    %66 = arith.select %63, %60, %65 : vector<256x3xi1>, vector<256x3xf32>
    %67 = vector.shape_cast %66 : vector<256x3xf32> to vector<16x16x3xf32>
    %68 = arith.truncf %67 : vector<16x16x3xf32> to vector<16x16x3xbf16>
    %c0_35 = arith.constant 0 : index
    %c0_36 = arith.constant 0 : index
    %c0_37 = arith.constant 0 : index
    %c0_38 = arith.constant 0 : index
    %69 = vector.load %arg5[%c0_35, %c0_36, %c0_37, %c0_38] : memref<1x16x16x3xbf16, #tpu.memory_space<vmem>>, vector<1x16x16x3xbf16>
    %70 = vector.shape_cast %69 : vector<1x16x16x3xbf16> to vector<16x16x3xbf16>
    %71 = vector.shape_cast %68 : vector<16x16x3xbf16> to vector<1x16x16x3xbf16>
    tpu.vector_store %arg5[%c0_35, %c0_36, %c0_37, %c0_38], %71 {strides = array<i32>} : memref<1x16x16x3xbf16, #tpu.memory_space<vmem>>, vector<1x16x16x3xbf16>,
    return
  }
  func.func @transform_0(%arg0: i32) -> (i32, i32, i32, i32) {
    %c0_i32 = arith.constant 0 : i32
    %c0_i32_0 = arith.constant 0 : i32
    %c0_i32_1 = arith.constant 0 : i32
    %c0_i32_2 = arith.constant 0 : i32
    return %arg0, %c0_i32, %c0_i32_0, %c0_i32_1 : i32, i32, i32, i32
  }
  func.func @transform_1(%arg0: i32) -> (i32, i32, i32) {
    %c0_i32 = arith.constant 0 : i32
    %c0_i32_0 = arith.constant 0 : i32
    %c0_i32_1 = arith.constant 0 : i32
    %c0_i32_2 = arith.constant 0 : i32
    return %c0_i32, %c0_i32_0, %c0_i32_1 : i32, i32, i32
  }
  func.func @transform_2(%arg0: i32) -> (i32, i32) {
    %c0_i32 = arith.constant 0 : i32
    %c0_i32_0 = arith.constant 0 : i32
    %c0_i32_1 = arith.constant 0 : i32
    return %c0_i32, %c0_i32_0 : i32, i32
  }
  func.func @transform_3(%arg0: i32) -> i32 {
    %c0_i32 = arith.constant 0 : i32
    %c0_i32_0 = arith.constant 0 : i32
    return %c0_i32 : i32
  }
  func.func @transform_4(%arg0: i32) -> (i32, i32, i32, i32) {
    %c0_i32 = arith.constant 0 : i32
    %c0_i32_0 = arith.constant 0 : i32
    %c0_i32_1 = arith.constant 0 : i32
    %c0_i32_2 = arith.constant 0 : i32
    return %arg0, %c0_i32, %c0_i32_0, %c0_i32_1 : i32, i32, i32, i32
  }
}

</mosaic_0001>

<bundles_post_ra>
// kernel: tile.18
= control target key start
LH: loop header
LB: loop body
LE: loop exit
PB: predicated region body
PF: predicated region fallthrough
CT: control target
= control target key end

     0   :  { %s22_s0 = inlined_call_operand.vmem [shape: f32[8], index: 0, kind: input, shape index: {}]   ;;  %s23_s1 = inlined_call_operand.vmem [shape: f32[4,8], index: 1, kind: output, shape index: {}]  }
   0x1   :  { %v4_v0 = vld [vmem:[%s22_s0] ss:$0 sm:$0xff] }
   0x2   :  { %5 = vst [vmem:[%s23_s1] sm:$0xf] %v4_v0 }

// kernel: tile.19
= control target key start
LH: loop header
LB: loop body
LE: loop exit
PB: predicated region body
PF: predicated region fallthrough
CT: control target
= control target key end

     0   :  { %vm7_vm0 = vcmask 64512   ;;  %s37_s8 = smov 8   ;;  %s38_s9 = smov 16   ;;  %vm13_vm1 = vcmask 261312   ;;  %vm19_vm2 = vcmask 195712   ;;  %vm25_vm3 = vcmask 130112   ;;  %s55_s0 = inlined_call_operand.vmem [shape: f32[4,8], index: 0, kind: input, shape index: {}]   ;;  %s56_s1 = inlined_call_operand.vmem [shape: f32[1,32], index: 1, kind: output, shape index: {}]  }
   0x1   :  { %v4_v0 = vld [vmem:[%s55_s0] sm:$0xf]  ;;  %s36_s0 = smov 24  }
   0x2   :  { %5 = vst [vmem:[#allocation1] sm:$0xf] %v4_v0 }
   0x9   :  { %v10_v1 = vld [vmem:[#allocation1 + $0x3] sm:$0x1]   ;;  %v22_v2 = vld [vmem:[#allocation1 + $0x1] sm:$0x1]   ;;  %v6_v3 = vld [vmem:[#allocation1] sm:$0x1]  }
   0xa   :  { %11 = vrot.lane.b32.xlu0 %v10_v1, %s36_s0  ;;  %23 = vrot.lane.b32.xlu1 %v22_v2, %s37_s8  ;;  %v16_v4 = vld [vmem:[#allocation1 + $0x2] sm:$0x1]   ;;  %8 = vst.msk [vmem:[#allocation0] sm:$0x1] %vm7_vm0, %v6_v3  }
   0xe   :  { %17 = vrot.lane.b32.xlu0 %v16_v4, %s38_s9 }
  0x7c   :  { %v12_v5 = vpop.permute.xlu0 %11   ;;  %v24_v6 = vpop.permute.xlu1 %23  }
  0x7d   :  { %14 = vst.msk [vmem:[#allocation0] sm:$0x1] %vm13_vm1, %v12_v5  }
  0x80   :  { %v18_v7 = vpop.permute.xlu0 %17  }
  0x81   :  { %20 = vst.msk [vmem:[#allocation0] sm:$0x1] %vm19_vm2, %v18_v7  }
  0x82   :  { %26 = vst.msk [vmem:[#allocation0] sm:$0x1] %vm25_vm3, %v24_v6  }
  0x89   :  { %v30_v8 = vld [vmem:[#allocation0] sm:$0x1] }
  0x8a   :  { %32 = vst [vmem:[%s56_s1] sm:$0x1] %v30_v8 }

// kernel: ebrn_forward.26
= control target key start
LH: loop header
LB: loop body
LE: loop exit
PB: predicated region body
PF: predicated region fallthrough
CT: control target
= control target key end

     0   :  { %s1960_s17 = smov 0   ;;  %s2305_s0 = inlined_call_operand.vmem [shape: bf16[2,10,10,3], index: 0, kind: input, shape index: {}]   ;;  %s2306_s1 = inlined_call_operand.vmem [shape: f32[9,3,32], index: 1, kind: input, shape index: {}]   ;;  %s2307_s2 = inlined_call_operand.vmem [shape: f32[1,32], index: 2, kind: input, shape index: {}]   ;;  %s2308_s3 = inlined_call_operand.<no memory space> [shape: f32[1], index: 3, kind: input, shape index: {}]   ;;  %s2309_s4 = inlined_call_operand.vmem [shape: bf16[2,8,8,32], index: 4, kind: output, shape index: {}]  }
   0x1   :  { %9 = sst [smem:[#allocation2]] %s2308_s3 }
   0x2 LB: > { %s1541_s18 = sadd.s32 4294967295, %s1930_s17   ;;  %p1545_p0 = scmp.ge.s32.totalorder %s1930_s17, 1  ;;  %s1930_s17 = sphi %s1960_s17, %s15_s17  }
   0x3   : > { %p163_p1 = scmp.lt.s32.totalorder %s1930_s17, 3 }
   0x5   : > { %p164_p2 = pnand %p1545_p0, %p163_p1 }
   0x6   : > { %v1549_v0 = vld [vmem:[%s2306_s1 + $0x4] sm:$0x7] (!%p164_p2)  ;;  %vm300_vm0 = vcmask (!%p164_p2), 1042432   ;;  %v1974_v1 = vld [vmem:[%s2306_s1 + $0x10] sm:$0x7] (!%p164_p2)  ;;  %p189_p3 = scmp.lt.s32.totalorder (!%p164_p2), %s1541_s18, 1 }
   0x7   : > { %167 = sbr.rel (%p164_p2) target bundleno = 316 (0x13c), region = 36  ;;  %1723 = vmatprep.subr.msk.mxu1 (!%p164_p2), %vm300_vm0, %v1549_v0  ;;  %1779 = vmatprep.subr.msk.mxu0 (!%p164_p2), %vm300_vm0, %v1974_v1  ;;  %v239_v2 = vld [vmem:[%s2306_s1] sm:$0x7] (!%p164_p2)  ;;  %v1598_v3 = vld [vmem:[%s2306_s1 + $0x14] sm:$0x7] (!%p164_p2)  ;;  %vm256_vm1 = vcmask (!%p164_p2), 1046528  }
   0x8   : > { %1724 = vmatpush3.msk.msra.mxu1 (!%p164_p2), %vm300_vm0, %v1549_v0  ;;  %1780 = vmatpush3.msk.msra.mxu0 (!%p164_p2), %vm300_vm0, %v1974_v1  ;;  %vm283_vm2 = vcmask (!%p164_p2), 23552   ;;  %vm533_vm3 = vcmask (!%p164_p2), 1045504   ;;  %v1608_v41 = vld [vmem:[%s2306_s1 + $0x18] sm:$0x7] (!%p164_p2)  ;;  %v2051_v44 = vld [vmem:[%s2306_s1 + $0x8] sm:$0x7] (!%p164_p2) }
   0x9   : > { %1737 = vmatprep.subr.msk.mxu1 (!%p164_p2), %vm300_vm0, %v239_v2  ;;  %1793 = vmatprep.subr.msk.mxu0 (!%p164_p2), %vm300_vm0, %v1598_v3  ;;  %s1443_s14 = sld [smem:[#allocation2]] (!%p164_p2)  ;;  %vm1477_vm6 = vcmask (!%p164_p2), 257024  }
   0xe   : > { %s2311_s18 = smov (!%p189_p3, %s1541_s18), 1 }
   0xf   : > { %s1915_s26 = smul.u32 80, %s2311_s18  ;;  %s1641_s19 = sshll.u32 %s2311_s18, 5 }
  0x10   : > { %s2284_s21 = scalar_lea.vmem %s2309_s4, %s1641_s19 }
  0x11   : > { %s1996_s29 = scalar_lea.vmem %s2305_s0, %s1915_s26 }
  0x12   : > { %v199_v4 = vld [vmem:[%s1996_s29] ss:$8 sps:$4 sm:$0xff]   ;;  %v2000_v5 = vld [vmem:[%s1996_s29 + $0x4] sm:$0x1]  ;;  %v202_v6 = vld [vmem:[%s1996_s29 + $0xc] sm:$0x1] }
  0x13   : > { %v2003_v7 = vunpack.c.l.bf16 %v199_v4  ;;  %v220_v8 = vunpack.c.l.bf16 %v2000_v5  ;;  %v2006_v9 = vunpack.c.h.bf16 %v199_v4  ;;  %v222_v10 = vunpack.c.l.bf16 %v202_v6  ;;  %v203_v11 = vld [vmem:[%s1996_s29 + $0x10] ss:$8 sps:$4 sm:$0xff]   ;;  %v204_v12 = vld [vmem:[%s1996_s29 + $0x14] sm:$0x1]  ;;  %v206_v13 = vld [vmem:[%s1996_s29 + $0x1c] sm:$0x1] }
  0x14   : > { %v2011_v14 = vunpack.c.l.bf16 %v203_v11  ;;  %v224_v15 = vunpack.c.l.bf16 %v204_v12  ;;  %v2013_v16 = vunpack.c.h.bf16 %v203_v11  ;;  %v226_v17 = vunpack.c.l.bf16 %v206_v13  ;;  %v207_v18 = vld [vmem:[%s1996_s29 + $0x20] ss:$8 sps:$4 sm:$0xff]   ;;  %v208_v23 = vld [vmem:[%s1996_s29 + $0x24] sm:$0x1]  ;;  %v210_v28 = vld [vmem:[%s1996_s29 + $0x2c] sm:$0x1] }
  0x15   : > { %v257_v19 = vrot.slane %v2003_v7, 1  ;;  %v258_v20 = vrot.slane %v220_v8, 1  ;;  %v260_v21 = vrot.slane %v2006_v9, 1  ;;  %v261_v22 = vrot.slane %v222_v10, 1  ;;  %v211_v33 = vld [vmem:[%s1996_s29 + $0x30] ss:$8 sps:$4 sm:$0xff]  }
  0x16   : > { %v263_v24 = vrot.slane %v2011_v14, 1  ;;  %v264_v25 = vrot.slane %v224_v15, 1  ;;  %v541_v26 = vrot.slane %v224_v15, 2  ;;  %v266_v27 = vrot.slane %v2013_v16, 1  ;;  %v212_v38 = vld [vmem:[%s1996_s29 + $0x34] sm:$0x1] }
  0x17   : > { %v259_v29 = vsel %vm256_vm1, %v257_v19, %v258_v20  ;;  %v262_v30 = vsel %vm256_vm1, %v260_v21, %v261_v22  ;;  %v267_v31 = vrot.slane %v226_v17, 1  ;;  %v2026_v32 = vunpack.c.l.bf16 %v207_v18  ;;  %v214_v48 = vld [vmem:[%s1996_s29 + $0x3c] sm:$0x1]  ;;  %v2099_v11 = vld [vmem:[%s1996_s29 + $0x44] sm:$0x1] }
  0x18   : > { %1725 = vmatprep.mubr.msk.f32.mxu1 %vm283_vm2, %v259_v29  ;;  %1781 = vmatprep.mubr.msk.f32.mxu0 %vm283_vm2, %v262_v30  ;;  %v2032_v34 = vsel %vm256_vm1, %v263_v24, %v264_v25  ;;  %v228_v35 = vunpack.c.l.bf16 %v208_v23  ;;  %v537_v36 = vrot.slane %v2006_v9, 2  ;;  %v538_v37 = vrot.slane %v222_v10, 2  ;;  %v1618_v13 = vld [vmem:[%s2306_s1 + $0x1c] sm:$0x7]  ;;  %v1578_v29 = vld [vmem:[%s2306_s1 + $0xc] sm:$0x7] }
  0x19   : > { %1726 = vmatmul.mubr.msk.f32.vlgmr.msra.gmra.mrb[0].mxu1 %vm283_vm2, %v262_v30  ;;  %1782 = vmatmul.mubr.msk.f32.vlgmr.msra.gmra.mrb[0].mxu0 %vm283_vm2, %v2032_v34  ;;  %v2040_v39 = vsel %vm256_vm1, %v266_v27, %v267_v31  ;;  %v269_v40 = vrot.slane %v2026_v32, 1  ;;  %v2046_v42 = vunpack.c.h.bf16 %v207_v18  ;;  %v230_v43 = vunpack.c.l.bf16 %v210_v28 }
  0x1a   : > { %1738 = vmatpush3.msk.msra.mxu1 %vm300_vm0, %v239_v2  ;;  %1794 = vmatpush3.msk.msra.mxu0 %vm300_vm0, %v1598_v3  ;;  %v270_v45 = vrot.slane %v228_v35, 1  ;;  %v540_v46 = vrot.slane %v2011_v14, 2  ;;  %v2056_v47 = vunpack.c.l.bf16 %v211_v33  ;;  %v2064_v49 = vsel %vm533_vm3, %v537_v36, %v538_v37  ;;  %v215_v2 = vld [vmem:[%s1996_s29 + $0x40] ss:$8 sps:$4 sm:$0xff]  }
  0x1b   : > { %1728 = vmatprep.mubr.msk.f32.mxu1 %vm283_vm2, %v2032_v34  ;;  %1784 = vmatprep.mubr.msk.f32.mxu0 %vm283_vm2, %v2040_v39  ;;  %v272_v50 = vrot.slane %v2046_v42, 1  ;;  %v273_v51 = vrot.slane %v230_v43, 1  ;;  %v232_v52 = vunpack.c.l.bf16 %v212_v38  ;;  %v543_v55 = vrot.slane %v2013_v16, 2 }
  0x1c   : > { %v2068_v53 = vsel %vm256_vm1, %v269_v40, %v270_v45  ;;  %1807 = vmatprep.subr.msk.mxu0 %vm300_vm0, %v1608_v41  ;;  %v275_v54 = vrot.slane %v2056_v47, 1  ;;  %v544_v56 = vrot.slane %v226_v17, 2  ;;  %1751 = vmatprep.subr.msk.mxu1 %vm300_vm0, %v2051_v44  ;;  %v2080_v57 = vsel %vm533_vm3, %v540_v46, %v541_v26  ;;  %v1638_v45 = vld [vmem:[%s2307_s2] ss:$0 sm:$0xff] }
  0x1d   : > { %1729 = vmatmul.mubr.msk.f32.gmra.mrb[2].mxu1 %vm283_vm2, %v2040_v39  ;;  %1785 = vmatmul.mubr.msk.f32.gmra.mrb[2].mxu0 %vm283_vm2, %v2068_v53  ;;  %v276_v58 = vrot.slane %v232_v52, 1  ;;  %v2082_v59 = vunpack.c.h.bf16 %v211_v33  ;;  %v234_v60 = vunpack.c.l.bf16 %v214_v48  ;;  %v2089_v61 = vsel %vm256_vm1, %v272_v50, %v273_v51 }
  0x1e   : > { %1731 = vmatprep.mubr.msk.f32.mxu1 %vm283_vm2, %v2068_v53  ;;  %1795 = vmatprep.mubr.msk.f32.mxu0 %vm283_vm2, %v2064_v49  ;;  %v546_v62 = vrot.slane %v2026_v32, 2  ;;  %v547_v63 = vrot.slane %v228_v35, 2  ;;  %v549_v0 = vrot.slane %v2046_v42, 2  ;;  %v550_v10 = vrot.slane %v230_v43, 2  ;;  %v1628_v35 = vld [vmem:[%s2306_s1 + $0x20] sm:$0x7] }
  0x1f   : > { %v2095_v3 = vsel %vm256_vm1, %v275_v54, %v276_v58  ;;  %v278_v4 = vrot.slane %v2082_v59, 1  ;;  %v279_v6 = vrot.slane %v234_v60, 1  ;;  %v2102_v12 = vsel %vm533_vm3, %v543_v55, %v544_v56 }
  0x20   : > { %v2112_v15 = vsel %vm533_vm3, %v546_v62, %v547_v63  ;;  %v552_v17 = vrot.slane %v2056_v47, 2  ;;  %v553_v19 = vrot.slane %v232_v52, 2  ;;  %v2121_v20 = vunpack.c.l.bf16 %v215_v2 }
  0x21   : > { %1732 = vmatmul.mubr.msk.f32.gmra.mrb[4].mxu1 %vm283_vm2, %v2089_v61  ;;  %1796 = vmatmul.mubr.msk.f32.vlgmr.msra.gmra.mrb[0].mxu0 %vm283_vm2, %v2080_v57  ;;  %v2119_v18 = vsel %vm256_vm1, %v278_v4, %v279_v6  ;;  %v236_v21 = vunpack.c.l.bf16 %v2099_v11  ;;  %v2127_v22 = vsel %vm533_vm3, %v549_v0, %v550_v10  ;;  %v555_v23 = vrot.slane %v2082_v59, 2 }
  0x22   : > { %1808 = vmatpush3.msk.msra.mxu0 %vm300_vm0, %v1608_v41  ;;  %1734 = vmatprep.mubr.msk.f32.mxu1 %vm283_vm2, %v2095_v3  ;;  %v556_v24 = vrot.slane %v234_v60, 2  ;;  %v2140_v25 = vsel %vm533_vm3, %v552_v17, %v553_v19  ;;  %v937_v26 = vrot.slane %v2121_v20, 2  ;;  %v534_v31 = vrot.slane %v2003_v7, 2 }
  0x23   : > { %1798 = vmatprep.mubr.msk.f32.mxu0 %vm283_vm2, %v2102_v12  ;;  %1821 = vmatprep.subr.msk.mxu0 %vm300_vm0, %v1618_v13  ;;  %v938_v27 = vrot.slane %v236_v21, 2  ;;  %v535_v33 = vrot.slane %v220_v8, 2  ;;  %v218_v8 = vld [vmem:[%s1996_s29 + $0x4c] sm:$0x1]  ;;  %v814_v37 = vrot.slane %v2121_v20, 1  ;;  %v815_v38 = vrot.slane %v236_v21, 1 }
  0x24   : > { %v2144_v28 = vsel %vm533_vm3, %v555_v23, %v556_v24  ;;  %v238_v36 = vunpack.c.l.bf16 %v218_v8  ;;  %v1452_v48 = vstv %s1443_s14 }
  0x25   : > { %1735 = vmatmul.mubr.msk.f32.gmra.mrb[6].mxu1 %vm283_vm2, %v2119_v18  ;;  %1799 = vmatmul.mubr.msk.f32.gmra.mrb[2].mxu0 %vm283_vm2, %v2112_v15  ;;  %v2158_v30 = vsel %vm533_vm3, %v937_v26, %v938_v27  ;;  %v536_v5 = vsel %vm533_vm3, %v534_v31, %v535_v33  ;;  %v816_v40 = vsel %vm256_vm1, %v814_v37, %v815_v38 }
  0x26   : > { %1739 = vmatprep.mubr.msk.f32.mxu1 %vm283_vm2, %v2003_v7  ;;  %1801 = vmatprep.mubr.msk.f32.mxu0 %vm283_vm2, %v2127_v22  ;;  %v237_v7 = vunpack.c.h.bf16 %v215_v2 }
  0x29   : > { %1740 = vmatmul.mubr.msk.f32.vlgmr.msra.gmra.mrb[0].mxu1 %vm283_vm2, %v2006_v9  ;;  %1802 = vmatmul.mubr.msk.f32.gmra.mrb[4].mxu0 %vm283_vm2, %v2140_v25 }
  0x2a   : > { %1752 = vmatpush3.msk.msra.mxu1 %vm300_vm0, %v2051_v44  ;;  %1742 = vmatprep.mubr.msk.f32.mxu1 %vm283_vm2, %v2011_v14 }
  0x2b   : > { %1804 = vmatprep.mubr.msk.f32.mxu0 %vm283_vm2, %v2144_v28  ;;  %1765 = vmatprep.subr.msk.mxu1 %vm300_vm0, %v1578_v29 }
  0x2d   : > { %1743 = vmatmul.mubr.msk.f32.gmra.mrb[2].mxu1 %vm283_vm2, %v2013_v16  ;;  %1805 = vmatmul.mubr.msk.f32.gmra.mrb[6].mxu0 %vm283_vm2, %v2158_v30 }
  0x2e   : > { %1745 = vmatprep.mubr.msk.f32.mxu1 %vm283_vm2, %v2026_v32  ;;  %1809 = vmatprep.mubr.msk.f32.mxu0 %vm283_vm2, %v2011_v14 }
  0x31   : > { %1746 = vmatmul.mubr.msk.f32.gmra.mrb[4].mxu1 %vm283_vm2, %v2046_v42  ;;  %1810 = vmatmul.mubr.msk.f32.vlgmr.msra.gmra.mrb[0].mxu0 %vm283_vm2, %v2013_v16 }
  0x32   : > { %1822 = vmatpush3.msk.msra.mxu0 %vm300_vm0, %v1618_v13  ;;  %1748 = vmatprep.mubr.msk.f32.mxu1 %vm283_vm2, %v2056_v47 }
  0x33   : > { %1812 = vmatprep.mubr.msk.f32.mxu0 %vm283_vm2, %v2026_v32  ;;  %1835 = vmatprep.subr.msk.mxu0 %vm300_vm0, %v1628_v35 }
  0x35   : > { %1749 = vmatmul.mubr.msk.f32.gmra.mrb[6].mxu1 %vm283_vm2, %v2082_v59  ;;  %1813 = vmatmul.mubr.msk.f32.gmra.mrb[2].mxu0 %vm283_vm2, %v2046_v42 }
  0x36   : > { %1753 = vmatprep.mubr.msk.f32.mxu1 %vm283_vm2, %v536_v5  ;;  %1815 = vmatprep.mubr.msk.f32.mxu0 %vm283_vm2, %v2056_v47 }
  0x39   : > { %1754 = vmatmul.mubr.msk.f32.vlgmr.msra.gmra.mrb[0].mxu1 %vm283_vm2, %v2064_v49  ;;  %1816 = vmatmul.mubr.msk.f32.gmra.mrb[4].mxu0 %vm283_vm2, %v2082_v59 }
  0x3a   : > { %1766 = vmatpush3.msk.msra.mxu1 %vm300_vm0, %v1578_v29  ;;  %1756 = vmatprep.mubr.msk.f32.mxu1 %vm283_vm2, %v2080_v57 }
  0x3b   : > { %1818 = vmatprep.mubr.msk.f32.mxu0 %vm283_vm2, %v2121_v20  ;;  %1849 = vmatprep.subr.msk.mxu1 %vm300_vm0, %v1974_v1 }
  0x3d   : > { %1757 = vmatmul.mubr.msk.f32.gmra.mrb[2].mxu1 %vm283_vm2, %v2102_v12  ;;  %1819 = vmatmul.mubr.msk.f32.gmra.mrb[6].mxu0 %vm283_vm2, %v237_v7 }
  0x3e   : > { %1759 = vmatprep.mubr.msk.f32.mxu1 %vm283_vm2, %v2112_v15  ;;  %1823 = vmatprep.mubr.msk.f32.mxu0 %vm283_vm2, %v2032_v34  ;;  %v1182_v34 = vrot.slane %v237_v7, 1 }
  0x41   : > { %1760 = vmatmul.mubr.msk.f32.gmra.mrb[4].mxu1 %vm283_vm2, %v2127_v22  ;;  %1824 = vmatmul.mubr.msk.f32.vlgmr.msra.gmra.mrb[0].mxu0 %vm283_vm2, %v2040_v39  ;;  %v1183_v39 = vrot.slane %v238_v36, 1 }
  0x42   : > { %1836 = vmatpush3.msk.msra.mxu0 %vm300_vm0, %v1628_v35  ;;  %1762 = vmatprep.mubr.msk.f32.mxu1 %vm283_vm2, %v2140_v25 }
  0x43   : > { %1826 = vmatprep.mubr.msk.f32.mxu0 %vm283_vm2, %v2068_v53 }
  0x45   : > { %1763 = vmatmul.mubr.msk.f32.gmra.mrb[6].mxu1 %vm283_vm2, %v2144_v28  ;;  %1827 = vmatmul.mubr.msk.f32.gmra.mrb[2].mxu0 %vm283_vm2, %v2089_v61 }
  0x46   : > { %1767 = vmatprep.mubr.msk.f32.mxu1 %vm283_vm2, %v2006_v9  ;;  %1829 = vmatprep.mubr.msk.f32.mxu0 %vm283_vm2, %v2095_v3  ;;  %v1184_v9 = vsel %vm256_vm1, %v1182_v34, %v1183_v39 }
  0x49   : > { %1768 = vmatmul.mubr.msk.f32.vlgmr.msra.gmra.mrb[0].mxu1 %vm283_vm2, %v2011_v14  ;;  %1830 = vmatmul.mubr.msk.f32.gmra.mrb[4].mxu0 %vm283_vm2, %v2119_v18  ;;  %v1306_v14 = vrot.slane %v238_v36, 2 }
  0x4a   : > { %1850 = vmatpush3.msk.msra.mxu1 %vm300_vm0, %v1974_v1  ;;  %1770 = vmatprep.mubr.msk.f32.mxu1 %vm283_vm2, %v2013_v16  ;;  %v1305_v1 = vrot.slane %v237_v7, 2 }
  0x4b   : > { %1832 = vmatprep.mubr.msk.f32.mxu0 %vm283_vm2, %v816_v40 }
  0x4c   : > { %v1307_v16 = vsel %vm533_vm3, %v1305_v1, %v1306_v14 }
  0x4d   : > { %1771 = vmatmul.mubr.msk.f32.gmra.mrb[2].mxu1 %vm283_vm2, %v2026_v32  ;;  %1833 = vmatmul.mubr.msk.f32.gmra.mrb[6].mxu0 %vm283_vm2, %v1184_v9 }
  0x4e   : > { %1773 = vmatprep.mubr.msk.f32.mxu1 %vm283_vm2, %v2046_v42  ;;  %1837 = vmatprep.mubr.msk.f32.mxu0 %vm283_vm2, %v2080_v57 }
  0x51   : > { %1774 = vmatmul.mubr.msk.f32.gmra.mrb[4].mxu1 %vm283_vm2, %v2056_v47  ;;  %1838 = vmatmul.mubr.msk.f32.vlgmr.msra.gmra.mrb[0].mxu0 %vm283_vm2, %v2102_v12 }
  0x52   : > { %1776 = vmatprep.mubr.msk.f32.mxu1 %vm283_vm2, %v2082_v59  ;;  %1840 = vmatprep.mubr.msk.f32.mxu0 %vm283_vm2, %v2112_v15 }
  0x55   : > { %1777 = vmatmul.mubr.msk.f32.gmra.mrb[6].mxu1 %vm283_vm2, %v2121_v20  ;;  %1841 = vmatmul.mubr.msk.f32.gmra.mrb[2].mxu0 %vm283_vm2, %v2127_v22 }
  0x56   : > { %1787 = vmatprep.mubr.msk.f32.mxu1 %vm283_vm2, %v2089_v61  ;;  %1843 = vmatprep.mubr.msk.f32.mxu0 %vm283_vm2, %v2140_v25 }
  0x59   : > { %1788 = vmatmul.mubr.msk.f32.vlgmr.msra.gmra.mrb[4].mxu1 %vm283_vm2, %v2095_v3  ;;  %1844 = vmatmul.mubr.msk.f32.gmra.mrb[4].mxu0 %vm283_vm2, %v2144_v28 }
  0x5a   : > { %1790 = vmatprep.mubr.msk.f32.mxu1 %vm283_vm2, %v2119_v18  ;;  %1846 = vmatprep.mubr.msk.f32.mxu0 %vm283_vm2, %v2158_v30 }
  0x5d   : > { %1791 = vmatmul.mubr.msk.f32.gmra.mrb[6].mxu1 %vm283_vm2, %v816_v40  ;;  %1847 = vmatmul.mubr.msk.f32.gmra.mrb[6].mxu0 %vm283_vm2, %v1307_v16 }
 0x11c   : > { %v1769_v32 = vpop.f32.mrb[0].mxu1 }
 0x11d   : > { %v766_v41 = vpop.f32.mrb[1].mxu1 }
 0x120   : > { %v1772_v42 = vpop.f32.mrb[2].mxu1 }
 0x121   : > { %v776_v43 = vpop.f32.mrb[3].mxu1 }
 0x124   : > { %v1839_v44 = vpop.f32.mrb[0].mxu0 }
 0x125   : > { %v1851_v46 = vadd.f32 %v1839_v44, %v1769_v32  ;;  %v1381_v47 = vpop.f32.mrb[1].mxu0 }
 0x126   : > { %v1852_v49 = vadd.f32 %v1381_v47, %v766_v41 }
 0x127   : > { %v1436_v50 = vadd.f32 %v1851_v46, %v1638_v45 }
 0x128   : > { %v1435_v51 = vadd.f32 %v1852_v49, %v1638_v45  ;;  %v1842_v52 = vpop.f32.mrb[2].mxu0 }
 0x129   : > { %vm1445_vm4 = vcmp.ge.f32.partialorder %v1436_v50, 0.0  ;;  %v1454_v53 = vmul.f32 %v1452_v48, %v1436_v50  ;;  %v1853_v54 = vadd.f32 %v1842_v52, %v1772_v42  ;;  %v1391_v55 = vpop.f32.mrb[3].mxu0 }
 0x12a   : > { %vm1444_vm5 = vcmp.ge.f32.partialorder %v1435_v51, 0.0  ;;  %v1453_v56 = vmul.f32 %v1452_v48, %v1435_v51  ;;  %v1854_v57 = vadd.f32 %v1391_v55, %v776_v43 }
 0x12b   : > { %v1462_v58 = vsel %vm1445_vm4, %v1436_v50, %v1454_v53  ;;  %v1438_v59 = vadd.f32 %v1853_v54, %v1638_v45 }
 0x12c   : > { %v1470_v60 = vpack.c.bf16 %v1462_v58, %v1462_v58  ;;  %v1461_v61 = vsel %vm1444_vm5, %v1435_v51, %v1453_v56  ;;  %v1437_v62 = vadd.f32 %v1854_v57, %v1638_v45  ;;  %v1789_v63 = vpop.f32.mrb[4].mxu1  ;;  %v1845_v0 = vpop.f32.mrb[4].mxu0 }
 0x12d   : > { %v1469_v2 = vpack.c.bf16 %v1461_v61, %v1461_v61  ;;  %vm1447_vm7 = vcmp.ge.f32.partialorder %v1438_v59, 0.0  ;;  %v1456_v3 = vmul.f32 %v1452_v48, %v1438_v59  ;;  %v1855_v4 = vadd.f32 %v1845_v0, %v1789_v63  ;;  %v910_v6 = vpop.f32.mrb[5].mxu1  ;;  %v1401_v10 = vpop.f32.mrb[5].mxu0 }
 0x12e   : > { %1479 = vst.msk [vmem:[%s2284_s21 + $0x4] sm:$0xf] %vm1477_vm6, %v1470_v60  ;;  %vm1446_vm8 = vcmp.ge.f32.partialorder %v1437_v62, 0.0  ;;  %v1455_v11 = vmul.f32 %v1452_v48, %v1437_v62  ;;  %v1856_v12 = vadd.f32 %v1401_v10, %v910_v6 }
 0x12f   : > { %1478 = vst.msk [vmem:[%s2284_s21] sm:$0xf] %vm1477_vm6, %v1469_v2  ;;  %v1464_v13 = vsel %vm1447_vm7, %v1438_v59, %v1456_v3  ;;  %v1440_v15 = vadd.f32 %v1855_v4, %v1638_v45 }
 0x130   : > { %v1472_v17 = vpack.c.bf16 %v1464_v13, %v1464_v13  ;;  %v1463_v18 = vsel %vm1446_vm8, %v1437_v62, %v1455_v11  ;;  %v1439_v19 = vadd.f32 %v1856_v12, %v1638_v45  ;;  %v1792_v20 = vpop.f32.mrb[6].mxu1  ;;  %v1848_v21 = vpop.f32.mrb[6].mxu0 }
 0x131   : > { %v1471_v22 = vpack.c.bf16 %v1463_v18, %v1463_v18  ;;  %vm1449_vm9 = vcmp.ge.f32.partialorder %v1440_v15, 0.0  ;;  %v1458_v23 = vmul.f32 %v1452_v48, %v1440_v15  ;;  %v1857_v24 = vadd.f32 %v1848_v21, %v1792_v20  ;;  %v920_v25 = vpop.f32.mrb[7].mxu1  ;;  %v1411_v26 = vpop.f32.mrb[7].mxu0 }
 0x132   : > { %1481 = vst.msk [vmem:[%s2284_s21 + $0xc] sm:$0xf] %vm1477_vm6, %v1472_v17  ;;  %vm1448_vm10 = vcmp.ge.f32.partialorder %v1439_v19, 0.0  ;;  %v1457_v27 = vmul.f32 %v1452_v48, %v1439_v19  ;;  %v1858_v28 = vadd.f32 %v1411_v26, %v920_v25 }
 0x133   : > { %1480 = vst.msk [vmem:[%s2284_s21 + $0x8] sm:$0xf] %vm1477_vm6, %v1471_v22  ;;  %v1466_v29 = vsel %vm1449_vm9, %v1440_v15, %v1458_v23  ;;  %v1442_v30 = vadd.f32 %v1857_v24, %v1638_v45 }
 0x134   : > { %v1474_v31 = vpack.c.bf16 %v1466_v29, %v1466_v29  ;;  %v1465_v33 = vsel %vm1448_vm10, %v1439_v19, %v1457_v27  ;;  %v1441_v35 = vadd.f32 %v1858_v28, %v1638_v45 }
 0x135   : > { %v1473_v5 = vpack.c.bf16 %v1465_v33, %v1465_v33  ;;  %vm1451_vm11 = vcmp.ge.f32.partialorder %v1442_v30, 0.0  ;;  %v1460_v7 = vmul.f32 %v1452_v48, %v1442_v30 }
 0x136   : > { %1483 = vst.msk [vmem:[%s2284_s21 + $0x14] sm:$0xf] %vm1477_vm6, %v1474_v31  ;;  %vm1450_vm12 = vcmp.ge.f32.partialorder %v1441_v35, 0.0  ;;  %v1459_v8 = vmul.f32 %v1452_v48, %v1441_v35 }
 0x137   : > { %1482 = vst.msk [vmem:[%s2284_s21 + $0x10] sm:$0xf] %vm1477_vm6, %v1473_v5  ;;  %v1468_v36 = vsel %vm1451_vm11, %v1442_v30, %v1460_v7 }
 0x138   : > { %v1476_v37 = vpack.c.bf16 %v1468_v36, %v1468_v36  ;;  %v1467_v38 = vsel %vm1450_vm12, %v1441_v35, %v1459_v8 }
 0x139   : > { %v1475_v34 = vpack.c.bf16 %v1467_v38, %v1467_v38 }
 0x13a   : > { %1485 = vst.msk [vmem:[%s2284_s21 + $0x1c] sm:$0xf] %vm1477_vm6, %v1476_v37 }
 0x13b   : > { %1484 = vst.msk [vmem:[%s2284_s21 + $0x18] sm:$0xf] %vm1477_vm6, %v1475_v34 }
 0x13c PF: > { %s15_s17 = sadd.s32 1, %s1930_s17  }
 0x13d   : > { %p12_p4 = scmp.ge.s32.totalorder %s15_s17, 4  }
 0x13f   :  { %14 = sbr.rel (!%p12_p4) target bundleno = 2 (0x2), region = 74 }

// kernel: ebrn_forward.29
= control target key start
LH: loop header
LB: loop body
LE: loop exit
PB: predicated region body
PF: predicated region fallthrough
CT: control target
= control target key end

     0   :  { %vm108_vm0 = vcmask 1043456   ;;  %vm83_vm1 = vcmask 64512   ;;  %vm323_vm2 = vcmask 257024   ;;  %s598_s1 = inlined_call_operand.vmem [shape: bf16[8,32], index: 1, kind: input, shape index: {}]   ;;  %s599_s0 = inlined_call_operand.vmem [shape: bf16[128,8], index: 0, kind: input, shape index: {}]   ;;  %s600_s2 = inlined_call_operand.vmem [shape: f32[1,32], index: 2, kind: input, shape index: {}]   ;;  %s601_s3 = inlined_call_operand.<no memory space> [shape: f32[1], index: 3, kind: input, shape index: {}]   ;;  %s602_s4 = inlined_call_operand.vmem [shape: bf16[128,32], index: 4, kind: output, shape index: {}]  }
   0x1   :  { %v35_v0 = vld [vmem:[%s598_s1] sm:$0xf]  ;;  %v426_v4 = vld [vmem:[%s599_s0 + $0x8] sm:$0xff]   ;;  %v428_v6 = vld [vmem:[%s599_s0 + $0x10] sm:$0xff]   ;;  %v500_v12 = vstv %s601_s3 }
   0x2   :  { %422 = vmatprep.subr.msk.bf16.mxu0 %vm108_vm0, %v35_v0  ;;  %423 = vmatprep.subr.msk.bf16.mxu1 %vm108_vm0, %v35_v0  ;;  %v110_v1 = vsel %vm108_vm0, %v35_v0, 0  ;;  %v424_v2 = vld [vmem:[%s599_s0] sm:$0xff]   ;;  %v427_v5 = vld [vmem:[%s599_s0 + $0x28] sm:$0xff]   ;;  %v429_v7 = vld [vmem:[%s599_s0 + $0x30] sm:$0xff]  }
   0x3   :  { %403 = vmatpush3.bf16.msra.mxu0 %v110_v1  ;;  %421 = vmatpush3.bf16.msra.mxu1 %v110_v1  ;;  %v425_v3 = vld [vmem:[%s599_s0 + $0x20] sm:$0xff]   ;;  %v430_v8 = vld [vmem:[%s599_s0 + $0x18] sm:$0xff]  }
   0x4   :  { %404 = vmatprep.mubr.msk.bf16.mxu0 %vm83_vm1, %v424_v2  ;;  %412 = vmatprep.mubr.msk.bf16.mxu1 %vm83_vm1, %v425_v3  ;;  %v431_v9 = vld [vmem:[%s599_s0 + $0x38] sm:$0xff]   ;;  %v495_v10 = vld [vmem:[%s600_s2] ss:$0 sm:$0xff] }
   0x6   :  { %405 = vmatmul.mubr.msk.bf16.vlgmr.msra.gmra.mrb[0].mxu0 %vm83_vm1, %v426_v4  ;;  %413 = vmatmul.mubr.msk.bf16.vlgmr.msra.gmra.mrb[0].mxu1 %vm83_vm1, %v427_v5 }
   0x7   :  { %408 = vmatprep.mubr.msk.bf16.mxu0 %vm83_vm1, %v428_v6  ;;  %416 = vmatprep.mubr.msk.bf16.mxu1 %vm83_vm1, %v429_v7 }
   0xe   :  { %409 = vmatmul.mubr.msk.bf16.gmra.mrb[4].mxu0 %vm83_vm1, %v430_v8  ;;  %417 = vmatmul.mubr.msk.bf16.gmra.mrb[4].mxu1 %vm83_vm1, %v431_v9 }
  0xd9   :  { %v406_v11 = vpop.f32.mrb[0].mxu0  ;;  %v414_v14 = vpop.f32.mrb[0].mxu1 }
  0xda   :  { %v155_v13 = vadd.f32 %v406_v11, %v495_v10  ;;  %v146_v15 = vpop.f32.mrb[1].mxu0  ;;  %v187_v16 = vadd.f32 %v414_v14, %v495_v10  ;;  %v178_v18 = vpop.f32.mrb[1].mxu1 }
  0xdb   :  { %v147_v17 = vadd.f32 %v495_v10, %v146_v15  ;;  %v407_v19 = vpop.f32.mrb[2].mxu0  ;;  %v179_v21 = vadd.f32 %v495_v10, %v178_v18  ;;  %v415_v23 = vpop.f32.mrb[2].mxu1 }
  0xdc   :  { %vm212_vm3 = vcmp.ge.f32.partialorder %v155_v13, 0.0  ;;  %v229_v20 = vmul.f32 %v500_v12, %v155_v13  ;;  %v158_v22 = vadd.f32 %v407_v19, %v495_v10  ;;  %v149_v24 = vpop.f32.mrb[3].mxu0  ;;  %vm220_vm4 = vcmp.ge.f32.partialorder %v187_v16, 0.0  ;;  %v181_v27 = vpop.f32.mrb[3].mxu1 }
  0xdd   :  { %v237_v25 = vmul.f32 %v500_v12, %v187_v16  ;;  %vm210_vm5 = vcmp.ge.f32.partialorder %v147_v17, 0.0  ;;  %v227_v26 = vmul.f32 %v500_v12, %v147_v17  ;;  %vm218_vm6 = vcmp.ge.f32.partialorder %v179_v21, 0.0 }
  0xde   :  { %v245_v28 = vsel %vm212_vm3, %v155_v13, %v229_v20  ;;  %v235_v29 = vmul.f32 %v500_v12, %v179_v21  ;;  %vm213_vm7 = vcmp.ge.f32.partialorder %v158_v22, 0.0  ;;  %v230_v33 = vmul.f32 %v500_v12, %v158_v22 }
  0xdf   :  { %v379_v30 = vpack.c.bf16 %v245_v28, %v245_v28  ;;  %v253_v31 = vsel %vm220_vm4, %v187_v16, %v237_v25  ;;  %v243_v32 = vsel %vm210_vm5, %v147_v17, %v227_v26  ;;  %v190_v37 = vadd.f32 %v415_v23, %v495_v10 }
  0xe0   :  { %v387_v34 = vpack.c.bf16 %v253_v31, %v253_v31  ;;  %v377_v35 = vpack.c.bf16 %v243_v32, %v243_v32  ;;  %v251_v36 = vsel %vm218_vm6, %v179_v21, %v235_v29  ;;  %v246_v39 = vsel %vm213_vm7, %v158_v22, %v230_v33 }
  0xe1   :  { %326 = vst.msk [vmem:[%s602_s4 + $0x8] sm:$0xf] %vm323_vm2, %v379_v30  ;;  %v385_v38 = vpack.c.bf16 %v251_v36, %v251_v36  ;;  %v150_v40 = vadd.f32 %v495_v10, %v149_v24  ;;  %v182_v41 = vadd.f32 %v495_v10, %v181_v27  ;;  %v410_v42 = vpop.f32.mrb[4].mxu0  ;;  %v380_v43 = vpack.c.bf16 %v246_v39, %v246_v39  ;;  %v418_v46 = vpop.f32.mrb[4].mxu1 }
  0xe2   :  { %334 = vst.msk [vmem:[%s602_s4 + $0x28] sm:$0xf] %vm323_vm2, %v387_v34  ;;  %324 = vst.msk [vmem:[%s602_s4] sm:$0xf] %vm323_vm2, %v377_v35  ;;  %vm221_vm8 = vcmp.ge.f32.partialorder %v190_v37, 0.0  ;;  %v238_v44 = vmul.f32 %v500_v12, %v190_v37  ;;  %v171_v45 = vadd.f32 %v410_v42, %v495_v10  ;;  %v162_v47 = vpop.f32.mrb[5].mxu0  ;;  %v203_v54 = vadd.f32 %v418_v46, %v495_v10 }
  0xe3   :  { %332 = vst.msk [vmem:[%s602_s4 + $0x20] sm:$0xf] %vm323_vm2, %v385_v38  ;;  %vm211_vm9 = vcmp.ge.f32.partialorder %v150_v40, 0.0  ;;  %v228_v48 = vmul.f32 %v500_v12, %v150_v40  ;;  %vm219_vm10 = vcmp.ge.f32.partialorder %v182_v41, 0.0  ;;  %v236_v49 = vmul.f32 %v500_v12, %v182_v41  ;;  %v194_v50 = vpop.f32.mrb[5].mxu1  ;;  %v411_v51 = vpop.f32.mrb[6].mxu0 }
  0xe4   :  { %327 = vst.msk [vmem:[%s602_s4 + $0xc] sm:$0xf] %vm323_vm2, %v380_v43  ;;  %v254_v52 = vsel %vm221_vm8, %v190_v37, %v238_v44  ;;  %vm216_vm11 = vcmp.ge.f32.partialorder %v171_v45, 0.0  ;;  %v233_v53 = vmul.f32 %v500_v12, %v171_v45  ;;  %v419_v55 = vpop.f32.mrb[6].mxu1  ;;  %v165_v56 = vpop.f32.mrb[7].mxu0  ;;  %v163_v60 = vadd.f32 %v495_v10, %v162_v47 }
  0xe5   :  { %v388_v57 = vpack.c.bf16 %v254_v52, %v254_v52  ;;  %v244_v58 = vsel %vm211_vm9, %v150_v40, %v228_v48  ;;  %v252_v59 = vsel %vm219_vm10, %v182_v41, %v236_v49  ;;  %v197_v61 = vpop.f32.mrb[7].mxu1  ;;  %vm224_vm12 = vcmp.ge.f32.partialorder %v203_v54, 0.0 }
  0xe6   :  { %v378_v62 = vpack.c.bf16 %v244_v58, %v244_v58  ;;  %v386_v63 = vpack.c.bf16 %v252_v59, %v252_v59  ;;  %v249_v0 = vsel %vm216_vm11, %v171_v45, %v233_v53  ;;  %v241_v2 = vmul.f32 %v500_v12, %v203_v54 }
  0xe7   :  { %335 = vst.msk [vmem:[%s602_s4 + $0x2c] sm:$0xf] %vm323_vm2, %v388_v57  ;;  %v383_v1 = vpack.c.bf16 %v249_v0, %v249_v0  ;;  %vm214_vm13 = vcmp.ge.f32.partialorder %v163_v60, 0.0  ;;  %v231_v3 = vmul.f32 %v500_v12, %v163_v60  ;;  %v195_v4 = vadd.f32 %v495_v10, %v194_v50 }
  0xe8   :  { %325 = vst.msk [vmem:[%s602_s4 + $0x4] sm:$0xf] %vm323_vm2, %v378_v62  ;;  %333 = vst.msk [vmem:[%s602_s4 + $0x24] sm:$0xf] %vm323_vm2, %v386_v63  ;;  %v174_v5 = vadd.f32 %v411_v51, %v495_v10  ;;  %v206_v6 = vadd.f32 %v419_v55, %v495_v10  ;;  %v166_v7 = vadd.f32 %v495_v10, %v165_v56 }
  0xe9   :  { %330 = vst.msk [vmem:[%s602_s4 + $0x18] sm:$0xf] %vm323_vm2, %v383_v1  ;;  %v257_v8 = vsel %vm224_vm12, %v203_v54, %v241_v2  ;;  %v247_v9 = vsel %vm214_vm13, %v163_v60, %v231_v3  ;;  %v198_v11 = vadd.f32 %v495_v10, %v197_v61  ;;  %vm222_vm14 = vcmp.ge.f32.partialorder %v195_v4, 0.0 }
  0xea   :  { %v391_v13 = vpack.c.bf16 %v257_v8, %v257_v8  ;;  %v381_v14 = vpack.c.bf16 %v247_v9, %v247_v9  ;;  %v239_v15 = vmul.f32 %v500_v12, %v195_v4  ;;  %vm217_vm15 = vcmp.ge.f32.partialorder %v174_v5, 0.0 }
  0xeb   :  { %v234_v16 = vmul.f32 %v500_v12, %v174_v5  ;;  %vm225_vm0 = vcmp.ge.f32.partialorder %v206_v6, 0.0  ;;  %v242_v17 = vmul.f32 %v500_v12, %v206_v6  ;;  %vm215_vm1 = vcmp.ge.f32.partialorder %v166_v7, 0.0 }
  0xec   :  { %338 = vst.msk [vmem:[%s602_s4 + $0x38] sm:$0xf] %vm323_vm2, %v391_v13  ;;  %328 = vst.msk [vmem:[%s602_s4 + $0x10] sm:$0xf] %vm323_vm2, %v381_v14  ;;  %v255_v10 = vsel %vm222_vm14, %v195_v4, %v239_v15  ;;  %v232_v18 = vmul.f32 %v500_v12, %v166_v7  ;;  %vm223_vm3 = vcmp.ge.f32.partialorder %v198_v11, 0.0  ;;  %v240_v22 = vmul.f32 %v500_v12, %v198_v11 }
  0xed   :  { %v389_v19 = vpack.c.bf16 %v255_v10, %v255_v10  ;;  %v250_v20 = vsel %vm217_vm15, %v174_v5, %v234_v16  ;;  %v258_v21 = vsel %vm225_vm0, %v206_v6, %v242_v17 }
  0xee   :  { %v384_v23 = vpack.c.bf16 %v250_v20, %v250_v20  ;;  %v392_v24 = vpack.c.bf16 %v258_v21, %v258_v21  ;;  %v248_v25 = vsel %vm215_vm1, %v166_v7, %v232_v18  ;;  %v256_v27 = vsel %vm223_vm3, %v198_v11, %v240_v22 }
  0xef   :  { %336 = vst.msk [vmem:[%s602_s4 + $0x30] sm:$0xf] %vm323_vm2, %v389_v19  ;;  %v382_v26 = vpack.c.bf16 %v248_v25, %v248_v25  ;;  %v390_v12 = vpack.c.bf16 %v256_v27, %v256_v27 }
  0xf0   :  { %331 = vst.msk [vmem:[%s602_s4 + $0x1c] sm:$0xf] %vm323_vm2, %v384_v23  ;;  %339 = vst.msk [vmem:[%s602_s4 + $0x3c] sm:$0xf] %vm323_vm2, %v392_v24 }
  0xf1   :  { %329 = vst.msk [vmem:[%s602_s4 + $0x14] sm:$0xf] %vm323_vm2, %v382_v26  ;;  %337 = vst.msk [vmem:[%s602_s4 + $0x34] sm:$0xf] %vm323_vm2, %v390_v12 }

// kernel: ebrn_forward.28
= control target key start
LH: loop header
LB: loop body
LE: loop exit
PB: predicated region body
PF: predicated region fallthrough
CT: control target
= control target key end

     0   :  { %s1923_s17 = smov 0   ;;  %s2248_s0 = inlined_call_operand.vmem [shape: bf16[2,10,10,8], index: 0, kind: input, shape index: {}]   ;;  %s2249_s1 = inlined_call_operand.vmem [shape: f32[9,8,8], index: 1, kind: input, shape index: {}]   ;;  %s2250_s2 = inlined_call_operand.vmem [shape: f32[1,8], index: 2, kind: input, shape index: {}]   ;;  %s2251_s3 = inlined_call_operand.<no memory space> [shape: f32[1], index: 3, kind: input, shape index: {}]   ;;  %s2252_s4 = inlined_call_operand.vmem [shape: bf16[2,8,8,8], index: 4, kind: output, shape index: {}]  }
   0x1   :  { %9 = sst [smem:[#allocation2]] %s2251_s3 }
   0x2 LB: > { %s1513_s18 = sadd.s32 4294967295, %s1893_s17   ;;  %p1517_p0 = scmp.ge.s32.totalorder %s1893_s17, 1  ;;  %s1893_s17 = sphi %s1923_s17, %s15_s17  }
   0x3   : > { %p163_p1 = scmp.lt.s32.totalorder %s1893_s17, 3 }
   0x5   : > { %p164_p2 = pnand %p1517_p0, %p163_p1 }
   0x6   : > { %v1521_v0 = vld [vmem:[%s2249_s1 + $0x8] sm:$0xff] (!%p164_p2)  ;;  %v1937_v1 = vld [vmem:[%s2249_s1 + $0x20] sm:$0xff] (!%p164_p2)  ;;  %p189_p3 = scmp.lt.s32.totalorder (!%p164_p2), %s1513_s18, 1  ;;  %vm256_vm0 = vcmask (!%p164_p2), 1046528   ;;  %vm283_vm1 = vcmask (!%p164_p2), 64512   ;;  %vm526_vm2 = vcmask (!%p164_p2), 1045504  }
   0x7   : > { %167 = sbr.rel (%p164_p2) target bundleno = 316 (0x13c), region = 36  ;;  %v239_v2 = vld [vmem:[%s2249_s1] sm:$0xff] (!%p164_p2)  ;;  %1686 = vmatprep.subr.mxu1 (!%p164_p2), %v1521_v0  ;;  %1742 = vmatprep.subr.mxu0 (!%p164_p2), %v1937_v1  ;;  %v1565_v3 = vld [vmem:[%s2249_s1 + $0x28] sm:$0xff] (!%p164_p2)  ;;  %v1574_v41 = vld [vmem:[%s2249_s1 + $0x30] sm:$0xff] (!%p164_p2)  ;;  %s1415_s14 = sld [smem:[#allocation2]] (!%p164_p2)  ;;  %vm1449_vm5 = vcmask (!%p164_p2), 60416  }
   0x8   : > { %1687 = vmatpush3.msra.mxu1 (!%p164_p2), %v1521_v0  ;;  %1743 = vmatpush3.msra.mxu0 (!%p164_p2), %v1937_v1  ;;  %v2008_v44 = vld [vmem:[%s2249_s1 + $0x10] sm:$0xff] (!%p164_p2) }
   0x9   : > { %1700 = vmatprep.subr.mxu1 (!%p164_p2), %v239_v2  ;;  %1756 = vmatprep.subr.mxu0 (!%p164_p2), %v1565_v3 }
   0xe   : > { %s2254_s18 = smov (!%p189_p3, %s1513_s18), 1 }
   0xf   : > { %s1878_s26 = smul.u32 80, %s2254_s18  ;;  %s1604_s19 = sshll.u32 %s2254_s18, 5 }
  0x10   : > { %s2227_s21 = scalar_lea.vmem %s2252_s4, %s1604_s19 }
  0x11   : > { %s1953_s29 = scalar_lea.vmem %s2248_s0, %s1878_s26 }
  0x12   : > { %v199_v4 = vld [vmem:[%s1953_s29] ss:$8 sps:$4 sm:$0xff]   ;;  %v1957_v5 = vld [vmem:[%s1953_s29 + $0x4] sm:$0x1]  ;;  %v202_v6 = vld [vmem:[%s1953_s29 + $0xc] sm:$0x1] }
  0x13   : > { %v1960_v7 = vunpack.c.l.bf16 %v199_v4  ;;  %v220_v8 = vunpack.c.l.bf16 %v1957_v5  ;;  %v1963_v9 = vunpack.c.h.bf16 %v199_v4  ;;  %v222_v10 = vunpack.c.l.bf16 %v202_v6  ;;  %v203_v11 = vld [vmem:[%s1953_s29 + $0x10] ss:$8 sps:$4 sm:$0xff]   ;;  %v204_v12 = vld [vmem:[%s1953_s29 + $0x14] sm:$0x1]  ;;  %v206_v13 = vld [vmem:[%s1953_s29 + $0x1c] sm:$0x1] }
  0x14   : > { %v1968_v14 = vunpack.c.l.bf16 %v203_v11  ;;  %v224_v15 = vunpack.c.l.bf16 %v204_v12  ;;  %v1970_v16 = vunpack.c.h.bf16 %v203_v11  ;;  %v226_v17 = vunpack.c.l.bf16 %v206_v13  ;;  %v207_v18 = vld [vmem:[%s1953_s29 + $0x20] ss:$8 sps:$4 sm:$0xff]   ;;  %v208_v23 = vld [vmem:[%s1953_s29 + $0x24] sm:$0x1]  ;;  %v210_v28 = vld [vmem:[%s1953_s29 + $0x2c] sm:$0x1] }
  0x15   : > { %v257_v19 = vrot.slane %v1960_v7, 1  ;;  %v258_v20 = vrot.slane %v220_v8, 1  ;;  %v260_v21 = vrot.slane %v1963_v9, 1  ;;  %v261_v22 = vrot.slane %v222_v10, 1  ;;  %v211_v33 = vld [vmem:[%s1953_s29 + $0x30] ss:$8 sps:$4 sm:$0xff]  }
  0x16   : > { %v263_v24 = vrot.slane %v1968_v14, 1  ;;  %v264_v25 = vrot.slane %v224_v15, 1  ;;  %v534_v26 = vrot.slane %v224_v15, 2  ;;  %v266_v27 = vrot.slane %v1970_v16, 1  ;;  %v212_v38 = vld [vmem:[%s1953_s29 + $0x34] sm:$0x1] }
  0x17   : > { %v259_v29 = vsel %vm256_vm0, %v257_v19, %v258_v20  ;;  %v262_v30 = vsel %vm256_vm0, %v260_v21, %v261_v22  ;;  %v267_v31 = vrot.slane %v226_v17, 1  ;;  %v1983_v32 = vunpack.c.l.bf16 %v207_v18  ;;  %v214_v48 = vld [vmem:[%s1953_s29 + $0x3c] sm:$0x1]  ;;  %v2052_v11 = vld [vmem:[%s1953_s29 + $0x44] sm:$0x1] }
  0x18   : > { %1688 = vmatprep.mubr.msk.f32.mxu1 %vm283_vm1, %v259_v29  ;;  %1744 = vmatprep.mubr.msk.f32.mxu0 %vm283_vm1, %v262_v30  ;;  %v1989_v34 = vsel %vm256_vm0, %v263_v24, %v264_v25  ;;  %v228_v35 = vunpack.c.l.bf16 %v208_v23  ;;  %v530_v36 = vrot.slane %v1963_v9, 2  ;;  %v531_v37 = vrot.slane %v222_v10, 2  ;;  %v1583_v13 = vld [vmem:[%s2249_s1 + $0x38] sm:$0xff] }
  0x19   : > { %1689 = vmatmul.mubr.msk.f32.vlgmr.msra.gmra.mrb[0].mxu1 %vm283_vm1, %v262_v30  ;;  %1745 = vmatmul.mubr.msk.f32.vlgmr.msra.gmra.mrb[0].mxu0 %vm283_vm1, %v1989_v34  ;;  %v1997_v39 = vsel %vm256_vm0, %v266_v27, %v267_v31  ;;  %v269_v40 = vrot.slane %v1983_v32, 1  ;;  %v2003_v42 = vunpack.c.h.bf16 %v207_v18  ;;  %v230_v43 = vunpack.c.l.bf16 %v210_v28  ;;  %v1547_v29 = vld [vmem:[%s2249_s1 + $0x18] sm:$0xff] }
  0x1a   : > { %1701 = vmatpush3.msra.mxu1 %v239_v2  ;;  %1757 = vmatpush3.msra.mxu0 %v1565_v3  ;;  %v270_v45 = vrot.slane %v228_v35, 1  ;;  %v533_v46 = vrot.slane %v1968_v14, 2  ;;  %v2011_v47 = vunpack.c.l.bf16 %v211_v33  ;;  %v2019_v49 = vsel %vm526_vm2, %v530_v36, %v531_v37  ;;  %v215_v2 = vld [vmem:[%s1953_s29 + $0x40] ss:$8 sps:$4 sm:$0xff]  }
  0x1b   : > { %1691 = vmatprep.mubr.msk.f32.mxu1 %vm283_vm1, %v1989_v34  ;;  %1747 = vmatprep.mubr.msk.f32.mxu0 %vm283_vm1, %v1997_v39  ;;  %v272_v50 = vrot.slane %v2003_v42, 1  ;;  %v273_v51 = vrot.slane %v230_v43, 1  ;;  %v232_v52 = vunpack.c.l.bf16 %v212_v38  ;;  %v536_v55 = vrot.slane %v1970_v16, 2 }
  0x1c   : > { %v2023_v53 = vsel %vm256_vm0, %v269_v40, %v270_v45  ;;  %1770 = vmatprep.subr.mxu0 %v1574_v41  ;;  %v275_v54 = vrot.slane %v2011_v47, 1  ;;  %v537_v56 = vrot.slane %v226_v17, 2  ;;  %1714 = vmatprep.subr.mxu1 %v2008_v44  ;;  %v2033_v57 = vsel %vm526_vm2, %v533_v46, %v534_v26  ;;  %v1601_v45 = vld [vmem:[%s2250_s2] ss:$0 sm:$0xff] }
  0x1d   : > { %1692 = vmatmul.mubr.msk.f32.gmra.mrb[2].mxu1 %vm283_vm1, %v1997_v39  ;;  %1748 = vmatmul.mubr.msk.f32.gmra.mrb[2].mxu0 %vm283_vm1, %v2023_v53  ;;  %v276_v58 = vrot.slane %v232_v52, 1  ;;  %v2035_v59 = vunpack.c.h.bf16 %v211_v33  ;;  %v234_v60 = vunpack.c.l.bf16 %v214_v48  ;;  %v2042_v61 = vsel %vm256_vm0, %v272_v50, %v273_v51 }
  0x1e   : > { %1694 = vmatprep.mubr.msk.f32.mxu1 %vm283_vm1, %v2023_v53  ;;  %1758 = vmatprep.mubr.msk.f32.mxu0 %vm283_vm1, %v2019_v49  ;;  %v539_v62 = vrot.slane %v1983_v32, 2  ;;  %v540_v63 = vrot.slane %v228_v35, 2  ;;  %v542_v0 = vrot.slane %v2003_v42, 2  ;;  %v543_v10 = vrot.slane %v230_v43, 2  ;;  %v1592_v35 = vld [vmem:[%s2249_s1 + $0x40] sm:$0xff] }
  0x1f   : > { %v2048_v3 = vsel %vm256_vm0, %v275_v54, %v276_v58  ;;  %v278_v4 = vrot.slane %v2035_v59, 1  ;;  %v279_v6 = vrot.slane %v234_v60, 1  ;;  %v2055_v12 = vsel %vm526_vm2, %v536_v55, %v537_v56 }
  0x20   : > { %v2065_v15 = vsel %vm526_vm2, %v539_v62, %v540_v63  ;;  %v545_v17 = vrot.slane %v2011_v47, 2  ;;  %v546_v19 = vrot.slane %v232_v52, 2  ;;  %v2073_v20 = vunpack.c.l.bf16 %v215_v2 }
  0x21   : > { %1695 = vmatmul.mubr.msk.f32.gmra.mrb[4].mxu1 %vm283_vm1, %v2042_v61  ;;  %1759 = vmatmul.mubr.msk.f32.vlgmr.msra.gmra.mrb[0].mxu0 %vm283_vm1, %v2033_v57  ;;  %v2071_v18 = vsel %vm256_vm0, %v278_v4, %v279_v6  ;;  %v236_v21 = vunpack.c.l.bf16 %v2052_v11  ;;  %v2079_v22 = vsel %vm526_vm2, %v542_v0, %v543_v10  ;;  %v548_v23 = vrot.slane %v2035_v59, 2 }
  0x22   : > { %1771 = vmatpush3.msra.mxu0 %v1574_v41  ;;  %1697 = vmatprep.mubr.msk.f32.mxu1 %vm283_vm1, %v2048_v3  ;;  %v549_v24 = vrot.slane %v234_v60, 2  ;;  %v2091_v25 = vsel %vm526_vm2, %v545_v17, %v546_v19  ;;  %v921_v26 = vrot.slane %v2073_v20, 2  ;;  %v527_v31 = vrot.slane %v1960_v7, 2 }
  0x23   : > { %1761 = vmatprep.mubr.msk.f32.mxu0 %vm283_vm1, %v2055_v12  ;;  %1784 = vmatprep.subr.mxu0 %v1583_v13  ;;  %v922_v27 = vrot.slane %v236_v21, 2  ;;  %v528_v33 = vrot.slane %v220_v8, 2  ;;  %v218_v8 = vld [vmem:[%s1953_s29 + $0x4c] sm:$0x1]  ;;  %v801_v37 = vrot.slane %v2073_v20, 1  ;;  %v802_v38 = vrot.slane %v236_v21, 1 }
  0x24   : > { %v2095_v28 = vsel %vm526_vm2, %v548_v23, %v549_v24  ;;  %v238_v36 = vunpack.c.l.bf16 %v218_v8  ;;  %v1424_v48 = vstv %s1415_s14 }
  0x25   : > { %1698 = vmatmul.mubr.msk.f32.gmra.mrb[6].mxu1 %vm283_vm1, %v2071_v18  ;;  %1762 = vmatmul.mubr.msk.f32.gmra.mrb[2].mxu0 %vm283_vm1, %v2065_v15  ;;  %v2108_v30 = vsel %vm526_vm2, %v921_v26, %v922_v27  ;;  %v529_v5 = vsel %vm526_vm2, %v527_v31, %v528_v33  ;;  %v803_v40 = vsel %vm256_vm0, %v801_v37, %v802_v38 }
  0x26   : > { %1702 = vmatprep.mubr.msk.f32.mxu1 %vm283_vm1, %v1960_v7  ;;  %1764 = vmatprep.mubr.msk.f32.mxu0 %vm283_vm1, %v2079_v22  ;;  %v237_v7 = vunpack.c.h.bf16 %v215_v2 }
  0x29   : > { %1703 = vmatmul.mubr.msk.f32.vlgmr.msra.gmra.mrb[0].mxu1 %vm283_vm1, %v1963_v9  ;;  %1765 = vmatmul.mubr.msk.f32.gmra.mrb[4].mxu0 %vm283_vm1, %v2091_v25 }
  0x2a   : > { %1715 = vmatpush3.msra.mxu1 %v2008_v44  ;;  %1705 = vmatprep.mubr.msk.f32.mxu1 %vm283_vm1, %v1968_v14 }
  0x2b   : > { %1767 = vmatprep.mubr.msk.f32.mxu0 %vm283_vm1, %v2095_v28  ;;  %1728 = vmatprep.subr.mxu1 %v1547_v29 }
  0x2d   : > { %1706 = vmatmul.mubr.msk.f32.gmra.mrb[2].mxu1 %vm283_vm1, %v1970_v16  ;;  %1768 = vmatmul.mubr.msk.f32.gmra.mrb[6].mxu0 %vm283_vm1, %v2108_v30 }
  0x2e   : > { %1708 = vmatprep.mubr.msk.f32.mxu1 %vm283_vm1, %v1983_v32  ;;  %1772 = vmatprep.mubr.msk.f32.mxu0 %vm283_vm1, %v1968_v14 }
  0x31   : > { %1709 = vmatmul.mubr.msk.f32.gmra.mrb[4].mxu1 %vm283_vm1, %v2003_v42  ;;  %1773 = vmatmul.mubr.msk.f32.vlgmr.msra.gmra.mrb[0].mxu0 %vm283_vm1, %v1970_v16 }
  0x32   : > { %1785 = vmatpush3.msra.mxu0 %v1583_v13  ;;  %1711 = vmatprep.mubr.msk.f32.mxu1 %vm283_vm1, %v2011_v47 }
  0x33   : > { %1775 = vmatprep.mubr.msk.f32.mxu0 %vm283_vm1, %v1983_v32  ;;  %1798 = vmatprep.subr.mxu0 %v1592_v35 }
  0x35   : > { %1712 = vmatmul.mubr.msk.f32.gmra.mrb[6].mxu1 %vm283_vm1, %v2035_v59  ;;  %1776 = vmatmul.mubr.msk.f32.gmra.mrb[2].mxu0 %vm283_vm1, %v2003_v42 }
  0x36   : > { %1716 = vmatprep.mubr.msk.f32.mxu1 %vm283_vm1, %v529_v5  ;;  %1778 = vmatprep.mubr.msk.f32.mxu0 %vm283_vm1, %v2011_v47 }
  0x39   : > { %1717 = vmatmul.mubr.msk.f32.vlgmr.msra.gmra.mrb[0].mxu1 %vm283_vm1, %v2019_v49  ;;  %1779 = vmatmul.mubr.msk.f32.gmra.mrb[4].mxu0 %vm283_vm1, %v2035_v59 }
  0x3a   : > { %1729 = vmatpush3.msra.mxu1 %v1547_v29  ;;  %1719 = vmatprep.mubr.msk.f32.mxu1 %vm283_vm1, %v2033_v57 }
  0x3b   : > { %1781 = vmatprep.mubr.msk.f32.mxu0 %vm283_vm1, %v2073_v20  ;;  %1812 = vmatprep.subr.mxu1 %v1937_v1 }
  0x3d   : > { %1720 = vmatmul.mubr.msk.f32.gmra.mrb[2].mxu1 %vm283_vm1, %v2055_v12  ;;  %1782 = vmatmul.mubr.msk.f32.gmra.mrb[6].mxu0 %vm283_vm1, %v237_v7 }
  0x3e   : > { %1722 = vmatprep.mubr.msk.f32.mxu1 %vm283_vm1, %v2065_v15  ;;  %1786 = vmatprep.mubr.msk.f32.mxu0 %vm283_vm1, %v1989_v34  ;;  %v1160_v34 = vrot.slane %v237_v7, 1 }
  0x41   : > { %1723 = vmatmul.mubr.msk.f32.gmra.mrb[4].mxu1 %vm283_vm1, %v2079_v22  ;;  %1787 = vmatmul.mubr.msk.f32.vlgmr.msra.gmra.mrb[0].mxu0 %vm283_vm1, %v1997_v39  ;;  %v1161_v39 = vrot.slane %v238_v36, 1 }
  0x42   : > { %1799 = vmatpush3.msra.mxu0 %v1592_v35  ;;  %1725 = vmatprep.mubr.msk.f32.mxu1 %vm283_vm1, %v2091_v25 }
  0x43   : > { %1789 = vmatprep.mubr.msk.f32.mxu0 %vm283_vm1, %v2023_v53 }
  0x45   : > { %1726 = vmatmul.mubr.msk.f32.gmra.mrb[6].mxu1 %vm283_vm1, %v2095_v28  ;;  %1790 = vmatmul.mubr.msk.f32.gmra.mrb[2].mxu0 %vm283_vm1, %v2042_v61 }
  0x46   : > { %1730 = vmatprep.mubr.msk.f32.mxu1 %vm283_vm1, %v1963_v9  ;;  %1792 = vmatprep.mubr.msk.f32.mxu0 %vm283_vm1, %v2048_v3  ;;  %v1162_v9 = vsel %vm256_vm0, %v1160_v34, %v1161_v39 }
  0x49   : > { %1731 = vmatmul.mubr.msk.f32.vlgmr.msra.gmra.mrb[0].mxu1 %vm283_vm1, %v1968_v14  ;;  %1793 = vmatmul.mubr.msk.f32.gmra.mrb[4].mxu0 %vm283_vm1, %v2071_v18  ;;  %v1281_v14 = vrot.slane %v238_v36, 2 }
  0x4a   : > { %1813 = vmatpush3.msra.mxu1 %v1937_v1  ;;  %1733 = vmatprep.mubr.msk.f32.mxu1 %vm283_vm1, %v1970_v16  ;;  %v1280_v1 = vrot.slane %v237_v7, 2 }
  0x4b   : > { %1795 = vmatprep.mubr.msk.f32.mxu0 %vm283_vm1, %v803_v40 }
  0x4c   : > { %v1282_v16 = vsel %vm526_vm2, %v1280_v1, %v1281_v14 }
  0x4d   : > { %1734 = vmatmul.mubr.msk.f32.gmra.mrb[2].mxu1 %vm283_vm1, %v1983_v32  ;;  %1796 = vmatmul.mubr.msk.f32.gmra.mrb[6].mxu0 %vm283_vm1, %v1162_v9 }
  0x4e   : > { %1736 = vmatprep.mubr.msk.f32.mxu1 %vm283_vm1, %v2003_v42  ;;  %1800 = vmatprep.mubr.msk.f32.mxu0 %vm283_vm1, %v2033_v57 }
  0x51   : > { %1737 = vmatmul.mubr.msk.f32.gmra.mrb[4].mxu1 %vm283_vm1, %v2011_v47  ;;  %1801 = vmatmul.mubr.msk.f32.vlgmr.msra.gmra.mrb[0].mxu0 %vm283_vm1, %v2055_v12 }
  0x52   : > { %1739 = vmatprep.mubr.msk.f32.mxu1 %vm283_vm1, %v2035_v59  ;;  %1803 = vmatprep.mubr.msk.f32.mxu0 %vm283_vm1, %v2065_v15 }
  0x55   : > { %1740 = vmatmul.mubr.msk.f32.gmra.mrb[6].mxu1 %vm283_vm1, %v2073_v20  ;;  %1804 = vmatmul.mubr.msk.f32.gmra.mrb[2].mxu0 %vm283_vm1, %v2079_v22 }
  0x56   : > { %1750 = vmatprep.mubr.msk.f32.mxu1 %vm283_vm1, %v2042_v61  ;;  %1806 = vmatprep.mubr.msk.f32.mxu0 %vm283_vm1, %v2091_v25 }
  0x59   : > { %1751 = vmatmul.mubr.msk.f32.vlgmr.msra.gmra.mrb[4].mxu1 %vm283_vm1, %v2048_v3  ;;  %1807 = vmatmul.mubr.msk.f32.gmra.mrb[4].mxu0 %vm283_vm1, %v2095_v28 }
  0x5a   : > { %1753 = vmatprep.mubr.msk.f32.mxu1 %vm283_vm1, %v2071_v18  ;;  %1809 = vmatprep.mubr.msk.f32.mxu0 %vm283_vm1, %v2108_v30 }
  0x5d   : > { %1754 = vmatmul.mubr.msk.f32.gmra.mrb[6].mxu1 %vm283_vm1, %v803_v40  ;;  %1810 = vmatmul.mubr.msk.f32.gmra.mrb[6].mxu0 %vm283_vm1, %v1282_v16 }
 0x11c   : > { %v1732_v32 = vpop.f32.mrb[0].mxu1 }
 0x11d   : > { %v753_v41 = vpop.f32.mrb[1].mxu1 }
 0x120   : > { %v1735_v42 = vpop.f32.mrb[2].mxu1 }
 0x121   : > { %v763_v43 = vpop.f32.mrb[3].mxu1 }
 0x124   : > { %v1802_v44 = vpop.f32.mrb[0].mxu0 }
 0x125   : > { %v1814_v46 = vadd.f32 %v1802_v44, %v1732_v32  ;;  %v1353_v47 = vpop.f32.mrb[1].mxu0 }
 0x126   : > { %v1815_v49 = vadd.f32 %v1353_v47, %v753_v41 }
 0x127   : > { %v1408_v50 = vadd.f32 %v1814_v46, %v1601_v45 }
 0x128   : > { %v1407_v51 = vadd.f32 %v1815_v49, %v1601_v45  ;;  %v1805_v52 = vpop.f32.mrb[2].mxu0 }
 0x129   : > { %vm1417_vm3 = vcmp.ge.f32.partialorder %v1408_v50, 0.0  ;;  %v1426_v53 = vmul.f32 %v1424_v48, %v1408_v50  ;;  %v1816_v54 = vadd.f32 %v1805_v52, %v1735_v42  ;;  %v1363_v55 = vpop.f32.mrb[3].mxu0 }
 0x12a   : > { %vm1416_vm4 = vcmp.ge.f32.partialorder %v1407_v51, 0.0  ;;  %v1425_v56 = vmul.f32 %v1424_v48, %v1407_v51  ;;  %v1817_v57 = vadd.f32 %v1363_v55, %v763_v43 }
 0x12b   : > { %v1434_v58 = vsel %vm1417_vm3, %v1408_v50, %v1426_v53  ;;  %v1410_v59 = vadd.f32 %v1816_v54, %v1601_v45 }
 0x12c   : > { %v1442_v60 = vpack.c.bf16 %v1434_v58, %v1434_v58  ;;  %v1433_v61 = vsel %vm1416_vm4, %v1407_v51, %v1425_v56  ;;  %v1409_v62 = vadd.f32 %v1817_v57, %v1601_v45  ;;  %v1752_v63 = vpop.f32.mrb[4].mxu1  ;;  %v1808_v0 = vpop.f32.mrb[4].mxu0 }
 0x12d   : > { %v1441_v2 = vpack.c.bf16 %v1433_v61, %v1433_v61  ;;  %vm1419_vm6 = vcmp.ge.f32.partialorder %v1410_v59, 0.0  ;;  %v1428_v3 = vmul.f32 %v1424_v48, %v1410_v59  ;;  %v1818_v4 = vadd.f32 %v1808_v0, %v1752_v63  ;;  %v894_v6 = vpop.f32.mrb[5].mxu1  ;;  %v1373_v10 = vpop.f32.mrb[5].mxu0 }
 0x12e   : > { %1451 = vst.msk [vmem:[%s2227_s21 + $0x4] sm:$0xf] %vm1449_vm5, %v1442_v60  ;;  %vm1418_vm7 = vcmp.ge.f32.partialorder %v1409_v62, 0.0  ;;  %v1427_v11 = vmul.f32 %v1424_v48, %v1409_v62  ;;  %v1819_v12 = vadd.f32 %v1373_v10, %v894_v6 }
 0x12f   : > { %1450 = vst.msk [vmem:[%s2227_s21] sm:$0xf] %vm1449_vm5, %v1441_v2  ;;  %v1436_v13 = vsel %vm1419_vm6, %v1410_v59, %v1428_v3  ;;  %v1412_v15 = vadd.f32 %v1818_v4, %v1601_v45 }
 0x130   : > { %v1444_v17 = vpack.c.bf16 %v1436_v13, %v1436_v13  ;;  %v1435_v18 = vsel %vm1418_vm7, %v1409_v62, %v1427_v11  ;;  %v1411_v19 = vadd.f32 %v1819_v12, %v1601_v45  ;;  %v1755_v20 = vpop.f32.mrb[6].mxu1  ;;  %v1811_v21 = vpop.f32.mrb[6].mxu0 }
 0x131   : > { %v1443_v22 = vpack.c.bf16 %v1435_v18, %v1435_v18  ;;  %vm1421_vm8 = vcmp.ge.f32.partialorder %v1412_v15, 0.0  ;;  %v1430_v23 = vmul.f32 %v1424_v48, %v1412_v15  ;;  %v1820_v24 = vadd.f32 %v1811_v21, %v1755_v20  ;;  %v904_v25 = vpop.f32.mrb[7].mxu1  ;;  %v1383_v26 = vpop.f32.mrb[7].mxu0 }
 0x132   : > { %1453 = vst.msk [vmem:[%s2227_s21 + $0xc] sm:$0xf] %vm1449_vm5, %v1444_v17  ;;  %vm1420_vm9 = vcmp.ge.f32.partialorder %v1411_v19, 0.0  ;;  %v1429_v27 = vmul.f32 %v1424_v48, %v1411_v19  ;;  %v1821_v28 = vadd.f32 %v1383_v26, %v904_v25 }
 0x133   : > { %1452 = vst.msk [vmem:[%s2227_s21 + $0x8] sm:$0xf] %vm1449_vm5, %v1443_v22  ;;  %v1438_v29 = vsel %vm1421_vm8, %v1412_v15, %v1430_v23  ;;  %v1414_v30 = vadd.f32 %v1820_v24, %v1601_v45 }
 0x134   : > { %v1446_v31 = vpack.c.bf16 %v1438_v29, %v1438_v29  ;;  %v1437_v33 = vsel %vm1420_vm9, %v1411_v19, %v1429_v27  ;;  %v1413_v35 = vadd.f32 %v1821_v28, %v1601_v45 }
 0x135   : > { %v1445_v5 = vpack.c.bf16 %v1437_v33, %v1437_v33  ;;  %vm1423_vm10 = vcmp.ge.f32.partialorder %v1414_v30, 0.0  ;;  %v1432_v7 = vmul.f32 %v1424_v48, %v1414_v30 }
 0x136   : > { %1455 = vst.msk [vmem:[%s2227_s21 + $0x14] sm:$0xf] %vm1449_vm5, %v1446_v31  ;;  %vm1422_vm11 = vcmp.ge.f32.partialorder %v1413_v35, 0.0  ;;  %v1431_v8 = vmul.f32 %v1424_v48, %v1413_v35 }
 0x137   : > { %1454 = vst.msk [vmem:[%s2227_s21 + $0x10] sm:$0xf] %vm1449_vm5, %v1445_v5  ;;  %v1440_v36 = vsel %vm1423_vm10, %v1414_v30, %v1432_v7 }
 0x138   : > { %v1448_v37 = vpack.c.bf16 %v1440_v36, %v1440_v36  ;;  %v1439_v38 = vsel %vm1422_vm11, %v1413_v35, %v1431_v8 }
 0x139   : > { %v1447_v34 = vpack.c.bf16 %v1439_v38, %v1439_v38 }
 0x13a   : > { %1457 = vst.msk [vmem:[%s2227_s21 + $0x1c] sm:$0xf] %vm1449_vm5, %v1448_v37 }
 0x13b   : > { %1456 = vst.msk [vmem:[%s2227_s21 + $0x18] sm:$0xf] %vm1449_vm5, %v1447_v34 }
 0x13c PF: > { %s15_s17 = sadd.s32 1, %s1893_s17  }
 0x13d   : > { %p12_p4 = scmp.ge.s32.totalorder %s15_s17, 4  }
 0x13f   :  { %14 = sbr.rel (!%p12_p4) target bundleno = 2 (0x2), region = 74 }

// kernel: ebrn_forward.27
= control target key start
LH: loop header
LB: loop body
LE: loop exit
PB: predicated region body
PF: predicated region fallthrough
CT: control target
= control target key end

     0   :  { %s2129_s17 = smov 0   ;;  %s2561_s0 = inlined_call_operand.vmem [shape: bf16[2,10,10,32], index: 0, kind: input, shape index: {}]   ;;  %s2562_s1 = inlined_call_operand.vmem [shape: f32[9,32,8], index: 1, kind: input, shape index: {}]   ;;  %s2563_s2 = inlined_call_operand.vmem [shape: f32[1,8], index: 2, kind: input, shape index: {}]   ;;  %s2564_s3 = inlined_call_operand.<no memory space> [shape: f32[1], index: 3, kind: input, shape index: {}]   ;;  %s2565_s4 = inlined_call_operand.vmem [shape: bf16[2,8,8,8], index: 4, kind: output, shape index: {}]  }
   0x1   :  { %9 = sst [smem:[#allocation2]] %s2564_s3 }
   0x2 LB: > { %s1540_s18 = sadd.s32 4294967295, %s2099_s17   ;;  %p1544_p0 = scmp.ge.s32.totalorder %s2099_s17, 1  ;;  %s2099_s17 = sphi %s2129_s17, %s15_s17  }
   0x3   : > { %p163_p1 = scmp.lt.s32.totalorder %s2099_s17, 3 }
   0x5   : > { %p164_p2 = pnand %p1544_p0, %p163_p1 }
   0x6   : > { %v1548_v0 = vld [vmem:[%s2562_s1 + $0x20] sm:$0xff] (!%p164_p2)  ;;  %v1549_v1 = vld [vmem:[%s2562_s1 + $0x28] sm:$0xff] (!%p164_p2)  ;;  %p189_p3 = scmp.lt.s32.totalorder (!%p164_p2), %s1540_s18, 1  ;;  %v1550_v5 = vld [vmem:[%s2562_s1 + $0x30] sm:$0xff] (!%p164_p2)  ;;  %vm259_vm0 = vcmask (!%p164_p2), 1046528   ;;  %vm289_vm1 = vcmask (!%p164_p2), 261120  }
   0x7   : > { %167 = sbr.rel (%p164_p2) target bundleno = 316 (0x13c), region = 36  ;;  %v1592_v2 = vld [vmem:[%s2562_s1 + $0x80] sm:$0xff] (!%p164_p2)  ;;  %v1944_v3 = vpack.c.bf16 (!%p164_p2), %v1549_v1, %v1548_v0  ;;  %v1593_v4 = vld [vmem:[%s2562_s1 + $0x88] sm:$0xff] (!%p164_p2)  ;;  %v1551_v6 = vld [vmem:[%s2562_s1 + $0x38] sm:$0xff] (!%p164_p2)  ;;  %vm532_vm2 = vcmask (!%p164_p2), 1045504   ;;  %vm1476_vm5 = vcmask (!%p164_p2), 60416  }
   0x8   : > { %v2155_v7 = vpack.c.bf16 (!%p164_p2), %v1593_v4, %v1592_v2  ;;  %v1948_v8 = vpack.c.bf16 (!%p164_p2), %v1551_v6, %v1550_v5  ;;  %v1594_v9 = vld [vmem:[%s2562_s1 + $0x90] sm:$0xff] (!%p164_p2)  ;;  %v1595_v10 = vld [vmem:[%s2562_s1 + $0x98] sm:$0xff] (!%p164_p2)  ;;  %v239_v11 = vld [vmem:[%s2562_s1] sm:$0xff] (!%p164_p2) }
   0x9   : > { %1945 = vmatprep.subr.bf16.mxu1 (!%p164_p2), %v1944_v3  ;;  %v2168_v12 = vpack.c.bf16 (!%p164_p2), %v1595_v10, %v1594_v9  ;;  %v240_v13 = vld [vmem:[%s2562_s1 + $0x8] sm:$0xff] (!%p164_p2)  ;;  %v1604_v14 = vld [vmem:[%s2562_s1 + $0xa0] sm:$0xff] (!%p164_p2)  ;;  %v1606_v16 = vld [vmem:[%s2562_s1 + $0xb0] sm:$0xff] (!%p164_p2) }
   0xa   : > { %v1605_v15 = vld [vmem:[%s2562_s1 + $0xa8] sm:$0xff] (!%p164_p2)  ;;  %1977 = vmatprep.subr.bf16.mxu0 (!%p164_p2), %v2155_v7  ;;  %1947 = vmatpush3.bf16.msra.mxu1 (!%p164_p2), %v1944_v3  ;;  %v1607_v17 = vld [vmem:[%s2562_s1 + $0xb8] sm:$0xff] (!%p164_p2)  ;;  %v241_v18 = vld [vmem:[%s2562_s1 + $0x10] sm:$0xff] (!%p164_p2)  ;;  %v1952_v19 = vpack.c.bf16 (!%p164_p2), %v240_v13, %v239_v11 }
   0xb   : > { %1979 = vmatpush3.bf16.msra.mxu0 (!%p164_p2), %v2155_v7  ;;  %1949 = vmatprep.subr.bf16.mxu1 (!%p164_p2), %v1948_v8  ;;  %v242_v20 = vld [vmem:[%s2562_s1 + $0x18] sm:$0xff] (!%p164_p2)  ;;  %v1616_v21 = vld [vmem:[%s2562_s1 + $0xc0] sm:$0xff] (!%p164_p2)  ;;  %v1617_v22 = vld [vmem:[%s2562_s1 + $0xc8] sm:$0xff] (!%p164_p2)  ;;  %v1984_v23 = vpack.c.bf16 (!%p164_p2), %v1605_v15, %v1604_v14  ;;  %v2211_v27 = vpack.c.bf16 (!%p164_p2), %v1607_v17, %v1606_v16 }
   0xc   : > { %1981 = vmatprep.subr.bf16.mxu0 (!%p164_p2), %v2168_v12  ;;  %v2213_v28 = vpack.c.bf16 (!%p164_p2), %v242_v20, %v241_v18  ;;  %v2215_v29 = vpack.c.bf16 (!%p164_p2), %v1617_v22, %v1616_v21  ;;  %v1568_v57 = vld [vmem:[%s2562_s1 + $0x40] sm:$0xff] (!%p164_p2)  ;;  %v1569_v58 = vld [vmem:[%s2562_s1 + $0x48] sm:$0xff] (!%p164_p2) }
   0xd   : > { %v2270_v9 = vpack.c.bf16 (!%p164_p2), %v1569_v58, %v1568_v57 }
   0xe   : > { %s2567_s18 = smov (!%p189_p3, %s1540_s18), 1  ;;  %1951 = vmatpush3.bf16.msra.mxu1 %v1948_v8 }
   0xf   : > { %s2084_s16 = smul.u32 80, %s2567_s18  ;;  %1983 = vmatpush3.bf16.msra.mxu0 %v2168_v12  ;;  %1953 = vmatprep.subr.bf16.mxu1 %v1952_v19  ;;  %s1655_s22 = sshll.u32 %s2567_s18, 5 }
  0x10   : > { %1985 = vmatprep.subr.bf16.mxu0 %v1984_v23  ;;  %s2540_s25 = scalar_lea.vmem %s2565_s4, %s1655_s22 }
  0x11   : > { %s2204_s6 = scalar_lea.vmem %s2561_s0, %s2084_s16 }
  0x12   : > { %v199_v24 = vld [vmem:[%s2204_s6] ss:$8 sps:$4 sm:$0xff]   ;;  %v2208_v25 = vld [vmem:[%s2204_s6 + $0x4] sm:$0x1]  ;;  %v202_v26 = vld [vmem:[%s2204_s6 + $0xc] sm:$0x1] }
  0x13   : > { %v2217_v30 = vunpack.c.l.bf16 %v199_v24  ;;  %v220_v31 = vunpack.c.l.bf16 %v2208_v25  ;;  %v2220_v32 = vunpack.c.h.bf16 %v199_v24  ;;  %v222_v33 = vunpack.c.l.bf16 %v202_v26  ;;  %v203_v34 = vld [vmem:[%s2204_s6 + $0x10] ss:$8 sps:$4 sm:$0xff]   ;;  %v204_v35 = vld [vmem:[%s2204_s6 + $0x14] sm:$0x1]  ;;  %v206_v36 = vld [vmem:[%s2204_s6 + $0x1c] sm:$0x1] }
  0x14   : > { %v2226_v37 = vunpack.c.l.bf16 %v203_v34  ;;  %v224_v38 = vunpack.c.l.bf16 %v204_v35  ;;  %v2228_v39 = vunpack.c.h.bf16 %v203_v34  ;;  %v226_v40 = vunpack.c.l.bf16 %v206_v36  ;;  %v207_v41 = vld [vmem:[%s2204_s6 + $0x20] ss:$8 sps:$4 sm:$0xff]   ;;  %v208_v46 = vld [vmem:[%s2204_s6 + $0x24] sm:$0x1]  ;;  %v210_v51 = vld [vmem:[%s2204_s6 + $0x2c] sm:$0x1] }
  0x15   : > { %v260_v42 = vrot.slane %v2217_v30, 1  ;;  %v261_v43 = vrot.slane %v220_v31, 1  ;;  %v263_v44 = vrot.slane %v2220_v32, 1  ;;  %v264_v45 = vrot.slane %v222_v33, 1  ;;  %v211_v56 = vld [vmem:[%s2204_s6 + $0x30] ss:$8 sps:$4 sm:$0xff]  }
  0x16   : > { %v266_v47 = vrot.slane %v2226_v37, 1  ;;  %v267_v48 = vrot.slane %v224_v38, 1  ;;  %v540_v49 = vrot.slane %v224_v38, 2  ;;  %v269_v50 = vrot.slane %v2228_v39, 1  ;;  %v212_v63 = vld [vmem:[%s2204_s6 + $0x34] sm:$0x1] }
  0x17   : > { %v262_v52 = vsel %vm259_vm0, %v260_v42, %v261_v43  ;;  %v265_v53 = vsel %vm259_vm0, %v263_v44, %v264_v45  ;;  %v270_v54 = vrot.slane %v226_v40, 1  ;;  %v2241_v55 = vunpack.c.l.bf16 %v207_v41  ;;  %v214_v8 = vld [vmem:[%s2204_s6 + $0x3c] sm:$0x1]  ;;  %v2311_v36 = vld [vmem:[%s2204_s6 + $0x40] ss:$8 sps:$4 sm:$0xff]  }
  0x18   : > { %1772 = vmatprep.mubr.msk.f32.mxu1 %vm289_vm1, %v262_v52  ;;  %1852 = vmatprep.mubr.msk.f32.mxu0 %vm289_vm1, %v265_v53  ;;  %v2253_v59 = vsel %vm259_vm0, %v266_v47, %v267_v48  ;;  %v228_v60 = vunpack.c.l.bf16 %v208_v46  ;;  %v536_v61 = vrot.slane %v2220_v32, 2  ;;  %v537_v62 = vrot.slane %v222_v33, 2  ;;  %v1619_v24 = vld [vmem:[%s2562_s1 + $0xd8] sm:$0xff]  ;;  %v2321_v42 = vld [vmem:[%s2204_s6 + $0x44] sm:$0x1] }
  0x19   : > { %1773 = vmatmul.mubr.msk.f32.vlgmr.msra.gmra.mrb[0].mxu1 %vm289_vm1, %v265_v53  ;;  %1853 = vmatmul.mubr.msk.f32.vlgmr.msra.gmra.mrb[0].mxu0 %vm289_vm1, %v2253_v59  ;;  %v2261_v0 = vsel %vm259_vm0, %v269_v50, %v270_v54  ;;  %v272_v1 = vrot.slane %v2241_v55, 1  ;;  %v2264_v2 = vunpack.c.h.bf16 %v207_v41  ;;  %v230_v3 = vunpack.c.l.bf16 %v210_v51  ;;  %v1628_v47 = vld [vmem:[%s2562_s1 + $0xe0] sm:$0xff]  ;;  %v1570_v54 = vld [vmem:[%s2562_s1 + $0x50] sm:$0xff] }
  0x1a   : > { %1955 = vmatpush3.bf16.msra.mxu1 %v1952_v19  ;;  %1987 = vmatpush3.bf16.msra.mxu0 %v1984_v23  ;;  %v273_v4 = vrot.slane %v228_v60, 1  ;;  %v539_v5 = vrot.slane %v2226_v37, 2  ;;  %v2267_v6 = vunpack.c.l.bf16 %v211_v56  ;;  %v2277_v10 = vsel %vm532_vm2, %v536_v61, %v537_v62  ;;  %v1618_v23 = vld [vmem:[%s2562_s1 + $0xd0] sm:$0xff] }
  0x1b   : > { %1775 = vmatprep.mubr.msk.f32.mxu1 %vm289_vm1, %v2253_v59  ;;  %1855 = vmatprep.mubr.msk.f32.mxu0 %vm289_vm1, %v2261_v0  ;;  %v275_v11 = vrot.slane %v2264_v2, 1  ;;  %v276_v13 = vrot.slane %v230_v3, 1  ;;  %v232_v14 = vunpack.c.l.bf16 %v212_v63  ;;  %v542_v17 = vrot.slane %v2228_v39, 2 }
  0x1c   : > { %1989 = vmatprep.subr.bf16.mxu0 %v2211_v27  ;;  %v2282_v15 = vsel %vm259_vm0, %v272_v1, %v273_v4  ;;  %1957 = vmatprep.subr.bf16.mxu1 %v2213_v28  ;;  %v278_v16 = vrot.slane %v2267_v6, 1  ;;  %v543_v18 = vrot.slane %v226_v40, 2  ;;  %v2292_v19 = vsel %vm532_vm2, %v539_v5, %v540_v49  ;;  %v1580_v1 = vld [vmem:[%s2562_s1 + $0x60] sm:$0xff] }
  0x1d   : > { %1776 = vmatmul.mubr.msk.f32.gmra.mrb[2].mxu1 %vm289_vm1, %v2261_v0  ;;  %1856 = vmatmul.mubr.msk.f32.gmra.mrb[2].mxu0 %vm289_vm1, %v2282_v15  ;;  %v279_v20 = vrot.slane %v232_v14, 1  ;;  %v2294_v21 = vunpack.c.h.bf16 %v211_v56  ;;  %v234_v22 = vunpack.c.l.bf16 %v214_v8  ;;  %v2306_v26 = vsel %vm259_vm0, %v275_v11, %v276_v13  ;;  %v1571_v56 = vld [vmem:[%s2562_s1 + $0x58] sm:$0xff]  ;;  %v1630_v8 = vld [vmem:[%s2562_s1 + $0xf0] sm:$0xff] }
  0x1e   : > { %1991 = vmatpush3.bf16.msra.mxu0 %v2211_v27  ;;  %1778 = vmatprep.mubr.msk.f32.mxu1 %vm289_vm1, %v2282_v15  ;;  %v545_v33 = vrot.slane %v2241_v55, 2  ;;  %v546_v34 = vrot.slane %v228_v60, 2  ;;  %v548_v35 = vrot.slane %v2264_v2, 2  ;;  %v549_v41 = vrot.slane %v230_v3, 2  ;;  %v1581_v3 = vld [vmem:[%s2562_s1 + $0x68] sm:$0xff]  ;;  %v1631_v11 = vld [vmem:[%s2562_s1 + $0xf8] sm:$0xff] }
  0x1f   : > { %1872 = vmatprep.mubr.msk.f32.mxu0 %vm289_vm1, %v2277_v10  ;;  %1993 = vmatprep.subr.bf16.mxu0 %v2215_v29  ;;  %v2317_v27 = vsel %vm259_vm0, %v278_v16, %v279_v20  ;;  %v281_v38 = vrot.slane %v2294_v21, 1  ;;  %v282_v40 = vrot.slane %v234_v22, 1  ;;  %v2325_v43 = vsel %vm532_vm2, %v542_v17, %v543_v18  ;;  %v1640_v16 = vld [vmem:[%s2562_s1 + $0x100] sm:$0xff]  ;;  %v1641_v17 = vld [vmem:[%s2562_s1 + $0x108] sm:$0xff] }
  0x20   : > { %1959 = vmatpush3.bf16.msra.mxu1 %v2213_v28  ;;  %v1996_v44 = vpack.c.bf16 %v1619_v24, %v1618_v23  ;;  %v2332_v45 = vsel %vm532_vm2, %v545_v33, %v546_v34  ;;  %v551_v46 = vrot.slane %v2267_v6, 2  ;;  %v1629_v28 = vld [vmem:[%s2562_s1 + $0xe8] sm:$0xff]  ;;  %v552_v49 = vrot.slane %v232_v14, 2  ;;  %v1642_v23 = vld [vmem:[%s2562_s1 + $0x110] sm:$0xff] }
  0x21   : > { %1779 = vmatmul.mubr.msk.f32.gmra.mrb[4].mxu1 %vm289_vm1, %v2306_v26  ;;  %1873 = vmatmul.mubr.msk.f32.vlgmr.msra.gmra.mrb[0].mxu0 %vm289_vm1, %v2292_v19  ;;  %v2345_v48 = vsel %vm259_vm0, %v281_v38, %v282_v40  ;;  %v2348_v50 = vunpack.c.l.bf16 %v2311_v36  ;;  %v236_v51 = vunpack.c.l.bf16 %v2321_v42  ;;  %v2355_v52 = vsel %vm532_vm2, %v548_v35, %v549_v41  ;;  %v218_v33 = vld [vmem:[%s2204_s6 + $0x4c] sm:$0x1]  ;;  %s1442_s6 = sld [smem:[#allocation2]] }
  0x22   : > { %1995 = vmatpush3.bf16.msra.mxu0 %v2215_v29  ;;  %1781 = vmatprep.mubr.msk.f32.mxu1 %vm289_vm1, %v2317_v27  ;;  %v554_v29 = vrot.slane %v2294_v21, 2  ;;  %v555_v53 = vrot.slane %v234_v22, 2  ;;  %v2000_v57 = vpack.c.bf16 %v1629_v28, %v1628_v47  ;;  %v2373_v58 = vsel %vm532_vm2, %v551_v46, %v552_v49 }
  0x23   : > { %1875 = vmatprep.mubr.msk.f32.mxu0 %vm289_vm1, %v2325_v43  ;;  %1961 = vmatprep.subr.bf16.mxu1 %v2270_v9  ;;  %v936_v60 = vrot.slane %v2348_v50, 2  ;;  %v937_v61 = vrot.slane %v236_v51, 2  ;;  %v1964_v62 = vpack.c.bf16 %v1571_v56, %v1570_v54  ;;  %v1968_v5 = vpack.c.bf16 %v1581_v3, %v1580_v1 }
  0x24   : > { %1997 = vmatprep.subr.bf16.mxu0 %v1996_v44  ;;  %v2379_v63 = vsel %vm532_vm2, %v554_v29, %v555_v53  ;;  %v534_v13 = vrot.slane %v220_v31, 2  ;;  %v2004_v14 = vpack.c.bf16 %v1631_v11, %v1630_v8  ;;  %v1583_v31 = vld [vmem:[%s2562_s1 + $0x78] sm:$0xff]  ;;  %v2008_v18 = vpack.c.bf16 %v1641_v17, %v1640_v16 }
  0x25   : > { %1782 = vmatmul.mubr.msk.f32.gmra.mrb[6].mxu1 %vm289_vm1, %v2345_v48  ;;  %1876 = vmatmul.mubr.msk.f32.gmra.mrb[2].mxu0 %vm289_vm1, %v2332_v45  ;;  %v2395_v4 = vsel %vm532_vm2, %v936_v60, %v937_v61  ;;  %v237_v22 = vunpack.c.h.bf16 %v2311_v36  ;;  %v238_v34 = vunpack.c.l.bf16 %v218_v33  ;;  %v814_v35 = vrot.slane %v236_v51, 1 }
  0x26   : > { %1792 = vmatprep.mubr.msk.f32.mxu1 %vm289_vm1, %v2217_v30  ;;  %1878 = vmatprep.mubr.msk.f32.mxu0 %vm289_vm1, %v2355_v52 }
  0x27   : > { %1999 = vmatpush3.bf16.msra.mxu0 %v1996_v44  ;;  %v1451_v38 = vstv %s1442_s6 }
  0x28   : > { %2001 = vmatprep.subr.bf16.mxu0 %v2000_v57 }
  0x29   : > { %1793 = vmatmul.mubr.msk.f32.vlgmr.msra.gmra.mrb[0].mxu1 %vm289_vm1, %v2220_v32  ;;  %1879 = vmatmul.mubr.msk.f32.gmra.mrb[4].mxu0 %vm289_vm1, %v2373_v58 }
  0x2a   : > { %1963 = vmatpush3.bf16.msra.mxu1 %v2270_v9  ;;  %1795 = vmatprep.mubr.msk.f32.mxu1 %vm289_vm1, %v2226_v37  ;;  %v533_v9 = vrot.slane %v2217_v30, 2  ;;  %v1582_v30 = vld [vmem:[%s2562_s1 + $0x70] sm:$0xff] }
  0x2b   : > { %1881 = vmatprep.mubr.msk.f32.mxu0 %vm289_vm1, %v2379_v63  ;;  %1965 = vmatprep.subr.bf16.mxu1 %v1964_v62  ;;  %v1972_v20 = vpack.c.bf16 %v1583_v31, %v1582_v30 }
  0x2c   : > { %v535_v25 = vsel %vm532_vm2, %v533_v9, %v534_v13 }
  0x2d   : > { %1796 = vmatmul.mubr.msk.f32.gmra.mrb[2].mxu1 %vm289_vm1, %v2228_v39  ;;  %1882 = vmatmul.mubr.msk.f32.gmra.mrb[6].mxu0 %vm289_vm1, %v2395_v4 }
  0x2e   : > { %1798 = vmatprep.mubr.msk.f32.mxu1 %vm289_vm1, %v2241_v55  ;;  %1892 = vmatprep.mubr.msk.f32.mxu0 %vm289_vm1, %v2226_v37 }
  0x2f   : > { %1967 = vmatpush3.bf16.msra.mxu1 %v1964_v62 }
  0x30   : > { %1969 = vmatprep.subr.bf16.mxu1 %v1968_v5 }
  0x31   : > { %1799 = vmatmul.mubr.msk.f32.gmra.mrb[4].mxu1 %vm289_vm1, %v2264_v2  ;;  %1893 = vmatmul.mubr.msk.f32.vlgmr.msra.gmra.mrb[0].mxu0 %vm289_vm1, %v2228_v39 }
  0x32   : > { %2003 = vmatpush3.bf16.msra.mxu0 %v2000_v57  ;;  %1801 = vmatprep.mubr.msk.f32.mxu1 %vm289_vm1, %v2267_v6 }
  0x33   : > { %1895 = vmatprep.mubr.msk.f32.mxu0 %vm289_vm1, %v2241_v55  ;;  %2005 = vmatprep.subr.bf16.mxu0 %v2004_v14 }
  0x35   : > { %1802 = vmatmul.mubr.msk.f32.gmra.mrb[6].mxu1 %vm289_vm1, %v2294_v21  ;;  %1896 = vmatmul.mubr.msk.f32.gmra.mrb[2].mxu0 %vm289_vm1, %v2264_v2 }
  0x36   : > { %1812 = vmatprep.mubr.msk.f32.mxu1 %vm289_vm1, %v535_v25  ;;  %1898 = vmatprep.mubr.msk.f32.mxu0 %vm289_vm1, %v2267_v6 }
  0x37   : > { %2007 = vmatpush3.bf16.msra.mxu0 %v2004_v14 }
  0x38   : > { %2009 = vmatprep.subr.bf16.mxu0 %v2008_v18 }
  0x39   : > { %1813 = vmatmul.mubr.msk.f32.vlgmr.msra.gmra.mrb[0].mxu1 %vm289_vm1, %v2277_v10  ;;  %1899 = vmatmul.mubr.msk.f32.gmra.mrb[4].mxu0 %vm289_vm1, %v2294_v21  ;;  %v1643_v10 = vld [vmem:[%s2562_s1 + $0x118] sm:$0xff] }
  0x3a   : > { %1971 = vmatpush3.bf16.msra.mxu1 %v1968_v5  ;;  %1815 = vmatprep.mubr.msk.f32.mxu1 %vm289_vm1, %v2292_v19  ;;  %v2012_v24 = vpack.c.bf16 %v1643_v10, %v1642_v23 }
  0x3b   : > { %1901 = vmatprep.mubr.msk.f32.mxu0 %vm289_vm1, %v2348_v50  ;;  %1973 = vmatprep.subr.bf16.mxu1 %v1972_v20 }
  0x3d   : > { %1816 = vmatmul.mubr.msk.f32.gmra.mrb[2].mxu1 %vm289_vm1, %v2325_v43  ;;  %1902 = vmatmul.mubr.msk.f32.gmra.mrb[6].mxu0 %vm289_vm1, %v237_v22 }
  0x3e   : > { %1818 = vmatprep.mubr.msk.f32.mxu1 %vm289_vm1, %v2332_v45  ;;  %1912 = vmatprep.mubr.msk.f32.mxu0 %vm289_vm1, %v2253_v59  ;;  %v813_v59 = vrot.slane %v2348_v50, 1 }
  0x3f   : > { %1975 = vmatpush3.bf16.msra.mxu1 %v1972_v20 }
  0x40   : > { %2016 = vmatprep.subr.bf16.mxu1 %v2155_v7  ;;  %v815_v36 = vsel %vm259_vm0, %v813_v59, %v814_v35 }
  0x41   : > { %1819 = vmatmul.mubr.msk.f32.gmra.mrb[4].mxu1 %vm289_vm1, %v2355_v52  ;;  %1913 = vmatmul.mubr.msk.f32.vlgmr.msra.gmra.mrb[0].mxu0 %vm289_vm1, %v2261_v0  ;;  %v1181_v0 = vrot.slane %v237_v22, 1 }
  0x42   : > { %2011 = vmatpush3.bf16.msra.mxu0 %v2008_v18  ;;  %1821 = vmatprep.mubr.msk.f32.mxu1 %vm289_vm1, %v2373_v58 }
  0x43   : > { %1915 = vmatprep.mubr.msk.f32.mxu0 %vm289_vm1, %v2282_v15  ;;  %2013 = vmatprep.subr.bf16.mxu0 %v2012_v24  ;;  %v1182_v15 = vrot.slane %v238_v34, 1 }
  0x45   : > { %1822 = vmatmul.mubr.msk.f32.gmra.mrb[6].mxu1 %vm289_vm1, %v2379_v63  ;;  %1916 = vmatmul.mubr.msk.f32.gmra.mrb[2].mxu0 %vm289_vm1, %v2306_v26 }
  0x46   : > { %1832 = vmatprep.mubr.msk.f32.mxu1 %vm289_vm1, %v2220_v32  ;;  %1918 = vmatprep.mubr.msk.f32.mxu0 %vm289_vm1, %v2317_v27  ;;  %v1183_v32 = vsel %vm259_vm0, %v1181_v0, %v1182_v15 }
  0x47   : > { %2015 = vmatpush3.bf16.msra.mxu0 %v2012_v24 }
  0x49   : > { %1833 = vmatmul.mubr.msk.f32.vlgmr.msra.gmra.mrb[0].mxu1 %vm289_vm1, %v2226_v37  ;;  %1919 = vmatmul.mubr.msk.f32.gmra.mrb[4].mxu0 %vm289_vm1, %v2345_v48 }
  0x4a   : > { %2018 = vmatpush3.bf16.msra.mxu1 %v2155_v7  ;;  %1835 = vmatprep.mubr.msk.f32.mxu1 %vm289_vm1, %v2228_v39  ;;  %v1304_v7 = vrot.slane %v237_v22, 2 }
  0x4b   : > { %1921 = vmatprep.mubr.msk.f32.mxu0 %vm289_vm1, %v815_v36  ;;  %2017 = vmatprep.subr.bf16.mxu1 %v2168_v12 }
  0x4d   : > { %1836 = vmatmul.mubr.msk.f32.gmra.mrb[2].mxu1 %vm289_vm1, %v2241_v55  ;;  %1922 = vmatmul.mubr.msk.f32.gmra.mrb[6].mxu0 %vm289_vm1, %v1183_v32 }
  0x4e   : > { %1838 = vmatprep.mubr.msk.f32.mxu1 %vm289_vm1, %v2264_v2  ;;  %1932 = vmatprep.mubr.msk.f32.mxu0 %vm289_vm1, %v2292_v19 }
  0x4f   : > { %2019 = vmatpush3.bf16.msra.mxu1 %v2168_v12  ;;  %v1305_v12 = vrot.slane %v238_v34, 2 }
  0x51   : > { %1839 = vmatmul.mubr.msk.f32.gmra.mrb[4].mxu1 %vm289_vm1, %v2267_v6  ;;  %1933 = vmatmul.mubr.msk.f32.vlgmr.msra.gmra.mrb[0].mxu0 %vm289_vm1, %v2325_v43  ;;  %v1306_v37 = vsel %vm532_vm2, %v1304_v7, %v1305_v12 }
  0x52   : > { %1841 = vmatprep.mubr.msk.f32.mxu1 %vm289_vm1, %v2294_v21  ;;  %1935 = vmatprep.mubr.msk.f32.mxu0 %vm289_vm1, %v2332_v45  ;;  %v1652_v21 = vld [vmem:[%s2563_s2] ss:$0 sm:$0xff] }
  0x55   : > { %1842 = vmatmul.mubr.msk.f32.gmra.mrb[6].mxu1 %vm289_vm1, %v2348_v50  ;;  %1936 = vmatmul.mubr.msk.f32.gmra.mrb[2].mxu0 %vm289_vm1, %v2355_v52 }
  0x56   : > { %1858 = vmatprep.mubr.msk.f32.mxu1 %vm289_vm1, %v2306_v26  ;;  %1938 = vmatprep.mubr.msk.f32.mxu0 %vm289_vm1, %v2373_v58 }
  0x59   : > { %1859 = vmatmul.mubr.msk.f32.vlgmr.msra.gmra.mrb[4].mxu1 %vm289_vm1, %v2317_v27  ;;  %1939 = vmatmul.mubr.msk.f32.gmra.mrb[4].mxu0 %vm289_vm1, %v2379_v63 }
  0x5a   : > { %1861 = vmatprep.mubr.msk.f32.mxu1 %vm289_vm1, %v2345_v48  ;;  %1941 = vmatprep.mubr.msk.f32.mxu0 %vm289_vm1, %v2395_v4 }
  0x5d   : > { %1862 = vmatmul.mubr.msk.f32.gmra.mrb[6].mxu1 %vm289_vm1, %v815_v36  ;;  %1942 = vmatmul.mubr.msk.f32.gmra.mrb[6].mxu0 %vm289_vm1, %v1306_v37 }
 0x11c   : > { %v1834_v39 = vpop.f32.mrb[0].mxu1 }
 0x11d   : > { %v765_v55 = vpop.f32.mrb[1].mxu1 }
 0x120   : > { %v1837_v2 = vpop.f32.mrb[2].mxu1 }
 0x121   : > { %v775_v6 = vpop.f32.mrb[3].mxu1 }
 0x124   : > { %v1934_v19 = vpop.f32.mrb[0].mxu0 }
 0x125   : > { %v2020_v26 = vadd.f32 %v1934_v19, %v1834_v39  ;;  %v1380_v27 = vpop.f32.mrb[1].mxu0 }
 0x126   : > { %v2021_v40 = vadd.f32 %v1380_v27, %v765_v55 }
 0x127   : > { %v1435_v41 = vadd.f32 %v2020_v26, %v1652_v21 }
 0x128   : > { %v1434_v42 = vadd.f32 %v2021_v40, %v1652_v21  ;;  %v1937_v43 = vpop.f32.mrb[2].mxu0 }
 0x129   : > { %vm1444_vm3 = vcmp.ge.f32.partialorder %v1435_v41, 0.0  ;;  %v1453_v44 = vmul.f32 %v1451_v38, %v1435_v41  ;;  %v2022_v45 = vadd.f32 %v1937_v43, %v1837_v2  ;;  %v1390_v46 = vpop.f32.mrb[3].mxu0 }
 0x12a   : > { %vm1443_vm4 = vcmp.ge.f32.partialorder %v1434_v42, 0.0  ;;  %v1452_v47 = vmul.f32 %v1451_v38, %v1434_v42  ;;  %v2023_v28 = vadd.f32 %v1390_v46, %v775_v6 }
 0x12b   : > { %v1461_v48 = vsel %vm1444_vm3, %v1435_v41, %v1453_v44  ;;  %v1437_v49 = vadd.f32 %v2022_v45, %v1652_v21 }
 0x12c   : > { %v1469_v50 = vpack.c.bf16 %v1461_v48, %v1461_v48  ;;  %v1460_v51 = vsel %vm1443_vm4, %v1434_v42, %v1452_v47  ;;  %v1436_v52 = vadd.f32 %v2023_v28, %v1652_v21  ;;  %v1860_v29 = vpop.f32.mrb[4].mxu1  ;;  %v1940_v53 = vpop.f32.mrb[4].mxu0 }
 0x12d   : > { %v1468_v54 = vpack.c.bf16 %v1460_v51, %v1460_v51  ;;  %vm1446_vm6 = vcmp.ge.f32.partialorder %v1437_v49, 0.0  ;;  %v1455_v56 = vmul.f32 %v1451_v38, %v1437_v49  ;;  %v2024_v57 = vadd.f32 %v1940_v53, %v1860_v29  ;;  %v909_v58 = vpop.f32.mrb[5].mxu1  ;;  %v1400_v60 = vpop.f32.mrb[5].mxu0 }
 0x12e   : > { %1478 = vst.msk [vmem:[%s2540_s25 + $0x4] sm:$0xf] %vm1476_vm5, %v1469_v50  ;;  %vm1445_vm7 = vcmp.ge.f32.partialorder %v1436_v52, 0.0  ;;  %v1454_v61 = vmul.f32 %v1451_v38, %v1436_v52  ;;  %v2025_v62 = vadd.f32 %v1400_v60, %v909_v58 }
 0x12f   : > { %1477 = vst.msk [vmem:[%s2540_s25] sm:$0xf] %vm1476_vm5, %v1468_v54  ;;  %v1463_v63 = vsel %vm1446_vm6, %v1437_v49, %v1455_v56  ;;  %v1439_v1 = vadd.f32 %v2024_v57, %v1652_v21 }
 0x130   : > { %v1471_v3 = vpack.c.bf16 %v1463_v63, %v1463_v63  ;;  %v1462_v4 = vsel %vm1445_vm7, %v1436_v52, %v1454_v61  ;;  %v1438_v5 = vadd.f32 %v2025_v62, %v1652_v21  ;;  %v1863_v8 = vpop.f32.mrb[6].mxu1  ;;  %v1943_v11 = vpop.f32.mrb[6].mxu0 }
 0x131   : > { %v1470_v9 = vpack.c.bf16 %v1462_v4, %v1462_v4  ;;  %vm1448_vm8 = vcmp.ge.f32.partialorder %v1439_v1, 0.0  ;;  %v1457_v13 = vmul.f32 %v1451_v38, %v1439_v1  ;;  %v2026_v14 = vadd.f32 %v1943_v11, %v1863_v8  ;;  %v919_v16 = vpop.f32.mrb[7].mxu1  ;;  %v1410_v17 = vpop.f32.mrb[7].mxu0 }
 0x132   : > { %1480 = vst.msk [vmem:[%s2540_s25 + $0xc] sm:$0xf] %vm1476_vm5, %v1471_v3  ;;  %vm1447_vm9 = vcmp.ge.f32.partialorder %v1438_v5, 0.0  ;;  %v1456_v25 = vmul.f32 %v1451_v38, %v1438_v5  ;;  %v2027_v30 = vadd.f32 %v1410_v17, %v919_v16 }
 0x133   : > { %1479 = vst.msk [vmem:[%s2540_s25 + $0x8] sm:$0xf] %vm1476_vm5, %v1470_v9  ;;  %v1465_v31 = vsel %vm1448_vm8, %v1439_v1, %v1457_v13  ;;  %v1441_v18 = vadd.f32 %v2026_v14, %v1652_v21 }
 0x134   : > { %v1473_v20 = vpack.c.bf16 %v1465_v31, %v1465_v31  ;;  %v1464_v22 = vsel %vm1447_vm9, %v1438_v5, %v1456_v25  ;;  %v1440_v23 = vadd.f32 %v2027_v30, %v1652_v21 }
 0x135   : > { %v1472_v10 = vpack.c.bf16 %v1464_v22, %v1464_v22  ;;  %vm1450_vm10 = vcmp.ge.f32.partialorder %v1441_v18, 0.0  ;;  %v1459_v24 = vmul.f32 %v1451_v38, %v1441_v18 }
 0x136   : > { %1482 = vst.msk [vmem:[%s2540_s25 + $0x14] sm:$0xf] %vm1476_vm5, %v1473_v20  ;;  %vm1449_vm11 = vcmp.ge.f32.partialorder %v1440_v23, 0.0  ;;  %v1458_v33 = vmul.f32 %v1451_v38, %v1440_v23 }
 0x137   : > { %1481 = vst.msk [vmem:[%s2540_s25 + $0x10] sm:$0xf] %vm1476_vm5, %v1472_v10  ;;  %v1467_v34 = vsel %vm1450_vm10, %v1441_v18, %v1459_v24 }
 0x138   : > { %v1475_v59 = vpack.c.bf16 %v1467_v34, %v1467_v34  ;;  %v1466_v35 = vsel %vm1449_vm11, %v1440_v23, %v1458_v33 }
 0x139   : > { %v1474_v0 = vpack.c.bf16 %v1466_v35, %v1466_v35 }
 0x13a   : > { %1484 = vst.msk [vmem:[%s2540_s25 + $0x1c] sm:$0xf] %vm1476_vm5, %v1475_v59 }
 0x13b   : > { %1483 = vst.msk [vmem:[%s2540_s25 + $0x18] sm:$0xf] %vm1476_vm5, %v1474_v0 }
 0x13c PF: > { %s15_s17 = sadd.s32 1, %s2099_s17  }
 0x13d   : > { %p12_p4 = scmp.ge.s32.totalorder %s15_s17, 4  }
 0x13f   :  { %14 = sbr.rel (!%p12_p4) target bundleno = 2 (0x2), region = 74 }

// kernel: ebrn_forward.33
= control target key start
LH: loop header
LB: loop body
LE: loop exit
PB: predicated region body
PF: predicated region fallthrough
CT: control target
= control target key end

     0   :  { %vm101_vm0 = vcmask 261120   ;;  %vm385_vm1 = vcmask 60416   ;;  %s792_s1 = inlined_call_operand.vmem [shape: bf16[32,8], index: 1, kind: input, shape index: {}]   ;;  %s793_s0 = inlined_call_operand.vmem [shape: bf16[128,32], index: 0, kind: input, shape index: {}]   ;;  %s794_s4 = inlined_call_operand.vmem [shape: bf16[128,8], index: 4, kind: input, shape index: {}]   ;;  %s795_s3 = inlined_call_operand.<no memory space> [shape: f32[1], index: 3, kind: input, shape index: {}]   ;;  %s796_s2 = inlined_call_operand.vmem [shape: f32[1,8], index: 2, kind: input, shape index: {}]   ;;  %s797_s5 = inlined_call_operand.vmem [shape: bf16[128,8], index: 5, kind: output, shape index: {}]  }
   0x1   :  { %v530_v0 = vld [vmem:[%s792_s1] sm:$0xff]   ;;  %v531_v1 = vld [vmem:[%s792_s1 + $0x8] sm:$0xff]   ;;  %v536_v6 = vld [vmem:[%s793_s0 + $0x10] sm:$0xff]   ;;  %v636_v15 = vstv %s795_s3 }
   0x2   :  { %506 = vmatprep.subr.bf16.mxu0 %v530_v0  ;;  %526 = vmatprep.subr.bf16.mxu1 %v530_v0  ;;  %v532_v2 = vld [vmem:[%s793_s0] sm:$0xff]   ;;  %v534_v4 = vld [vmem:[%s793_s0 + $0x8] sm:$0xff]   ;;  %v537_v7 = vld [vmem:[%s793_s0 + $0x30] sm:$0xff]  }
   0x3   :  { %507 = vmatpush3.bf16.msra.mxu0 %v530_v0  ;;  %528 = vmatpush3.bf16.msra.mxu1 %v530_v0  ;;  %v533_v3 = vld [vmem:[%s793_s0 + $0x20] sm:$0xff]   ;;  %v535_v5 = vld [vmem:[%s793_s0 + $0x28] sm:$0xff]   ;;  %v538_v8 = vld [vmem:[%s793_s0 + $0x18] sm:$0xff]  }
   0x4   :  { %508 = vmatprep.subr.bf16.mxu0 %v531_v1  ;;  %527 = vmatprep.subr.bf16.mxu1 %v531_v1  ;;  %v539_v9 = vld [vmem:[%s793_s0 + $0x38] sm:$0xff]   ;;  %v611_v10 = vld [vmem:[%s794_s4 + $0x8] sm:$0xff]   ;;  %v621_v12 = vld [vmem:[%s794_s4] sm:$0xff]  }
   0x5   :  { %510 = vmatprep.mubr.msk.bf16.mxu0 %vm101_vm0, %v532_v2  ;;  %518 = vmatprep.mubr.msk.bf16.mxu1 %vm101_vm0, %v533_v3  ;;  %v616_v11 = vld [vmem:[%s794_s4 + $0x28] sm:$0xff]   ;;  %v626_v13 = vld [vmem:[%s794_s4 + $0x20] sm:$0xff]   ;;  %v631_v14 = vld [vmem:[%s794_s4 + $0x18] sm:$0xff]   ;;  %v463_v20 = vunpack.c.l.bf16 %v611_v10  ;;  %v459_v22 = vunpack.c.l.bf16 %v621_v12  ;;  %v464_v24 = vunpack.c.h.bf16 %v611_v10  ;;  %v460_v26 = vunpack.c.h.bf16 %v621_v12 }
   0x6   :  { %v641_v16 = vld [vmem:[%s794_s4 + $0x38] sm:$0xff]   ;;  %v646_v17 = vld [vmem:[%s794_s4 + $0x10] sm:$0xff]   ;;  %v656_v19 = vld [vmem:[%s796_s2] ss:$0 sm:$0xff]  ;;  %v479_v21 = vunpack.c.l.bf16 %v616_v11  ;;  %v475_v23 = vunpack.c.l.bf16 %v626_v13  ;;  %v480_v25 = vunpack.c.h.bf16 %v616_v11  ;;  %v476_v27 = vunpack.c.h.bf16 %v626_v13 }
   0x7   :  { %509 = vmatpush3.bf16.msra.mxu0 %v531_v1  ;;  %529 = vmatpush3.bf16.msra.mxu1 %v531_v1  ;;  %v651_v18 = vld [vmem:[%s794_s4 + $0x30] sm:$0xff]   ;;  %v471_v30 = vunpack.c.l.bf16 %v631_v14  ;;  %v487_v31 = vunpack.c.l.bf16 %v641_v16  ;;  %v467_v32 = vunpack.c.l.bf16 %v646_v17  ;;  %v472_v38 = vunpack.c.h.bf16 %v631_v14 }
   0x8   :  { %v483_v33 = vunpack.c.l.bf16 %v651_v18  ;;  %v488_v39 = vunpack.c.h.bf16 %v641_v16  ;;  %v468_v44 = vunpack.c.h.bf16 %v646_v17  ;;  %v484_v45 = vunpack.c.h.bf16 %v651_v18 }
   0xa   :  { %511 = vmatmul.mubr.msk.bf16.vlgmr.msra.gmra.mrb[0].mxu0 %vm101_vm0, %v534_v4  ;;  %519 = vmatmul.mubr.msk.bf16.vlgmr.msra.gmra.mrb[0].mxu1 %vm101_vm0, %v535_v5 }
   0xb   :  { %514 = vmatprep.mubr.msk.bf16.mxu0 %vm101_vm0, %v536_v6  ;;  %522 = vmatprep.mubr.msk.bf16.mxu1 %vm101_vm0, %v537_v7 }
  0x12   :  { %515 = vmatmul.mubr.msk.bf16.gmra.mrb[4].mxu0 %vm101_vm0, %v538_v8  ;;  %523 = vmatmul.mubr.msk.bf16.gmra.mrb[4].mxu1 %vm101_vm0, %v539_v9 }
  0xdd   :  { %v512_v28 = vpop.f32.mrb[0].mxu0  ;;  %v520_v29 = vpop.f32.mrb[0].mxu1 }
  0xde   :  { %v169_v34 = vadd.f32 %v512_v28, %v656_v19  ;;  %v201_v35 = vadd.f32 %v520_v29, %v656_v19  ;;  %v160_v36 = vpop.f32.mrb[1].mxu0  ;;  %v192_v37 = vpop.f32.mrb[1].mxu1 }
  0xdf   :  { %v161_v40 = vadd.f32 %v656_v19, %v160_v36  ;;  %v193_v41 = vadd.f32 %v656_v19, %v192_v37  ;;  %v513_v42 = vpop.f32.mrb[2].mxu0  ;;  %v521_v43 = vpop.f32.mrb[2].mxu1 }
  0xe0   :  { %vm226_vm2 = vcmp.ge.f32.partialorder %v169_v34, 0.0  ;;  %v243_v46 = vmul.f32 %v636_v15, %v169_v34  ;;  %vm234_vm3 = vcmp.ge.f32.partialorder %v201_v35, 0.0  ;;  %v251_v47 = vmul.f32 %v636_v15, %v201_v35  ;;  %v163_v48 = vpop.f32.mrb[3].mxu0  ;;  %v195_v49 = vpop.f32.mrb[3].mxu1 }
  0xe1   :  { %vm224_vm4 = vcmp.ge.f32.partialorder %v161_v40, 0.0  ;;  %v241_v50 = vmul.f32 %v636_v15, %v161_v40  ;;  %vm232_vm5 = vcmp.ge.f32.partialorder %v193_v41, 0.0  ;;  %v249_v51 = vmul.f32 %v636_v15, %v193_v41 }
  0xe2   :  { %v259_v52 = vsel %vm226_vm2, %v169_v34, %v243_v46  ;;  %v267_v53 = vsel %vm234_vm3, %v201_v35, %v251_v47  ;;  %v172_v54 = vadd.f32 %v513_v42, %v656_v19  ;;  %v204_v55 = vadd.f32 %v521_v43, %v656_v19 }
  0xe3   :  { %v307_v56 = vsub.f32 %v463_v20, %v259_v52  ;;  %v315_v57 = vsub.f32 %v479_v21, %v267_v53  ;;  %v257_v58 = vsel %vm224_vm4, %v161_v40, %v241_v50  ;;  %v265_v59 = vsel %vm232_vm5, %v193_v41, %v249_v51 }
  0xe4   :  { %v305_v60 = vsub.f32 %v459_v22, %v257_v58  ;;  %v313_v61 = vsub.f32 %v475_v23, %v265_v59  ;;  %vm227_vm6 = vcmp.ge.f32.partialorder %v172_v54, 0.0  ;;  %v244_v62 = vmul.f32 %v636_v15, %v172_v54 }
  0xe5   :  { %v443_v63 = vpack.c.bf16 %v307_v56, %v307_v56  ;;  %v451_v0 = vpack.c.bf16 %v315_v57, %v315_v57  ;;  %vm235_vm7 = vcmp.ge.f32.partialorder %v204_v55, 0.0  ;;  %v252_v1 = vmul.f32 %v636_v15, %v204_v55  ;;  %v516_v2 = vpop.f32.mrb[4].mxu0  ;;  %v524_v3 = vpop.f32.mrb[4].mxu1 }
  0xe6   :  { %v441_v4 = vpack.c.bf16 %v305_v60, %v305_v60  ;;  %v449_v5 = vpack.c.bf16 %v313_v61, %v313_v61  ;;  %v260_v6 = vsel %vm227_vm6, %v172_v54, %v244_v62  ;;  %v164_v7 = vadd.f32 %v656_v19, %v163_v48  ;;  %v176_v8 = vpop.f32.mrb[5].mxu0  ;;  %v208_v9 = vpop.f32.mrb[5].mxu1 }
  0xe7   :  { %388 = vst.msk [vmem:[%s797_s5 + $0x8] sm:$0xf] %vm385_vm1, %v443_v63  ;;  %396 = vst.msk [vmem:[%s797_s5 + $0x28] sm:$0xf] %vm385_vm1, %v451_v0  ;;  %v308_v10 = vsub.f32 %v464_v24, %v260_v6  ;;  %v268_v20 = vsel %vm235_vm7, %v204_v55, %v252_v1  ;;  %v196_v21 = vadd.f32 %v656_v19, %v195_v49  ;;  %v517_v23 = vpop.f32.mrb[6].mxu0  ;;  %v525_v28 = vpop.f32.mrb[6].mxu1 }
  0xe8   :  { %v185_v22 = vadd.f32 %v516_v2, %v656_v19  ;;  %386 = vst.msk [vmem:[%s797_s5] sm:$0xf] %vm385_vm1, %v441_v4  ;;  %394 = vst.msk [vmem:[%s797_s5 + $0x20] sm:$0xf] %vm385_vm1, %v449_v5  ;;  %v316_v24 = vsub.f32 %v480_v25, %v268_v20  ;;  %vm225_vm8 = vcmp.ge.f32.partialorder %v164_v7, 0.0  ;;  %v242_v29 = vmul.f32 %v636_v15, %v164_v7  ;;  %v179_v35 = vpop.f32.mrb[7].mxu0 }
  0xe9   :  { %v217_v34 = vadd.f32 %v524_v3, %v656_v19  ;;  %v211_v36 = vpop.f32.mrb[7].mxu1  ;;  %v444_v37 = vpack.c.bf16 %v308_v10, %v308_v10  ;;  %vm233_vm9 = vcmp.ge.f32.partialorder %v196_v21, 0.0  ;;  %v250_v40 = vmul.f32 %v636_v15, %v196_v21 }
  0xea   :  { %vm230_vm10 = vcmp.ge.f32.partialorder %v185_v22, 0.0  ;;  %v452_v41 = vpack.c.bf16 %v316_v24, %v316_v24  ;;  %v258_v42 = vsel %vm225_vm8, %v164_v7, %v242_v29  ;;  %v247_v43 = vmul.f32 %v636_v15, %v185_v22 }
  0xeb   :  { %vm238_vm11 = vcmp.ge.f32.partialorder %v217_v34, 0.0  ;;  %389 = vst.msk [vmem:[%s797_s5 + $0xc] sm:$0xf] %vm385_vm1, %v444_v37  ;;  %v306_v11 = vsub.f32 %v460_v26, %v258_v42  ;;  %v266_v25 = vsel %vm233_vm9, %v196_v21, %v250_v40  ;;  %v255_v46 = vmul.f32 %v636_v15, %v217_v34 }
  0xec   :  { %v177_v47 = vadd.f32 %v656_v19, %v176_v8  ;;  %397 = vst.msk [vmem:[%s797_s5 + $0x2c] sm:$0xf] %vm385_vm1, %v452_v41  ;;  %v314_v48 = vsub.f32 %v476_v27, %v266_v25  ;;  %v263_v49 = vsel %vm230_vm10, %v185_v22, %v247_v43  ;;  %v209_v50 = vadd.f32 %v656_v19, %v208_v9 }
  0xed   :  { %v188_v51 = vadd.f32 %v517_v23, %v656_v19  ;;  %v442_v12 = vpack.c.bf16 %v306_v11, %v306_v11  ;;  %v311_v26 = vsub.f32 %v471_v30, %v263_v49  ;;  %v271_v52 = vsel %vm238_vm11, %v217_v34, %v255_v46 }
  0xee   :  { %vm228_vm12 = vcmp.ge.f32.partialorder %v177_v47, 0.0  ;;  %v450_v53 = vpack.c.bf16 %v314_v48, %v314_v48  ;;  %v319_v54 = vsub.f32 %v487_v31, %v271_v52  ;;  %v245_v55 = vmul.f32 %v636_v15, %v177_v47 }
  0xef   :  { %vm236_vm13 = vcmp.ge.f32.partialorder %v209_v50, 0.0  ;;  %387 = vst.msk [vmem:[%s797_s5 + $0x4] sm:$0xf] %vm385_vm1, %v442_v12  ;;  %v447_v13 = vpack.c.bf16 %v311_v26, %v311_v26  ;;  %v253_v27 = vmul.f32 %v636_v15, %v209_v50  ;;  %vm231_vm14 = vcmp.ge.f32.partialorder %v188_v51, 0.0 }
  0xf0   :  { %v248_v30 = vmul.f32 %v636_v15, %v188_v51  ;;  %395 = vst.msk [vmem:[%s797_s5 + $0x24] sm:$0xf] %vm385_vm1, %v450_v53  ;;  %v455_v31 = vpack.c.bf16 %v319_v54, %v319_v54  ;;  %v261_v56 = vsel %vm228_vm12, %v177_v47, %v245_v55  ;;  %v220_v57 = vadd.f32 %v525_v28, %v656_v19 }
  0xf1   :  { %v180_v58 = vadd.f32 %v656_v19, %v179_v35  ;;  %392 = vst.msk [vmem:[%s797_s5 + $0x18] sm:$0xf] %vm385_vm1, %v447_v13  ;;  %v309_v59 = vsub.f32 %v467_v32, %v261_v56  ;;  %v269_v60 = vsel %vm236_vm13, %v209_v50, %v253_v27  ;;  %v212_v62 = vadd.f32 %v656_v19, %v211_v36 }
  0xf2   :  { %v264_v61 = vsel %vm231_vm14, %v188_v51, %v248_v30  ;;  %400 = vst.msk [vmem:[%s797_s5 + $0x38] sm:$0xf] %vm385_vm1, %v455_v31  ;;  %v317_v63 = vsub.f32 %v483_v33, %v269_v60  ;;  %vm239_vm15 = vcmp.ge.f32.partialorder %v220_v57, 0.0  ;;  %v256_v1 = vmul.f32 %v636_v15, %v220_v57 }
  0xf3   :  { %v312_v0 = vsub.f32 %v472_v38, %v264_v61  ;;  %v445_v2 = vpack.c.bf16 %v309_v59, %v309_v59  ;;  %vm229_vm0 = vcmp.ge.f32.partialorder %v180_v58, 0.0  ;;  %v246_v32 = vmul.f32 %v636_v15, %v180_v58 }
  0xf4   :  { %vm237_vm2 = vcmp.ge.f32.partialorder %v212_v62, 0.0  ;;  %v453_v19 = vpack.c.bf16 %v317_v63, %v317_v63  ;;  %v272_v4 = vsel %vm239_vm15, %v220_v57, %v256_v1  ;;  %v254_v5 = vmul.f32 %v636_v15, %v212_v62 }
  0xf5   :  { %v448_v3 = vpack.c.bf16 %v312_v0, %v312_v0  ;;  %390 = vst.msk [vmem:[%s797_s5 + $0x10] sm:$0xf] %vm385_vm1, %v445_v2  ;;  %v320_v14 = vsub.f32 %v488_v39, %v272_v4  ;;  %v262_v33 = vsel %vm229_vm0, %v180_v58, %v246_v32 }
  0xf6   :  { %398 = vst.msk [vmem:[%s797_s5 + $0x30] sm:$0xf] %vm385_vm1, %v453_v19  ;;  %v310_v15 = vsub.f32 %v468_v44, %v262_v33  ;;  %v270_v38 = vsel %vm237_vm2, %v212_v62, %v254_v5 }
  0xf7   :  { %393 = vst.msk [vmem:[%s797_s5 + $0x1c] sm:$0xf] %vm385_vm1, %v448_v3  ;;  %v456_v6 = vpack.c.bf16 %v320_v14, %v320_v14  ;;  %v318_v16 = vsub.f32 %v484_v45, %v270_v38 }
  0xf8   :  { %v446_v39 = vpack.c.bf16 %v310_v15, %v310_v15 }
  0xf9   :  { %401 = vst.msk [vmem:[%s797_s5 + $0x3c] sm:$0xf] %vm385_vm1, %v456_v6  ;;  %v454_v7 = vpack.c.bf16 %v318_v16, %v318_v16 }
  0xfa   :  { %391 = vst.msk [vmem:[%s797_s5 + $0x14] sm:$0xf] %vm385_vm1, %v446_v39 }
  0xfb   :  { %399 = vst.msk [vmem:[%s797_s5 + $0x34] sm:$0xf] %vm385_vm1, %v454_v7 }

// kernel: ebrn_forward.36
= control target key start
LH: loop header
LB: loop body
LE: loop exit
PB: predicated region body
PF: predicated region fallthrough
CT: control target
= control target key end

     0   :  { %s2033_s20 = smov 0   ;;  %s2391_s0 = inlined_call_operand.vmem [shape: bf16[2,10,10,8], index: 0, kind: input, shape index: {}]   ;;  %s2392_s1 = inlined_call_operand.vmem [shape: f32[9,8,8], index: 1, kind: input, shape index: {}]   ;;  %s2393_s2 = inlined_call_operand.vmem [shape: f32[1,8], index: 2, kind: input, shape index: {}]   ;;  %s2394_s3 = inlined_call_operand.<no memory space> [shape: f32[1], index: 3, kind: input, shape index: {}]   ;;  %s2395_s4 = inlined_call_operand.vmem [shape: bf16[2,8,8,8], index: 4, kind: input, shape index: {}]   ;;  %s2396_s5 = inlined_call_operand.vmem [shape: bf16[2,8,8,8], index: 5, kind: output, shape index: {}]  }
   0x1   :  { %10 = sst [smem:[#allocation2]] %s2394_s3 }
   0x2 LB: > { %s1596_s21 = sadd.s32 4294967295, %s1998_s20   ;;  %p1600_p0 = scmp.ge.s32.totalorder %s1998_s20, 1  ;;  %s1998_s20 = sphi %s2033_s20, %s16_s20  }
   0x3   : > { %p198_p1 = scmp.lt.s32.totalorder %s1998_s20, 3 }
   0x5   : > { %p199_p2 = pnand %p1600_p0, %p198_p1 }
   0x6   : > { %v1606_v0 = vld [vmem:[%s2392_s1 + $0x8] sm:$0xff] (!%p199_p2)  ;;  %v2047_v1 = vld [vmem:[%s2392_s1 + $0x20] sm:$0xff] (!%p199_p2)  ;;  %p231_p3 = scmp.lt.s32.totalorder (!%p199_p2), %s1596_s21, 1  ;;  %vm303_vm0 = vcmask (!%p199_p2), 1046528   ;;  %vm330_vm1 = vcmask (!%p199_p2), 64512   ;;  %vm573_vm2 = vcmask (!%p199_p2), 1045504  }
   0x7   : > { %202 = sbr.rel (%p199_p2) target bundleno = 318 (0x13e), region = 40  ;;  %v286_v2 = vld [vmem:[%s2392_s1] sm:$0xff] (!%p199_p2)  ;;  %1791 = vmatprep.subr.mxu1 (!%p199_p2), %v1606_v0  ;;  %1847 = vmatprep.subr.mxu0 (!%p199_p2), %v2047_v1  ;;  %v1650_v3 = vld [vmem:[%s2392_s1 + $0x28] sm:$0xff] (!%p199_p2)  ;;  %v1659_v41 = vld [vmem:[%s2392_s1 + $0x30] sm:$0xff] (!%p199_p2)  ;;  %s1462_s18 = sld [smem:[#allocation2]] (!%p199_p2)  ;;  %vm1520_vm5 = vcmask (!%p199_p2), 60416  }
   0x8   : > { %1792 = vmatpush3.msra.mxu1 (!%p199_p2), %v1606_v0  ;;  %1848 = vmatpush3.msra.mxu0 (!%p199_p2), %v2047_v1  ;;  %v2118_v44 = vld [vmem:[%s2392_s1 + $0x10] sm:$0xff] (!%p199_p2) }
   0x9   : > { %1805 = vmatprep.subr.mxu1 (!%p199_p2), %v286_v2  ;;  %1861 = vmatprep.subr.mxu0 (!%p199_p2), %v1650_v3 }
   0xe   : > { %s2398_s21 = smov (!%p231_p3, %s1596_s21), 1 }
   0xf   : > { %s1983_s29 = smul.u32 80, %s2398_s21  ;;  %s1689_s19 = sshll.u32 %s2398_s21, 5 }
  0x10   : > { %s2336_s3 = scalar_lea.vmem %s2395_s4, %s1689_s19  ;;  %s2359_s28 = scalar_lea.vmem %s2396_s5, %s1689_s19 }
  0x11   : > { %s2063_s7 = scalar_lea.vmem %s2391_s0, %s1983_s29 }
  0x12   : > { %v246_v4 = vld [vmem:[%s2063_s7] ss:$8 sps:$4 sm:$0xff]   ;;  %v2067_v5 = vld [vmem:[%s2063_s7 + $0x4] sm:$0x1]  ;;  %v249_v6 = vld [vmem:[%s2063_s7 + $0xc] sm:$0x1] }
  0x13   : > { %v2070_v7 = vunpack.c.l.bf16 %v246_v4  ;;  %v267_v8 = vunpack.c.l.bf16 %v2067_v5  ;;  %v2073_v9 = vunpack.c.h.bf16 %v246_v4  ;;  %v269_v10 = vunpack.c.l.bf16 %v249_v6  ;;  %v250_v11 = vld [vmem:[%s2063_s7 + $0x10] ss:$8 sps:$4 sm:$0xff]   ;;  %v251_v12 = vld [vmem:[%s2063_s7 + $0x14] sm:$0x1]  ;;  %v253_v13 = vld [vmem:[%s2063_s7 + $0x1c] sm:$0x1] }
  0x14   : > { %v2078_v14 = vunpack.c.l.bf16 %v250_v11  ;;  %v271_v15 = vunpack.c.l.bf16 %v251_v12  ;;  %v2080_v16 = vunpack.c.h.bf16 %v250_v11  ;;  %v273_v17 = vunpack.c.l.bf16 %v253_v13  ;;  %v254_v18 = vld [vmem:[%s2063_s7 + $0x20] ss:$8 sps:$4 sm:$0xff]   ;;  %v255_v23 = vld [vmem:[%s2063_s7 + $0x24] sm:$0x1]  ;;  %v257_v28 = vld [vmem:[%s2063_s7 + $0x2c] sm:$0x1] }
  0x15   : > { %v304_v19 = vrot.slane %v2070_v7, 1  ;;  %v305_v20 = vrot.slane %v267_v8, 1  ;;  %v307_v21 = vrot.slane %v2073_v9, 1  ;;  %v308_v22 = vrot.slane %v269_v10, 1  ;;  %v258_v33 = vld [vmem:[%s2063_s7 + $0x30] ss:$8 sps:$4 sm:$0xff]  }
  0x16   : > { %v310_v24 = vrot.slane %v2078_v14, 1  ;;  %v311_v25 = vrot.slane %v271_v15, 1  ;;  %v581_v26 = vrot.slane %v271_v15, 2  ;;  %v313_v27 = vrot.slane %v2080_v16, 1  ;;  %v259_v38 = vld [vmem:[%s2063_s7 + $0x34] sm:$0x1] }
  0x17   : > { %v306_v29 = vsel %vm303_vm0, %v304_v19, %v305_v20  ;;  %v309_v30 = vsel %vm303_vm0, %v307_v21, %v308_v22  ;;  %v314_v31 = vrot.slane %v273_v17, 1  ;;  %v2093_v32 = vunpack.c.l.bf16 %v254_v18  ;;  %v261_v48 = vld [vmem:[%s2063_s7 + $0x3c] sm:$0x1]  ;;  %v2162_v11 = vld [vmem:[%s2063_s7 + $0x44] sm:$0x1] }
  0x18   : > { %1793 = vmatprep.mubr.msk.f32.mxu1 %vm330_vm1, %v306_v29  ;;  %1849 = vmatprep.mubr.msk.f32.mxu0 %vm330_vm1, %v309_v30  ;;  %v2099_v34 = vsel %vm303_vm0, %v310_v24, %v311_v25  ;;  %v275_v35 = vunpack.c.l.bf16 %v255_v23  ;;  %v577_v36 = vrot.slane %v2073_v9, 2  ;;  %v578_v37 = vrot.slane %v269_v10, 2  ;;  %v1668_v13 = vld [vmem:[%s2392_s1 + $0x38] sm:$0xff] }
  0x19   : > { %1794 = vmatmul.mubr.msk.f32.vlgmr.msra.gmra.mrb[0].mxu1 %vm330_vm1, %v309_v30  ;;  %1850 = vmatmul.mubr.msk.f32.vlgmr.msra.gmra.mrb[0].mxu0 %vm330_vm1, %v2099_v34  ;;  %v2107_v39 = vsel %vm303_vm0, %v313_v27, %v314_v31  ;;  %v316_v40 = vrot.slane %v2093_v32, 1  ;;  %v2113_v42 = vunpack.c.h.bf16 %v254_v18  ;;  %v277_v43 = vunpack.c.l.bf16 %v257_v28  ;;  %v1632_v29 = vld [vmem:[%s2392_s1 + $0x18] sm:$0xff] }
  0x1a   : > { %1806 = vmatpush3.msra.mxu1 %v286_v2  ;;  %1862 = vmatpush3.msra.mxu0 %v1650_v3  ;;  %v317_v45 = vrot.slane %v275_v35, 1  ;;  %v580_v46 = vrot.slane %v2078_v14, 2  ;;  %v2121_v47 = vunpack.c.l.bf16 %v258_v33  ;;  %v2129_v49 = vsel %vm573_vm2, %v577_v36, %v578_v37  ;;  %v262_v2 = vld [vmem:[%s2063_s7 + $0x40] ss:$8 sps:$4 sm:$0xff]  }
  0x1b   : > { %1796 = vmatprep.mubr.msk.f32.mxu1 %vm330_vm1, %v2099_v34  ;;  %1852 = vmatprep.mubr.msk.f32.mxu0 %vm330_vm1, %v2107_v39  ;;  %v319_v50 = vrot.slane %v2113_v42, 1  ;;  %v320_v51 = vrot.slane %v277_v43, 1  ;;  %v279_v52 = vunpack.c.l.bf16 %v259_v38  ;;  %v583_v55 = vrot.slane %v2080_v16, 2 }
  0x1c   : > { %v2133_v53 = vsel %vm303_vm0, %v316_v40, %v317_v45  ;;  %1875 = vmatprep.subr.mxu0 %v1659_v41  ;;  %v322_v54 = vrot.slane %v2121_v47, 1  ;;  %v584_v56 = vrot.slane %v273_v17, 2  ;;  %1819 = vmatprep.subr.mxu1 %v2118_v44  ;;  %v2143_v57 = vsel %vm573_vm2, %v580_v46, %v581_v26  ;;  %v2341_v45 = vld [vmem:[%s2393_s2] ss:$0 sm:$0xff] }
  0x1d   : > { %1797 = vmatmul.mubr.msk.f32.gmra.mrb[2].mxu1 %vm330_vm1, %v2107_v39  ;;  %1853 = vmatmul.mubr.msk.f32.gmra.mrb[2].mxu0 %vm330_vm1, %v2133_v53  ;;  %v323_v58 = vrot.slane %v279_v52, 1  ;;  %v2145_v59 = vunpack.c.h.bf16 %v258_v33  ;;  %v281_v60 = vunpack.c.l.bf16 %v261_v48  ;;  %v2152_v61 = vsel %vm303_vm0, %v319_v50, %v320_v51 }
  0x1e   : > { %1799 = vmatprep.mubr.msk.f32.mxu1 %vm330_vm1, %v2133_v53  ;;  %1863 = vmatprep.mubr.msk.f32.mxu0 %vm330_vm1, %v2129_v49  ;;  %v586_v62 = vrot.slane %v2093_v32, 2  ;;  %v587_v63 = vrot.slane %v275_v35, 2  ;;  %v589_v0 = vrot.slane %v2113_v42, 2  ;;  %v590_v10 = vrot.slane %v277_v43, 2  ;;  %v1677_v35 = vld [vmem:[%s2392_s1 + $0x40] sm:$0xff] }
  0x1f   : > { %v2158_v3 = vsel %vm303_vm0, %v322_v54, %v323_v58  ;;  %v325_v4 = vrot.slane %v2145_v59, 1  ;;  %v326_v6 = vrot.slane %v281_v60, 1  ;;  %v2165_v12 = vsel %vm573_vm2, %v583_v55, %v584_v56  ;;  %v1707_v55 = vld [vmem:[%s2336_s3 + $0x8] sm:$0xff]  }
  0x20   : > { %v2175_v15 = vsel %vm573_vm2, %v586_v62, %v587_v63  ;;  %v592_v17 = vrot.slane %v2121_v47, 2  ;;  %v593_v19 = vrot.slane %v279_v52, 2  ;;  %v2183_v20 = vunpack.c.l.bf16 %v262_v2 }
  0x21   : > { %1800 = vmatmul.mubr.msk.f32.gmra.mrb[4].mxu1 %vm330_vm1, %v2152_v61  ;;  %1864 = vmatmul.mubr.msk.f32.vlgmr.msra.gmra.mrb[0].mxu0 %vm330_vm1, %v2143_v57  ;;  %v2181_v18 = vsel %vm303_vm0, %v325_v4, %v326_v6  ;;  %v283_v21 = vunpack.c.l.bf16 %v2162_v11  ;;  %v2189_v22 = vsel %vm573_vm2, %v589_v0, %v590_v10  ;;  %v595_v23 = vrot.slane %v2145_v59, 2 }
  0x22   : > { %1876 = vmatpush3.msra.mxu0 %v1659_v41  ;;  %1802 = vmatprep.mubr.msk.f32.mxu1 %vm330_vm1, %v2158_v3  ;;  %v596_v24 = vrot.slane %v281_v60, 2  ;;  %v2201_v25 = vsel %vm573_vm2, %v592_v17, %v593_v19  ;;  %v968_v26 = vrot.slane %v2183_v20, 2  ;;  %v574_v31 = vrot.slane %v2070_v7, 2 }
  0x23   : > { %1866 = vmatprep.mubr.msk.f32.mxu0 %vm330_vm1, %v2165_v12  ;;  %1889 = vmatprep.subr.mxu0 %v1668_v13  ;;  %v969_v27 = vrot.slane %v283_v21, 2  ;;  %v575_v33 = vrot.slane %v267_v8, 2  ;;  %v265_v8 = vld [vmem:[%s2063_s7 + $0x4c] sm:$0x1]  ;;  %v848_v37 = vrot.slane %v2183_v20, 1  ;;  %v849_v38 = vrot.slane %v283_v21, 1 }
  0x24   : > { %v2205_v28 = vsel %vm573_vm2, %v595_v23, %v596_v24  ;;  %v285_v36 = vunpack.c.l.bf16 %v265_v8  ;;  %v1698_v0 = vunpack.c.h.bf16 %v1707_v55  ;;  %v1697_v6 = vunpack.c.l.bf16 %v1707_v55  ;;  %v1709_v8 = vld [vmem:[%s2336_s3 + $0x18] sm:$0xff]  }
  0x25   : > { %1803 = vmatmul.mubr.msk.f32.gmra.mrb[6].mxu1 %vm330_vm1, %v2181_v18  ;;  %1867 = vmatmul.mubr.msk.f32.gmra.mrb[2].mxu0 %vm330_vm1, %v2175_v15  ;;  %v2218_v30 = vsel %vm573_vm2, %v968_v26, %v969_v27  ;;  %v576_v5 = vsel %vm573_vm2, %v574_v31, %v575_v33  ;;  %v850_v40 = vsel %vm303_vm0, %v848_v37, %v849_v38 }
  0x26   : > { %1807 = vmatprep.mubr.msk.f32.mxu1 %vm330_vm1, %v2070_v7  ;;  %1869 = vmatprep.mubr.msk.f32.mxu0 %vm330_vm1, %v2189_v22  ;;  %v284_v7 = vunpack.c.h.bf16 %v262_v2 }
  0x29   : > { %1808 = vmatmul.mubr.msk.f32.vlgmr.msra.gmra.mrb[0].mxu1 %vm330_vm1, %v2073_v9  ;;  %1870 = vmatmul.mubr.msk.f32.gmra.mrb[4].mxu0 %vm330_vm1, %v2201_v25 }
  0x2a   : > { %1820 = vmatpush3.msra.mxu1 %v2118_v44  ;;  %1810 = vmatprep.mubr.msk.f32.mxu1 %vm330_vm1, %v2078_v14 }
  0x2b   : > { %1872 = vmatprep.mubr.msk.f32.mxu0 %vm330_vm1, %v2205_v28  ;;  %1833 = vmatprep.subr.mxu1 %v1632_v29 }
  0x2d   : > { %1811 = vmatmul.mubr.msk.f32.gmra.mrb[2].mxu1 %vm330_vm1, %v2080_v16  ;;  %1873 = vmatmul.mubr.msk.f32.gmra.mrb[6].mxu0 %vm330_vm1, %v2218_v30 }
  0x2e   : > { %1813 = vmatprep.mubr.msk.f32.mxu1 %vm330_vm1, %v2093_v32  ;;  %1877 = vmatprep.mubr.msk.f32.mxu0 %vm330_vm1, %v2078_v14 }
  0x31   : > { %1814 = vmatmul.mubr.msk.f32.gmra.mrb[4].mxu1 %vm330_vm1, %v2113_v42  ;;  %1878 = vmatmul.mubr.msk.f32.vlgmr.msra.gmra.mrb[0].mxu0 %vm330_vm1, %v2080_v16 }
  0x32   : > { %1890 = vmatpush3.msra.mxu0 %v1668_v13  ;;  %1816 = vmatprep.mubr.msk.f32.mxu1 %vm330_vm1, %v2121_v47 }
  0x33   : > { %1880 = vmatprep.mubr.msk.f32.mxu0 %vm330_vm1, %v2093_v32  ;;  %1903 = vmatprep.subr.mxu0 %v1677_v35 }
  0x35   : > { %1817 = vmatmul.mubr.msk.f32.gmra.mrb[6].mxu1 %vm330_vm1, %v2145_v59  ;;  %1881 = vmatmul.mubr.msk.f32.gmra.mrb[2].mxu0 %vm330_vm1, %v2113_v42 }
  0x36   : > { %1821 = vmatprep.mubr.msk.f32.mxu1 %vm330_vm1, %v576_v5  ;;  %1883 = vmatprep.mubr.msk.f32.mxu0 %vm330_vm1, %v2121_v47 }
  0x39   : > { %1822 = vmatmul.mubr.msk.f32.vlgmr.msra.gmra.mrb[0].mxu1 %vm330_vm1, %v2129_v49  ;;  %1884 = vmatmul.mubr.msk.f32.gmra.mrb[4].mxu0 %vm330_vm1, %v2145_v59  ;;  %v2344_v49 = vstv %s1462_s18 }
  0x3a   : > { %1834 = vmatpush3.msra.mxu1 %v1632_v29  ;;  %1824 = vmatprep.mubr.msk.f32.mxu1 %vm330_vm1, %v2143_v57 }
  0x3b   : > { %1886 = vmatprep.mubr.msk.f32.mxu0 %vm330_vm1, %v2183_v20  ;;  %1917 = vmatprep.subr.mxu1 %v2047_v1 }
  0x3d   : > { %1825 = vmatmul.mubr.msk.f32.gmra.mrb[2].mxu1 %vm330_vm1, %v2165_v12  ;;  %1887 = vmatmul.mubr.msk.f32.gmra.mrb[6].mxu0 %vm330_vm1, %v284_v7 }
  0x3e   : > { %1827 = vmatprep.mubr.msk.f32.mxu1 %vm330_vm1, %v2175_v15  ;;  %1891 = vmatprep.mubr.msk.f32.mxu0 %vm330_vm1, %v2099_v34  ;;  %v1207_v34 = vrot.slane %v284_v7, 1 }
  0x41   : > { %1828 = vmatmul.mubr.msk.f32.gmra.mrb[4].mxu1 %vm330_vm1, %v2189_v22  ;;  %1892 = vmatmul.mubr.msk.f32.vlgmr.msra.gmra.mrb[0].mxu0 %vm330_vm1, %v2107_v39  ;;  %v1208_v39 = vrot.slane %v285_v36, 1 }
  0x42   : > { %1904 = vmatpush3.msra.mxu0 %v1677_v35  ;;  %1830 = vmatprep.mubr.msk.f32.mxu1 %vm330_vm1, %v2201_v25 }
  0x43   : > { %1894 = vmatprep.mubr.msk.f32.mxu0 %vm330_vm1, %v2133_v53 }
  0x45   : > { %1831 = vmatmul.mubr.msk.f32.gmra.mrb[6].mxu1 %vm330_vm1, %v2205_v28  ;;  %1895 = vmatmul.mubr.msk.f32.gmra.mrb[2].mxu0 %vm330_vm1, %v2152_v61 }
  0x46   : > { %1835 = vmatprep.mubr.msk.f32.mxu1 %vm330_vm1, %v2073_v9  ;;  %1897 = vmatprep.mubr.msk.f32.mxu0 %vm330_vm1, %v2158_v3  ;;  %v1209_v9 = vsel %vm303_vm0, %v1207_v34, %v1208_v39 }
  0x49   : > { %1836 = vmatmul.mubr.msk.f32.vlgmr.msra.gmra.mrb[0].mxu1 %vm330_vm1, %v2078_v14  ;;  %1898 = vmatmul.mubr.msk.f32.gmra.mrb[4].mxu0 %vm330_vm1, %v2181_v18  ;;  %v1328_v14 = vrot.slane %v285_v36, 2 }
  0x4a   : > { %1918 = vmatpush3.msra.mxu1 %v2047_v1  ;;  %1838 = vmatprep.mubr.msk.f32.mxu1 %vm330_vm1, %v2080_v16  ;;  %v1327_v1 = vrot.slane %v284_v7, 2 }
  0x4b   : > { %1900 = vmatprep.mubr.msk.f32.mxu0 %vm330_vm1, %v850_v40 }
  0x4c   : > { %v1329_v16 = vsel %vm573_vm2, %v1327_v1, %v1328_v14 }
  0x4d   : > { %1839 = vmatmul.mubr.msk.f32.gmra.mrb[2].mxu1 %vm330_vm1, %v2093_v32  ;;  %1901 = vmatmul.mubr.msk.f32.gmra.mrb[6].mxu0 %vm330_vm1, %v1209_v9 }
  0x4e   : > { %1841 = vmatprep.mubr.msk.f32.mxu1 %vm330_vm1, %v2113_v42  ;;  %1905 = vmatprep.mubr.msk.f32.mxu0 %vm330_vm1, %v2143_v57 }
  0x51   : > { %1842 = vmatmul.mubr.msk.f32.gmra.mrb[4].mxu1 %vm330_vm1, %v2121_v47  ;;  %1906 = vmatmul.mubr.msk.f32.vlgmr.msra.gmra.mrb[0].mxu0 %vm330_vm1, %v2165_v12  ;;  %v1692_v47 = vld [vmem:[%s2336_s3] sm:$0xff]   ;;  %v1708_v12 = vld [vmem:[%s2336_s3 + $0x10] sm:$0xff]  }
  0x52   : > { %1844 = vmatprep.mubr.msk.f32.mxu1 %vm330_vm1, %v2145_v59  ;;  %1908 = vmatprep.mubr.msk.f32.mxu0 %vm330_vm1, %v2175_v15  ;;  %v1694_v52 = vunpack.c.h.bf16 %v1692_v47  ;;  %v1693_v57 = vunpack.c.l.bf16 %v1692_v47  ;;  %v1702_v26 = vunpack.c.h.bf16 %v1708_v12 }
  0x55   : > { %1845 = vmatmul.mubr.msk.f32.gmra.mrb[6].mxu1 %vm330_vm1, %v2183_v20  ;;  %1909 = vmatmul.mubr.msk.f32.gmra.mrb[2].mxu0 %vm330_vm1, %v2189_v22 }
  0x56   : > { %1855 = vmatprep.mubr.msk.f32.mxu1 %vm330_vm1, %v2152_v61  ;;  %1911 = vmatprep.mubr.msk.f32.mxu0 %vm330_vm1, %v2201_v25 }
  0x59   : > { %1856 = vmatmul.mubr.msk.f32.vlgmr.msra.gmra.mrb[4].mxu1 %vm330_vm1, %v2158_v3  ;;  %1912 = vmatmul.mubr.msk.f32.gmra.mrb[4].mxu0 %vm330_vm1, %v2205_v28 }
  0x5a   : > { %1858 = vmatprep.mubr.msk.f32.mxu1 %vm330_vm1, %v2181_v18  ;;  %1914 = vmatprep.mubr.msk.f32.mxu0 %vm330_vm1, %v2218_v30  ;;  %v1701_v30 = vunpack.c.l.bf16 %v1708_v12 }
  0x5d   : > { %1859 = vmatmul.mubr.msk.f32.gmra.mrb[6].mxu1 %vm330_vm1, %v850_v40  ;;  %1915 = vmatmul.mubr.msk.f32.gmra.mrb[6].mxu0 %vm330_vm1, %v1329_v16 }
 0x11c   : > { %v1837_v32 = vpop.f32.mrb[0].mxu1 }
 0x11d   : > { %v800_v41 = vpop.f32.mrb[1].mxu1 }
 0x120   : > { %v1840_v42 = vpop.f32.mrb[2].mxu1 }
 0x121   : > { %v810_v43 = vpop.f32.mrb[3].mxu1 }
 0x124   : > { %v1907_v44 = vpop.f32.mrb[0].mxu0 }
 0x125   : > { %v1919_v46 = vadd.f32 %v1907_v44, %v1837_v32  ;;  %v1400_v48 = vpop.f32.mrb[1].mxu0  ;;  %v1706_v32 = vunpack.c.h.bf16 %v1709_v8  ;;  %v1705_v44 = vunpack.c.l.bf16 %v1709_v8 }
 0x126   : > { %v1920_v50 = vadd.f32 %v1400_v48, %v800_v41 }
 0x127   : > { %v1455_v51 = vadd.f32 %v1919_v46, %v2341_v45 }
 0x128   : > { %v1454_v53 = vadd.f32 %v1920_v50, %v2341_v45  ;;  %v1910_v54 = vpop.f32.mrb[2].mxu0 }
 0x129   : > { %vm1464_vm3 = vcmp.ge.f32.partialorder %v1455_v51, 0.0  ;;  %v1473_v56 = vmul.f32 %v2344_v49, %v1455_v51  ;;  %v1921_v58 = vadd.f32 %v1910_v54, %v1840_v42  ;;  %v1410_v59 = vpop.f32.mrb[3].mxu0 }
 0x12a   : > { %vm1463_vm4 = vcmp.ge.f32.partialorder %v1454_v53, 0.0  ;;  %v1472_v60 = vmul.f32 %v2344_v49, %v1454_v53  ;;  %v1922_v61 = vadd.f32 %v1410_v59, %v810_v43 }
 0x12b   : > { %v1481_v62 = vsel %vm1464_vm3, %v1455_v51, %v1473_v56  ;;  %v1457_v63 = vadd.f32 %v1921_v58, %v2341_v45 }
 0x12c   : > { %v1505_v2 = vadd.f32 %v1694_v52, %v1481_v62  ;;  %v1480_v3 = vsel %vm1463_vm4, %v1454_v53, %v1472_v60  ;;  %v1456_v4 = vadd.f32 %v1922_v61, %v2341_v45  ;;  %v1857_v10 = vpop.f32.mrb[4].mxu1  ;;  %v1913_v11 = vpop.f32.mrb[4].mxu0 }
 0x12d   : > { %v1504_v13 = vadd.f32 %v1693_v57, %v1480_v3  ;;  %vm1466_vm6 = vcmp.ge.f32.partialorder %v1457_v63, 0.0  ;;  %v1475_v15 = vmul.f32 %v2344_v49, %v1457_v63  ;;  %v1923_v17 = vadd.f32 %v1913_v11, %v1857_v10  ;;  %v941_v18 = vpop.f32.mrb[5].mxu1  ;;  %v1420_v19 = vpop.f32.mrb[5].mxu0 }
 0x12e   : > { %v1513_v20 = vpack.c.bf16 %v1505_v2, %v1505_v2  ;;  %vm1465_vm7 = vcmp.ge.f32.partialorder %v1456_v4, 0.0  ;;  %v1474_v21 = vmul.f32 %v2344_v49, %v1456_v4  ;;  %v1924_v22 = vadd.f32 %v1420_v19, %v941_v18 }
 0x12f   : > { %v1512_v23 = vpack.c.bf16 %v1504_v13, %v1504_v13  ;;  %v1483_v24 = vsel %vm1466_vm6, %v1457_v63, %v1475_v15  ;;  %v1459_v25 = vadd.f32 %v1923_v17, %v2341_v45 }
 0x130   : > { %1522 = vst.msk [vmem:[%s2359_s28 + $0x4] sm:$0xf] %vm1520_vm5, %v1513_v20  ;;  %v1507_v27 = vadd.f32 %v1698_v0, %v1483_v24  ;;  %v1482_v28 = vsel %vm1465_vm7, %v1456_v4, %v1474_v21  ;;  %v1458_v29 = vadd.f32 %v1924_v22, %v2341_v45  ;;  %v1860_v31 = vpop.f32.mrb[6].mxu1  ;;  %v1916_v33 = vpop.f32.mrb[6].mxu0 }
 0x131   : > { %1521 = vst.msk [vmem:[%s2359_s28] sm:$0xf] %vm1520_vm5, %v1512_v23  ;;  %v1506_v35 = vadd.f32 %v1697_v6, %v1482_v28  ;;  %vm1468_vm8 = vcmp.ge.f32.partialorder %v1459_v25, 0.0  ;;  %v1477_v5 = vmul.f32 %v2344_v49, %v1459_v25  ;;  %v1925_v7 = vadd.f32 %v1916_v33, %v1860_v31  ;;  %v951_v36 = vpop.f32.mrb[7].mxu1  ;;  %v1430_v37 = vpop.f32.mrb[7].mxu0 }
 0x132   : > { %v1515_v38 = vpack.c.bf16 %v1507_v27, %v1507_v27  ;;  %vm1467_vm9 = vcmp.ge.f32.partialorder %v1458_v29, 0.0  ;;  %v1476_v34 = vmul.f32 %v2344_v49, %v1458_v29  ;;  %v1926_v39 = vadd.f32 %v1430_v37, %v951_v36 }
 0x133   : > { %v1514_v40 = vpack.c.bf16 %v1506_v35, %v1506_v35  ;;  %v1485_v9 = vsel %vm1468_vm8, %v1459_v25, %v1477_v5  ;;  %v1461_v1 = vadd.f32 %v1925_v7, %v2341_v45 }
 0x134   : > { %1524 = vst.msk [vmem:[%s2359_s28 + $0xc] sm:$0xf] %vm1520_vm5, %v1515_v38  ;;  %v1509_v14 = vadd.f32 %v1702_v26, %v1485_v9  ;;  %v1484_v16 = vsel %vm1467_vm9, %v1458_v29, %v1476_v34  ;;  %v1460_v41 = vadd.f32 %v1926_v39, %v2341_v45 }
 0x135   : > { %1523 = vst.msk [vmem:[%s2359_s28 + $0x8] sm:$0xf] %vm1520_vm5, %v1514_v40  ;;  %v1508_v42 = vadd.f32 %v1701_v30, %v1484_v16  ;;  %vm1470_vm10 = vcmp.ge.f32.partialorder %v1461_v1, 0.0  ;;  %v1479_v43 = vmul.f32 %v2344_v49, %v1461_v1 }
 0x136   : > { %v1517_v46 = vpack.c.bf16 %v1509_v14, %v1509_v14  ;;  %vm1469_vm11 = vcmp.ge.f32.partialorder %v1460_v41, 0.0  ;;  %v1478_v47 = vmul.f32 %v2344_v49, %v1460_v41 }
 0x137   : > { %v1516_v48 = vpack.c.bf16 %v1508_v42, %v1508_v42  ;;  %v1487_v50 = vsel %vm1470_vm10, %v1461_v1, %v1479_v43 }
 0x138   : > { %1526 = vst.msk [vmem:[%s2359_s28 + $0x14] sm:$0xf] %vm1520_vm5, %v1517_v46  ;;  %v1511_v51 = vadd.f32 %v1706_v32, %v1487_v50  ;;  %v1486_v52 = vsel %vm1469_vm11, %v1460_v41, %v1478_v47 }
 0x139   : > { %1525 = vst.msk [vmem:[%s2359_s28 + $0x10] sm:$0xf] %vm1520_vm5, %v1516_v48  ;;  %v1510_v45 = vadd.f32 %v1705_v44, %v1486_v52 }
 0x13a   : > { %v1519_v53 = vpack.c.bf16 %v1511_v51, %v1511_v51 }
 0x13b   : > { %v1518_v54 = vpack.c.bf16 %v1510_v45, %v1510_v45 }
 0x13c   : > { %1528 = vst.msk [vmem:[%s2359_s28 + $0x1c] sm:$0xf] %vm1520_vm5, %v1519_v53 }
 0x13d   : > { %1527 = vst.msk [vmem:[%s2359_s28 + $0x18] sm:$0xf] %vm1520_vm5, %v1518_v54 }
 0x13e PF: > { %s16_s20 = sadd.s32 1, %s1998_s20  }
 0x13f   : > { %p13_p4 = scmp.ge.s32.totalorder %s16_s20, 4  }
 0x141   :  { %15 = sbr.rel (!%p13_p4) target bundleno = 2 (0x2), region = 81 }

// kernel: ebrn_forward.46
= control target key start
LH: loop header
LB: loop body
LE: loop exit
PB: predicated region body
PF: predicated region fallthrough
CT: control target
= control target key end

     0   :  { %s4845_s17 = smov 0   ;;  %s6148_s0 = inlined_call_operand.vmem [shape: bf16[2,18,18,8], index: 0, kind: input, shape index: {}]   ;;  %s6149_s1 = inlined_call_operand.vmem [shape: f32[9,8,8], index: 1, kind: input, shape index: {}]   ;;  %s6150_s2 = inlined_call_operand.vmem [shape: f32[1,8], index: 2, kind: input, shape index: {}]   ;;  %s6151_s3 = inlined_call_operand.<no memory space> [shape: f32[1], index: 3, kind: input, shape index: {}]   ;;  %s6152_s4 = inlined_call_operand.vmem [shape: bf16[2,16,16,8], index: 4, kind: output, shape index: {}]  }
   0x1   :  { %9 = sst [smem:[#allocation2]] %s6151_s3 }
   0x2 LB: > { %s3379_s18 = sadd.s32 4294967295, %s4815_s17   ;;  %p3383_p0 = scmp.ge.s32.totalorder %s4815_s17, 1  ;;  %s4815_s17 = sphi %s4845_s17, %s15_s17  }
   0x3   : > { %p163_p1 = scmp.lt.s32.totalorder %s4815_s17, 3 }
   0x5   : > { %p164_p2 = pnand %p3383_p0, %p163_p1 }
   0x7   : > { %167 = sbr.rel (%p164_p2) target bundleno = 534 (0x216), region = 36 }
   0xe   : > { %v3387_v0 = vld [vmem:[%s6149_s1 + $0x8] sm:$0xff]  ;;  %v4859_v1 = vld [vmem:[%s6149_s1 + $0x20] sm:$0xff]  ;;  %p189_p3 = scmp.lt.s32.totalorder %s3379_s18, 1  ;;  %vm356_vm0 = vcmask 1046528   ;;  %vm439_vm1 = vcmask 64512   ;;  %v4944_v41 = vld [vmem:[%s6149_s1 + $0x30] sm:$0xff] }
   0xf   : > { %v307_v2 = vld [vmem:[%s6149_s1] sm:$0xff]  ;;  %4092 = vmatprep.subr.mxu1 %v3387_v0  ;;  %4292 = vmatprep.subr.mxu0 %v4859_v1  ;;  %v3551_v3 = vld [vmem:[%s6149_s1 + $0x28] sm:$0xff]  ;;  %v4949_v42 = vld [vmem:[%s6149_s1 + $0x10] sm:$0xff]  ;;  %vm1018_vm2 = vcmask 1045504   ;;  %s3065_s14 = sld [smem:[#allocation2]]  ;;  %vm3291_vm5 = vcmask 60416  }
  0x10   : > { %4093 = vmatpush3.msra.mxu1 %v3387_v0  ;;  %4293 = vmatpush3.msra.mxu0 %v4859_v1  ;;  %s6366_s18 = smov (!%p189_p3, %s3379_s18), 1 }
  0x11   : > { %4142 = vmatprep.subr.mxu1 %v307_v2  ;;  %4342 = vmatprep.subr.mxu0 %v3551_v3  ;;  %s4800_s26 = smul.u32 216, %s6366_s18  ;;  %s3718_s19 = sshll.u32 %s6366_s18, 7 }
  0x12   : > { %s6011_s21 = scalar_lea.vmem %s6152_s4, %s3718_s19 }
  0x13   : > { %s4875_s29 = scalar_lea.vmem %s6148_s0, %s4800_s26 }
  0x14   : > { %v3752_v4 = vld [vmem:[%s4875_s29] sm:$0xff]   ;;  %v202_v5 = vld [vmem:[%s4875_s29 + $0xc] sm:$0xff]   ;;  %v4880_v6 = vld [vmem:[%s4875_s29 + $0x8] sm:$0x1] }
  0x15   : > { %v4882_v7 = vunpack.c.l.bf16 %v3752_v4  ;;  %v4884_v8 = vunpack.c.h.bf16 %v3752_v4  ;;  %v4886_v9 = vunpack.c.l.bf16 %v202_v5  ;;  %v4888_v10 = vunpack.c.h.bf16 %v202_v5  ;;  %v4891_v11 = vld [vmem:[%s4875_s29 + $0x14] sm:$0x1]  ;;  %v3787_v12 = vld [vmem:[%s4875_s29 + $0x18] sm:$0xff]   ;;  %v4901_v17 = vld [vmem:[%s4875_s29 + $0x20] sm:$0x1] }
  0x16   : > { %v6153_v13 = vunpack.c.l.bf16 %v4880_v6  ;;  %v258_v14 = vunpack.c.l.bf16 %v4891_v11  ;;  %v4896_v15 = vunpack.c.l.bf16 %v3787_v12  ;;  %v4898_v16 = vunpack.c.h.bf16 %v3787_v12  ;;  %v208_v22 = vld [vmem:[%s4875_s29 + $0x24] sm:$0xff]   ;;  %v4913_v25 = vld [vmem:[%s4875_s29 + $0x2c] sm:$0x1]  ;;  %v3788_v26 = vld [vmem:[%s4875_s29 + $0x30] sm:$0xff]  }
  0x17   : > { %6239 = vst [vmem:[#allocation3_spill] sm:$0xff] %v4886_v9  ;;  %6240 = vst [vmem:[#allocation4_spill] sm:$0xff] %v4888_v10  ;;  %v357_v18 = vrot.slane %v4882_v7, 1  ;;  %v358_v19 = vrot.slane %v4884_v8, 1  ;;  %v362_v20 = vrot.slane %v4886_v9, 1  ;;  %v363_v21 = vrot.slane %v4888_v10, 1 }
  0x18   : > { %v360_v23 = vrot.slane %v6153_v13, 1  ;;  %v365_v24 = vrot.slane %v258_v14, 1  ;;  %v367_v29 = vrot.slane %v4896_v15, 1  ;;  %v368_v30 = vrot.slane %v4898_v16, 1  ;;  %v4921_v31 = vld [vmem:[%s4875_s29 + $0x38] sm:$0x1] }
  0x19   : > { %v359_v27 = vsel %vm356_vm0, %v357_v18, %v358_v19  ;;  %v364_v28 = vsel %vm356_vm0, %v362_v20, %v363_v21  ;;  %v261_v34 = vunpack.c.l.bf16 %v4901_v17  ;;  %v4928_v35 = vunpack.c.l.bf16 %v208_v22  ;;  %v214_v36 = vld [vmem:[%s4875_s29 + $0x3c] sm:$0xff]   ;;  %v4967_v51 = vld [vmem:[%s4875_s29 + $0x44] sm:$0x1]  ;;  %v3789_v55 = vld [vmem:[%s4875_s29 + $0x48] sm:$0xff]  }
  0x1a   : > { %4094 = vmatprep.mubr.msk.f32.mxu1 %vm439_vm1, %v359_v27  ;;  %4294 = vmatprep.mubr.msk.f32.mxu0 %vm439_vm1, %v364_v28  ;;  %v361_v32 = vsel %vm356_vm0, %v358_v19, %v360_v23  ;;  %v366_v33 = vsel %vm356_vm0, %v363_v21, %v365_v24  ;;  %v4934_v37 = vsel %vm356_vm0, %v367_v29, %v368_v30  ;;  %v4936_v38 = vunpack.c.h.bf16 %v208_v22  ;;  %v5031_v23 = vld [vmem:[%s4875_s29 + $0x5c] sm:$0x1]  ;;  %v3790_v24 = vld [vmem:[%s4875_s29 + $0x60] sm:$0xff]  }
  0x1b   : > { %4095 = vmatmul.mubr.msk.f32.vlgmr.msra.gmra.mrb[0].mxu1 %vm439_vm1, %v361_v32  ;;  %4295 = vmatmul.mubr.msk.f32.vlgmr.msra.gmra.mrb[0].mxu0 %vm439_vm1, %v366_v33  ;;  %6241 = vst [vmem:[#allocation5_spill] sm:$0xff] %v4934_v37  ;;  %v6159_v39 = vunpack.c.l.bf16 %v4913_v25  ;;  %v4939_v40 = vunpack.c.l.bf16 %v3788_v26  ;;  %v370_v43 = vrot.slane %v261_v34, 1  ;;  %v372_v44 = vrot.slane %v4928_v35, 1 }
  0x1c   : > { %4143 = vmatpush3.msra.mxu1 %v307_v2  ;;  %4343 = vmatpush3.msra.mxu0 %v3551_v3  ;;  %v4954_v45 = vunpack.c.h.bf16 %v3788_v26  ;;  %v6158_v46 = vunpack.c.l.bf16 %v4921_v31  ;;  %v373_v47 = vrot.slane %v4936_v38, 1  ;;  %v4964_v50 = vunpack.c.l.bf16 %v214_v36  ;;  %v5004_v2 = vld [vmem:[%s4875_s29 + $0x50] sm:$0x1]  ;;  %v220_v3 = vld [vmem:[%s4875_s29 + $0x54] sm:$0xff]  }
  0x1d   : > { %4097 = vmatprep.mubr.msk.f32.mxu1 %vm439_vm1, %v364_v28  ;;  %4297 = vmatprep.mubr.msk.f32.mxu0 %vm439_vm1, %v4934_v37  ;;  %v375_v48 = vrot.slane %v6159_v39, 1  ;;  %v377_v49 = vrot.slane %v4939_v40, 1  ;;  %v4970_v52 = vsel %vm356_vm0, %v368_v30, %v370_v43  ;;  %v4973_v54 = vunpack.c.h.bf16 %v214_v36  ;;  %v5058_v43 = vld [vmem:[%s4875_s29 + $0x68] sm:$0x1] }
  0x1e   : > { %6242 = vst [vmem:[#allocation6_spill] sm:$0xff] %v4970_v52  ;;  %v378_v53 = vrot.slane %v4954_v45, 1  ;;  %4392 = vmatprep.subr.mxu0 %v4944_v41  ;;  %4192 = vmatprep.subr.mxu1 %v4949_v42  ;;  %v4982_v56 = vsel %vm356_vm0, %v372_v44, %v373_v47  ;;  %v380_v58 = vrot.slane %v6158_v46, 1  ;;  %v382_v59 = vrot.slane %v4964_v50, 1 }
  0x1f   : > { %4098 = vmatmul.mubr.msk.f32.gmra.mrb[2].mxu1 %vm439_vm1, %v366_v33  ;;  %4298 = vmatmul.mubr.msk.f32.gmra.mrb[2].mxu0 %vm439_vm1, %v4970_v52  ;;  %6243 = vst [vmem:[#allocation7_spill] sm:$0xff] %v4982_v56  ;;  %v4989_v57 = vsel %vm356_vm0, %v373_v47, %v375_v48  ;;  %v6157_v60 = vunpack.c.l.bf16 %v4967_v51  ;;  %v383_v62 = vrot.slane %v4973_v54, 1  ;;  %v4999_v63 = vunpack.c.l.bf16 %v3789_v55 }
  0x20   : > { %4100 = vmatprep.mubr.msk.f32.mxu1 %vm439_vm1, %v4934_v37  ;;  %4300 = vmatprep.mubr.msk.f32.mxu0 %vm439_vm1, %v4982_v56  ;;  %6244 = vst [vmem:[#allocation8_spill] sm:$0xff] %v4989_v57  ;;  %v4996_v61 = vsel %vm356_vm0, %v377_v49, %v378_v53  ;;  %v5001_v0 = vunpack.c.h.bf16 %v3789_v55  ;;  %v5016_v4 = vsel %vm356_vm0, %v378_v53, %v380_v58  ;;  %v6156_v12 = vunpack.c.l.bf16 %v5004_v2  ;;  %v226_v58 = vld [vmem:[%s4875_s29 + $0x6c] sm:$0xff]  }
  0x21   : > { %6245 = vst [vmem:[#allocation9_spill] sm:$0xff] %v4996_v61  ;;  %6246 = vst [vmem:[#allocation10_spill] sm:$0xff] %v5016_v4  ;;  %v385_v5 = vrot.slane %v6157_v60, 1  ;;  %v5021_v18 = vunpack.c.l.bf16 %v220_v3  ;;  %v5024_v19 = vsel %vm356_vm0, %v382_v59, %v383_v62  ;;  %v387_v20 = vrot.slane %v4999_v63, 1 }
  0x22   : > { %6247 = vst [vmem:[#allocation11_spill] sm:$0xff] %v5024_v19  ;;  %v388_v21 = vrot.slane %v5001_v0, 1  ;;  %v5028_v22 = vunpack.c.h.bf16 %v220_v3  ;;  %v390_v27 = vrot.slane %v6156_v12, 1  ;;  %v6155_v29 = vunpack.c.l.bf16 %v5031_v23  ;;  %v232_v12 = vld [vmem:[%s4875_s29 + $0x84] sm:$0xff]  }
  0x23   : > { %4101 = vmatmul.mubr.msk.f32.gmra.mrb[4].mxu1 %vm439_vm1, %v4970_v52  ;;  %4301 = vmatmul.mubr.msk.f32.gmra.mrb[4].mxu0 %vm439_vm1, %v4989_v57  ;;  %v5043_v26 = vsel %vm356_vm0, %v383_v62, %v385_v5  ;;  %v392_v28 = vrot.slane %v5021_v18, 1  ;;  %v5053_v33 = vunpack.c.l.bf16 %v3790_v24  ;;  %v5055_v36 = vunpack.c.h.bf16 %v3790_v24  ;;  %v3793_v52 = vld [vmem:[%s4875_s29 + $0xa8] sm:$0xff]  }
  0x24   : > { %4103 = vmatprep.mubr.msk.f32.mxu1 %vm439_vm1, %v4982_v56  ;;  %4303 = vmatprep.mubr.msk.f32.mxu0 %vm439_vm1, %v4996_v61  ;;  %6248 = vst [vmem:[#allocation12_spill] sm:$0xff] %v5043_v26  ;;  %v5050_v30 = vsel %vm356_vm0, %v387_v20, %v388_v21  ;;  %v393_v32 = vrot.slane %v5028_v22, 1  ;;  %v5069_v44 = vsel %vm356_vm0, %v388_v21, %v390_v27  ;;  %v395_v47 = vrot.slane %v6155_v29, 1  ;;  %v5096_v20 = vld [vmem:[%s4875_s29 + $0x74] sm:$0x1] }
  0x25   : > { %6249 = vst [vmem:[#allocation13_spill] sm:$0xff] %v5050_v30  ;;  %6250 = vst [vmem:[#allocation14_spill] sm:$0xff] %v5069_v44  ;;  %v6154_v48 = vunpack.c.l.bf16 %v5058_v43  ;;  %v397_v53 = vrot.slane %v5053_v33, 1  ;;  %v398_v55 = vrot.slane %v5055_v36, 1  ;;  %v1024_v3 = vrot.slane %v4886_v9, 2 }
  0x26   : > { %v5075_v49 = vsel %vm356_vm0, %v392_v28, %v393_v32  ;;  %v5089_v59 = vsel %vm356_vm0, %v393_v32, %v395_v47  ;;  %v1025_v5 = vrot.slane %v4888_v10, 2  ;;  %v5101_v24 = vunpack.c.l.bf16 %v226_v58  ;;  %v3791_v28 = vld [vmem:[%s4875_s29 + $0x78] sm:$0xff]  }
  0x27   : > { %4104 = vmatmul.mubr.msk.f32.gmra.mrb[6].mxu1 %vm439_vm1, %v4989_v57  ;;  %4304 = vmatmul.mubr.msk.f32.gmra.mrb[6].mxu0 %vm439_vm1, %v5016_v4  ;;  %6251 = vst [vmem:[#allocation15_spill] sm:$0xff] %v5075_v49  ;;  %6252 = vst [vmem:[#allocation16_spill] sm:$0xff] %v5089_v59  ;;  %v400_v62 = vrot.slane %v6154_v48, 1  ;;  %v5099_v21 = vsel %vm356_vm0, %v397_v53, %v398_v55  ;;  %v5103_v27 = vunpack.c.h.bf16 %v226_v58  ;;  %v1027_v32 = vrot.slane %v258_v14, 2  ;;  %v5124_v14 = vld [vmem:[%s4875_s29 + $0x80] sm:$0x1] }
  0x28   : > { %4106 = vmatprep.mubr.msk.f32.mxu1 %vm439_vm1, %v4996_v61  ;;  %4306 = vmatprep.mubr.msk.f32.mxu0 %vm439_vm1, %v5024_v19  ;;  %6253 = vst [vmem:[#allocation17_spill] sm:$0xff] %v5099_v21  ;;  %v6161_v47 = vunpack.c.l.bf16 %v5096_v20  ;;  %v5121_v11 = vsel %vm1018_vm2, %v1024_v3, %v1025_v5  ;;  %v402_v58 = vrot.slane %v5101_v24, 1  ;;  %v5128_v48 = vunpack.c.l.bf16 %v3791_v28 }
  0x29   : > { %v5118_v53 = vsel %vm356_vm0, %v398_v55, %v400_v62  ;;  %v403_v13 = vrot.slane %v5103_v27, 1  ;;  %v5130_v29 = vunpack.c.h.bf16 %v3791_v28  ;;  %v1029_v60 = vrot.slane %v4896_v15, 2 }
  0x2a   : > { %6254 = vst [vmem:[#allocation18_spill] sm:$0xff] %v5118_v53  ;;  %v1030_v46 = vrot.slane %v4898_v16, 2  ;;  %v5140_v55 = vsel %vm1018_vm2, %v1025_v5, %v1027_v32  ;;  %v405_v62 = vrot.slane %v6161_v47, 1  ;;  %v1032_v28 = vrot.slane %v261_v34, 2 }
  0x2b   : > { %4107 = vmatmul.mubr.msk.f32.gmra.mrb[8].mxu1 %vm439_vm1, %v5016_v4  ;;  %4307 = vmatmul.mubr.msk.f32.gmra.mrb[8].mxu0 %vm439_vm1, %v5043_v26  ;;  %v1034_v39 = vrot.slane %v4928_v35, 2  ;;  %v5154_v5 = vunpack.c.h.bf16 %v232_v12  ;;  %v5157_v32 = vsel %vm356_vm0, %v402_v58, %v403_v13  ;;  %v407_v47 = vrot.slane %v5128_v48, 1  ;;  %v5174_v58 = vld [vmem:[%s6149_s1 + $0x38] sm:$0xff] }
  0x2c   : > { %4109 = vmatprep.mubr.msk.f32.mxu1 %vm439_vm1, %v5024_v19  ;;  %4309 = vmatprep.mubr.msk.f32.mxu0 %vm439_vm1, %v5050_v30  ;;  %6255 = vst [vmem:[#allocation19_spill] sm:$0xff] %v5157_v32  ;;  %v408_v3 = vrot.slane %v5130_v29, 1  ;;  %v5166_v17 = vsel %vm1018_vm2, %v1029_v60, %v1030_v46  ;;  %v6257_v34 = vunpack.c.l.bf16 %v4913_v25  ;;  %v6259_v60 = vunpack.c.l.bf16 %v5124_v14  ;;  %v5197_v4 = vld [vmem:[%s4875_s29 + $0x98] sm:$0x1] }
  0x2d   : > { %6256 = vst [vmem:[#allocation20_spill] sm:$0xff] %v5166_v17  ;;  %v1049_v37 = vrot.slane %v4999_v63, 2 }
  0x2e   : > { %v410_v25 = vrot.slane %v6259_v60, 1  ;;  %v5202_v60 = vsel %vm356_vm0, %v407_v47, %v408_v3 }
  0x2f   : > { %4110 = vmatmul.mubr.msk.f32.gmra.mrb[10].mxu1 %vm439_vm1, %v5043_v26  ;;  %4310 = vmatmul.mubr.msk.f32.gmra.mrb[10].mxu0 %vm439_vm1, %v5069_v44  ;;  %v1040_v26 = vrot.slane %v4954_v45, 2  ;;  %6261 = vst [vmem:[#allocation23_spill] sm:$0xff] %v5202_v60 }
  0x30   : > { %4112 = vmatprep.mubr.msk.f32.mxu1 %vm439_vm1, %v5050_v30  ;;  %4312 = vmatprep.mubr.msk.f32.mxu0 %vm439_vm1, %v5075_v49  ;;  %v5181_v30 = vsel %vm356_vm0, %v403_v13, %v405_v62  ;;  %v413_v13 = vrot.slane %v5154_v5, 1 }
  0x31   : > { %6258 = vst [vmem:[#allocation21_spill] sm:$0xff] %v5181_v30 }
  0x33   : > { %4113 = vmatmul.mubr.msk.f32.gmra.mrb[12].mxu1 %vm439_vm1, %v5069_v44  ;;  %4313 = vmatmul.mubr.msk.f32.gmra.mrb[12].mxu0 %vm439_vm1, %v5089_v59  ;;  %v1037_v44 = vrot.slane %v6257_v34, 2  ;;  %v1039_v34 = vrot.slane %v4939_v40, 2 }
  0x34   : > { %4115 = vmatprep.mubr.msk.f32.mxu1 %vm439_vm1, %v5075_v49  ;;  %4315 = vmatprep.mubr.msk.f32.mxu0 %vm439_vm1, %v5099_v21  ;;  %v5163_v49 = vld [vmem:[%s4875_s29 + $0x8c] sm:$0x1] }
  0x35   : > { %v5224_v47 = vsel %vm1018_vm2, %v1039_v34, %v1040_v26 }
  0x36   : > { %6265 = vst [vmem:[#allocation27_spill] sm:$0xff] %v5224_v47 }
  0x37   : > { %4116 = vmatmul.mubr.msk.f32.gmra.mrb[14].mxu1 %vm439_vm1, %v5089_v59  ;;  %4316 = vmatmul.mubr.msk.f32.gmra.mrb[14].mxu0 %vm439_vm1, %v5118_v53  ;;  %v5152_v59 = vunpack.c.l.bf16 %v232_v12  ;;  %v3792_v12 = vld [vmem:[%s4875_s29 + $0x90] sm:$0xff]  }
  0x38   : > { %4118 = vmatprep.mubr.msk.f32.mxu1 %vm439_vm1, %v5099_v21  ;;  %4344 = vmatprep.mubr.msk.f32.mxu0 %vm439_vm1, %v5121_v11  ;;  %v1035_v21 = vrot.slane %v4936_v38, 2 }
  0x39   : > { %v412_v19 = vrot.slane %v5152_v59, 1 }
  0x3a   : > { %v5214_v62 = vsel %vm1018_vm2, %v1035_v21, %v1037_v44 }
  0x3b   : > { %4119 = vmatmul.mubr.msk.f32.gmra.mrb[16].mxu1 %vm439_vm1, %v5118_v53  ;;  %4345 = vmatmul.mubr.msk.f32.vlgmr.msra.gmra.mrb[0].mxu0 %vm439_vm1, %v5140_v55  ;;  %v5191_v53 = vsel %vm1018_vm2, %v1030_v46, %v1032_v28  ;;  %v5209_v46 = vunpack.c.h.bf16 %v3792_v12  ;;  %v238_v28 = vld [vmem:[%s4875_s29 + $0x9c] sm:$0xff]   ;;  %6263 = vst [vmem:[#allocation25_spill] sm:$0xff] %v5214_v62  ;;  %v5234_v44 = vsel %vm356_vm0, %v412_v19, %v413_v13  ;;  %v6269_v19 = vunpack.c.l.bf16 %v4967_v51 }
  0x3c   : > { %4393 = vmatpush3.msra.mxu0 %v4944_v41  ;;  %4121 = vmatprep.mubr.msk.f32.mxu1 %vm439_vm1, %v5157_v32  ;;  %6260 = vst [vmem:[#allocation22_spill] sm:$0xff] %v5191_v53  ;;  %v5205_v41 = vsel %vm1018_vm2, %v1034_v39, %v1035_v21  ;;  %v5207_v32 = vunpack.c.l.bf16 %v3792_v12  ;;  %v5221_v39 = vsel %vm356_vm0, %v408_v3, %v410_v25  ;;  %v6266_v12 = vunpack.c.l.bf16 %v4921_v31  ;;  %v5243_v31 = vld [vmem:[%s4875_s29 + $0xa4] sm:$0x1] }
  0x3d   : > { %4347 = vmatprep.mubr.msk.f32.mxu0 %vm439_vm1, %v5166_v17  ;;  %6262 = vst [vmem:[#allocation24_spill] sm:$0xff] %v5205_v41  ;;  %4442 = vmatprep.subr.mxu0 %v5174_v58  ;;  %6264 = vst [vmem:[#allocation26_spill] sm:$0xff] %v5221_v39  ;;  %v6268_v21 = vunpack.c.l.bf16 %v5163_v49  ;;  %v5238_v25 = vunpack.c.l.bf16 %v238_v28  ;;  %v5240_v34 = vunpack.c.h.bf16 %v238_v28  ;;  %v418_v57 = vrot.slane %v5209_v46, 1 }
  0x3e   : > { %v1042_v61 = vrot.slane %v6266_v12, 2  ;;  %6267 = vst [vmem:[#allocation28_spill] sm:$0xff] %v5234_v44  ;;  %v417_v12 = vrot.slane %v5207_v32, 1  ;;  %v1047_v56 = vrot.slane %v6269_v19, 2  ;;  %v6270_v28 = vunpack.c.l.bf16 %v5197_v4 }
  0x3f   : > { %4122 = vmatmul.mubr.msk.f32.gmra.mrb[18].mxu1 %vm439_vm1, %v5181_v30  ;;  %4348 = vmatmul.mubr.msk.f32.gmra.mrb[2].mxu0 %vm439_vm1, %v5191_v53  ;;  %v415_v3 = vrot.slane %v6268_v21, 1  ;;  %v1045_v30 = vrot.slane %v4973_v54, 2  ;;  %v5281_v17 = vunpack.c.h.bf16 %v3793_v52 }
  0x40   : > { %4124 = vmatprep.mubr.msk.f32.mxu1 %vm439_vm1, %v5202_v60  ;;  %4350 = vmatprep.mubr.msk.f32.mxu0 %vm439_vm1, %v5205_v41  ;;  %v1044_v60 = vrot.slane %v4964_v50, 2  ;;  %v420_v21 = vrot.slane %v6270_v28, 1  ;;  %v1050_v41 = vrot.slane %v5001_v0, 2  ;;  %v5269_v19 = vsel %vm1018_vm2, %v1040_v26, %v1042_v61  ;;  %v244_v61 = vld [vmem:[%s4875_s29 + $0xb4] sm:$0xff]  }
  0x41   : > { %v5266_v51 = vsel %vm356_vm0, %v413_v13, %v415_v3  ;;  %6272 = vst [vmem:[#allocation30_spill] sm:$0xff] %v5269_v19  ;;  %v422_v28 = vrot.slane %v5238_v25, 1  ;;  %v5287_v13 = vsel %vm1018_vm2, %v1045_v30, %v1047_v56  ;;  %v6278_v56 = vunpack.c.l.bf16 %v5004_v2 }
  0x42   : > { %6271 = vst [vmem:[#allocation29_spill] sm:$0xff] %v5266_v51  ;;  %v5277_v53 = vsel %vm1018_vm2, %v1044_v60, %v1045_v30  ;;  %6275 = vst [vmem:[#allocation33_spill] sm:$0xff] %v5287_v13  ;;  %v5295_v26 = vsel %vm356_vm0, %v418_v57, %v420_v21  ;;  %v5298_v60 = vsel %vm1018_vm2, %v1049_v37, %v1050_v41  ;;  %v1055_v37 = vrot.slane %v5028_v22, 2 }
  0x43   : > { %4125 = vmatmul.mubr.msk.f32.gmra.mrb[20].mxu1 %vm439_vm1, %v5221_v39  ;;  %4351 = vmatmul.mubr.msk.f32.gmra.mrb[4].mxu0 %vm439_vm1, %v5214_v62  ;;  %v423_v39 = vrot.slane %v5240_v34, 1  ;;  %v5274_v62 = vsel %vm356_vm0, %v417_v12, %v418_v57  ;;  %6274 = vst [vmem:[#allocation32_spill] sm:$0xff] %v5277_v53  ;;  %6276 = vst [vmem:[#allocation34_spill] sm:$0xff] %v5295_v26  ;;  %v1052_v30 = vrot.slane %v6278_v56, 2  ;;  %v1054_v57 = vrot.slane %v5021_v18, 2 }
  0x44   : > { %4127 = vmatprep.mubr.msk.f32.mxu1 %vm439_vm1, %v5234_v44  ;;  %4353 = vmatprep.mubr.msk.f32.mxu0 %vm439_vm1, %v5224_v47  ;;  %6273 = vst [vmem:[#allocation31_spill] sm:$0xff] %v5274_v62  ;;  %v5279_v44 = vunpack.c.l.bf16 %v3793_v52  ;;  %v5284_v47 = vld [vmem:[%s4875_s29 + $0xb0] sm:$0x1]  ;;  %v6277_v52 = vunpack.c.l.bf16 %v5243_v31  ;;  %v428_v2 = vrot.slane %v5281_v17, 1  ;;  %v5316_v56 = vunpack.c.l.bf16 %v244_v61 }
  0x45   : > { %v5309_v12 = vsel %vm356_vm0, %v422_v28, %v423_v39  ;;  %v5331_v21 = vsel %vm1018_vm2, %v1050_v41, %v1052_v30  ;;  %v1060_v30 = vrot.slane %v5055_v36, 2 }
  0x46   : > { %v425_v3 = vrot.slane %v6277_v52, 1  ;;  %6279 = vst [vmem:[#allocation35_spill] sm:$0xff] %v5309_v12  ;;  %v427_v52 = vrot.slane %v5279_v44, 1  ;;  %6282 = vst [vmem:[#allocation38_spill] sm:$0xff] %v5331_v21 }
  0x47   : > { %4128 = vmatmul.mubr.msk.f32.gmra.mrb[22].mxu1 %vm439_vm1, %v5266_v51  ;;  %4354 = vmatmul.mubr.msk.f32.gmra.mrb[6].mxu0 %vm439_vm1, %v5269_v19  ;;  %v5318_v51 = vunpack.c.h.bf16 %v244_v61  ;;  %v5340_v61 = vsel %vm1018_vm2, %v1054_v57, %v1055_v37 }
  0x48   : > { %4130 = vmatprep.mubr.msk.f32.mxu1 %vm439_vm1, %v5274_v62  ;;  %4356 = vmatprep.mubr.msk.f32.mxu0 %vm439_vm1, %v5277_v53  ;;  %v5321_v62 = vld [vmem:[%s4875_s29 + $0xbc] sm:$0x1]  ;;  %v5328_v28 = vsel %vm356_vm0, %v423_v39, %v425_v3  ;;  %v6283_v53 = vunpack.c.l.bf16 %v5031_v23  ;;  %6284 = vst [vmem:[#allocation39_spill] sm:$0xff] %v5340_v61  ;;  %v1059_v39 = vrot.slane %v5053_v33, 2  ;;  %v5347_v3 = vsel %vm356_vm0, %v427_v52, %v428_v2 }
  0x49   : > { %6280 = vst [vmem:[#allocation36_spill] sm:$0xff] %v5318_v51  ;;  %6281 = vst [vmem:[#allocation37_spill] sm:$0xff] %v5328_v28  ;;  %v6217_v41 = vunpack.c.l.bf16 %v5321_v62  ;;  %v432_v23 = vrot.slane %v5316_v56, 1 }
  0x4a   : > { %v1057_v19 = vrot.slane %v6283_v53, 2  ;;  %6286 = vst [vmem:[#allocation40_spill] sm:$0xff] %v5347_v3  ;;  %v433_v53 = vrot.slane %v5318_v51, 1 }
  0x4b   : > { %4131 = vmatmul.mubr.msk.f32.gmra.mrb[24].mxu1 %vm439_vm1, %v5295_v26  ;;  %4357 = vmatmul.mubr.msk.f32.gmra.mrb[8].mxu0 %vm439_vm1, %v5287_v13  ;;  %v6285_v26 = vunpack.c.l.bf16 %v5284_v47  ;;  %v435_v52 = vrot.slane %v6217_v41, 1  ;;  %v1080_v41 = vrot.slane %v5209_v46, 2 }
  0x4c   : > { %4133 = vmatprep.mubr.msk.f32.mxu1 %vm439_vm1, %v5309_v12  ;;  %4359 = vmatprep.mubr.msk.f32.mxu0 %vm439_vm1, %v5298_v60  ;;  %v5364_v57 = vsel %vm1018_vm2, %v1055_v37, %v1057_v19  ;;  %v6291_v37 = vunpack.c.l.bf16 %v5096_v20 }
  0x4d   : > { %v430_v13 = vrot.slane %v6285_v26, 1 }
  0x4f   : > { %4134 = vmatmul.mubr.msk.f32.gmra.mrb[26].mxu1 %vm439_vm1, %v5328_v28  ;;  %4360 = vmatmul.mubr.msk.f32.gmra.mrb[10].mxu0 %vm439_vm1, %v5331_v21  ;;  %v5361_v26 = vsel %vm356_vm0, %v428_v2, %v430_v13  ;;  %v6288_v28 = vunpack.c.l.bf16 %v5058_v43  ;;  %v5371_v21 = vsel %vm356_vm0, %v432_v23, %v433_v53  ;;  %v1065_v13 = vrot.slane %v5103_v27, 2 }
  0x50   : > { %4136 = vmatprep.mubr.msk.f32.mxu1 %vm439_vm1, %v5347_v3  ;;  %4362 = vmatprep.mubr.msk.f32.mxu0 %vm439_vm1, %v5340_v61  ;;  %6287 = vst [vmem:[#allocation41_spill] sm:$0xff] %v5361_v26  ;;  %6289 = vst [vmem:[#allocation42_spill] sm:$0xff] %v5371_v21  ;;  %v5374_v3 = vsel %vm1018_vm2, %v1059_v39, %v1060_v30  ;;  %v1064_v61 = vrot.slane %v5101_v24, 2  ;;  %v5387_v43 = vsel %vm356_vm0, %v433_v53, %v435_v52 }
  0x51   : > { %v1062_v12 = vrot.slane %v6288_v28, 2  ;;  %6290 = vst [vmem:[#allocation43_spill] sm:$0xff] %v5387_v43  ;;  %v1067_v2 = vrot.slane %v6291_v37, 2  ;;  %v1069_v39 = vrot.slane %v5128_v48, 2  ;;  %v1070_v23 = vrot.slane %v5130_v29, 2  ;;  %v5420_v37 = vld [vmem:[%s6149_s1 + $0x18] sm:$0xff] }
  0x52   : > { %v5395_v28 = vsel %vm1018_vm2, %v1064_v61, %v1065_v13  ;;  %v1074_v53 = vrot.slane %v5152_v59, 2 }
  0x53   : > { %4137 = vmatmul.mubr.msk.f32.gmra.mrb[28].mxu1 %vm439_vm1, %v5361_v26  ;;  %4363 = vmatmul.mubr.msk.f32.gmra.mrb[12].mxu0 %vm439_vm1, %v5364_v57  ;;  %v5390_v19 = vsel %vm1018_vm2, %v1060_v30, %v1062_v12  ;;  %v5408_v20 = vsel %vm1018_vm2, %v1065_v13, %v1067_v2  ;;  %v6292_v12 = vunpack.c.l.bf16 %v5124_v14  ;;  %v1075_v30 = vrot.slane %v5154_v5, 2 }
  0x54   : > { %4139 = vmatprep.mubr.msk.f32.mxu1 %vm439_vm1, %v5371_v21  ;;  %4365 = vmatprep.mubr.msk.f32.mxu0 %vm439_vm1, %v5374_v3  ;;  %v5415_v52 = vsel %vm1018_vm2, %v1069_v39, %v1070_v23  ;;  %v6293_v13 = vunpack.c.l.bf16 %v5163_v49  ;;  %v6295_v49 = vunpack.c.l.bf16 %v5197_v4  ;;  %v3794_v21 = vld [vmem:[%s4875_s29 + $0xc0] sm:$0xff]   ;;  %v1095_v26 = vrot.slane %v5318_v51, 2 }
  0x55   : > { %v1072_v61 = vrot.slane %v6292_v12, 2  ;;  %v5437_v39 = vsel %vm1018_vm2, %v1074_v53, %v1075_v30  ;;  %v1079_v12 = vrot.slane %v5207_v32, 2  ;;  %v1084_v53 = vrot.slane %v5238_v25, 2 }
  0x56   : > { %v1077_v2 = vrot.slane %v6293_v13, 2  ;;  %v1085_v13 = vrot.slane %v5240_v34, 2 }
  0x57   : > { %4140 = vmatmul.mubr.msk.f32.gmra.mrb[30].mxu1 %vm439_vm1, %v5387_v43  ;;  %4366 = vmatmul.mubr.msk.f32.gmra.mrb[14].mxu0 %vm439_vm1, %v5390_v19  ;;  %v5430_v14 = vsel %vm1018_vm2, %v1070_v23, %v1072_v61  ;;  %v1082_v23 = vrot.slane %v6295_v49, 2  ;;  %v5456_v61 = vsel %vm1018_vm2, %v1079_v12, %v1080_v41  ;;  %v1089_v49 = vrot.slane %v5279_v44, 2 }
  0x58   : > { %4144 = vmatprep.mubr.msk.f32.mxu1 %vm439_vm1, %v4882_v7  ;;  %4368 = vmatprep.mubr.msk.f32.mxu0 %vm439_vm1, %v5395_v28  ;;  %v5474_v12 = vsel %vm1018_vm2, %v1084_v53, %v1085_v13  ;;  %v1090_v43 = vrot.slane %v5281_v17, 2  ;;  %v1094_v53 = vrot.slane %v5316_v56, 2 }
  0x59   : > { %v5469_v4 = vsel %vm1018_vm2, %v1080_v41, %v1082_v23  ;;  %v6299_v41 = vunpack.c.l.bf16 %v5284_v47 }
  0x5a   : > { %6296 = vst [vmem:[#allocation45_spill] sm:$0xff] %v5469_v4 }
  0x5b   : > { %4145 = vmatmul.mubr.msk.f32.vlgmr.msra.gmra.mrb[0].mxu1 %vm439_vm1, %v4884_v8  ;;  %4369 = vmatmul.mubr.msk.f32.gmra.mrb[16].mxu0 %vm439_vm1, %v5408_v20  ;;  %v1092_v23 = vrot.slane %v6299_v41, 2 }
  0x5c   : > { %4193 = vmatpush3.msra.mxu1 %v4949_v42  ;;  %4147 = vmatprep.mubr.msk.f32.mxu1 %vm439_vm1, %v4886_v9  ;;  %v5451_v42 = vsel %vm1018_vm2, %v1075_v30, %v1077_v2  ;;  %v6297_v30 = vunpack.c.l.bf16 %v5243_v31  ;;  %v5499_v9 = vunpack.c.h.bf16 %v3794_v21 }
  0x5d   : > { %4371 = vmatprep.mubr.msk.f32.mxu0 %vm439_vm1, %v5415_v52  ;;  %4242 = vmatprep.subr.mxu1 %v5420_v37  ;;  %6294 = vst [vmem:[#allocation44_spill] sm:$0xff] %v5451_v42  ;;  %v5513_v47 = vsel %vm1018_vm2, %v1090_v43, %v1092_v23 }
  0x5e   : > { %v1087_v2 = vrot.slane %v6297_v30, 2  ;;  %v5494_v30 = vsel %vm1018_vm2, %v1089_v49, %v1090_v43  ;;  %6301 = vst [vmem:[#allocation48_spill] sm:$0xff] %v5513_v47  ;;  %v5519_v49 = vsel %vm1018_vm2, %v1094_v53, %v1095_v26  ;;  %v5561_v53 = vld [vmem:[%s6149_s1 + $0x40] sm:$0xff] }
  0x5f   : > { %4148 = vmatmul.mubr.msk.f32.gmra.mrb[2].mxu1 %vm439_vm1, %v4888_v10  ;;  %4372 = vmatmul.mubr.msk.f32.gmra.mrb[18].mxu0 %vm439_vm1, %v5430_v14  ;;  %6300 = vst [vmem:[#allocation47_spill] sm:$0xff] %v5494_v30  ;;  %v5497_v10 = vunpack.c.l.bf16 %v3794_v21  ;;  %v6302_v21 = vunpack.c.l.bf16 %v5321_v62  ;;  %6303 = vst [vmem:[#allocation49_spill] sm:$0xff] %v5519_v49 }
  0x60   : > { %4150 = vmatprep.mubr.msk.f32.mxu1 %vm439_vm1, %v4896_v15  ;;  %4374 = vmatprep.mubr.msk.f32.mxu0 %vm439_vm1, %v5437_v39  ;;  %v5488_v31 = vsel %vm1018_vm2, %v1085_v13, %v1087_v2 }
  0x61   : > { %6298 = vst [vmem:[#allocation46_spill] sm:$0xff] %v5488_v31  ;;  %v1097_v13 = vrot.slane %v6302_v21, 2  ;;  %v1956_v41 = vrot.slane %v5497_v10, 2  ;;  %v6307_v21 = vunpack.c.l.bf16 %v4880_v6 }
  0x63   : > { %4151 = vmatmul.mubr.msk.f32.gmra.mrb[4].mxu1 %vm439_vm1, %v4898_v16  ;;  %4375 = vmatmul.mubr.msk.f32.gmra.mrb[20].mxu0 %vm439_vm1, %v5451_v42  ;;  %v5532_v62 = vsel %vm1018_vm2, %v1095_v26, %v1097_v13  ;;  %v1022_v13 = vrot.slane %v6307_v21, 2  ;;  %v6315_v21 = vld [vmem:[#allocation33_spill] sm:$0xff] }
  0x64   : > { %4153 = vmatprep.mubr.msk.f32.mxu1 %vm439_vm1, %v4928_v35  ;;  %4377 = vmatprep.mubr.msk.f32.mxu0 %vm439_vm1, %v5456_v61  ;;  %6304 = vst [vmem:[#allocation50_spill] sm:$0xff] %v5532_v62 }
  0x67   : > { %4154 = vmatmul.mubr.msk.f32.gmra.mrb[6].mxu1 %vm439_vm1, %v4936_v38  ;;  %4378 = vmatmul.mubr.msk.f32.gmra.mrb[22].mxu0 %vm439_vm1, %v5469_v4  ;;  %v5502_v4 = vld [vmem:[%s4875_s29 + $0xc8] sm:$0x1] }
  0x68   : > { %4156 = vmatprep.mubr.msk.f32.mxu1 %vm439_vm1, %v4939_v40  ;;  %4380 = vmatprep.mubr.msk.f32.mxu0 %vm439_vm1, %v5474_v12  ;;  %v6230_v2 = vunpack.c.l.bf16 %v5502_v4 }
  0x6a   : > { %v1959_v43 = vrot.slane %v6230_v2, 2  ;;  %v6317_v2 = vld [vmem:[#allocation39_spill] sm:$0xff] }
  0x6b   : > { %4157 = vmatmul.mubr.msk.f32.gmra.mrb[8].mxu1 %vm439_vm1, %v4954_v45  ;;  %4381 = vmatmul.mubr.msk.f32.gmra.mrb[24].mxu0 %vm439_vm1, %v5488_v31  ;;  %v1957_v31 = vrot.slane %v5499_v9, 2 }
  0x6c   : > { %4159 = vmatprep.mubr.msk.f32.mxu1 %vm439_vm1, %v4964_v50  ;;  %4383 = vmatprep.mubr.msk.f32.mxu0 %vm439_vm1, %v5494_v30 }
  0x6d   : > { %v5537_v23 = vsel %vm1018_vm2, %v1956_v41, %v1957_v31  ;;  %v5548_v26 = vsel %vm1018_vm2, %v1957_v31, %v1959_v43  ;;  %v1020_v31 = vrot.slane %v4884_v8, 2  ;;  %v6309_v8 = vld [vmem:[#allocation22_spill] sm:$0xff] }
  0x6e   : > { %6305 = vst [vmem:[#allocation51_spill] sm:$0xff] %v5537_v23  ;;  %6306 = vst [vmem:[#allocation52_spill] sm:$0xff] %v5548_v26  ;;  %v6313_v43 = vld [vmem:[#allocation30_spill] sm:$0xff] }
  0x6f   : > { %4160 = vmatmul.mubr.msk.f32.gmra.mrb[10].mxu1 %vm439_vm1, %v4973_v54  ;;  %4384 = vmatmul.mubr.msk.f32.gmra.mrb[26].mxu0 %vm439_vm1, %v5513_v47  ;;  %v1023_v6 = vsel %vm1018_vm2, %v1020_v31, %v1022_v13 }
  0x70   : > { %4162 = vmatprep.mubr.msk.f32.mxu1 %vm439_vm1, %v4999_v63  ;;  %4386 = vmatprep.mubr.msk.f32.mxu0 %vm439_vm1, %v5519_v49 }
  0x73   : > { %4163 = vmatmul.mubr.msk.f32.gmra.mrb[12].mxu1 %vm439_vm1, %v5001_v0  ;;  %4387 = vmatmul.mubr.msk.f32.gmra.mrb[28].mxu0 %vm439_vm1, %v5532_v62 }
  0x74   : > { %4165 = vmatprep.mubr.msk.f32.mxu1 %vm439_vm1, %v5021_v18  ;;  %4389 = vmatprep.mubr.msk.f32.mxu0 %vm439_vm1, %v5537_v23  ;;  %v6320_v23 = vld [vmem:[#allocation7_spill] sm:$0xff] }
  0x77   : > { %4166 = vmatmul.mubr.msk.f32.gmra.mrb[14].mxu1 %vm439_vm1, %v5028_v22  ;;  %4390 = vmatmul.mubr.msk.f32.gmra.mrb[30].mxu0 %vm439_vm1, %v5548_v26  ;;  %v6318_v26 = vld [vmem:[#allocation5_spill] sm:$0xff] }
  0x78   : > { %4168 = vmatprep.mubr.msk.f32.mxu1 %vm439_vm1, %v5053_v33  ;;  %4394 = vmatprep.mubr.msk.f32.mxu0 %vm439_vm1, %v4896_v15 }
  0x7b   : > { %4169 = vmatmul.mubr.msk.f32.gmra.mrb[16].mxu1 %vm439_vm1, %v5055_v36  ;;  %4395 = vmatmul.mubr.msk.f32.vlgmr.msra.gmra.mrb[0].mxu0 %vm439_vm1, %v4898_v16 }
  0x7c   : > { %4443 = vmatpush3.msra.mxu0 %v5174_v58  ;;  %4171 = vmatprep.mubr.msk.f32.mxu1 %vm439_vm1, %v5101_v24  ;;  %v1019_v58 = vrot.slane %v4882_v7, 2  ;;  %v6308_v7 = vld [vmem:[#allocation20_spill] sm:$0xff] }
  0x7d   : > { %4397 = vmatprep.mubr.msk.f32.mxu0 %vm439_vm1, %v4928_v35  ;;  %4492 = vmatprep.subr.mxu0 %v5561_v53 }
  0x7e   : > { %v1021_v41 = vsel %vm1018_vm2, %v1019_v58, %v1020_v31  ;;  %v6314_v58 = vld [vmem:[#allocation32_spill] sm:$0xff] }
  0x7f   : > { %4172 = vmatmul.mubr.msk.f32.gmra.mrb[18].mxu1 %vm439_vm1, %v5103_v27  ;;  %4398 = vmatmul.mubr.msk.f32.gmra.mrb[2].mxu0 %vm439_vm1, %v4936_v38  ;;  %v250_v31 = vld [vmem:[%s4875_s29 + $0xcc] sm:$0xff]  }
  0x80   : > { %4174 = vmatprep.mubr.msk.f32.mxu1 %vm439_vm1, %v5128_v48  ;;  %4400 = vmatprep.mubr.msk.f32.mxu0 %vm439_vm1, %v4939_v40  ;;  %v5684_v13 = vunpack.c.l.bf16 %v250_v31 }
  0x83   : > { %4175 = vmatmul.mubr.msk.f32.gmra.mrb[20].mxu1 %vm439_vm1, %v5130_v29  ;;  %4401 = vmatmul.mubr.msk.f32.gmra.mrb[4].mxu0 %vm439_vm1, %v4954_v45 }
  0x84   : > { %4177 = vmatprep.mubr.msk.f32.mxu1 %vm439_vm1, %v5152_v59  ;;  %4403 = vmatprep.mubr.msk.f32.mxu0 %vm439_vm1, %v4964_v50 }
  0x87   : > { %4178 = vmatmul.mubr.msk.f32.gmra.mrb[22].mxu1 %vm439_vm1, %v5154_v5  ;;  %4404 = vmatmul.mubr.msk.f32.gmra.mrb[6].mxu0 %vm439_vm1, %v4973_v54 }
  0x88   : > { %4180 = vmatprep.mubr.msk.f32.mxu1 %vm439_vm1, %v5207_v32  ;;  %4406 = vmatprep.mubr.msk.f32.mxu0 %vm439_vm1, %v4999_v63 }
  0x8b   : > { %4181 = vmatmul.mubr.msk.f32.gmra.mrb[24].mxu1 %vm439_vm1, %v5209_v46  ;;  %4407 = vmatmul.mubr.msk.f32.gmra.mrb[8].mxu0 %vm439_vm1, %v5001_v0 }
  0x8c   : > { %4183 = vmatprep.mubr.msk.f32.mxu1 %vm439_vm1, %v5238_v25  ;;  %4409 = vmatprep.mubr.msk.f32.mxu0 %vm439_vm1, %v5021_v18 }
  0x8f   : > { %4184 = vmatmul.mubr.msk.f32.gmra.mrb[26].mxu1 %vm439_vm1, %v5240_v34  ;;  %4410 = vmatmul.mubr.msk.f32.gmra.mrb[10].mxu0 %vm439_vm1, %v5028_v22 }
  0x90   : > { %4186 = vmatprep.mubr.msk.f32.mxu1 %vm439_vm1, %v5279_v44  ;;  %4412 = vmatprep.mubr.msk.f32.mxu0 %vm439_vm1, %v5053_v33 }
  0x93   : > { %4187 = vmatmul.mubr.msk.f32.gmra.mrb[28].mxu1 %vm439_vm1, %v5281_v17  ;;  %4413 = vmatmul.mubr.msk.f32.gmra.mrb[12].mxu0 %vm439_vm1, %v5055_v36 }
  0x94   : > { %4189 = vmatprep.mubr.msk.f32.mxu1 %vm439_vm1, %v5316_v56  ;;  %4415 = vmatprep.mubr.msk.f32.mxu0 %vm439_vm1, %v5101_v24 }
  0x97   : > { %4190 = vmatmul.mubr.msk.f32.gmra.mrb[30].mxu1 %vm439_vm1, %v5318_v51  ;;  %4416 = vmatmul.mubr.msk.f32.gmra.mrb[14].mxu0 %vm439_vm1, %v5103_v27 }
  0x98   : > { %4194 = vmatprep.mubr.msk.f32.mxu1 %vm439_vm1, %v1021_v41  ;;  %4418 = vmatprep.mubr.msk.f32.mxu0 %vm439_vm1, %v5128_v48  ;;  %v6316_v41 = vld [vmem:[#allocation38_spill] sm:$0xff] }
  0x9b   : > { %4195 = vmatmul.mubr.msk.f32.vlgmr.msra.gmra.mrb[0].mxu1 %vm439_vm1, %v1023_v6  ;;  %4419 = vmatmul.mubr.msk.f32.gmra.mrb[16].mxu0 %vm439_vm1, %v5130_v29  ;;  %v5690_v6 = vunpack.c.h.bf16 %v250_v31  ;;  %v6319_v31 = vld [vmem:[#allocation6_spill] sm:$0xff] }
  0x9c   : > { %4243 = vmatpush3.msra.mxu1 %v5420_v37  ;;  %4197 = vmatprep.mubr.msk.f32.mxu1 %vm439_vm1, %v5121_v11  ;;  %v6310_v11 = vld [vmem:[#allocation24_spill] sm:$0xff]  ;;  %v6312_v37 = vld [vmem:[#allocation27_spill] sm:$0xff] }
  0x9d   : > { %4421 = vmatprep.mubr.msk.f32.mxu0 %vm439_vm1, %v5152_v59  ;;  %4542 = vmatprep.subr.mxu1 %v4859_v1 }
  0x9f   : > { %4198 = vmatmul.mubr.msk.f32.gmra.mrb[2].mxu1 %vm439_vm1, %v5140_v55  ;;  %4422 = vmatmul.mubr.msk.f32.gmra.mrb[18].mxu0 %vm439_vm1, %v5154_v5  ;;  %v6311_v55 = vld [vmem:[#allocation25_spill] sm:$0xff] }
  0xa0   : > { %4200 = vmatprep.mubr.msk.f32.mxu1 %vm439_vm1, %v6308_v7  ;;  %4424 = vmatprep.mubr.msk.f32.mxu0 %vm439_vm1, %v5207_v32 }
  0xa3   : > { %4201 = vmatmul.mubr.msk.f32.gmra.mrb[4].mxu1 %vm439_vm1, %v6309_v8  ;;  %4425 = vmatmul.mubr.msk.f32.gmra.mrb[20].mxu0 %vm439_vm1, %v5209_v46 }
  0xa4   : > { %4203 = vmatprep.mubr.msk.f32.mxu1 %vm439_vm1, %v6310_v11  ;;  %4427 = vmatprep.mubr.msk.f32.mxu0 %vm439_vm1, %v5238_v25 }
  0xa7   : > { %4204 = vmatmul.mubr.msk.f32.gmra.mrb[6].mxu1 %vm439_vm1, %v6311_v55  ;;  %4428 = vmatmul.mubr.msk.f32.gmra.mrb[22].mxu0 %vm439_vm1, %v5240_v34 }
  0xa8   : > { %4206 = vmatprep.mubr.msk.f32.mxu1 %vm439_vm1, %v6312_v37  ;;  %4430 = vmatprep.mubr.msk.f32.mxu0 %vm439_vm1, %v5279_v44 }
  0xab   : > { %4207 = vmatmul.mubr.msk.f32.gmra.mrb[8].mxu1 %vm439_vm1, %v6313_v43  ;;  %4431 = vmatmul.mubr.msk.f32.gmra.mrb[24].mxu0 %vm439_vm1, %v5281_v17 }
  0xac   : > { %4209 = vmatprep.mubr.msk.f32.mxu1 %vm439_vm1, %v6314_v58  ;;  %4433 = vmatprep.mubr.msk.f32.mxu0 %vm439_vm1, %v5316_v56 }
  0xaf   : > { %4210 = vmatmul.mubr.msk.f32.gmra.mrb[10].mxu1 %vm439_vm1, %v6315_v21  ;;  %4434 = vmatmul.mubr.msk.f32.gmra.mrb[26].mxu0 %vm439_vm1, %v5318_v51  ;;  %v6321_v51 = vld [vmem:[#allocation8_spill] sm:$0xff] }
  0xb0   : > { %4212 = vmatprep.mubr.msk.f32.mxu1 %vm439_vm1, %v5298_v60  ;;  %4436 = vmatprep.mubr.msk.f32.mxu0 %vm439_vm1, %v5497_v10 }
  0xb3   : > { %4213 = vmatmul.mubr.msk.f32.gmra.mrb[12].mxu1 %vm439_vm1, %v6316_v41  ;;  %4437 = vmatmul.mubr.msk.f32.gmra.mrb[28].mxu0 %vm439_vm1, %v5499_v9 }
  0xb4   : > { %4215 = vmatprep.mubr.msk.f32.mxu1 %vm439_vm1, %v6317_v2  ;;  %4439 = vmatprep.mubr.msk.f32.mxu0 %vm439_vm1, %v5684_v13 }
  0xb7   : > { %4216 = vmatmul.mubr.msk.f32.gmra.mrb[14].mxu1 %vm439_vm1, %v5364_v57  ;;  %4440 = vmatmul.mubr.msk.f32.gmra.mrb[30].mxu0 %vm439_vm1, %v5690_v6 }
  0xb8   : > { %4218 = vmatprep.mubr.msk.f32.mxu1 %vm439_vm1, %v5374_v3  ;;  %4444 = vmatprep.mubr.msk.f32.mxu0 %vm439_vm1, %v6318_v26  ;;  %v6322_v26 = vld [vmem:[#allocation9_spill] sm:$0xff] }
  0xbb   : > { %4219 = vmatmul.mubr.msk.f32.gmra.mrb[16].mxu1 %vm439_vm1, %v5390_v19  ;;  %4445 = vmatmul.mubr.msk.f32.vlgmr.msra.gmra.mrb[0].mxu0 %vm439_vm1, %v6319_v31  ;;  %v6326_v31 = vld [vmem:[#allocation13_spill] sm:$0xff] }
  0xbc   : > { %4493 = vmatpush3.msra.mxu0 %v5561_v53  ;;  %4221 = vmatprep.mubr.msk.f32.mxu1 %vm439_vm1, %v5395_v28  ;;  %v6323_v53 = vld [vmem:[#allocation10_spill] sm:$0xff] }
  0xbd   : > { %4447 = vmatprep.mubr.msk.f32.mxu0 %vm439_vm1, %v6320_v23  ;;  %v6324_v23 = vld [vmem:[#allocation11_spill] sm:$0xff] }
  0xbf   : > { %4222 = vmatmul.mubr.msk.f32.gmra.mrb[18].mxu1 %vm439_vm1, %v5408_v20  ;;  %4448 = vmatmul.mubr.msk.f32.gmra.mrb[2].mxu0 %vm439_vm1, %v6321_v51  ;;  %v6325_v51 = vld [vmem:[#allocation12_spill] sm:$0xff] }
  0xc0   : > { %4224 = vmatprep.mubr.msk.f32.mxu1 %vm439_vm1, %v5415_v52  ;;  %4450 = vmatprep.mubr.msk.f32.mxu0 %vm439_vm1, %v6322_v26  ;;  %v6327_v26 = vld [vmem:[#allocation45_spill] sm:$0xff] }
  0xc3   : > { %4225 = vmatmul.mubr.msk.f32.gmra.mrb[20].mxu1 %vm439_vm1, %v5430_v14  ;;  %4451 = vmatmul.mubr.msk.f32.gmra.mrb[4].mxu0 %vm439_vm1, %v6323_v53  ;;  %v6328_v53 = vld [vmem:[#allocation14_spill] sm:$0xff] }
  0xc4   : > { %4227 = vmatprep.mubr.msk.f32.mxu1 %vm439_vm1, %v5437_v39  ;;  %4453 = vmatprep.mubr.msk.f32.mxu0 %vm439_vm1, %v6324_v23  ;;  %v6329_v23 = vld [vmem:[#allocation15_spill] sm:$0xff] }
  0xc7   : > { %4228 = vmatmul.mubr.msk.f32.gmra.mrb[22].mxu1 %vm439_vm1, %v5451_v42  ;;  %4454 = vmatmul.mubr.msk.f32.gmra.mrb[6].mxu0 %vm439_vm1, %v6325_v51  ;;  %v6330_v42 = vld [vmem:[#allocation46_spill] sm:$0xff]  ;;  %v6331_v51 = vld [vmem:[#allocation16_spill] sm:$0xff] }
  0xc8   : > { %4230 = vmatprep.mubr.msk.f32.mxu1 %vm439_vm1, %v5456_v61  ;;  %4456 = vmatprep.mubr.msk.f32.mxu0 %vm439_vm1, %v6326_v31  ;;  %v6332_v31 = vld [vmem:[#allocation17_spill] sm:$0xff] }
  0xcb   : > { %4231 = vmatmul.mubr.msk.f32.gmra.mrb[24].mxu1 %vm439_vm1, %v6327_v26  ;;  %4457 = vmatmul.mubr.msk.f32.gmra.mrb[8].mxu0 %vm439_vm1, %v6328_v53  ;;  %v6333_v53 = vld [vmem:[#allocation18_spill] sm:$0xff] }
  0xcc   : > { %4233 = vmatprep.mubr.msk.f32.mxu1 %vm439_vm1, %v5474_v12  ;;  %4459 = vmatprep.mubr.msk.f32.mxu0 %vm439_vm1, %v6329_v23  ;;  %v6334_v23 = vld [vmem:[#allocation19_spill] sm:$0xff] }
  0xcf   : > { %4234 = vmatmul.mubr.msk.f32.gmra.mrb[26].mxu1 %vm439_vm1, %v6330_v42  ;;  %4460 = vmatmul.mubr.msk.f32.gmra.mrb[10].mxu0 %vm439_vm1, %v6331_v51  ;;  %v6335_v51 = vld [vmem:[#allocation21_spill] sm:$0xff] }
  0xd0   : > { %4236 = vmatprep.mubr.msk.f32.mxu1 %vm439_vm1, %v5494_v30  ;;  %4462 = vmatprep.mubr.msk.f32.mxu0 %vm439_vm1, %v6332_v31  ;;  %v6336_v30 = vld [vmem:[#allocation3_spill] sm:$0xff] }
  0xd1   : > { %v6337_v31 = vld [vmem:[#allocation23_spill] sm:$0xff] }
  0xd3   : > { %4237 = vmatmul.mubr.msk.f32.gmra.mrb[28].mxu1 %vm439_vm1, %v5513_v47  ;;  %4463 = vmatmul.mubr.msk.f32.gmra.mrb[12].mxu0 %vm439_vm1, %v6333_v53  ;;  %v6338_v47 = vld [vmem:[#allocation4_spill] sm:$0xff]  ;;  %v6339_v53 = vld [vmem:[#allocation26_spill] sm:$0xff] }
  0xd4   : > { %4239 = vmatprep.mubr.msk.f32.mxu1 %vm439_vm1, %v5519_v49  ;;  %4465 = vmatprep.mubr.msk.f32.mxu0 %vm439_vm1, %v6334_v23  ;;  %v1689_v49 = vrot.slane %v5499_v9, 1 }
  0xd7   : > { %4240 = vmatmul.mubr.msk.f32.gmra.mrb[30].mxu1 %vm439_vm1, %v5532_v62  ;;  %4466 = vmatmul.mubr.msk.f32.gmra.mrb[14].mxu0 %vm439_vm1, %v6335_v51  ;;  %v6340_v62 = vld [vmem:[#allocation28_spill] sm:$0xff] }
  0xd8   : > { %4244 = vmatprep.mubr.msk.f32.mxu1 %vm439_vm1, %v6336_v30  ;;  %4468 = vmatprep.mubr.msk.f32.mxu0 %vm439_vm1, %v6337_v31  ;;  %v6341_v30 = vld [vmem:[#allocation29_spill] sm:$0xff] }
  0xdb   : > { %4245 = vmatmul.mubr.msk.f32.vlgmr.msra.gmra.mrb[0].mxu1 %vm439_vm1, %v6338_v47  ;;  %4469 = vmatmul.mubr.msk.f32.gmra.mrb[16].mxu0 %vm439_vm1, %v6339_v53  ;;  %v6342_v47 = vld [vmem:[#allocation31_spill] sm:$0xff] }
  0xdc   : > { %4543 = vmatpush3.msra.mxu1 %v4859_v1  ;;  %4247 = vmatprep.mubr.msk.f32.mxu1 %vm439_vm1, %v4896_v15  ;;  %v6343_v1 = vld [vmem:[#allocation34_spill] sm:$0xff]  ;;  %v6344_v15 = vld [vmem:[#allocation35_spill] sm:$0xff] }
  0xdd   : > { %4471 = vmatprep.mubr.msk.f32.mxu0 %vm439_vm1, %v6340_v62 }
  0xdf   : > { %4248 = vmatmul.mubr.msk.f32.gmra.mrb[2].mxu1 %vm439_vm1, %v4898_v16  ;;  %4472 = vmatmul.mubr.msk.f32.gmra.mrb[18].mxu0 %vm439_vm1, %v6341_v30  ;;  %v6345_v16 = vld [vmem:[#allocation37_spill] sm:$0xff] }
  0xe0   : > { %4250 = vmatprep.mubr.msk.f32.mxu1 %vm439_vm1, %v4928_v35  ;;  %4474 = vmatprep.mubr.msk.f32.mxu0 %vm439_vm1, %v6342_v47  ;;  %v6346_v35 = vld [vmem:[#allocation40_spill] sm:$0xff] }
  0xe3   : > { %4251 = vmatmul.mubr.msk.f32.gmra.mrb[4].mxu1 %vm439_vm1, %v4936_v38  ;;  %4475 = vmatmul.mubr.msk.f32.gmra.mrb[20].mxu0 %vm439_vm1, %v6343_v1  ;;  %v1688_v38 = vrot.slane %v5497_v10, 1  ;;  %v2490_v1 = vrot.slane %v5684_v13, 1 }
  0xe4   : > { %4253 = vmatprep.mubr.msk.f32.mxu1 %vm439_vm1, %v4939_v40  ;;  %4477 = vmatprep.mubr.msk.f32.mxu0 %vm439_vm1, %v6344_v15  ;;  %v5805_v40 = vld [vmem:[%s4875_s29 + $0xd4] sm:$0x1] }
  0xe5   : > { %v6347_v15 = vld [vmem:[#allocation41_spill] sm:$0xff]  ;;  %v5819_v42 = vsel %vm356_vm0, %v1688_v38, %v1689_v49 }
  0xe7   : > { %4254 = vmatmul.mubr.msk.f32.gmra.mrb[6].mxu1 %vm439_vm1, %v4954_v45  ;;  %4478 = vmatmul.mubr.msk.f32.gmra.mrb[22].mxu0 %vm439_vm1, %v6345_v16  ;;  %v6348_v45 = vld [vmem:[#allocation42_spill] sm:$0xff]  ;;  %v306_v16 = vunpack.c.l.bf16 %v5805_v40 }
  0xe8   : > { %4256 = vmatprep.mubr.msk.f32.mxu1 %vm439_vm1, %v4964_v50  ;;  %4480 = vmatprep.mubr.msk.f32.mxu0 %vm439_vm1, %v6346_v35  ;;  %v6349_v50 = vunpack.c.l.bf16 %v5502_v4 }
  0xe9   : > { %v2493_v4 = vrot.slane %v306_v16, 1 }
  0xea   : > { %v1691_v35 = vrot.slane %v6349_v50, 1 }
  0xeb   : > { %4257 = vmatmul.mubr.msk.f32.gmra.mrb[8].mxu1 %vm439_vm1, %v4973_v54  ;;  %4481 = vmatmul.mubr.msk.f32.gmra.mrb[24].mxu0 %vm439_vm1, %v6347_v15  ;;  %v2491_v54 = vrot.slane %v5690_v6, 1  ;;  %v6350_v15 = vld [vmem:[#allocation43_spill] sm:$0xff] }
  0xec   : > { %4259 = vmatprep.mubr.msk.f32.mxu1 %vm439_vm1, %v4999_v63  ;;  %4483 = vmatprep.mubr.msk.f32.mxu0 %vm439_vm1, %v6348_v45  ;;  %v5832_v63 = vsel %vm356_vm0, %v1689_v49, %v1691_v35 }
  0xed   : > { %v2492_v38 = vsel %vm356_vm0, %v2490_v1, %v2491_v54 }
  0xef   : > { %4260 = vmatmul.mubr.msk.f32.gmra.mrb[10].mxu1 %vm439_vm1, %v5001_v0  ;;  %4484 = vmatmul.mubr.msk.f32.gmra.mrb[26].mxu0 %vm439_vm1, %v6350_v15  ;;  %v2494_v0 = vsel %vm356_vm0, %v2491_v54, %v2493_v4 }
  0xf0   : > { %4262 = vmatprep.mubr.msk.f32.mxu1 %vm439_vm1, %v5021_v18  ;;  %4486 = vmatprep.mubr.msk.f32.mxu0 %vm439_vm1, %v5819_v42  ;;  %v6351_v18 = vld [vmem:[#allocation36_spill] sm:$0xff] }
  0xf3   : > { %4263 = vmatmul.mubr.msk.f32.gmra.mrb[12].mxu1 %vm439_vm1, %v5028_v22  ;;  %4487 = vmatmul.mubr.msk.f32.gmra.mrb[28].mxu0 %vm439_vm1, %v5832_v63  ;;  %v6354_v22 = vld [vmem:[#allocation46_spill] sm:$0xff] }
  0xf4   : > { %4265 = vmatprep.mubr.msk.f32.mxu1 %vm439_vm1, %v5053_v33  ;;  %4489 = vmatprep.mubr.msk.f32.mxu0 %vm439_vm1, %v2492_v38  ;;  %v6356_v33 = vld [vmem:[#allocation47_spill] sm:$0xff] }
  0xf7   : > { %4266 = vmatmul.mubr.msk.f32.gmra.mrb[14].mxu1 %vm439_vm1, %v5055_v36  ;;  %4490 = vmatmul.mubr.msk.f32.gmra.mrb[30].mxu0 %vm439_vm1, %v2494_v0  ;;  %v6357_v36 = vld [vmem:[#allocation37_spill] sm:$0xff] }
  0xf8   : > { %4268 = vmatprep.mubr.msk.f32.mxu1 %vm439_vm1, %v5101_v24  ;;  %4494 = vmatprep.mubr.msk.f32.mxu0 %vm439_vm1, %v6308_v7  ;;  %v6360_v24 = vld [vmem:[#allocation49_spill] sm:$0xff] }
  0xfb   : > { %4269 = vmatmul.mubr.msk.f32.gmra.mrb[16].mxu1 %vm439_vm1, %v5103_v27  ;;  %4495 = vmatmul.mubr.msk.f32.vlgmr.msra.gmra.mrb[0].mxu0 %vm439_vm1, %v6309_v8  ;;  %v2758_v27 = vrot.slane %v5684_v13, 2 }
  0xfc   : > { %4271 = vmatprep.mubr.msk.f32.mxu1 %vm439_vm1, %v5128_v48  ;;  %4497 = vmatprep.mubr.msk.f32.mxu0 %vm439_vm1, %v6310_v11  ;;  %v6358_v48 = vld [vmem:[#allocation48_spill] sm:$0xff]  ;;  %v5999_v11 = vld [vmem:[%s6150_s2] ss:$0 sm:$0xff] }
  0xff   : > { %4272 = vmatmul.mubr.msk.f32.gmra.mrb[18].mxu1 %vm439_vm1, %v5130_v29  ;;  %4498 = vmatmul.mubr.msk.f32.gmra.mrb[2].mxu0 %vm439_vm1, %v6311_v55  ;;  %v6355_v29 = vld [vmem:[#allocation35_spill] sm:$0xff] }
 0x100   : > { %4274 = vmatprep.mubr.msk.f32.mxu1 %vm439_vm1, %v5152_v59  ;;  %4500 = vmatprep.mubr.msk.f32.mxu0 %vm439_vm1, %v6312_v37  ;;  %v6359_v59 = vld [vmem:[#allocation40_spill] sm:$0xff] }
 0x103   : > { %4275 = vmatmul.mubr.msk.f32.gmra.mrb[20].mxu1 %vm439_vm1, %v5154_v5  ;;  %4501 = vmatmul.mubr.msk.f32.gmra.mrb[4].mxu0 %vm439_vm1, %v6313_v43  ;;  %v2759_v5 = vrot.slane %v5690_v6, 2  ;;  %v6001_v43 = vstv %s3065_s14 }
 0x104   : > { %4277 = vmatprep.mubr.msk.f32.mxu1 %vm439_vm1, %v5207_v32  ;;  %4503 = vmatprep.mubr.msk.f32.mxu0 %vm439_vm1, %v6314_v58  ;;  %v6361_v32 = vld [vmem:[#allocation41_spill] sm:$0xff] }
 0x107   : > { %4278 = vmatmul.mubr.msk.f32.gmra.mrb[22].mxu1 %vm439_vm1, %v5209_v46  ;;  %4504 = vmatmul.mubr.msk.f32.gmra.mrb[6].mxu0 %vm439_vm1, %v6315_v21  ;;  %v6363_v46 = vld [vmem:[#allocation51_spill] sm:$0xff] }
 0x108   : > { %4280 = vmatprep.mubr.msk.f32.mxu1 %vm439_vm1, %v5238_v25  ;;  %4506 = vmatprep.mubr.msk.f32.mxu0 %vm439_vm1, %v5298_v60  ;;  %v2760_v25 = vsel %vm1018_vm2, %v2758_v27, %v2759_v5 }
 0x10b   : > { %4281 = vmatmul.mubr.msk.f32.gmra.mrb[24].mxu1 %vm439_vm1, %v5240_v34  ;;  %4507 = vmatmul.mubr.msk.f32.gmra.mrb[8].mxu0 %vm439_vm1, %v6316_v41  ;;  %v6364_v34 = vld [vmem:[#allocation52_spill] sm:$0xff] }
 0x10c   : > { %4283 = vmatprep.mubr.msk.f32.mxu1 %vm439_vm1, %v5279_v44  ;;  %4509 = vmatprep.mubr.msk.f32.mxu0 %vm439_vm1, %v6317_v2  ;;  %v2761_v44 = vrot.slane %v306_v16, 2 }
 0x10e   : > { %v2762_v60 = vsel %vm1018_vm2, %v2759_v5, %v2761_v44 }
 0x10f   : > { %4284 = vmatmul.mubr.msk.f32.gmra.mrb[26].mxu1 %vm439_vm1, %v5281_v17  ;;  %4510 = vmatmul.mubr.msk.f32.gmra.mrb[10].mxu0 %vm439_vm1, %v5364_v57  ;;  %v6362_v17 = vld [vmem:[#allocation50_spill] sm:$0xff] }
 0x110   : > { %4286 = vmatprep.mubr.msk.f32.mxu1 %vm439_vm1, %v5316_v56  ;;  %4512 = vmatprep.mubr.msk.f32.mxu0 %vm439_vm1, %v5374_v3 }
 0x113   : > { %4287 = vmatmul.mubr.msk.f32.gmra.mrb[28].mxu1 %vm439_vm1, %v6351_v18  ;;  %4513 = vmatmul.mubr.msk.f32.gmra.mrb[12].mxu0 %vm439_vm1, %v5390_v19 }
 0x114   : > { %4289 = vmatprep.mubr.msk.f32.mxu1 %vm439_vm1, %v5497_v10  ;;  %4515 = vmatprep.mubr.msk.f32.mxu0 %vm439_vm1, %v5395_v28  ;;  %v6353_v10 = vld [vmem:[#allocation34_spill] sm:$0xff] }
 0x117   : > { %4290 = vmatmul.mubr.msk.f32.gmra.mrb[30].mxu1 %vm439_vm1, %v5499_v9  ;;  %4516 = vmatmul.mubr.msk.f32.gmra.mrb[14].mxu0 %vm439_vm1, %v5408_v20  ;;  %v6352_v9 = vld [vmem:[#allocation44_spill] sm:$0xff] }
 0x118   : > { %4318 = vmatprep.mubr.msk.f32.mxu1 %vm439_vm1, %v6334_v23  ;;  %4518 = vmatprep.mubr.msk.f32.mxu0 %vm439_vm1, %v5415_v52 }
 0x11b   : > { %4319 = vmatmul.mubr.msk.f32.vlgmr.msra.gmra.mrb[16].mxu1 %vm439_vm1, %v6335_v51  ;;  %4519 = vmatmul.mubr.msk.f32.gmra.mrb[16].mxu0 %vm439_vm1, %v5430_v14 }
 0x11c   : > { %4321 = vmatprep.mubr.msk.f32.mxu1 %vm439_vm1, %v6337_v31  ;;  %4521 = vmatprep.mubr.msk.f32.mxu0 %vm439_vm1, %v5437_v39 }
 0x11f   : > { %4322 = vmatmul.mubr.msk.f32.gmra.mrb[18].mxu1 %vm439_vm1, %v6339_v53  ;;  %4522 = vmatmul.mubr.msk.f32.gmra.mrb[18].mxu0 %vm439_vm1, %v6352_v9 }
 0x120   : > { %4324 = vmatprep.mubr.msk.f32.mxu1 %vm439_vm1, %v6340_v62  ;;  %4524 = vmatprep.mubr.msk.f32.mxu0 %vm439_vm1, %v5456_v61 }
 0x123   : > { %4325 = vmatmul.mubr.msk.f32.gmra.mrb[20].mxu1 %vm439_vm1, %v6341_v30  ;;  %4525 = vmatmul.mubr.msk.f32.gmra.mrb[20].mxu0 %vm439_vm1, %v6327_v26 }
 0x124   : > { %4327 = vmatprep.mubr.msk.f32.mxu1 %vm439_vm1, %v6342_v47  ;;  %4527 = vmatprep.mubr.msk.f32.mxu0 %vm439_vm1, %v5474_v12 }
 0x127   : > { %4328 = vmatmul.mubr.msk.f32.gmra.mrb[22].mxu1 %vm439_vm1, %v6353_v10  ;;  %4528 = vmatmul.mubr.msk.f32.gmra.mrb[22].mxu0 %vm439_vm1, %v6354_v22 }
 0x128   : > { %4330 = vmatprep.mubr.msk.f32.mxu1 %vm439_vm1, %v6355_v29  ;;  %4530 = vmatprep.mubr.msk.f32.mxu0 %vm439_vm1, %v6356_v33 }
 0x12b   : > { %4331 = vmatmul.mubr.msk.f32.gmra.mrb[24].mxu1 %vm439_vm1, %v6357_v36  ;;  %4531 = vmatmul.mubr.msk.f32.gmra.mrb[24].mxu0 %vm439_vm1, %v6358_v48 }
 0x12c   : > { %4333 = vmatprep.mubr.msk.f32.mxu1 %vm439_vm1, %v6359_v59  ;;  %4533 = vmatprep.mubr.msk.f32.mxu0 %vm439_vm1, %v6360_v24 }
 0x12f   : > { %4334 = vmatmul.mubr.msk.f32.gmra.mrb[26].mxu1 %vm439_vm1, %v6361_v32  ;;  %4534 = vmatmul.mubr.msk.f32.gmra.mrb[26].mxu0 %vm439_vm1, %v6362_v17 }
 0x130   : > { %4336 = vmatprep.mubr.msk.f32.mxu1 %vm439_vm1, %v6348_v45  ;;  %4536 = vmatprep.mubr.msk.f32.mxu0 %vm439_vm1, %v6363_v46 }
 0x133   : > { %4337 = vmatmul.mubr.msk.f32.gmra.mrb[28].mxu1 %vm439_vm1, %v6350_v15  ;;  %4537 = vmatmul.mubr.msk.f32.gmra.mrb[28].mxu0 %vm439_vm1, %v6364_v34 }
 0x134   : > { %4339 = vmatprep.mubr.msk.f32.mxu1 %vm439_vm1, %v5819_v42  ;;  %4539 = vmatprep.mubr.msk.f32.mxu0 %vm439_vm1, %v2760_v25 }
 0x137   : > { %4340 = vmatmul.mubr.msk.f32.gmra.mrb[30].mxu1 %vm439_vm1, %v5832_v63  ;;  %4540 = vmatmul.mubr.msk.f32.gmra.mrb[30].mxu0 %vm439_vm1, %v2762_v60 }
 0x1ae   : > { %v4246_v56 = vpop.f32.mrb[0].mxu1 }
 0x1af   : > { %v1496_v3 = vpop.f32.mrb[1].mxu1 }
 0x1b2   : > { %v4249_v57 = vpop.f32.mrb[2].mxu1 }
 0x1b3   : > { %v1506_v19 = vpop.f32.mrb[3].mxu1 }
 0x1b6   : > { %v4252_v28 = vpop.f32.mrb[4].mxu1 }
 0x1b7   : > { %v1516_v20 = vpop.f32.mrb[5].mxu1 }
 0x1ba   : > { %v4255_v52 = vpop.f32.mrb[6].mxu1 }
 0x1bb   : > { %v1526_v14 = vpop.f32.mrb[7].mxu1 }
 0x1be   : > { %v5980_v39 = vpop.f32.mrb[8].mxu1 }
 0x1bf   : > { %v5982_v42 = vpop.f32.mrb[9].mxu1 }
 0x1c2   : > { %v5984_v61 = vpop.f32.mrb[10].mxu1 }
 0x1c3   : > { %v5986_v12 = vpop.f32.mrb[11].mxu1 }
 0x1c6   : > { %v5988_v2 = vpop.f32.mrb[12].mxu1 }
 0x1c7   : > { %v5990_v49 = vpop.f32.mrb[13].mxu1 }
 0x1ca   : > { %v5992_v62 = vpop.f32.mrb[14].mxu1 }
 0x1cb   : > { %v5994_v7 = vpop.f32.mrb[15].mxu1 }
 0x1ce   : > { %v4496_v8 = vpop.f32.mrb[0].mxu0 }
 0x1cf   : > { %v4544_v55 = vadd.f32 %v4496_v8, %v4246_v56  ;;  %v2835_v37 = vpop.f32.mrb[1].mxu0 }
 0x1d0   : > { %v4545_v58 = vadd.f32 %v2835_v37, %v1496_v3 }
 0x1d1   : > { %v3034_v21 = vadd.f32 %v4544_v55, %v5999_v11 }
 0x1d2   : > { %v3033_v13 = vadd.f32 %v4545_v58, %v5999_v11  ;;  %v4499_v41 = vpop.f32.mrb[2].mxu0 }
 0x1d3   : > { %vm3067_vm3 = vcmp.ge.f32.partialorder %v3034_v21, 0.0  ;;  %v3100_v6 = vmul.f32 %v6001_v43, %v3034_v21  ;;  %v4546_v26 = vadd.f32 %v4499_v41, %v4249_v57  ;;  %v2845_v23 = vpop.f32.mrb[3].mxu0 }
 0x1d4   : > { %vm3066_vm4 = vcmp.ge.f32.partialorder %v3033_v13, 0.0  ;;  %v3099_v51 = vmul.f32 %v6001_v43, %v3033_v13  ;;  %v4547_v31 = vadd.f32 %v2845_v23, %v1506_v19 }
 0x1d5   : > { %v3132_v53 = vsel %vm3067_vm3, %v3034_v21, %v3100_v6  ;;  %v3036_v30 = vadd.f32 %v4546_v26, %v5999_v11 }
 0x1d6   : > { %v3720_v47 = vpack.c.bf16 %v3132_v53, %v3132_v53  ;;  %v3131_v1 = vsel %vm3066_vm4, %v3033_v13, %v3099_v51  ;;  %v3035_v15 = vadd.f32 %v4547_v31, %v5999_v11  ;;  %v4502_v16 = vpop.f32.mrb[4].mxu0 }
 0x1d7   : > { %v3719_v35 = vpack.c.bf16 %v3131_v1, %v3131_v1  ;;  %vm3069_vm6 = vcmp.ge.f32.partialorder %v3036_v30, 0.0  ;;  %v3102_v40 = vmul.f32 %v6001_v43, %v3036_v30  ;;  %v4548_v45 = vadd.f32 %v4502_v16, %v4252_v28  ;;  %v2855_v50 = vpop.f32.mrb[5].mxu0 }
 0x1d8   : > { %3293 = vst.msk [vmem:[%s6011_s21 + $0x4] sm:$0xf] %vm3291_vm5, %v3720_v47  ;;  %vm3068_vm7 = vcmp.ge.f32.partialorder %v3035_v15, 0.0  ;;  %v3101_v54 = vmul.f32 %v6001_v43, %v3035_v15  ;;  %v4549_v63 = vadd.f32 %v2855_v50, %v1516_v20 }
 0x1d9   : > { %3292 = vst.msk [vmem:[%s6011_s21] sm:$0xf] %vm3291_vm5, %v3719_v35  ;;  %v3134_v4 = vsel %vm3069_vm6, %v3036_v30, %v3102_v40  ;;  %v3038_v38 = vadd.f32 %v4548_v45, %v5999_v11 }
 0x1da   : > { %v3722_v0 = vpack.c.bf16 %v3134_v4, %v3134_v4  ;;  %v3133_v18 = vsel %vm3068_vm7, %v3035_v15, %v3101_v54  ;;  %v3037_v9 = vadd.f32 %v4549_v63, %v5999_v11  ;;  %v4505_v10 = vpop.f32.mrb[6].mxu0 }
 0x1db   : > { %v3721_v22 = vpack.c.bf16 %v3133_v18, %v3133_v18  ;;  %vm3071_vm8 = vcmp.ge.f32.partialorder %v3038_v38, 0.0  ;;  %v3104_v29 = vmul.f32 %v6001_v43, %v3038_v38  ;;  %v4550_v33 = vadd.f32 %v4505_v10, %v4255_v52  ;;  %v2865_v36 = vpop.f32.mrb[7].mxu0 }
 0x1dc   : > { %3295 = vst.msk [vmem:[%s6011_s21 + $0xc] sm:$0xf] %vm3291_vm5, %v3722_v0  ;;  %vm3070_vm9 = vcmp.ge.f32.partialorder %v3037_v9, 0.0  ;;  %v3103_v48 = vmul.f32 %v6001_v43, %v3037_v9  ;;  %v4551_v59 = vadd.f32 %v2865_v36, %v1526_v14 }
 0x1dd   : > { %3294 = vst.msk [vmem:[%s6011_s21 + $0x8] sm:$0xf] %vm3291_vm5, %v3721_v22  ;;  %v3136_v24 = vsel %vm3071_vm8, %v3038_v38, %v3104_v29  ;;  %v3040_v27 = vadd.f32 %v4550_v33, %v5999_v11 }
 0x1de   : > { %v3724_v5 = vpack.c.bf16 %v3136_v24, %v3136_v24  ;;  %v3135_v32 = vsel %vm3070_vm9, %v3037_v9, %v3103_v48  ;;  %v3039_v17 = vadd.f32 %v4551_v59, %v5999_v11  ;;  %v4508_v46 = vpop.f32.mrb[8].mxu0 }
 0x1df   : > { %v3723_v44 = vpack.c.bf16 %v3135_v32, %v3135_v32  ;;  %vm3073_vm10 = vcmp.ge.f32.partialorder %v3040_v27, 0.0  ;;  %v3106_v25 = vmul.f32 %v6001_v43, %v3040_v27  ;;  %v4552_v34 = vadd.f32 %v4508_v46, %v5980_v39  ;;  %v2875_v60 = vpop.f32.mrb[9].mxu0 }
 0x1e0   : > { %3297 = vst.msk [vmem:[%s6011_s21 + $0x14] sm:$0xf] %vm3291_vm5, %v3724_v5  ;;  %vm3072_vm11 = vcmp.ge.f32.partialorder %v3039_v17, 0.0  ;;  %v3105_v56 = vmul.f32 %v6001_v43, %v3039_v17  ;;  %v4553_v3 = vadd.f32 %v2875_v60, %v5982_v42 }
 0x1e1   : > { %3296 = vst.msk [vmem:[%s6011_s21 + $0x10] sm:$0xf] %vm3291_vm5, %v3723_v44  ;;  %v3138_v57 = vsel %vm3073_vm10, %v3040_v27, %v3106_v25  ;;  %v3042_v19 = vadd.f32 %v4552_v34, %v5999_v11 }
 0x1e2   : > { %v3726_v28 = vpack.c.bf16 %v3138_v57, %v3138_v57  ;;  %v3137_v20 = vsel %vm3072_vm11, %v3039_v17, %v3105_v56  ;;  %v3041_v52 = vadd.f32 %v4553_v3, %v5999_v11  ;;  %v4511_v14 = vpop.f32.mrb[10].mxu0 }
 0x1e3   : > { %v3725_v39 = vpack.c.bf16 %v3137_v20, %v3137_v20  ;;  %vm3075_vm12 = vcmp.ge.f32.partialorder %v3042_v19, 0.0  ;;  %v3108_v8 = vmul.f32 %v6001_v43, %v3042_v19  ;;  %v4554_v55 = vadd.f32 %v4511_v14, %v5984_v61  ;;  %v2885_v37 = vpop.f32.mrb[11].mxu0 }
 0x1e4   : > { %3299 = vst.msk [vmem:[%s6011_s21 + $0x1c] sm:$0xf] %vm3291_vm5, %v3726_v28  ;;  %vm3074_vm13 = vcmp.ge.f32.partialorder %v3041_v52, 0.0  ;;  %v3107_v42 = vmul.f32 %v6001_v43, %v3041_v52  ;;  %v4555_v58 = vadd.f32 %v2885_v37, %v5986_v12 }
 0x1e5   : > { %3298 = vst.msk [vmem:[%s6011_s21 + $0x18] sm:$0xf] %vm3291_vm5, %v3725_v39  ;;  %v3140_v21 = vsel %vm3075_vm12, %v3042_v19, %v3108_v8  ;;  %v3044_v13 = vadd.f32 %v4554_v55, %v5999_v11 }
 0x1e6   : > { %v3728_v41 = vpack.c.bf16 %v3140_v21, %v3140_v21  ;;  %v3139_v6 = vsel %vm3074_vm13, %v3041_v52, %v3107_v42  ;;  %v3043_v26 = vadd.f32 %v4555_v58, %v5999_v11  ;;  %v4514_v61 = vpop.f32.mrb[12].mxu0 }
 0x1e7   : > { %v3727_v23 = vpack.c.bf16 %v3139_v6, %v3139_v6  ;;  %vm3077_vm14 = vcmp.ge.f32.partialorder %v3044_v13, 0.0  ;;  %v3110_v51 = vmul.f32 %v6001_v43, %v3044_v13  ;;  %v4556_v31 = vadd.f32 %v4514_v61, %v5988_v2  ;;  %v2895_v53 = vpop.f32.mrb[13].mxu0 }
 0x1e8   : > { %3301 = vst.msk [vmem:[%s6011_s21 + $0x24] sm:$0xf] %vm3291_vm5, %v3728_v41  ;;  %vm3076_vm15 = vcmp.ge.f32.partialorder %v3043_v26, 0.0  ;;  %v3109_v12 = vmul.f32 %v6001_v43, %v3043_v26  ;;  %v4557_v30 = vadd.f32 %v2895_v53, %v5990_v49 }
 0x1e9   : > { %3300 = vst.msk [vmem:[%s6011_s21 + $0x20] sm:$0xf] %vm3291_vm5, %v3727_v23  ;;  %v3142_v47 = vsel %vm3077_vm14, %v3044_v13, %v3110_v51  ;;  %v3046_v1 = vadd.f32 %v4556_v31, %v5999_v11 }
 0x1ea   : > { %v3730_v15 = vpack.c.bf16 %v3142_v47, %v3142_v47  ;;  %v3141_v16 = vsel %vm3076_vm15, %v3043_v26, %v3109_v12  ;;  %v3045_v35 = vadd.f32 %v4557_v30, %v5999_v11  ;;  %v4517_v2 = vpop.f32.mrb[14].mxu0 }
 0x1eb   : > { %v3729_v40 = vpack.c.bf16 %v3141_v16, %v3141_v16  ;;  %vm3079_vm0 = vcmp.ge.f32.partialorder %v3046_v1, 0.0  ;;  %v3112_v45 = vmul.f32 %v6001_v43, %v3046_v1  ;;  %v4558_v50 = vadd.f32 %v4517_v2, %v5992_v62  ;;  %v2905_v54 = vpop.f32.mrb[15].mxu0 }
 0x1ec   : > { %3303 = vst.msk [vmem:[%s6011_s21 + $0x2c] sm:$0xf] %vm3291_vm5, %v3730_v15  ;;  %vm3078_vm1 = vcmp.ge.f32.partialorder %v3045_v35, 0.0  ;;  %v3111_v49 = vmul.f32 %v6001_v43, %v3045_v35  ;;  %v4559_v63 = vadd.f32 %v2905_v54, %v5994_v7 }
 0x1ed   : > { %3302 = vst.msk [vmem:[%s6011_s21 + $0x28] sm:$0xf] %vm3291_vm5, %v3729_v40  ;;  %v3144_v4 = vsel %vm3079_vm0, %v3046_v1, %v3112_v45  ;;  %v3048_v38 = vadd.f32 %v4558_v50, %v5999_v11 }
 0x1ee   : > { %v3732_v0 = vpack.c.bf16 %v3144_v4, %v3144_v4  ;;  %v3143_v18 = vsel %vm3078_vm1, %v3045_v35, %v3111_v49  ;;  %v3047_v9 = vadd.f32 %v4559_v63, %v5999_v11  ;;  %v4320_v62 = vpop.f32.mrb[16].mxu1  ;;  %v4520_v10 = vpop.f32.mrb[16].mxu0 }
 0x1ef   : > { %v3731_v22 = vpack.c.bf16 %v3143_v18, %v3143_v18  ;;  %vm3081_vm2 = vcmp.ge.f32.partialorder %v3048_v38, 0.0  ;;  %v3114_v29 = vmul.f32 %v6001_v43, %v3048_v38  ;;  %v4560_v33 = vadd.f32 %v4520_v10, %v4320_v62  ;;  %v1845_v36 = vpop.f32.mrb[17].mxu1  ;;  %v2915_v48 = vpop.f32.mrb[17].mxu0 }
 0x1f0   : > { %3305 = vst.msk [vmem:[%s6011_s21 + $0x34] sm:$0xf] %vm3291_vm5, %v3732_v0  ;;  %vm3080_vm3 = vcmp.ge.f32.partialorder %v3047_v9, 0.0  ;;  %v3113_v7 = vmul.f32 %v6001_v43, %v3047_v9  ;;  %v4561_v59 = vadd.f32 %v2915_v48, %v1845_v36 }
 0x1f1   : > { %3304 = vst.msk [vmem:[%s6011_s21 + $0x30] sm:$0xf] %vm3291_vm5, %v3731_v22  ;;  %v3146_v24 = vsel %vm3081_vm2, %v3048_v38, %v3114_v29  ;;  %v3050_v27 = vadd.f32 %v4560_v33, %v5999_v11 }
 0x1f2   : > { %v3734_v5 = vpack.c.bf16 %v3146_v24, %v3146_v24  ;;  %v3145_v32 = vsel %vm3080_vm3, %v3047_v9, %v3113_v7  ;;  %v3049_v17 = vadd.f32 %v4561_v59, %v5999_v11  ;;  %v4323_v46 = vpop.f32.mrb[18].mxu1  ;;  %v4523_v44 = vpop.f32.mrb[18].mxu0 }
 0x1f3   : > { %v3733_v25 = vpack.c.bf16 %v3145_v32, %v3145_v32  ;;  %vm3083_vm4 = vcmp.ge.f32.partialorder %v3050_v27, 0.0  ;;  %v3116_v34 = vmul.f32 %v6001_v43, %v3050_v27  ;;  %v4562_v60 = vadd.f32 %v4523_v44, %v4323_v46  ;;  %v1855_v56 = vpop.f32.mrb[19].mxu1  ;;  %v2925_v3 = vpop.f32.mrb[19].mxu0 }
 0x1f4   : > { %3307 = vst.msk [vmem:[%s6011_s21 + $0x3c] sm:$0xf] %vm3291_vm5, %v3734_v5  ;;  %vm3082_vm6 = vcmp.ge.f32.partialorder %v3049_v17, 0.0  ;;  %v3115_v57 = vmul.f32 %v6001_v43, %v3049_v17  ;;  %v4563_v19 = vadd.f32 %v2925_v3, %v1855_v56 }
 0x1f5   : > { %3306 = vst.msk [vmem:[%s6011_s21 + $0x38] sm:$0xf] %vm3291_vm5, %v3733_v25  ;;  %v3148_v28 = vsel %vm3083_vm4, %v3050_v27, %v3116_v34  ;;  %v3052_v20 = vadd.f32 %v4562_v60, %v5999_v11 }
 0x1f6   : > { %v3736_v52 = vpack.c.bf16 %v3148_v28, %v3148_v28  ;;  %v3147_v14 = vsel %vm3082_vm6, %v3049_v17, %v3115_v57  ;;  %v3051_v39 = vadd.f32 %v4563_v19, %v5999_v11  ;;  %v4326_v8 = vpop.f32.mrb[20].mxu1  ;;  %v4526_v55 = vpop.f32.mrb[20].mxu0 }
 0x1f7   : > { %v3735_v37 = vpack.c.bf16 %v3147_v14, %v3147_v14  ;;  %vm3085_vm7 = vcmp.ge.f32.partialorder %v3052_v20, 0.0  ;;  %v3118_v42 = vmul.f32 %v6001_v43, %v3052_v20  ;;  %v4564_v58 = vadd.f32 %v4526_v55, %v4326_v8  ;;  %v1865_v21 = vpop.f32.mrb[21].mxu1  ;;  %v2935_v13 = vpop.f32.mrb[21].mxu0 }
 0x1f8   : > { %3309 = vst.msk [vmem:[%s6011_s21 + $0x44] sm:$0xf] %vm3291_vm5, %v3736_v52  ;;  %vm3084_vm8 = vcmp.ge.f32.partialorder %v3051_v39, 0.0  ;;  %v3117_v41 = vmul.f32 %v6001_v43, %v3051_v39  ;;  %v4565_v6 = vadd.f32 %v2935_v13, %v1865_v21 }
 0x1f9   : > { %3308 = vst.msk [vmem:[%s6011_s21 + $0x40] sm:$0xf] %vm3291_vm5, %v3735_v37  ;;  %v3150_v26 = vsel %vm3085_vm7, %v3052_v20, %v3118_v42  ;;  %v3054_v61 = vadd.f32 %v4564_v58, %v5999_v11 }
 0x1fa   : > { %v3738_v23 = vpack.c.bf16 %v3150_v26, %v3150_v26  ;;  %v3149_v51 = vsel %vm3084_vm8, %v3051_v39, %v3117_v41  ;;  %v3053_v31 = vadd.f32 %v4565_v6, %v5999_v11  ;;  %v4329_v53 = vpop.f32.mrb[22].mxu1  ;;  %v4529_v12 = vpop.f32.mrb[22].mxu0 }
 0x1fb   : > { %v3737_v30 = vpack.c.bf16 %v3149_v51, %v3149_v51  ;;  %vm3087_vm9 = vcmp.ge.f32.partialorder %v3054_v61, 0.0  ;;  %v3120_v47 = vmul.f32 %v6001_v43, %v3054_v61  ;;  %v4566_v1 = vadd.f32 %v4529_v12, %v4329_v53  ;;  %v1875_v15 = vpop.f32.mrb[23].mxu1  ;;  %v2945_v16 = vpop.f32.mrb[23].mxu0 }
 0x1fc   : > { %3311 = vst.msk [vmem:[%s6011_s21 + $0x4c] sm:$0xf] %vm3291_vm5, %v3738_v23  ;;  %vm3086_vm10 = vcmp.ge.f32.partialorder %v3053_v31, 0.0  ;;  %v3119_v35 = vmul.f32 %v6001_v43, %v3053_v31  ;;  %v4567_v2 = vadd.f32 %v2945_v16, %v1875_v15 }
 0x1fd   : > { %3310 = vst.msk [vmem:[%s6011_s21 + $0x48] sm:$0xf] %vm3291_vm5, %v3737_v30  ;;  %v3152_v40 = vsel %vm3087_vm9, %v3054_v61, %v3120_v47  ;;  %v3056_v45 = vadd.f32 %v4566_v1, %v5999_v11 }
 0x1fe   : > { %v3740_v50 = vpack.c.bf16 %v3152_v40, %v3152_v40  ;;  %v3151_v54 = vsel %vm3086_vm10, %v3053_v31, %v3119_v35  ;;  %v3055_v49 = vadd.f32 %v4567_v2, %v5999_v11  ;;  %v4332_v63 = vpop.f32.mrb[24].mxu1  ;;  %v4532_v4 = vpop.f32.mrb[24].mxu0 }
 0x1ff   : > { %v3739_v38 = vpack.c.bf16 %v3151_v54, %v3151_v54  ;;  %vm3089_vm11 = vcmp.ge.f32.partialorder %v3056_v45, 0.0  ;;  %v3122_v0 = vmul.f32 %v6001_v43, %v3056_v45  ;;  %v4568_v18 = vadd.f32 %v4532_v4, %v4332_v63  ;;  %v1885_v9 = vpop.f32.mrb[25].mxu1  ;;  %v2955_v62 = vpop.f32.mrb[25].mxu0 }
 0x200   : > { %3313 = vst.msk [vmem:[%s6011_s21 + $0x54] sm:$0xf] %vm3291_vm5, %v3740_v50  ;;  %vm3088_vm12 = vcmp.ge.f32.partialorder %v3055_v49, 0.0  ;;  %v3121_v10 = vmul.f32 %v6001_v43, %v3055_v49  ;;  %v4569_v22 = vadd.f32 %v2955_v62, %v1885_v9 }
 0x201   : > { %3312 = vst.msk [vmem:[%s6011_s21 + $0x50] sm:$0xf] %vm3291_vm5, %v3739_v38  ;;  %v3154_v29 = vsel %vm3089_vm11, %v3056_v45, %v3122_v0  ;;  %v3058_v33 = vadd.f32 %v4568_v18, %v5999_v11 }
 0x202   : > { %v3742_v36 = vpack.c.bf16 %v3154_v29, %v3154_v29  ;;  %v3153_v48 = vsel %vm3088_vm12, %v3055_v49, %v3121_v10  ;;  %v3057_v7 = vadd.f32 %v4569_v22, %v5999_v11  ;;  %v4335_v59 = vpop.f32.mrb[26].mxu1  ;;  %v4535_v24 = vpop.f32.mrb[26].mxu0 }
 0x203   : > { %v3741_v27 = vpack.c.bf16 %v3153_v48, %v3153_v48  ;;  %vm3091_vm13 = vcmp.ge.f32.partialorder %v3058_v33, 0.0  ;;  %v3124_v5 = vmul.f32 %v6001_v43, %v3058_v33  ;;  %v4570_v32 = vadd.f32 %v4535_v24, %v4335_v59  ;;  %v1895_v17 = vpop.f32.mrb[27].mxu1  ;;  %v2965_v46 = vpop.f32.mrb[27].mxu0 }
 0x204   : > { %3315 = vst.msk [vmem:[%s6011_s21 + $0x5c] sm:$0xf] %vm3291_vm5, %v3742_v36  ;;  %vm3090_vm14 = vcmp.ge.f32.partialorder %v3057_v7, 0.0  ;;  %v3123_v44 = vmul.f32 %v6001_v43, %v3057_v7  ;;  %v4571_v25 = vadd.f32 %v2965_v46, %v1895_v17 }
 0x205   : > { %3314 = vst.msk [vmem:[%s6011_s21 + $0x58] sm:$0xf] %vm3291_vm5, %v3741_v27  ;;  %v3156_v34 = vsel %vm3091_vm13, %v3058_v33, %v3124_v5  ;;  %v3060_v60 = vadd.f32 %v4570_v32, %v5999_v11 }
 0x206   : > { %v3744_v56 = vpack.c.bf16 %v3156_v34, %v3156_v34  ;;  %v3155_v3 = vsel %vm3090_vm14, %v3057_v7, %v3123_v44  ;;  %v3059_v57 = vadd.f32 %v4571_v25, %v5999_v11  ;;  %v4338_v19 = vpop.f32.mrb[28].mxu1  ;;  %v4538_v28 = vpop.f32.mrb[28].mxu0 }
 0x207   : > { %v3743_v20 = vpack.c.bf16 %v3155_v3, %v3155_v3  ;;  %vm3093_vm15 = vcmp.ge.f32.partialorder %v3060_v60, 0.0  ;;  %v3126_v52 = vmul.f32 %v6001_v43, %v3060_v60  ;;  %v4572_v14 = vadd.f32 %v4538_v28, %v4338_v19  ;;  %v1905_v39 = vpop.f32.mrb[29].mxu1  ;;  %v2975_v8 = vpop.f32.mrb[29].mxu0 }
 0x208   : > { %3317 = vst.msk [vmem:[%s6011_s21 + $0x64] sm:$0xf] %vm3291_vm5, %v3744_v56  ;;  %vm3092_vm0 = vcmp.ge.f32.partialorder %v3059_v57, 0.0  ;;  %v3125_v55 = vmul.f32 %v6001_v43, %v3059_v57  ;;  %v4573_v37 = vadd.f32 %v2975_v8, %v1905_v39 }
 0x209   : > { %3316 = vst.msk [vmem:[%s6011_s21 + $0x60] sm:$0xf] %vm3291_vm5, %v3743_v20  ;;  %v3158_v42 = vsel %vm3093_vm15, %v3060_v60, %v3126_v52  ;;  %v3062_v58 = vadd.f32 %v4572_v14, %v5999_v11 }
 0x20a   : > { %v3746_v21 = vpack.c.bf16 %v3158_v42, %v3158_v42  ;;  %v3157_v13 = vsel %vm3092_vm0, %v3059_v57, %v3125_v55  ;;  %v3061_v41 = vadd.f32 %v4573_v37, %v5999_v11  ;;  %v4341_v6 = vpop.f32.mrb[30].mxu1  ;;  %v4541_v26 = vpop.f32.mrb[30].mxu0 }
 0x20b   : > { %v3745_v61 = vpack.c.bf16 %v3157_v13, %v3157_v13  ;;  %vm3095_vm1 = vcmp.ge.f32.partialorder %v3062_v58, 0.0  ;;  %v3128_v23 = vmul.f32 %v6001_v43, %v3062_v58  ;;  %v4574_v51 = vadd.f32 %v4541_v26, %v4341_v6  ;;  %v1915_v31 = vpop.f32.mrb[31].mxu1  ;;  %v2985_v53 = vpop.f32.mrb[31].mxu0 }
 0x20c   : > { %3319 = vst.msk [vmem:[%s6011_s21 + $0x6c] sm:$0xf] %vm3291_vm5, %v3746_v21  ;;  %vm3094_vm2 = vcmp.ge.f32.partialorder %v3061_v41, 0.0  ;;  %v3127_v12 = vmul.f32 %v6001_v43, %v3061_v41  ;;  %v4575_v30 = vadd.f32 %v2985_v53, %v1915_v31 }
 0x20d   : > { %3318 = vst.msk [vmem:[%s6011_s21 + $0x68] sm:$0xf] %vm3291_vm5, %v3745_v61  ;;  %v3160_v47 = vsel %vm3095_vm1, %v3062_v58, %v3128_v23  ;;  %v3064_v1 = vadd.f32 %v4574_v51, %v5999_v11 }
 0x20e   : > { %v3748_v15 = vpack.c.bf16 %v3160_v47, %v3160_v47  ;;  %v3159_v16 = vsel %vm3094_vm2, %v3061_v41, %v3127_v12  ;;  %v3063_v35 = vadd.f32 %v4575_v30, %v5999_v11 }
 0x20f   : > { %v3747_v2 = vpack.c.bf16 %v3159_v16, %v3159_v16  ;;  %vm3097_vm3 = vcmp.ge.f32.partialorder %v3064_v1, 0.0  ;;  %v3130_v40 = vmul.f32 %v6001_v43, %v3064_v1 }
 0x210   : > { %3321 = vst.msk [vmem:[%s6011_s21 + $0x74] sm:$0xf] %vm3291_vm5, %v3748_v15  ;;  %vm3096_vm4 = vcmp.ge.f32.partialorder %v3063_v35, 0.0  ;;  %v3129_v45 = vmul.f32 %v6001_v43, %v3063_v35 }
 0x211   : > { %3320 = vst.msk [vmem:[%s6011_s21 + $0x70] sm:$0xf] %vm3291_vm5, %v3747_v2  ;;  %v3162_v50 = vsel %vm3097_vm3, %v3064_v1, %v3130_v40 }
 0x212   : > { %v3750_v54 = vpack.c.bf16 %v3162_v50, %v3162_v50  ;;  %v3161_v49 = vsel %vm3096_vm4, %v3063_v35, %v3129_v45 }
 0x213   : > { %v3749_v63 = vpack.c.bf16 %v3161_v49, %v3161_v49 }
 0x214   : > { %3323 = vst.msk [vmem:[%s6011_s21 + $0x7c] sm:$0xf] %vm3291_vm5, %v3750_v54 }
 0x215   : > { %3322 = vst.msk [vmem:[%s6011_s21 + $0x78] sm:$0xf] %vm3291_vm5, %v3749_v63 }
 0x216 PF: > { %s15_s17 = sadd.s32 1, %s4815_s17  }
 0x217   : > { %p12_p4 = scmp.ge.s32.totalorder %s15_s17, 4  }
 0x219   :  { %14 = sbr.rel (!%p12_p4) target bundleno = 2 (0x2), region = 74 }

// kernel: ebrn_forward.51
= control target key start
LH: loop header
LB: loop body
LE: loop exit
PB: predicated region body
PF: predicated region fallthrough
CT: control target
= control target key end

     0   :  { %s4972_s17 = smov 0   ;;  %s6332_s0 = inlined_call_operand.vmem [shape: bf16[2,18,18,24], index: 0, kind: input, shape index: {}]   ;;  %s6333_s1 = inlined_call_operand.vmem [shape: f32[9,24,3], index: 1, kind: input, shape index: {}]   ;;  %s6334_s2 = inlined_call_operand.vmem [shape: f32[1,3], index: 2, kind: input, shape index: {}]   ;;  %s6335_s3 = inlined_call_operand.<no memory space> [shape: f32[1], index: 3, kind: input, shape index: {}]   ;;  %s6336_s4 = inlined_call_operand.vmem [shape: bf16[2,16,16,3], index: 4, kind: output, shape index: {}]  }
   0x1   :  { %9 = sst [smem:[#allocation2]] %s6335_s3 }
   0x2 LB: > { %s3397_s18 = sadd.s32 4294967295, %s4942_s17   ;;  %p3401_p0 = scmp.ge.s32.totalorder %s4942_s17, 1  ;;  %s4942_s17 = sphi %s4972_s17, %s15_s17  }
   0x3   : > { %p163_p1 = scmp.lt.s32.totalorder %s4942_s17, 3 }
   0x5   : > { %p164_p2 = pnand %p3401_p0, %p163_p1 }
   0x7   : > { %167 = sbr.rel (%p164_p2) target bundleno = 534 (0x216), region = 36 }
   0xe   : > { %v3405_v0 = vld [vmem:[%s6333_s1 + $0x18] sm:$0xff]  ;;  %v3406_v1 = vld [vmem:[%s6333_s1 + $0x20] sm:$0xff]  ;;  %p189_p3 = scmp.lt.s32.totalorder %s3397_s18, 1  ;;  %v3543_v4 = vld [vmem:[%s6333_s1 + $0x68] sm:$0xff]  ;;  %vm358_vm0 = vcmask 1046528   ;;  %vm443_vm1 = vcmask 195584  }
   0xf   : > { %v3542_v2 = vld [vmem:[%s6333_s1 + $0x60] sm:$0xff]  ;;  %v4630_v3 = vpack.c.bf16 %v3406_v1, %v3405_v0  ;;  %v3407_v6 = vld [vmem:[%s6333_s1 + $0x28] sm:$0xff]  ;;  %v3544_v9 = vld [vmem:[%s6333_s1 + $0x70] sm:$0xff]  ;;  %vm1022_vm2 = vcmask 1045504   ;;  %vm3309_vm5 = vcmask 19456  }
  0x10   : > { %v4992_v5 = vpack.c.bf16 %v3543_v4, %v3542_v2  ;;  %s6550_s18 = smov (!%p189_p3, %s3397_s18), 1  ;;  %v307_v7 = vld [vmem:[%s6333_s1] sm:$0xff]  ;;  %v308_v8 = vld [vmem:[%s6333_s1 + $0x8] sm:$0xff]  ;;  %v3577_v10 = vld [vmem:[%s6333_s1 + $0x78] sm:$0xff] }
  0x11   : > { %4631 = vmatprep.subr.bf16.mxu1 %v4630_v3  ;;  %v3578_v11 = vld [vmem:[%s6333_s1 + $0x80] sm:$0xff]  ;;  %s4926_s12 = smul.u32 216, %s6550_s18  ;;  %v4634_v12 = vpack.c.bf16 %v308_v8, %v307_v7  ;;  %v3612_v14 = vld [vmem:[%s6333_s1 + $0x90] sm:$0xff]  ;;  %v3613_v24 = vld [vmem:[%s6333_s1 + $0x98] sm:$0xff]  ;;  %s3752_s5 = sshll.u32 %s6550_s18, 7 }
  0x12   : > { %6423 = vst [vmem:[#allocation3_spill] sm:$0xff] %v4992_v5  ;;  %4647 = vmatprep.subr.bf16.mxu0 %v4992_v5  ;;  %4633 = vmatpush3.bf16.msra.mxu1 %v4630_v3  ;;  %v4650_v13 = vpack.c.bf16 %v3578_v11, %v3577_v10  ;;  %v5067_v39 = vpack.c.bf16 %v3613_v24, %v3612_v14  ;;  %v3579_v50 = vld [vmem:[%s6333_s1 + $0x88] sm:$0xff]  ;;  %v309_v55 = vld [vmem:[%s6333_s1 + $0x10] sm:$0xff]  ;;  %v3473_v57 = vld [vmem:[%s6333_s1 + $0x38] sm:$0xff]  ;;  %s6195_s8 = scalar_lea.vmem %s6336_s4, %s3752_s5 }
  0x13   : > { %4649 = vmatpush3.bf16.msra.mxu0 %v4992_v5  ;;  %4148 = vmatprep.subr.mxu1 %v3407_v6  ;;  %s5020_s15 = scalar_lea.vmem %s6332_s0, %s4926_s12  ;;  %v3472_v56 = vld [vmem:[%s6333_s1 + $0x30] sm:$0xff] }
  0x14   : > { %4364 = vmatprep.subr.mxu0 %v3544_v9  ;;  %v3786_v15 = vld [vmem:[%s5020_s15] sm:$0xff]   ;;  %v202_v16 = vld [vmem:[%s5020_s15 + $0xc] sm:$0xff]   ;;  %v5028_v17 = vld [vmem:[%s5020_s15 + $0x8] sm:$0x1]  ;;  %v5131_v8 = vpack.c.bf16 %v3473_v57, %v3472_v56 }
  0x15   : > { %v5030_v18 = vunpack.c.l.bf16 %v3786_v15  ;;  %v5032_v19 = vunpack.c.h.bf16 %v3786_v15  ;;  %v5034_v20 = vunpack.c.l.bf16 %v202_v16  ;;  %v5036_v21 = vunpack.c.h.bf16 %v202_v16  ;;  %v5039_v22 = vld [vmem:[%s5020_s15 + $0x14] sm:$0x1]  ;;  %v3821_v23 = vld [vmem:[%s5020_s15 + $0x18] sm:$0xff]   ;;  %v5052_v29 = vld [vmem:[%s5020_s15 + $0x20] sm:$0x1] }
  0x16   : > { %4149 = vmatpush3.msra.mxu1 %v3407_v6  ;;  %v6337_v25 = vunpack.c.l.bf16 %v5028_v17  ;;  %v258_v26 = vunpack.c.l.bf16 %v5039_v22  ;;  %v5047_v27 = vunpack.c.l.bf16 %v3821_v23  ;;  %v5049_v28 = vunpack.c.h.bf16 %v3821_v23  ;;  %v208_v34 = vld [vmem:[%s5020_s15 + $0x24] sm:$0xff]   ;;  %v5064_v37 = vld [vmem:[%s5020_s15 + $0x2c] sm:$0x1]  ;;  %v3822_v38 = vld [vmem:[%s5020_s15 + $0x30] sm:$0xff]  }
  0x17   : > { %6424 = vst [vmem:[#allocation4_spill] sm:$0xff] %v5034_v20  ;;  %6425 = vst [vmem:[#allocation5_spill] sm:$0xff] %v5036_v21  ;;  %4365 = vmatpush3.msra.mxu0 %v3544_v9  ;;  %4635 = vmatprep.subr.bf16.mxu1 %v4634_v12  ;;  %v359_v30 = vrot.slane %v5030_v18, 1  ;;  %v360_v31 = vrot.slane %v5032_v19, 1  ;;  %v364_v32 = vrot.slane %v5034_v20, 1  ;;  %v365_v33 = vrot.slane %v5036_v21, 1 }
  0x18   : > { %4651 = vmatprep.subr.bf16.mxu0 %v4650_v13  ;;  %v362_v35 = vrot.slane %v6337_v25, 1  ;;  %v367_v36 = vrot.slane %v258_v26, 1  ;;  %v369_v42 = vrot.slane %v5047_v27, 1  ;;  %v370_v43 = vrot.slane %v5049_v28, 1  ;;  %v5074_v44 = vld [vmem:[%s5020_s15 + $0x38] sm:$0x1] }
  0x19   : > { %v361_v40 = vsel %vm358_vm0, %v359_v30, %v360_v31  ;;  %v366_v41 = vsel %vm358_vm0, %v364_v32, %v365_v33  ;;  %v261_v47 = vunpack.c.l.bf16 %v5052_v29  ;;  %v5081_v48 = vunpack.c.l.bf16 %v208_v34  ;;  %v214_v49 = vld [vmem:[%s5020_s15 + $0x3c] sm:$0xff]   ;;  %v5122_v2 = vld [vmem:[%s5020_s15 + $0x44] sm:$0x1]  ;;  %v3823_v7 = vld [vmem:[%s5020_s15 + $0x48] sm:$0xff]  }
  0x1a   : > { %4150 = vmatprep.mubr.msk.f32.mxu1 %vm443_vm1, %v361_v40  ;;  %4366 = vmatprep.mubr.msk.f32.mxu0 %vm443_vm1, %v366_v41  ;;  %v363_v45 = vsel %vm358_vm0, %v360_v31, %v362_v35  ;;  %v368_v46 = vsel %vm358_vm0, %v365_v33, %v367_v36  ;;  %v5090_v51 = vsel %vm358_vm0, %v369_v42, %v370_v43  ;;  %v5092_v52 = vunpack.c.h.bf16 %v208_v34  ;;  %v5159_v24 = vld [vmem:[%s5020_s15 + $0x50] sm:$0x1]  ;;  %v220_v30 = vld [vmem:[%s5020_s15 + $0x54] sm:$0xff]   ;;  %v3824_v42 = vld [vmem:[%s5020_s15 + $0x60] sm:$0xff]  }
  0x1b   : > { %4151 = vmatmul.mubr.msk.f32.vlgmr.msra.gmra.mrb[0].mxu1 %vm443_vm1, %v363_v45  ;;  %4367 = vmatmul.mubr.msk.f32.vlgmr.msra.gmra.mrb[0].mxu0 %vm443_vm1, %v368_v46  ;;  %6426 = vst [vmem:[#allocation6_spill] sm:$0xff] %v5090_v51  ;;  %v6343_v53 = vunpack.c.l.bf16 %v5064_v37  ;;  %v5095_v54 = vunpack.c.l.bf16 %v3822_v38  ;;  %v372_v58 = vrot.slane %v261_v47, 1  ;;  %v374_v59 = vrot.slane %v5081_v48, 1 }
  0x1c   : > { %4637 = vmatpush3.bf16.msra.mxu1 %v4634_v12  ;;  %4653 = vmatpush3.bf16.msra.mxu0 %v4650_v13  ;;  %v5109_v60 = vunpack.c.h.bf16 %v3822_v38  ;;  %v6342_v61 = vunpack.c.l.bf16 %v5074_v44  ;;  %v375_v62 = vrot.slane %v5092_v52, 1  ;;  %v5119_v1 = vunpack.c.l.bf16 %v214_v49 }
  0x1d   : > { %4153 = vmatprep.mubr.msk.f32.mxu1 %vm443_vm1, %v366_v41  ;;  %4369 = vmatprep.mubr.msk.f32.mxu0 %vm443_vm1, %v5090_v51  ;;  %v377_v63 = vrot.slane %v6343_v53, 1  ;;  %v379_v0 = vrot.slane %v5095_v54, 1  ;;  %v5125_v3 = vsel %vm358_vm0, %v370_v43, %v372_v58  ;;  %v5128_v6 = vunpack.c.h.bf16 %v214_v49  ;;  %v5188_v41 = vld [vmem:[%s5020_s15 + $0x5c] sm:$0x1]  ;;  %v5215_v58 = vld [vmem:[%s5020_s15 + $0x68] sm:$0x1] }
  0x1e   : > { %6427 = vst [vmem:[#allocation7_spill] sm:$0xff] %v5125_v3  ;;  %v380_v4 = vrot.slane %v5109_v60, 1  ;;  %4418 = vmatprep.subr.mxu0 %v3579_v50  ;;  %4202 = vmatprep.subr.mxu1 %v309_v55  ;;  %v5137_v9 = vsel %vm358_vm0, %v374_v59, %v375_v62  ;;  %v382_v11 = vrot.slane %v6342_v61, 1  ;;  %v384_v12 = vrot.slane %v5119_v1, 1 }
  0x1f   : > { %4154 = vmatmul.mubr.msk.f32.gmra.mrb[2].mxu1 %vm443_vm1, %v368_v46  ;;  %4370 = vmatmul.mubr.msk.f32.gmra.mrb[2].mxu0 %vm443_vm1, %v5125_v3  ;;  %6428 = vst [vmem:[#allocation8_spill] sm:$0xff] %v5137_v9  ;;  %v5144_v10 = vsel %vm358_vm0, %v375_v62, %v377_v63  ;;  %v6341_v13 = vunpack.c.l.bf16 %v5122_v2  ;;  %v385_v15 = vrot.slane %v5128_v6, 1  ;;  %v5154_v16 = vunpack.c.l.bf16 %v3823_v7 }
  0x20   : > { %4156 = vmatprep.mubr.msk.f32.mxu1 %vm443_vm1, %v5090_v51  ;;  %4372 = vmatprep.mubr.msk.f32.mxu0 %vm443_vm1, %v5137_v9  ;;  %6429 = vst [vmem:[#allocation9_spill] sm:$0xff] %v5144_v10  ;;  %v5151_v14 = vsel %vm358_vm0, %v379_v0, %v380_v4  ;;  %v5156_v23 = vunpack.c.h.bf16 %v3823_v7  ;;  %v5173_v31 = vsel %vm358_vm0, %v380_v4, %v382_v11  ;;  %v6340_v33 = vunpack.c.l.bf16 %v5159_v24  ;;  %v226_v11 = vld [vmem:[%s5020_s15 + $0x6c] sm:$0xff]  }
  0x21   : > { %6430 = vst [vmem:[#allocation10_spill] sm:$0xff] %v5151_v14  ;;  %4419 = vmatpush3.msra.mxu0 %v3579_v50  ;;  %4203 = vmatpush3.msra.mxu1 %v309_v55  ;;  %6431 = vst [vmem:[#allocation11_spill] sm:$0xff] %v5173_v31  ;;  %v387_v32 = vrot.slane %v6341_v13, 1  ;;  %v5178_v34 = vunpack.c.l.bf16 %v220_v30  ;;  %v5181_v35 = vsel %vm358_vm0, %v384_v12, %v385_v15  ;;  %v389_v36 = vrot.slane %v5154_v16, 1  ;;  %v3827_v51 = vld [vmem:[%s5020_s15 + $0xa8] sm:$0xff]  }
  0x22   : > { %4655 = vmatprep.subr.bf16.mxu0 %v5067_v39  ;;  %4639 = vmatprep.subr.bf16.mxu1 %v5131_v8  ;;  %6432 = vst [vmem:[#allocation12_spill] sm:$0xff] %v5181_v35  ;;  %v390_v38 = vrot.slane %v5156_v23, 1  ;;  %v5185_v40 = vunpack.c.h.bf16 %v220_v30  ;;  %v392_v45 = vrot.slane %v6340_v33, 1  ;;  %v6339_v49 = vunpack.c.l.bf16 %v5188_v41  ;;  %v232_v33 = vld [vmem:[%s5020_s15 + $0x84] sm:$0xff]  }
  0x23   : > { %4157 = vmatmul.mubr.msk.f32.gmra.mrb[4].mxu1 %vm443_vm1, %v5125_v3  ;;  %4373 = vmatmul.mubr.msk.f32.gmra.mrb[4].mxu0 %vm443_vm1, %v5144_v10  ;;  %v5200_v43 = vsel %vm358_vm0, %v385_v15, %v387_v32  ;;  %v394_v46 = vrot.slane %v5178_v34, 1  ;;  %v5210_v56 = vunpack.c.l.bf16 %v3824_v42  ;;  %v5212_v57 = vunpack.c.h.bf16 %v3824_v42 }
  0x24   : > { %4159 = vmatprep.mubr.msk.f32.mxu1 %vm443_vm1, %v5137_v9  ;;  %4375 = vmatprep.mubr.msk.f32.mxu0 %vm443_vm1, %v5151_v14  ;;  %6433 = vst [vmem:[#allocation13_spill] sm:$0xff] %v5200_v43  ;;  %v5207_v50 = vsel %vm358_vm0, %v389_v36, %v390_v38  ;;  %v395_v55 = vrot.slane %v5185_v40, 1  ;;  %v5226_v59 = vsel %vm358_vm0, %v390_v38, %v392_v45  ;;  %v397_v62 = vrot.slane %v6339_v49, 1  ;;  %v5253_v36 = vld [vmem:[%s5020_s15 + $0x74] sm:$0x1] }
  0x25   : > { %6434 = vst [vmem:[#allocation14_spill] sm:$0xff] %v5207_v50  ;;  %6435 = vst [vmem:[#allocation15_spill] sm:$0xff] %v5226_v59  ;;  %v6338_v63 = vunpack.c.l.bf16 %v5215_v58  ;;  %v399_v4 = vrot.slane %v5210_v56, 1  ;;  %v400_v7 = vrot.slane %v5212_v57, 1  ;;  %v1028_v30 = vrot.slane %v5034_v20, 2 }
  0x26   : > { %v5232_v0 = vsel %vm358_vm0, %v394_v46, %v395_v55  ;;  %v5246_v12 = vsel %vm358_vm0, %v395_v55, %v397_v62  ;;  %v1029_v32 = vrot.slane %v5036_v21, 2  ;;  %v5258_v42 = vunpack.c.l.bf16 %v226_v11  ;;  %v3825_v46 = vld [vmem:[%s5020_s15 + $0x78] sm:$0xff]  }
  0x27   : > { %4160 = vmatmul.mubr.msk.f32.gmra.mrb[6].mxu1 %vm443_vm1, %v5144_v10  ;;  %4376 = vmatmul.mubr.msk.f32.gmra.mrb[6].mxu0 %vm443_vm1, %v5173_v31  ;;  %6436 = vst [vmem:[#allocation16_spill] sm:$0xff] %v5232_v0  ;;  %6437 = vst [vmem:[#allocation17_spill] sm:$0xff] %v5246_v12  ;;  %v402_v15 = vrot.slane %v6338_v63, 1  ;;  %v5256_v38 = vsel %vm358_vm0, %v399_v4, %v400_v7  ;;  %v5260_v45 = vunpack.c.h.bf16 %v226_v11  ;;  %v1031_v55 = vrot.slane %v258_v26, 2  ;;  %v5281_v26 = vld [vmem:[%s5020_s15 + $0x80] sm:$0x1] }
  0x28   : > { %4162 = vmatprep.mubr.msk.f32.mxu1 %vm443_vm1, %v5151_v14  ;;  %4378 = vmatprep.mubr.msk.f32.mxu0 %vm443_vm1, %v5181_v35  ;;  %6438 = vst [vmem:[#allocation18_spill] sm:$0xff] %v5256_v38  ;;  %v6345_v62 = vunpack.c.l.bf16 %v5253_v36  ;;  %v5278_v22 = vsel %vm1022_vm2, %v1028_v30, %v1029_v32  ;;  %v404_v11 = vrot.slane %v5258_v42, 1  ;;  %v5285_v63 = vunpack.c.l.bf16 %v3825_v46  ;;  %v5358_v14 = vld [vmem:[%s5020_s15 + $0x98] sm:$0x1] }
  0x29   : > { %v5275_v4 = vsel %vm358_vm0, %v400_v7, %v402_v15  ;;  %v405_v25 = vrot.slane %v5260_v45, 1  ;;  %v5287_v49 = vunpack.c.h.bf16 %v3825_v46  ;;  %v1033_v13 = vrot.slane %v5047_v27, 2 }
  0x2a   : > { %6439 = vst [vmem:[#allocation19_spill] sm:$0xff] %v5275_v4  ;;  %v1034_v61 = vrot.slane %v5049_v28, 2  ;;  %v5297_v7 = vsel %vm1022_vm2, %v1029_v32, %v1031_v55  ;;  %v407_v15 = vrot.slane %v6345_v62, 1  ;;  %v1036_v46 = vrot.slane %v261_v47, 2 }
  0x2b   : > { %4163 = vmatmul.mubr.msk.f32.gmra.mrb[8].mxu1 %vm443_vm1, %v5173_v31  ;;  %4379 = vmatmul.mubr.msk.f32.gmra.mrb[8].mxu0 %vm443_vm1, %v5200_v43  ;;  %v1038_v53 = vrot.slane %v5081_v48, 2  ;;  %v5311_v32 = vunpack.c.h.bf16 %v232_v33  ;;  %v5314_v55 = vsel %vm358_vm0, %v404_v11, %v405_v25  ;;  %v409_v62 = vrot.slane %v5285_v63, 1 }
  0x2c   : > { %4165 = vmatprep.mubr.msk.f32.mxu1 %vm443_vm1, %v5181_v35  ;;  %4381 = vmatprep.mubr.msk.f32.mxu0 %vm443_vm1, %v5207_v50  ;;  %6440 = vst [vmem:[#allocation20_spill] sm:$0xff] %v5314_v55  ;;  %v410_v30 = vrot.slane %v5287_v49, 1  ;;  %v5323_v29 = vsel %vm1022_vm2, %v1033_v13, %v1034_v61  ;;  %v6441_v47 = vunpack.c.l.bf16 %v5064_v37  ;;  %v5336_v11 = vsel %vm358_vm0, %v405_v25, %v407_v15  ;;  %v3647_v35 = vld [vmem:[%s6333_s1 + $0xa8] sm:$0xff] }
  0x2d   : > { %6442 = vst [vmem:[#allocation21_spill] sm:$0xff] %v5336_v11  ;;  %v6443_v13 = vunpack.c.l.bf16 %v5281_v26  ;;  %v1043_v37 = vrot.slane %v5095_v54, 2  ;;  %v5352_v25 = vsel %vm1022_vm2, %v1034_v61, %v1036_v46  ;;  %v238_v46 = vld [vmem:[%s5020_s15 + $0x9c] sm:$0xff]   ;;  %v5444_v5 = vunpack.c.h.bf16 %v3827_v51 }
  0x2e   : > { %6444 = vst [vmem:[#allocation22_spill] sm:$0xff] %v5352_v25  ;;  %v5363_v10 = vsel %vm358_vm0, %v409_v62, %v410_v30  ;;  %v6450_v62 = vunpack.c.l.bf16 %v5074_v44  ;;  %v5405_v44 = vld [vmem:[%s5020_s15 + $0xa4] sm:$0x1] }
  0x2f   : > { %4166 = vmatmul.mubr.msk.f32.gmra.mrb[10].mxu1 %vm443_vm1, %v5200_v43  ;;  %4382 = vmatmul.mubr.msk.f32.gmra.mrb[10].mxu0 %vm443_vm1, %v5226_v59  ;;  %v412_v43 = vrot.slane %v6443_v13, 1  ;;  %v415_v13 = vrot.slane %v5311_v32, 1  ;;  %6445 = vst [vmem:[#allocation23_spill] sm:$0xff] %v5363_v10 }
  0x30   : > { %4168 = vmatprep.mubr.msk.f32.mxu1 %vm443_vm1, %v5207_v50  ;;  %4384 = vmatprep.mubr.msk.f32.mxu0 %vm443_vm1, %v5232_v0  ;;  %v3826_v50 = vld [vmem:[%s5020_s15 + $0x90] sm:$0xff]   ;;  %v1046_v3 = vrot.slane %v6450_v62, 2 }
  0x31   : > { %v5370_v61 = vunpack.c.h.bf16 %v3826_v50 }
  0x33   : > { %4169 = vmatmul.mubr.msk.f32.gmra.mrb[12].mxu1 %vm443_vm1, %v5226_v59  ;;  %4385 = vmatmul.mubr.msk.f32.gmra.mrb[12].mxu0 %vm443_vm1, %v5246_v12  ;;  %v1041_v59 = vrot.slane %v6441_v47, 2  ;;  %v1044_v47 = vrot.slane %v5109_v60, 2  ;;  %v420_v62 = vrot.slane %v5370_v61, 1 }
  0x34   : > { %4171 = vmatprep.mubr.msk.f32.mxu1 %vm443_vm1, %v5232_v0  ;;  %4387 = vmatprep.mubr.msk.f32.mxu0 %vm443_vm1, %v5256_v38  ;;  %v5320_v0 = vld [vmem:[%s5020_s15 + $0x8c] sm:$0x1] }
  0x37   : > { %4172 = vmatmul.mubr.msk.f32.gmra.mrb[14].mxu1 %vm443_vm1, %v5246_v12  ;;  %4388 = vmatmul.mubr.msk.f32.gmra.mrb[14].mxu0 %vm443_vm1, %v5275_v4  ;;  %v5309_v12 = vunpack.c.l.bf16 %v232_v33  ;;  %v3614_v33 = vld [vmem:[%s6333_s1 + $0xa0] sm:$0xff] }
  0x38   : > { %4174 = vmatprep.mubr.msk.f32.mxu1 %vm443_vm1, %v5256_v38  ;;  %4420 = vmatprep.mubr.msk.f32.mxu0 %vm443_vm1, %v5278_v22  ;;  %v1039_v38 = vrot.slane %v5092_v52, 2 }
  0x39   : > { %v414_v15 = vrot.slane %v5309_v12, 1 }
  0x3a   : > { %v5374_v31 = vsel %vm1022_vm2, %v1039_v38, %v1041_v59  ;;  %v1048_v59 = vrot.slane %v5119_v1, 2 }
  0x3b   : > { %4175 = vmatmul.mubr.msk.f32.gmra.mrb[16].mxu1 %vm443_vm1, %v5275_v4  ;;  %4421 = vmatmul.mubr.msk.f32.vlgmr.msra.gmra.mrb[0].mxu0 %vm443_vm1, %v5297_v7  ;;  %v3648_v4 = vld [vmem:[%s6333_s1 + $0xb0] sm:$0xff]  ;;  %6447 = vst [vmem:[#allocation25_spill] sm:$0xff] %v5374_v31 }
  0x3c   : > { %4657 = vmatpush3.bf16.msra.mxu0 %v5067_v39  ;;  %4177 = vmatprep.mubr.msk.f32.mxu1 %vm443_vm1, %v5314_v55  ;;  %v5366_v39 = vsel %vm1022_vm2, %v1038_v53, %v1039_v38  ;;  %v5368_v55 = vunpack.c.l.bf16 %v3826_v50  ;;  %v5376_v9 = vpack.c.bf16 %v3648_v4, %v3647_v35  ;;  %v5383_v53 = vsel %vm358_vm0, %v410_v30, %v412_v43 }
  0x3d   : > { %4423 = vmatprep.mubr.msk.f32.mxu0 %vm443_vm1, %v5323_v29  ;;  %6446 = vst [vmem:[#allocation24_spill] sm:$0xff] %v5366_v39  ;;  %4472 = vmatprep.subr.mxu0 %v3614_v33  ;;  %6448 = vst [vmem:[#allocation26_spill] sm:$0xff] %v5383_v53  ;;  %v5386_v50 = vsel %vm1022_vm2, %v1043_v37, %v1044_v47  ;;  %v5396_v35 = vsel %vm358_vm0, %v414_v15, %v415_v13  ;;  %v6452_v43 = vunpack.c.l.bf16 %v5320_v0 }
  0x3e   : > { %6449 = vst [vmem:[#allocation27_spill] sm:$0xff] %v5386_v50  ;;  %6451 = vst [vmem:[#allocation28_spill] sm:$0xff] %v5396_v35  ;;  %v5400_v4 = vunpack.c.l.bf16 %v238_v46  ;;  %v5402_v30 = vunpack.c.h.bf16 %v238_v46  ;;  %v419_v37 = vrot.slane %v5368_v55, 1  ;;  %v6453_v15 = vunpack.c.l.bf16 %v5122_v2 }
  0x3f   : > { %4178 = vmatmul.mubr.msk.f32.gmra.mrb[18].mxu1 %vm443_vm1, %v5336_v11  ;;  %4424 = vmatmul.mubr.msk.f32.gmra.mrb[2].mxu0 %vm443_vm1, %v5352_v25  ;;  %v417_v38 = vrot.slane %v6452_v43, 1  ;;  %v6454_v46 = vunpack.c.l.bf16 %v5358_v14 }
  0x40   : > { %4180 = vmatprep.mubr.msk.f32.mxu1 %vm443_vm1, %v5363_v10  ;;  %4426 = vmatprep.mubr.msk.f32.mxu0 %vm443_vm1, %v5366_v39  ;;  %v1049_v10 = vrot.slane %v5128_v6, 2  ;;  %v1051_v11 = vrot.slane %v6453_v15, 2  ;;  %v1053_v39 = vrot.slane %v5154_v16, 2  ;;  %v5437_v25 = vsel %vm358_vm0, %v419_v37, %v420_v62 }
  0x41   : > { %4473 = vmatpush3.msra.mxu0 %v3614_v33  ;;  %v422_v43 = vrot.slane %v6454_v46, 1  ;;  %v1054_v33 = vrot.slane %v5156_v23, 2  ;;  %v5429_v15 = vsel %vm358_vm0, %v415_v13, %v417_v38  ;;  %v424_v46 = vrot.slane %v5400_v4, 1  ;;  %6457 = vst [vmem:[#allocation31_spill] sm:$0xff] %v5437_v25 }
  0x42   : > { %4659 = vmatprep.subr.bf16.mxu0 %v5376_v9  ;;  %6455 = vst [vmem:[#allocation29_spill] sm:$0xff] %v5429_v15  ;;  %v5440_v2 = vsel %vm1022_vm2, %v1048_v59, %v1049_v10  ;;  %v5450_v13 = vsel %vm1022_vm2, %v1049_v10, %v1051_v11  ;;  %v6462_v10 = vunpack.c.l.bf16 %v5159_v24  ;;  %v430_v24 = vrot.slane %v5444_v5, 1 }
  0x43   : > { %4181 = vmatmul.mubr.msk.f32.gmra.mrb[20].mxu1 %vm443_vm1, %v5383_v53  ;;  %4427 = vmatmul.mubr.msk.f32.gmra.mrb[4].mxu0 %vm443_vm1, %v5374_v31  ;;  %v5432_v53 = vsel %vm1022_vm2, %v1044_v47, %v1046_v3  ;;  %v425_v31 = vrot.slane %v5402_v30, 1  ;;  %6458 = vst [vmem:[#allocation32_spill] sm:$0xff] %v5440_v2  ;;  %6459 = vst [vmem:[#allocation33_spill] sm:$0xff] %v5450_v13  ;;  %v244_v3 = vld [vmem:[%s5020_s15 + $0xb4] sm:$0xff]   ;;  %v5458_v47 = vsel %vm358_vm0, %v420_v62, %v422_v43 }
  0x44   : > { %4183 = vmatprep.mubr.msk.f32.mxu1 %vm443_vm1, %v5396_v35  ;;  %4429 = vmatprep.mubr.msk.f32.mxu0 %vm443_vm1, %v5386_v50  ;;  %6456 = vst [vmem:[#allocation30_spill] sm:$0xff] %v5432_v53  ;;  %v5442_v35 = vunpack.c.l.bf16 %v3827_v51  ;;  %v5447_v50 = vld [vmem:[%s5020_s15 + $0xb0] sm:$0x1]  ;;  %6460 = vst [vmem:[#allocation34_spill] sm:$0xff] %v5458_v47  ;;  %v5461_v59 = vsel %vm1022_vm2, %v1053_v39, %v1054_v33  ;;  %v6461_v51 = vunpack.c.l.bf16 %v5405_v44  ;;  %v1056_v11 = vrot.slane %v6462_v10, 2 }
  0x45   : > { %v5472_v37 = vsel %vm358_vm0, %v424_v46, %v425_v31  ;;  %v1058_v62 = vrot.slane %v5178_v34, 2  ;;  %v1059_v39 = vrot.slane %v5185_v40, 2  ;;  %v5479_v10 = vunpack.c.l.bf16 %v244_v3 }
  0x46   : > { %v427_v38 = vrot.slane %v6461_v51, 1  ;;  %6463 = vst [vmem:[#allocation35_spill] sm:$0xff] %v5472_v37  ;;  %v429_v51 = vrot.slane %v5442_v35, 1  ;;  %v5494_v43 = vsel %vm1022_vm2, %v1054_v33, %v1056_v11  ;;  %v1064_v11 = vrot.slane %v5212_v57, 2 }
  0x47   : > { %4184 = vmatmul.mubr.msk.f32.gmra.mrb[22].mxu1 %vm443_vm1, %v5429_v15  ;;  %4430 = vmatmul.mubr.msk.f32.gmra.mrb[6].mxu0 %vm443_vm1, %v5432_v53  ;;  %v5481_v15 = vunpack.c.h.bf16 %v244_v3  ;;  %6466 = vst [vmem:[#allocation38_spill] sm:$0xff] %v5494_v43  ;;  %v5503_v3 = vsel %vm1022_vm2, %v1058_v62, %v1059_v39 }
  0x48   : > { %4186 = vmatprep.mubr.msk.f32.mxu1 %vm443_vm1, %v5437_v25  ;;  %4432 = vmatprep.mubr.msk.f32.mxu0 %vm443_vm1, %v5440_v2  ;;  %v5484_v25 = vld [vmem:[%s5020_s15 + $0xbc] sm:$0x1]  ;;  %v5491_v46 = vsel %vm358_vm0, %v425_v31, %v427_v38  ;;  %v6467_v2 = vunpack.c.l.bf16 %v5188_v41  ;;  %6468 = vst [vmem:[#allocation39_spill] sm:$0xff] %v5503_v3  ;;  %v1063_v31 = vrot.slane %v5210_v56, 2  ;;  %v5510_v38 = vsel %vm358_vm0, %v429_v51, %v430_v24 }
  0x49   : > { %6464 = vst [vmem:[#allocation36_spill] sm:$0xff] %v5481_v15  ;;  %6465 = vst [vmem:[#allocation37_spill] sm:$0xff] %v5491_v46  ;;  %v6401_v33 = vunpack.c.l.bf16 %v5484_v25  ;;  %v434_v41 = vrot.slane %v5479_v10, 1 }
  0x4a   : > { %v1061_v53 = vrot.slane %v6467_v2, 2  ;;  %6470 = vst [vmem:[#allocation40_spill] sm:$0xff] %v5510_v38  ;;  %v435_v2 = vrot.slane %v5481_v15, 1 }
  0x4b   : > { %4187 = vmatmul.mubr.msk.f32.gmra.mrb[24].mxu1 %vm443_vm1, %v5458_v47  ;;  %4433 = vmatmul.mubr.msk.f32.gmra.mrb[8].mxu0 %vm443_vm1, %v5450_v13  ;;  %v6469_v47 = vunpack.c.l.bf16 %v5447_v50  ;;  %v437_v51 = vrot.slane %v6401_v33, 1 }
  0x4c   : > { %4189 = vmatprep.mubr.msk.f32.mxu1 %vm443_vm1, %v5472_v37  ;;  %4435 = vmatprep.mubr.msk.f32.mxu0 %vm443_vm1, %v5461_v59  ;;  %v5527_v62 = vsel %vm1022_vm2, %v1059_v39, %v1061_v53  ;;  %v6476_v39 = vunpack.c.l.bf16 %v5253_v36 }
  0x4d   : > { %v432_v13 = vrot.slane %v6469_v47, 1 }
  0x4f   : > { %4190 = vmatmul.mubr.msk.f32.gmra.mrb[26].mxu1 %vm443_vm1, %v5491_v46  ;;  %4436 = vmatmul.mubr.msk.f32.gmra.mrb[10].mxu0 %vm443_vm1, %v5494_v43  ;;  %v5524_v47 = vsel %vm358_vm0, %v430_v24, %v432_v13  ;;  %v6472_v46 = vunpack.c.l.bf16 %v5215_v58  ;;  %v5534_v43 = vsel %vm358_vm0, %v434_v41, %v435_v2  ;;  %v1069_v13 = vrot.slane %v5260_v45, 2 }
  0x50   : > { %4192 = vmatprep.mubr.msk.f32.mxu1 %vm443_vm1, %v5510_v38  ;;  %4438 = vmatprep.mubr.msk.f32.mxu0 %vm443_vm1, %v5503_v3  ;;  %6471 = vst [vmem:[#allocation41_spill] sm:$0xff] %v5524_v47  ;;  %6473 = vst [vmem:[#allocation42_spill] sm:$0xff] %v5534_v43  ;;  %v5537_v38 = vsel %vm1022_vm2, %v1063_v31, %v1064_v11  ;;  %v1068_v3 = vrot.slane %v5258_v42, 2  ;;  %v5550_v58 = vsel %vm358_vm0, %v435_v2, %v437_v51 }
  0x51   : > { %v1066_v37 = vrot.slane %v6472_v46, 2  ;;  %6474 = vst [vmem:[#allocation43_spill] sm:$0xff] %v5550_v58  ;;  %v1071_v24 = vrot.slane %v6476_v39, 2  ;;  %v1073_v31 = vrot.slane %v5285_v63, 2  ;;  %v1074_v41 = vrot.slane %v5287_v49, 2  ;;  %v3474_v39 = vld [vmem:[%s6333_s1 + $0x40] sm:$0xff] }
  0x52   : > { %v5558_v46 = vsel %vm1022_vm2, %v1068_v3, %v1069_v13  ;;  %v1078_v2 = vrot.slane %v5309_v12, 2 }
  0x53   : > { %4193 = vmatmul.mubr.msk.f32.gmra.mrb[28].mxu1 %vm443_vm1, %v5524_v47  ;;  %4439 = vmatmul.mubr.msk.f32.gmra.mrb[12].mxu0 %vm443_vm1, %v5527_v62  ;;  %v5553_v53 = vsel %vm1022_vm2, %v1064_v11, %v1066_v37  ;;  %v5571_v36 = vsel %vm1022_vm2, %v1069_v13, %v1071_v24  ;;  %v6477_v37 = vunpack.c.l.bf16 %v5281_v26  ;;  %v1079_v11 = vrot.slane %v5311_v32, 2  ;;  %v3507_v26 = vld [vmem:[%s6333_s1 + $0x48] sm:$0xff]  ;;  %v3508_v13 = vld [vmem:[%s6333_s1 + $0x50] sm:$0xff] }
  0x54   : > { %4195 = vmatprep.mubr.msk.f32.mxu1 %vm443_vm1, %v5534_v43  ;;  %4441 = vmatprep.mubr.msk.f32.mxu0 %vm443_vm1, %v5537_v38  ;;  %6475 = vst [vmem:[#allocation44_spill] sm:$0xff] %v5553_v53  ;;  %v5578_v51 = vsel %vm1022_vm2, %v1073_v31, %v1074_v41  ;;  %v6478_v31 = vunpack.c.l.bf16 %v5320_v0  ;;  %v1084_v43 = vrot.slane %v5370_v61, 2  ;;  %v1099_v47 = vrot.slane %v5481_v15, 2 }
  0x55   : > { %v1076_v3 = vrot.slane %v6477_v37, 2  ;;  %v5604_v33 = vsel %vm1022_vm2, %v1078_v2, %v1079_v11 }
  0x56   : > { %v1081_v37 = vrot.slane %v6478_v31, 2  ;;  %v1093_v31 = vrot.slane %v5442_v35, 2 }
  0x57   : > { %4196 = vmatmul.mubr.msk.f32.gmra.mrb[30].mxu1 %vm443_vm1, %v5550_v58  ;;  %4442 = vmatmul.mubr.msk.f32.gmra.mrb[14].mxu0 %vm443_vm1, %v5553_v53  ;;  %v5597_v24 = vsel %vm1022_vm2, %v1074_v41, %v1076_v3  ;;  %v1083_v58 = vrot.slane %v5368_v55, 2  ;;  %v6479_v41 = vunpack.c.l.bf16 %v5358_v14 }
  0x58   : > { %4204 = vmatprep.mubr.msk.f32.mxu1 %vm443_vm1, %v5030_v18  ;;  %4444 = vmatprep.mubr.msk.f32.mxu0 %vm443_vm1, %v5558_v46  ;;  %v5619_v0 = vsel %vm1022_vm2, %v1079_v11, %v1081_v37  ;;  %v1094_v37 = vrot.slane %v5444_v5, 2 }
  0x59   : > { %v1086_v3 = vrot.slane %v6479_v41, 2  ;;  %v5624_v2 = vsel %vm1022_vm2, %v1083_v58, %v1084_v43  ;;  %v6481_v58 = vunpack.c.l.bf16 %v5405_v44  ;;  %v3828_v41 = vld [vmem:[%s5020_s15 + $0xc0] sm:$0xff]  }
  0x5b   : > { %4205 = vmatmul.mubr.msk.f32.vlgmr.msra.gmra.mrb[0].mxu1 %vm443_vm1, %v5032_v19  ;;  %4445 = vmatmul.mubr.msk.f32.gmra.mrb[16].mxu0 %vm443_vm1, %v5571_v36  ;;  %v5638_v14 = vsel %vm1022_vm2, %v1084_v43, %v1086_v3  ;;  %v1091_v11 = vrot.slane %v6481_v58, 2  ;;  %v6483_v43 = vunpack.c.l.bf16 %v5447_v50  ;;  %v5663_v58 = vsel %vm1022_vm2, %v1093_v31, %v1094_v37 }
  0x5c   : > { %4641 = vmatpush3.bf16.msra.mxu1 %v5131_v8  ;;  %4207 = vmatprep.mubr.msk.f32.mxu1 %vm443_vm1, %v5034_v20  ;;  %v5608_v8 = vpack.c.bf16 %v3508_v13, %v3507_v26  ;;  %v1088_v26 = vrot.slane %v5400_v4, 2  ;;  %v1089_v13 = vrot.slane %v5402_v30, 2  ;;  %6480 = vst [vmem:[#allocation45_spill] sm:$0xff] %v5638_v14  ;;  %6484 = vst [vmem:[#allocation47_spill] sm:$0xff] %v5663_v58  ;;  %v5668_v20 = vunpack.c.h.bf16 %v3828_v41 }
  0x5d   : > { %4447 = vmatprep.mubr.msk.f32.mxu0 %vm443_vm1, %v5578_v51  ;;  %4256 = vmatprep.subr.mxu1 %v3474_v39  ;;  %v1096_v3 = vrot.slane %v6483_v43, 2 }
  0x5e   : > { %v5657_v44 = vsel %vm1022_vm2, %v1089_v13, %v1091_v11 }
  0x5f   : > { %4208 = vmatmul.mubr.msk.f32.gmra.mrb[2].mxu1 %vm443_vm1, %v5036_v21  ;;  %4448 = vmatmul.mubr.msk.f32.gmra.mrb[18].mxu0 %vm443_vm1, %v5597_v24  ;;  %6482 = vst [vmem:[#allocation46_spill] sm:$0xff] %v5657_v44  ;;  %v5666_v21 = vunpack.c.l.bf16 %v3828_v41  ;;  %v5682_v50 = vsel %vm1022_vm2, %v1094_v37, %v1096_v3 }
  0x60   : > { %4210 = vmatprep.mubr.msk.f32.mxu1 %vm443_vm1, %v5047_v27  ;;  %4450 = vmatprep.mubr.msk.f32.mxu0 %vm443_vm1, %v5604_v33  ;;  %6485 = vst [vmem:[#allocation48_spill] sm:$0xff] %v5682_v50 }
  0x61   : > { %4257 = vmatpush3.msra.mxu1 %v3474_v39  ;;  %v5643_v39 = vsel %vm1022_vm2, %v1088_v26, %v1089_v13  ;;  %v1098_v26 = vrot.slane %v5479_v10, 2  ;;  %v6486_v13 = vunpack.c.l.bf16 %v5484_v25  ;;  %v1966_v43 = vrot.slane %v5666_v21, 2 }
  0x62   : > { %4643 = vmatprep.subr.bf16.mxu1 %v5608_v8 }
  0x63   : > { %4211 = vmatmul.mubr.msk.f32.gmra.mrb[4].mxu1 %vm443_vm1, %v5049_v28  ;;  %4451 = vmatmul.mubr.msk.f32.gmra.mrb[20].mxu0 %vm443_vm1, %v5619_v0  ;;  %v1101_v11 = vrot.slane %v6486_v13, 2  ;;  %v5688_v41 = vsel %vm1022_vm2, %v1098_v26, %v1099_v47  ;;  %v3649_v26 = vld [vmem:[%s6333_s1 + $0xb8] sm:$0xff]  ;;  %v3683_v13 = vld [vmem:[%s6333_s1 + $0xc8] sm:$0xff] }
  0x64   : > { %4213 = vmatprep.mubr.msk.f32.mxu1 %vm443_vm1, %v5081_v48  ;;  %4453 = vmatprep.mubr.msk.f32.mxu0 %vm443_vm1, %v5624_v2  ;;  %6487 = vst [vmem:[#allocation49_spill] sm:$0xff] %v5688_v41 }
  0x65   : > { %v5701_v25 = vsel %vm1022_vm2, %v1099_v47, %v1101_v11 }
  0x66   : > { %6488 = vst [vmem:[#allocation50_spill] sm:$0xff] %v5701_v25 }
  0x67   : > { %4214 = vmatmul.mubr.msk.f32.gmra.mrb[6].mxu1 %vm443_vm1, %v5092_v52  ;;  %4454 = vmatmul.mubr.msk.f32.gmra.mrb[22].mxu0 %vm443_vm1, %v5638_v14  ;;  %v5671_v14 = vld [vmem:[%s5020_s15 + $0xc8] sm:$0x1] }
  0x68   : > { %4216 = vmatprep.mubr.msk.f32.mxu1 %vm443_vm1, %v5095_v54  ;;  %4456 = vmatprep.mubr.msk.f32.mxu0 %vm443_vm1, %v5643_v39  ;;  %v6414_v31 = vunpack.c.l.bf16 %v5671_v14 }
  0x6a   : > { %v1969_v37 = vrot.slane %v6414_v31, 2  ;;  %v6501_v31 = vld [vmem:[#allocation39_spill] sm:$0xff] }
  0x6b   : > { %4217 = vmatmul.mubr.msk.f32.gmra.mrb[8].mxu1 %vm443_vm1, %v5109_v60  ;;  %4457 = vmatmul.mubr.msk.f32.gmra.mrb[24].mxu0 %vm443_vm1, %v5657_v44  ;;  %v1967_v44 = vrot.slane %v5668_v20, 2 }
  0x6c   : > { %4219 = vmatprep.mubr.msk.f32.mxu1 %vm443_vm1, %v5119_v1  ;;  %4459 = vmatprep.mubr.msk.f32.mxu0 %vm443_vm1, %v5663_v58 }
  0x6d   : > { %v5706_v3 = vsel %vm1022_vm2, %v1966_v43, %v1967_v44  ;;  %v5717_v47 = vsel %vm1022_vm2, %v1967_v44, %v1969_v37  ;;  %v3682_v44 = vld [vmem:[%s6333_s1 + $0xc0] sm:$0xff]  ;;  %v1024_v43 = vrot.slane %v5032_v19, 2  ;;  %v6491_v37 = vunpack.c.l.bf16 %v5028_v17 }
  0x6e   : > { %6489 = vst [vmem:[#allocation51_spill] sm:$0xff] %v5706_v3  ;;  %6490 = vst [vmem:[#allocation52_spill] sm:$0xff] %v5717_v47  ;;  %v5745_v11 = vpack.c.bf16 %v3683_v13, %v3682_v44  ;;  %v6492_v19 = vld [vmem:[#allocation3_spill] sm:$0xff] }
  0x6f   : > { %4220 = vmatmul.mubr.msk.f32.gmra.mrb[10].mxu1 %vm443_vm1, %v5128_v6  ;;  %4460 = vmatmul.mubr.msk.f32.gmra.mrb[26].mxu0 %vm443_vm1, %v5682_v50  ;;  %v6496_v13 = vld [vmem:[#allocation27_spill] sm:$0xff] }
  0x70   : > { %4222 = vmatprep.mubr.msk.f32.mxu1 %vm443_vm1, %v5154_v16  ;;  %4462 = vmatprep.mubr.msk.f32.mxu0 %vm443_vm1, %v5688_v41 }
  0x73   : > { %4223 = vmatmul.mubr.msk.f32.gmra.mrb[12].mxu1 %vm443_vm1, %v5156_v23  ;;  %4463 = vmatmul.mubr.msk.f32.gmra.mrb[28].mxu0 %vm443_vm1, %v5701_v25 }
  0x74   : > { %4225 = vmatprep.mubr.msk.f32.mxu1 %vm443_vm1, %v5178_v34  ;;  %4465 = vmatprep.mubr.msk.f32.mxu0 %vm443_vm1, %v5706_v3  ;;  %v6503_v3 = vld [vmem:[#allocation7_spill] sm:$0xff] }
  0x77   : > { %4226 = vmatmul.mubr.msk.f32.gmra.mrb[14].mxu1 %vm443_vm1, %v5185_v40  ;;  %4466 = vmatmul.mubr.msk.f32.gmra.mrb[30].mxu0 %vm443_vm1, %v5717_v47  ;;  %v6502_v47 = vld [vmem:[#allocation6_spill] sm:$0xff] }
  0x78   : > { %4228 = vmatprep.mubr.msk.f32.mxu1 %vm443_vm1, %v5210_v56  ;;  %4474 = vmatprep.mubr.msk.f32.mxu0 %vm443_vm1, %v5047_v27 }
  0x7b   : > { %4229 = vmatmul.mubr.msk.f32.gmra.mrb[16].mxu1 %vm443_vm1, %v5212_v57  ;;  %4475 = vmatmul.mubr.msk.f32.vlgmr.msra.gmra.mrb[0].mxu0 %vm443_vm1, %v5049_v28 }
  0x7c   : > { %4661 = vmatpush3.bf16.msra.mxu0 %v5376_v9  ;;  %4231 = vmatprep.mubr.msk.f32.mxu1 %vm443_vm1, %v5258_v42  ;;  %v1023_v9 = vrot.slane %v5030_v18, 2  ;;  %v3509_v18 = vld [vmem:[%s6333_s1 + $0x58] sm:$0xff] }
  0x7d   : > { %4477 = vmatprep.mubr.msk.f32.mxu0 %vm443_vm1, %v5081_v48  ;;  %4526 = vmatprep.subr.mxu0 %v3649_v26 }
  0x7e   : > { %v1025_v44 = vsel %vm1022_vm2, %v1023_v9, %v1024_v43  ;;  %v6497_v9 = vld [vmem:[#allocation30_spill] sm:$0xff] }
  0x7f   : > { %4232 = vmatmul.mubr.msk.f32.gmra.mrb[18].mxu1 %vm443_vm1, %v5260_v45  ;;  %4478 = vmatmul.mubr.msk.f32.gmra.mrb[2].mxu0 %vm443_vm1, %v5092_v52 }
  0x80   : > { %4234 = vmatprep.mubr.msk.f32.mxu1 %vm443_vm1, %v5285_v63  ;;  %4480 = vmatprep.mubr.msk.f32.mxu0 %vm443_vm1, %v5095_v54 }
  0x81   : > { %4527 = vmatpush3.msra.mxu0 %v3649_v26  ;;  %v1026_v26 = vrot.slane %v6491_v37, 2  ;;  %v250_v37 = vld [vmem:[%s5020_s15 + $0xcc] sm:$0xff]  }
  0x82   : > { %4663 = vmatprep.subr.bf16.mxu0 %v5745_v11 }
  0x83   : > { %4235 = vmatmul.mubr.msk.f32.gmra.mrb[20].mxu1 %vm443_vm1, %v5287_v49  ;;  %4481 = vmatmul.mubr.msk.f32.gmra.mrb[4].mxu0 %vm443_vm1, %v5109_v60  ;;  %v1027_v17 = vsel %vm1022_vm2, %v1024_v43, %v1026_v26  ;;  %v6498_v43 = vld [vmem:[#allocation32_spill] sm:$0xff]  ;;  %v6499_v26 = vld [vmem:[#allocation33_spill] sm:$0xff] }
  0x84   : > { %4237 = vmatprep.mubr.msk.f32.mxu1 %vm443_vm1, %v5309_v12  ;;  %4483 = vmatprep.mubr.msk.f32.mxu0 %vm443_vm1, %v5119_v1 }
  0x87   : > { %4238 = vmatmul.mubr.msk.f32.gmra.mrb[22].mxu1 %vm443_vm1, %v5311_v32  ;;  %4484 = vmatmul.mubr.msk.f32.gmra.mrb[6].mxu0 %vm443_vm1, %v5128_v6 }
  0x88   : > { %4240 = vmatprep.mubr.msk.f32.mxu1 %vm443_vm1, %v5368_v55  ;;  %4486 = vmatprep.mubr.msk.f32.mxu0 %vm443_vm1, %v5154_v16 }
  0x8b   : > { %4241 = vmatmul.mubr.msk.f32.gmra.mrb[24].mxu1 %vm443_vm1, %v5370_v61  ;;  %4487 = vmatmul.mubr.msk.f32.gmra.mrb[8].mxu0 %vm443_vm1, %v5156_v23 }
  0x8c   : > { %4243 = vmatprep.mubr.msk.f32.mxu1 %vm443_vm1, %v5400_v4  ;;  %4489 = vmatprep.mubr.msk.f32.mxu0 %vm443_vm1, %v5178_v34 }
  0x8f   : > { %4244 = vmatmul.mubr.msk.f32.gmra.mrb[26].mxu1 %vm443_vm1, %v5402_v30  ;;  %4490 = vmatmul.mubr.msk.f32.gmra.mrb[10].mxu0 %vm443_vm1, %v5185_v40 }
  0x90   : > { %4246 = vmatprep.mubr.msk.f32.mxu1 %vm443_vm1, %v5442_v35  ;;  %4492 = vmatprep.mubr.msk.f32.mxu0 %vm443_vm1, %v5210_v56 }
  0x93   : > { %4247 = vmatmul.mubr.msk.f32.gmra.mrb[28].mxu1 %vm443_vm1, %v5444_v5  ;;  %4493 = vmatmul.mubr.msk.f32.gmra.mrb[12].mxu0 %vm443_vm1, %v5212_v57 }
  0x94   : > { %4249 = vmatprep.mubr.msk.f32.mxu1 %vm443_vm1, %v5479_v10  ;;  %4495 = vmatprep.mubr.msk.f32.mxu0 %vm443_vm1, %v5258_v42 }
  0x97   : > { %4250 = vmatmul.mubr.msk.f32.gmra.mrb[30].mxu1 %vm443_vm1, %v5481_v15  ;;  %4496 = vmatmul.mubr.msk.f32.gmra.mrb[14].mxu0 %vm443_vm1, %v5260_v45 }
  0x98   : > { %4258 = vmatprep.mubr.msk.f32.mxu1 %vm443_vm1, %v1025_v44  ;;  %4498 = vmatprep.mubr.msk.f32.mxu0 %vm443_vm1, %v5285_v63  ;;  %v5862_v44 = vunpack.c.l.bf16 %v250_v37 }
  0x9b   : > { %4259 = vmatmul.mubr.msk.f32.vlgmr.msra.gmra.mrb[0].mxu1 %vm443_vm1, %v1027_v17  ;;  %4499 = vmatmul.mubr.msk.f32.gmra.mrb[16].mxu0 %vm443_vm1, %v5287_v49  ;;  %v6500_v17 = vld [vmem:[#allocation38_spill] sm:$0xff] }
  0x9c   : > { %4645 = vmatpush3.bf16.msra.mxu1 %v5608_v8  ;;  %4261 = vmatprep.mubr.msk.f32.mxu1 %vm443_vm1, %v5278_v22  ;;  %v6493_v22 = vld [vmem:[#allocation22_spill] sm:$0xff]  ;;  %v6495_v8 = vld [vmem:[#allocation25_spill] sm:$0xff] }
  0x9d   : > { %4501 = vmatprep.mubr.msk.f32.mxu0 %vm443_vm1, %v5309_v12  ;;  %4310 = vmatprep.subr.mxu1 %v3509_v18 }
  0x9f   : > { %4262 = vmatmul.mubr.msk.f32.gmra.mrb[2].mxu1 %vm443_vm1, %v5297_v7  ;;  %4502 = vmatmul.mubr.msk.f32.gmra.mrb[18].mxu0 %vm443_vm1, %v5311_v32  ;;  %v6494_v7 = vld [vmem:[#allocation24_spill] sm:$0xff] }
  0xa0   : > { %4264 = vmatprep.mubr.msk.f32.mxu1 %vm443_vm1, %v5323_v29  ;;  %4504 = vmatprep.mubr.msk.f32.mxu0 %vm443_vm1, %v5368_v55 }
  0xa1   : > { %4311 = vmatpush3.msra.mxu1 %v3509_v18  ;;  %v5868_v18 = vunpack.c.h.bf16 %v250_v37  ;;  %v3684_v37 = vld [vmem:[%s6333_s1 + $0xd0] sm:$0xff] }
  0xa2   : > { %4666 = vmatprep.subr.bf16.mxu1 %v6492_v19 }
  0xa3   : > { %4265 = vmatmul.mubr.msk.f32.gmra.mrb[4].mxu1 %vm443_vm1, %v6493_v22  ;;  %4505 = vmatmul.mubr.msk.f32.gmra.mrb[20].mxu0 %vm443_vm1, %v5370_v61 }
  0xa4   : > { %4267 = vmatprep.mubr.msk.f32.mxu1 %vm443_vm1, %v6494_v7  ;;  %4507 = vmatprep.mubr.msk.f32.mxu0 %vm443_vm1, %v5400_v4 }
  0xa7   : > { %4268 = vmatmul.mubr.msk.f32.gmra.mrb[6].mxu1 %vm443_vm1, %v6495_v8  ;;  %4508 = vmatmul.mubr.msk.f32.gmra.mrb[22].mxu0 %vm443_vm1, %v5402_v30 }
  0xa8   : > { %4270 = vmatprep.mubr.msk.f32.mxu1 %vm443_vm1, %v6496_v13  ;;  %4510 = vmatprep.mubr.msk.f32.mxu0 %vm443_vm1, %v5442_v35 }
  0xab   : > { %4271 = vmatmul.mubr.msk.f32.gmra.mrb[8].mxu1 %vm443_vm1, %v6497_v9  ;;  %4511 = vmatmul.mubr.msk.f32.gmra.mrb[24].mxu0 %vm443_vm1, %v5444_v5 }
  0xac   : > { %4273 = vmatprep.mubr.msk.f32.mxu1 %vm443_vm1, %v6498_v43  ;;  %4513 = vmatprep.mubr.msk.f32.mxu0 %vm443_vm1, %v5479_v10 }
  0xaf   : > { %4274 = vmatmul.mubr.msk.f32.gmra.mrb[10].mxu1 %vm443_vm1, %v6499_v26  ;;  %4514 = vmatmul.mubr.msk.f32.gmra.mrb[26].mxu0 %vm443_vm1, %v5481_v15  ;;  %v6504_v15 = vld [vmem:[#allocation8_spill] sm:$0xff] }
  0xb0   : > { %4276 = vmatprep.mubr.msk.f32.mxu1 %vm443_vm1, %v5461_v59  ;;  %4516 = vmatprep.mubr.msk.f32.mxu0 %vm443_vm1, %v5666_v21 }
  0xb3   : > { %4277 = vmatmul.mubr.msk.f32.gmra.mrb[12].mxu1 %vm443_vm1, %v6500_v17  ;;  %4517 = vmatmul.mubr.msk.f32.gmra.mrb[28].mxu0 %vm443_vm1, %v5668_v20 }
  0xb4   : > { %4279 = vmatprep.mubr.msk.f32.mxu1 %vm443_vm1, %v6501_v31  ;;  %4519 = vmatprep.mubr.msk.f32.mxu0 %vm443_vm1, %v5862_v44 }
  0xb7   : > { %4280 = vmatmul.mubr.msk.f32.gmra.mrb[14].mxu1 %vm443_vm1, %v5527_v62  ;;  %4520 = vmatmul.mubr.msk.f32.gmra.mrb[30].mxu0 %vm443_vm1, %v5868_v18 }
  0xb8   : > { %4282 = vmatprep.mubr.msk.f32.mxu1 %vm443_vm1, %v5537_v38  ;;  %4528 = vmatprep.mubr.msk.f32.mxu0 %vm443_vm1, %v6502_v47  ;;  %v6505_v47 = vld [vmem:[#allocation9_spill] sm:$0xff] }
  0xbb   : > { %4283 = vmatmul.mubr.msk.f32.gmra.mrb[16].mxu1 %vm443_vm1, %v5553_v53  ;;  %4529 = vmatmul.mubr.msk.f32.vlgmr.msra.gmra.mrb[0].mxu0 %vm443_vm1, %v6503_v3  ;;  %v6506_v53 = vld [vmem:[#allocation10_spill] sm:$0xff]  ;;  %v6507_v3 = vld [vmem:[#allocation11_spill] sm:$0xff] }
  0xbc   : > { %4665 = vmatpush3.bf16.msra.mxu0 %v5745_v11  ;;  %4285 = vmatprep.mubr.msk.f32.mxu1 %vm443_vm1, %v5558_v46  ;;  %v6509_v11 = vld [vmem:[#allocation13_spill] sm:$0xff] }
  0xbd   : > { %4531 = vmatprep.mubr.msk.f32.mxu0 %vm443_vm1, %v6504_v15  ;;  %4580 = vmatprep.subr.mxu0 %v3684_v37  ;;  %v6508_v15 = vld [vmem:[#allocation12_spill] sm:$0xff] }
  0xbf   : > { %4286 = vmatmul.mubr.msk.f32.gmra.mrb[18].mxu1 %vm443_vm1, %v5571_v36  ;;  %4532 = vmatmul.mubr.msk.f32.gmra.mrb[2].mxu0 %vm443_vm1, %v6505_v47  ;;  %v6512_v47 = vld [vmem:[#allocation15_spill] sm:$0xff] }
  0xc0   : > { %4288 = vmatprep.mubr.msk.f32.mxu1 %vm443_vm1, %v5578_v51  ;;  %4534 = vmatprep.mubr.msk.f32.mxu0 %vm443_vm1, %v6506_v53  ;;  %v6510_v53 = vld [vmem:[#allocation14_spill] sm:$0xff] }
  0xc1   : > { %4581 = vmatpush3.msra.mxu0 %v3684_v37  ;;  %v6511_v37 = vld [vmem:[#allocation45_spill] sm:$0xff] }
  0xc3   : > { %4289 = vmatmul.mubr.msk.f32.gmra.mrb[20].mxu1 %vm443_vm1, %v5597_v24  ;;  %4535 = vmatmul.mubr.msk.f32.gmra.mrb[4].mxu0 %vm443_vm1, %v6507_v3  ;;  %v6513_v3 = vld [vmem:[#allocation16_spill] sm:$0xff] }
  0xc4   : > { %4291 = vmatprep.mubr.msk.f32.mxu1 %vm443_vm1, %v5604_v33  ;;  %4537 = vmatprep.mubr.msk.f32.mxu0 %vm443_vm1, %v6508_v15  ;;  %v6514_v15 = vld [vmem:[#allocation46_spill] sm:$0xff] }
  0xc7   : > { %4292 = vmatmul.mubr.msk.f32.gmra.mrb[22].mxu1 %vm443_vm1, %v5619_v0  ;;  %4538 = vmatmul.mubr.msk.f32.gmra.mrb[6].mxu0 %vm443_vm1, %v6509_v11  ;;  %v6515_v11 = vld [vmem:[#allocation17_spill] sm:$0xff] }
  0xc8   : > { %4294 = vmatprep.mubr.msk.f32.mxu1 %vm443_vm1, %v5624_v2  ;;  %4540 = vmatprep.mubr.msk.f32.mxu0 %vm443_vm1, %v6510_v53  ;;  %v6516_v53 = vld [vmem:[#allocation18_spill] sm:$0xff] }
  0xcb   : > { %4295 = vmatmul.mubr.msk.f32.gmra.mrb[24].mxu1 %vm443_vm1, %v6511_v37  ;;  %4541 = vmatmul.mubr.msk.f32.gmra.mrb[8].mxu0 %vm443_vm1, %v6512_v47  ;;  %v6517_v47 = vld [vmem:[#allocation19_spill] sm:$0xff] }
  0xcc   : > { %4297 = vmatprep.mubr.msk.f32.mxu1 %vm443_vm1, %v5643_v39  ;;  %4543 = vmatprep.mubr.msk.f32.mxu0 %vm443_vm1, %v6513_v3  ;;  %v6518_v3 = vld [vmem:[#allocation20_spill] sm:$0xff] }
  0xcf   : > { %4298 = vmatmul.mubr.msk.f32.gmra.mrb[26].mxu1 %vm443_vm1, %v6514_v15  ;;  %4544 = vmatmul.mubr.msk.f32.gmra.mrb[10].mxu0 %vm443_vm1, %v6515_v11  ;;  %v6519_v11 = vld [vmem:[#allocation21_spill] sm:$0xff] }
  0xd0   : > { %4300 = vmatprep.mubr.msk.f32.mxu1 %vm443_vm1, %v5663_v58  ;;  %4546 = vmatprep.mubr.msk.f32.mxu0 %vm443_vm1, %v6516_v53  ;;  %v6520_v58 = vld [vmem:[#allocation4_spill] sm:$0xff]  ;;  %v6521_v53 = vld [vmem:[#allocation23_spill] sm:$0xff] }
  0xd3   : > { %4301 = vmatmul.mubr.msk.f32.gmra.mrb[28].mxu1 %vm443_vm1, %v5682_v50  ;;  %4547 = vmatmul.mubr.msk.f32.gmra.mrb[12].mxu0 %vm443_vm1, %v6517_v47  ;;  %v6522_v50 = vld [vmem:[#allocation5_spill] sm:$0xff]  ;;  %v6523_v47 = vld [vmem:[#allocation26_spill] sm:$0xff] }
  0xd4   : > { %4303 = vmatprep.mubr.msk.f32.mxu1 %vm443_vm1, %v5688_v41  ;;  %4549 = vmatprep.mubr.msk.f32.mxu0 %vm443_vm1, %v6518_v3  ;;  %v1697_v41 = vrot.slane %v5668_v20, 1 }
  0xd7   : > { %4304 = vmatmul.mubr.msk.f32.gmra.mrb[30].mxu1 %vm443_vm1, %v5701_v25  ;;  %4550 = vmatmul.mubr.msk.f32.gmra.mrb[14].mxu0 %vm443_vm1, %v6519_v11  ;;  %v6524_v25 = vld [vmem:[#allocation28_spill] sm:$0xff] }
  0xd8   : > { %4312 = vmatprep.mubr.msk.f32.mxu1 %vm443_vm1, %v6520_v58  ;;  %4552 = vmatprep.mubr.msk.f32.mxu0 %vm443_vm1, %v6521_v53  ;;  %v4935_v58 = vld [vmem:[%s6333_s1 + $0x70] sm:$0xff] }
  0xdb   : > { %4313 = vmatmul.mubr.msk.f32.vlgmr.msra.gmra.mrb[0].mxu1 %vm443_vm1, %v6522_v50  ;;  %4553 = vmatmul.mubr.msk.f32.gmra.mrb[16].mxu0 %vm443_vm1, %v6523_v47  ;;  %v6525_v50 = vld [vmem:[#allocation29_spill] sm:$0xff] }
  0xdc   : > { %4668 = vmatpush3.bf16.msra.mxu1 %v6492_v19  ;;  %4315 = vmatprep.mubr.msk.f32.mxu1 %vm443_vm1, %v5047_v27  ;;  %v6526_v19 = vld [vmem:[#allocation31_spill] sm:$0xff]  ;;  %v6527_v27 = vld [vmem:[#allocation34_spill] sm:$0xff] }
  0xdd   : > { %4555 = vmatprep.mubr.msk.f32.mxu0 %vm443_vm1, %v6524_v25  ;;  %4667 = vmatprep.subr.mxu1 %v4935_v58 }
  0xdf   : > { %4316 = vmatmul.mubr.msk.f32.gmra.mrb[2].mxu1 %vm443_vm1, %v5049_v28  ;;  %4556 = vmatmul.mubr.msk.f32.gmra.mrb[18].mxu0 %vm443_vm1, %v6525_v50  ;;  %v6528_v28 = vld [vmem:[#allocation35_spill] sm:$0xff] }
  0xe0   : > { %4318 = vmatprep.mubr.msk.f32.mxu1 %vm443_vm1, %v5081_v48  ;;  %4558 = vmatprep.mubr.msk.f32.mxu0 %vm443_vm1, %v6526_v19  ;;  %v6529_v48 = vld [vmem:[#allocation37_spill] sm:$0xff] }
  0xe1   : > { %4669 = vmatpush3.msra.mxu1 %v4935_v58  ;;  %v6530_v58 = vld [vmem:[#allocation40_spill] sm:$0xff] }
  0xe3   : > { %4319 = vmatmul.mubr.msk.f32.gmra.mrb[4].mxu1 %vm443_vm1, %v5092_v52  ;;  %4559 = vmatmul.mubr.msk.f32.gmra.mrb[20].mxu0 %vm443_vm1, %v6527_v27  ;;  %v1696_v52 = vrot.slane %v5666_v21, 1  ;;  %v2504_v27 = vrot.slane %v5862_v44, 1 }
  0xe4   : > { %4321 = vmatprep.mubr.msk.f32.mxu1 %vm443_vm1, %v5095_v54  ;;  %4561 = vmatprep.mubr.msk.f32.mxu0 %vm443_vm1, %v6528_v28  ;;  %v5989_v54 = vld [vmem:[%s5020_s15 + $0xd4] sm:$0x1]  ;;  %s3083_s15 = sld [smem:[#allocation2]] }
  0xe5   : > { %v6531_v28 = vld [vmem:[#allocation41_spill] sm:$0xff]  ;;  %v6003_v15 = vsel %vm358_vm0, %v1696_v52, %v1697_v41 }
  0xe7   : > { %4322 = vmatmul.mubr.msk.f32.gmra.mrb[6].mxu1 %vm443_vm1, %v5109_v60  ;;  %4562 = vmatmul.mubr.msk.f32.gmra.mrb[22].mxu0 %vm443_vm1, %v6529_v48  ;;  %v6532_v60 = vld [vmem:[#allocation42_spill] sm:$0xff]  ;;  %v306_v48 = vunpack.c.l.bf16 %v5989_v54 }
  0xe8   : > { %4324 = vmatprep.mubr.msk.f32.mxu1 %vm443_vm1, %v5119_v1  ;;  %4564 = vmatprep.mubr.msk.f32.mxu0 %vm443_vm1, %v6530_v58  ;;  %v6533_v1 = vunpack.c.l.bf16 %v5671_v14 }
  0xe9   : > { %v2507_v14 = vrot.slane %v306_v48, 1 }
  0xea   : > { %v1699_v58 = vrot.slane %v6533_v1, 1 }
  0xeb   : > { %4325 = vmatmul.mubr.msk.f32.gmra.mrb[8].mxu1 %vm443_vm1, %v5128_v6  ;;  %4565 = vmatmul.mubr.msk.f32.gmra.mrb[24].mxu0 %vm443_vm1, %v6531_v28  ;;  %v2505_v6 = vrot.slane %v5868_v18, 1  ;;  %v6534_v28 = vld [vmem:[#allocation43_spill] sm:$0xff] }
  0xec   : > { %4327 = vmatprep.mubr.msk.f32.mxu1 %vm443_vm1, %v5154_v16  ;;  %4567 = vmatprep.mubr.msk.f32.mxu0 %vm443_vm1, %v6532_v60  ;;  %v6016_v16 = vsel %vm358_vm0, %v1697_v41, %v1699_v58 }
  0xed   : > { %v2506_v52 = vsel %vm358_vm0, %v2504_v27, %v2505_v6 }
  0xef   : > { %4328 = vmatmul.mubr.msk.f32.gmra.mrb[10].mxu1 %vm443_vm1, %v5156_v23  ;;  %4568 = vmatmul.mubr.msk.f32.gmra.mrb[26].mxu0 %vm443_vm1, %v6534_v28  ;;  %v2508_v23 = vsel %vm358_vm0, %v2505_v6, %v2507_v14 }
  0xf0   : > { %4330 = vmatprep.mubr.msk.f32.mxu1 %vm443_vm1, %v5178_v34  ;;  %4570 = vmatprep.mubr.msk.f32.mxu0 %vm443_vm1, %v6003_v15  ;;  %v6535_v34 = vld [vmem:[#allocation36_spill] sm:$0xff] }
  0xf3   : > { %4331 = vmatmul.mubr.msk.f32.gmra.mrb[12].mxu1 %vm443_vm1, %v5185_v40  ;;  %4571 = vmatmul.mubr.msk.f32.gmra.mrb[28].mxu0 %vm443_vm1, %v6016_v16  ;;  %v6536_v40 = vld [vmem:[#allocation44_spill] sm:$0xff] }
  0xf4   : > { %4333 = vmatprep.mubr.msk.f32.mxu1 %vm443_vm1, %v5210_v56  ;;  %4573 = vmatprep.mubr.msk.f32.mxu0 %vm443_vm1, %v2506_v52  ;;  %v6541_v56 = vld [vmem:[#allocation37_spill] sm:$0xff] }
  0xf7   : > { %4334 = vmatmul.mubr.msk.f32.gmra.mrb[14].mxu1 %vm443_vm1, %v5212_v57  ;;  %4574 = vmatmul.mubr.msk.f32.gmra.mrb[30].mxu0 %vm443_vm1, %v2508_v23  ;;  %v6542_v57 = vld [vmem:[#allocation48_spill] sm:$0xff] }
  0xf8   : > { %4336 = vmatprep.mubr.msk.f32.mxu1 %vm443_vm1, %v5258_v42  ;;  %4582 = vmatprep.mubr.msk.f32.mxu0 %vm443_vm1, %v5323_v29  ;;  %v2774_v42 = vrot.slane %v5862_v44, 2  ;;  %v6547_v29 = vld [vmem:[#allocation51_spill] sm:$0xff] }
  0xfb   : > { %4337 = vmatmul.mubr.msk.f32.gmra.mrb[16].mxu1 %vm443_vm1, %v5260_v45  ;;  %4583 = vmatmul.mubr.msk.f32.vlgmr.msra.gmra.mrb[0].mxu0 %vm443_vm1, %v6493_v22  ;;  %v2775_v45 = vrot.slane %v5868_v18, 2 }
  0xfc   : > { %4339 = vmatprep.mubr.msk.f32.mxu1 %vm443_vm1, %v5285_v63  ;;  %4585 = vmatprep.mubr.msk.f32.mxu0 %vm443_vm1, %v6494_v7  ;;  %v6543_v63 = vld [vmem:[#allocation40_spill] sm:$0xff] }
  0xff   : > { %4340 = vmatmul.mubr.msk.f32.gmra.mrb[18].mxu1 %vm443_vm1, %v5287_v49  ;;  %4586 = vmatmul.mubr.msk.f32.gmra.mrb[2].mxu0 %vm443_vm1, %v6495_v8  ;;  %v6540_v49 = vld [vmem:[#allocation47_spill] sm:$0xff] }
 0x100   : > { %4342 = vmatprep.mubr.msk.f32.mxu1 %vm443_vm1, %v5309_v12  ;;  %4588 = vmatprep.mubr.msk.f32.mxu0 %vm443_vm1, %v6496_v13  ;;  %v6544_v12 = vld [vmem:[#allocation49_spill] sm:$0xff]  ;;  %v6183_v8 = vld [vmem:[%s6334_s2] ss:$0 sm:$0xff] }
 0x103   : > { %4343 = vmatmul.mubr.msk.f32.gmra.mrb[20].mxu1 %vm443_vm1, %v5311_v32  ;;  %4589 = vmatmul.mubr.msk.f32.gmra.mrb[4].mxu0 %vm443_vm1, %v6497_v9  ;;  %v6545_v32 = vld [vmem:[#allocation41_spill] sm:$0xff] }
 0x104   : > { %4345 = vmatprep.mubr.msk.f32.mxu1 %vm443_vm1, %v5368_v55  ;;  %4591 = vmatprep.mubr.msk.f32.mxu0 %vm443_vm1, %v6498_v43  ;;  %v6546_v55 = vld [vmem:[#allocation50_spill] sm:$0xff]  ;;  %v6185_v43 = vstv %s3083_s15 }
 0x107   : > { %4346 = vmatmul.mubr.msk.f32.gmra.mrb[22].mxu1 %vm443_vm1, %v5370_v61  ;;  %4592 = vmatmul.mubr.msk.f32.gmra.mrb[6].mxu0 %vm443_vm1, %v6499_v26  ;;  %v2777_v61 = vrot.slane %v306_v48, 2 }
 0x108   : > { %4348 = vmatprep.mubr.msk.f32.mxu1 %vm443_vm1, %v5400_v4  ;;  %4594 = vmatprep.mubr.msk.f32.mxu0 %vm443_vm1, %v5461_v59  ;;  %v6548_v4 = vld [vmem:[#allocation52_spill] sm:$0xff] }
 0x10b   : > { %4349 = vmatmul.mubr.msk.f32.gmra.mrb[24].mxu1 %vm443_vm1, %v5402_v30  ;;  %4595 = vmatmul.mubr.msk.f32.gmra.mrb[8].mxu0 %vm443_vm1, %v6500_v17  ;;  %v2778_v30 = vsel %vm1022_vm2, %v2775_v45, %v2777_v61 }
 0x10c   : > { %4351 = vmatprep.mubr.msk.f32.mxu1 %vm443_vm1, %v5442_v35  ;;  %4597 = vmatprep.mubr.msk.f32.mxu0 %vm443_vm1, %v6501_v31  ;;  %v2776_v35 = vsel %vm1022_vm2, %v2774_v42, %v2775_v45 }
 0x10f   : > { %4352 = vmatmul.mubr.msk.f32.gmra.mrb[26].mxu1 %vm443_vm1, %v5444_v5  ;;  %4598 = vmatmul.mubr.msk.f32.gmra.mrb[10].mxu0 %vm443_vm1, %v5527_v62  ;;  %v6537_v5 = vld [vmem:[#allocation34_spill] sm:$0xff] }
 0x110   : > { %4354 = vmatprep.mubr.msk.f32.mxu1 %vm443_vm1, %v5479_v10  ;;  %4600 = vmatprep.mubr.msk.f32.mxu0 %vm443_vm1, %v5537_v38 }
 0x113   : > { %4355 = vmatmul.mubr.msk.f32.gmra.mrb[28].mxu1 %vm443_vm1, %v6535_v34  ;;  %4601 = vmatmul.mubr.msk.f32.gmra.mrb[12].mxu0 %vm443_vm1, %v6536_v40 }
 0x114   : > { %4357 = vmatprep.mubr.msk.f32.mxu1 %vm443_vm1, %v5666_v21  ;;  %4603 = vmatprep.mubr.msk.f32.mxu0 %vm443_vm1, %v5558_v46  ;;  %v6539_v21 = vld [vmem:[#allocation35_spill] sm:$0xff] }
 0x117   : > { %4358 = vmatmul.mubr.msk.f32.gmra.mrb[30].mxu1 %vm443_vm1, %v5668_v20  ;;  %4604 = vmatmul.mubr.msk.f32.gmra.mrb[14].mxu0 %vm443_vm1, %v5571_v36  ;;  %v6538_v20 = vld [vmem:[#allocation46_spill] sm:$0xff] }
 0x118   : > { %4390 = vmatprep.mubr.msk.f32.mxu1 %vm443_vm1, %v6518_v3  ;;  %4606 = vmatprep.mubr.msk.f32.mxu0 %vm443_vm1, %v5578_v51 }
 0x11b   : > { %4391 = vmatmul.mubr.msk.f32.vlgmr.msra.gmra.mrb[16].mxu1 %vm443_vm1, %v6519_v11  ;;  %4607 = vmatmul.mubr.msk.f32.gmra.mrb[16].mxu0 %vm443_vm1, %v5597_v24 }
 0x11c   : > { %4393 = vmatprep.mubr.msk.f32.mxu1 %vm443_vm1, %v6521_v53  ;;  %4609 = vmatprep.mubr.msk.f32.mxu0 %vm443_vm1, %v5604_v33 }
 0x11f   : > { %4394 = vmatmul.mubr.msk.f32.gmra.mrb[18].mxu1 %vm443_vm1, %v6523_v47  ;;  %4610 = vmatmul.mubr.msk.f32.gmra.mrb[18].mxu0 %vm443_vm1, %v5619_v0 }
 0x120   : > { %4396 = vmatprep.mubr.msk.f32.mxu1 %vm443_vm1, %v6524_v25  ;;  %4612 = vmatprep.mubr.msk.f32.mxu0 %vm443_vm1, %v5624_v2 }
 0x123   : > { %4397 = vmatmul.mubr.msk.f32.gmra.mrb[20].mxu1 %vm443_vm1, %v6525_v50  ;;  %4613 = vmatmul.mubr.msk.f32.gmra.mrb[20].mxu0 %vm443_vm1, %v6511_v37 }
 0x124   : > { %4399 = vmatprep.mubr.msk.f32.mxu1 %vm443_vm1, %v6526_v19  ;;  %4615 = vmatprep.mubr.msk.f32.mxu0 %vm443_vm1, %v5643_v39 }
 0x127   : > { %4400 = vmatmul.mubr.msk.f32.gmra.mrb[22].mxu1 %vm443_vm1, %v6537_v5  ;;  %4616 = vmatmul.mubr.msk.f32.gmra.mrb[22].mxu0 %vm443_vm1, %v6538_v20 }
 0x128   : > { %4402 = vmatprep.mubr.msk.f32.mxu1 %vm443_vm1, %v6539_v21  ;;  %4618 = vmatprep.mubr.msk.f32.mxu0 %vm443_vm1, %v6540_v49 }
 0x12b   : > { %4403 = vmatmul.mubr.msk.f32.gmra.mrb[24].mxu1 %vm443_vm1, %v6541_v56  ;;  %4619 = vmatmul.mubr.msk.f32.gmra.mrb[24].mxu0 %vm443_vm1, %v6542_v57 }
 0x12c   : > { %4405 = vmatprep.mubr.msk.f32.mxu1 %vm443_vm1, %v6543_v63  ;;  %4621 = vmatprep.mubr.msk.f32.mxu0 %vm443_vm1, %v6544_v12 }
 0x12f   : > { %4406 = vmatmul.mubr.msk.f32.gmra.mrb[26].mxu1 %vm443_vm1, %v6545_v32  ;;  %4622 = vmatmul.mubr.msk.f32.gmra.mrb[26].mxu0 %vm443_vm1, %v6546_v55 }
 0x130   : > { %4408 = vmatprep.mubr.msk.f32.mxu1 %vm443_vm1, %v6532_v60  ;;  %4624 = vmatprep.mubr.msk.f32.mxu0 %vm443_vm1, %v6547_v29 }
 0x133   : > { %4409 = vmatmul.mubr.msk.f32.gmra.mrb[28].mxu1 %vm443_vm1, %v6534_v28  ;;  %4625 = vmatmul.mubr.msk.f32.gmra.mrb[28].mxu0 %vm443_vm1, %v6548_v4 }
 0x134   : > { %4411 = vmatprep.mubr.msk.f32.mxu1 %vm443_vm1, %v6003_v15  ;;  %4627 = vmatprep.mubr.msk.f32.mxu0 %vm443_vm1, %v2776_v35 }
 0x137   : > { %4412 = vmatmul.mubr.msk.f32.gmra.mrb[30].mxu1 %vm443_vm1, %v6016_v16  ;;  %4628 = vmatmul.mubr.msk.f32.gmra.mrb[30].mxu0 %vm443_vm1, %v2778_v30 }
 0x1ae   : > { %v4314_v59 = vpop.f32.mrb[0].mxu1 }
 0x1af   : > { %v1504_v10 = vpop.f32.mrb[1].mxu1 }
 0x1b2   : > { %v4317_v33 = vpop.f32.mrb[2].mxu1 }
 0x1b3   : > { %v1514_v38 = vpop.f32.mrb[3].mxu1 }
 0x1b6   : > { %v4320_v62 = vpop.f32.mrb[4].mxu1 }
 0x1b7   : > { %v1524_v46 = vpop.f32.mrb[5].mxu1 }
 0x1ba   : > { %v4323_v36 = vpop.f32.mrb[6].mxu1 }
 0x1bb   : > { %v1534_v51 = vpop.f32.mrb[7].mxu1 }
 0x1be   : > { %v6164_v24 = vpop.f32.mrb[8].mxu1 }
 0x1bf   : > { %v6166_v0 = vpop.f32.mrb[9].mxu1 }
 0x1c2   : > { %v6168_v2 = vpop.f32.mrb[10].mxu1 }
 0x1c3   : > { %v6170_v39 = vpop.f32.mrb[11].mxu1 }
 0x1c6   : > { %v6172_v31 = vpop.f32.mrb[12].mxu1 }
 0x1c7   : > { %v6174_v41 = vpop.f32.mrb[13].mxu1 }
 0x1ca   : > { %v6176_v25 = vpop.f32.mrb[14].mxu1 }
 0x1cb   : > { %v6178_v22 = vpop.f32.mrb[15].mxu1 }
 0x1ce   : > { %v4584_v7 = vpop.f32.mrb[0].mxu0 }
 0x1cf   : > { %v4670_v13 = vadd.f32 %v4584_v7, %v4314_v59  ;;  %v2853_v9 = vpop.f32.mrb[1].mxu0 }
 0x1d0   : > { %v4671_v26 = vadd.f32 %v2853_v9, %v1504_v10 }
 0x1d1   : > { %v3052_v44 = vadd.f32 %v4670_v13, %v6183_v8 }
 0x1d2   : > { %v3051_v17 = vadd.f32 %v4671_v26, %v6183_v8  ;;  %v4587_v18 = vpop.f32.mrb[2].mxu0 }
 0x1d3   : > { %vm3085_vm3 = vcmp.ge.f32.partialorder %v3052_v44, 0.0  ;;  %v3118_v37 = vmul.f32 %v6185_v43, %v3052_v44  ;;  %v4672_v15 = vadd.f32 %v4587_v18, %v4317_v33  ;;  %v2863_v3 = vpop.f32.mrb[3].mxu0 }
 0x1d4   : > { %vm3084_vm4 = vcmp.ge.f32.partialorder %v3051_v17, 0.0  ;;  %v3117_v11 = vmul.f32 %v6185_v43, %v3051_v17  ;;  %v4673_v53 = vadd.f32 %v2863_v3, %v1514_v38 }
 0x1d5   : > { %v3150_v47 = vsel %vm3085_vm3, %v3052_v44, %v3118_v37  ;;  %v3054_v50 = vadd.f32 %v4672_v15, %v6183_v8 }
 0x1d6   : > { %v3754_v19 = vpack.c.bf16 %v3150_v47, %v3150_v47  ;;  %v3149_v27 = vsel %vm3084_vm4, %v3051_v17, %v3117_v11  ;;  %v3053_v28 = vadd.f32 %v4673_v53, %v6183_v8  ;;  %v4590_v48 = vpop.f32.mrb[4].mxu0 }
 0x1d7   : > { %v3753_v58 = vpack.c.bf16 %v3149_v27, %v3149_v27  ;;  %vm3087_vm6 = vcmp.ge.f32.partialorder %v3054_v50, 0.0  ;;  %v3120_v54 = vmul.f32 %v6185_v43, %v3054_v50  ;;  %v4674_v60 = vadd.f32 %v4590_v48, %v4320_v62  ;;  %v2873_v1 = vpop.f32.mrb[5].mxu0 }
 0x1d8   : > { %3311 = vst.msk [vmem:[%s6195_s8 + $0x4] sm:$0xf] %vm3309_vm5, %v3754_v19  ;;  %vm3086_vm7 = vcmp.ge.f32.partialorder %v3053_v28, 0.0  ;;  %v3119_v6 = vmul.f32 %v6185_v43, %v3053_v28  ;;  %v4675_v16 = vadd.f32 %v2873_v1, %v1524_v46 }
 0x1d9   : > { %3310 = vst.msk [vmem:[%s6195_s8] sm:$0xf] %vm3309_vm5, %v3753_v58  ;;  %v3152_v14 = vsel %vm3087_vm6, %v3054_v50, %v3120_v54  ;;  %v3056_v52 = vadd.f32 %v4674_v60, %v6183_v8 }
 0x1da   : > { %v3756_v23 = vpack.c.bf16 %v3152_v14, %v3152_v14  ;;  %v3151_v34 = vsel %vm3086_vm7, %v3053_v28, %v3119_v6  ;;  %v3055_v40 = vadd.f32 %v4675_v16, %v6183_v8  ;;  %v4593_v5 = vpop.f32.mrb[6].mxu0 }
 0x1db   : > { %v3755_v20 = vpack.c.bf16 %v3151_v34, %v3151_v34  ;;  %vm3089_vm8 = vcmp.ge.f32.partialorder %v3056_v52, 0.0  ;;  %v3122_v21 = vmul.f32 %v6185_v43, %v3056_v52  ;;  %v4676_v49 = vadd.f32 %v4593_v5, %v4323_v36  ;;  %v2883_v56 = vpop.f32.mrb[7].mxu0 }
 0x1dc   : > { %3313 = vst.msk [vmem:[%s6195_s8 + $0xc] sm:$0xf] %vm3309_vm5, %v3756_v23  ;;  %vm3088_vm9 = vcmp.ge.f32.partialorder %v3055_v40, 0.0  ;;  %v3121_v57 = vmul.f32 %v6185_v43, %v3055_v40  ;;  %v4677_v63 = vadd.f32 %v2883_v56, %v1534_v51 }
 0x1dd   : > { %3312 = vst.msk [vmem:[%s6195_s8 + $0x8] sm:$0xf] %vm3309_vm5, %v3755_v20  ;;  %v3154_v12 = vsel %vm3089_vm8, %v3056_v52, %v3122_v21  ;;  %v3058_v42 = vadd.f32 %v4676_v49, %v6183_v8 }
 0x1de   : > { %v3758_v45 = vpack.c.bf16 %v3154_v12, %v3154_v12  ;;  %v3153_v32 = vsel %vm3088_vm9, %v3055_v40, %v3121_v57  ;;  %v3057_v55 = vadd.f32 %v4677_v63, %v6183_v8  ;;  %v4596_v29 = vpop.f32.mrb[8].mxu0 }
 0x1df   : > { %v3757_v61 = vpack.c.bf16 %v3153_v32, %v3153_v32  ;;  %vm3091_vm10 = vcmp.ge.f32.partialorder %v3058_v42, 0.0  ;;  %v3124_v35 = vmul.f32 %v6185_v43, %v3058_v42  ;;  %v4678_v4 = vadd.f32 %v4596_v29, %v6164_v24  ;;  %v2893_v30 = vpop.f32.mrb[9].mxu0 }
 0x1e0   : > { %3315 = vst.msk [vmem:[%s6195_s8 + $0x14] sm:$0xf] %vm3309_vm5, %v3758_v45  ;;  %vm3090_vm11 = vcmp.ge.f32.partialorder %v3057_v55, 0.0  ;;  %v3123_v59 = vmul.f32 %v6185_v43, %v3057_v55  ;;  %v4679_v10 = vadd.f32 %v2893_v30, %v6166_v0 }
 0x1e1   : > { %3314 = vst.msk [vmem:[%s6195_s8 + $0x10] sm:$0xf] %vm3309_vm5, %v3757_v61  ;;  %v3156_v33 = vsel %vm3091_vm10, %v3058_v42, %v3124_v35  ;;  %v3060_v38 = vadd.f32 %v4678_v4, %v6183_v8 }
 0x1e2   : > { %v3760_v62 = vpack.c.bf16 %v3156_v33, %v3156_v33  ;;  %v3155_v46 = vsel %vm3090_vm11, %v3057_v55, %v3123_v59  ;;  %v3059_v36 = vadd.f32 %v4679_v10, %v6183_v8  ;;  %v4599_v51 = vpop.f32.mrb[10].mxu0 }
 0x1e3   : > { %v3759_v24 = vpack.c.bf16 %v3155_v46, %v3155_v46  ;;  %vm3093_vm12 = vcmp.ge.f32.partialorder %v3060_v38, 0.0  ;;  %v3126_v7 = vmul.f32 %v6185_v43, %v3060_v38  ;;  %v4680_v13 = vadd.f32 %v4599_v51, %v6168_v2  ;;  %v2903_v9 = vpop.f32.mrb[11].mxu0 }
 0x1e4   : > { %3317 = vst.msk [vmem:[%s6195_s8 + $0x1c] sm:$0xf] %vm3309_vm5, %v3760_v62  ;;  %vm3092_vm13 = vcmp.ge.f32.partialorder %v3059_v36, 0.0  ;;  %v3125_v0 = vmul.f32 %v6185_v43, %v3059_v36  ;;  %v4681_v26 = vadd.f32 %v2903_v9, %v6170_v39 }
 0x1e5   : > { %3316 = vst.msk [vmem:[%s6195_s8 + $0x18] sm:$0xf] %vm3309_vm5, %v3759_v24  ;;  %v3158_v44 = vsel %vm3093_vm12, %v3060_v38, %v3126_v7  ;;  %v3062_v17 = vadd.f32 %v4680_v13, %v6183_v8 }
 0x1e6   : > { %v3762_v18 = vpack.c.bf16 %v3158_v44, %v3158_v44  ;;  %v3157_v37 = vsel %vm3092_vm13, %v3059_v36, %v3125_v0  ;;  %v3061_v15 = vadd.f32 %v4681_v26, %v6183_v8  ;;  %v4602_v2 = vpop.f32.mrb[12].mxu0 }
 0x1e7   : > { %v3761_v3 = vpack.c.bf16 %v3157_v37, %v3157_v37  ;;  %vm3095_vm14 = vcmp.ge.f32.partialorder %v3062_v17, 0.0  ;;  %v3128_v11 = vmul.f32 %v6185_v43, %v3062_v17  ;;  %v4682_v53 = vadd.f32 %v4602_v2, %v6172_v31  ;;  %v2913_v47 = vpop.f32.mrb[13].mxu0 }
 0x1e8   : > { %3319 = vst.msk [vmem:[%s6195_s8 + $0x24] sm:$0xf] %vm3309_vm5, %v3762_v18  ;;  %vm3094_vm15 = vcmp.ge.f32.partialorder %v3061_v15, 0.0  ;;  %v3127_v39 = vmul.f32 %v6185_v43, %v3061_v15  ;;  %v4683_v50 = vadd.f32 %v2913_v47, %v6174_v41 }
 0x1e9   : > { %3318 = vst.msk [vmem:[%s6195_s8 + $0x20] sm:$0xf] %vm3309_vm5, %v3761_v3  ;;  %v3160_v19 = vsel %vm3095_vm14, %v3062_v17, %v3128_v11  ;;  %v3064_v27 = vadd.f32 %v4682_v53, %v6183_v8 }
 0x1ea   : > { %v3764_v28 = vpack.c.bf16 %v3160_v19, %v3160_v19  ;;  %v3159_v48 = vsel %vm3094_vm15, %v3061_v15, %v3127_v39  ;;  %v3063_v58 = vadd.f32 %v4683_v50, %v6183_v8  ;;  %v4605_v31 = vpop.f32.mrb[14].mxu0 }
 0x1eb   : > { %v3763_v54 = vpack.c.bf16 %v3159_v48, %v3159_v48  ;;  %vm3097_vm0 = vcmp.ge.f32.partialorder %v3064_v27, 0.0  ;;  %v3130_v60 = vmul.f32 %v6185_v43, %v3064_v27  ;;  %v4684_v1 = vadd.f32 %v4605_v31, %v6176_v25  ;;  %v2923_v6 = vpop.f32.mrb[15].mxu0 }
 0x1ec   : > { %3321 = vst.msk [vmem:[%s6195_s8 + $0x2c] sm:$0xf] %vm3309_vm5, %v3764_v28  ;;  %vm3096_vm1 = vcmp.ge.f32.partialorder %v3063_v58, 0.0  ;;  %v3129_v41 = vmul.f32 %v6185_v43, %v3063_v58  ;;  %v4685_v16 = vadd.f32 %v2923_v6, %v6178_v22 }
 0x1ed   : > { %3320 = vst.msk [vmem:[%s6195_s8 + $0x28] sm:$0xf] %vm3309_vm5, %v3763_v54  ;;  %v3162_v14 = vsel %vm3097_vm0, %v3064_v27, %v3130_v60  ;;  %v3066_v52 = vadd.f32 %v4684_v1, %v6183_v8 }
 0x1ee   : > { %v3766_v23 = vpack.c.bf16 %v3162_v14, %v3162_v14  ;;  %v3161_v34 = vsel %vm3096_vm1, %v3063_v58, %v3129_v41  ;;  %v3065_v40 = vadd.f32 %v4685_v16, %v6183_v8  ;;  %v4392_v25 = vpop.f32.mrb[16].mxu1  ;;  %v4608_v5 = vpop.f32.mrb[16].mxu0 }
 0x1ef   : > { %v3765_v20 = vpack.c.bf16 %v3161_v34, %v3161_v34  ;;  %vm3099_vm2 = vcmp.ge.f32.partialorder %v3066_v52, 0.0  ;;  %v3132_v21 = vmul.f32 %v6185_v43, %v3066_v52  ;;  %v4686_v49 = vadd.f32 %v4608_v5, %v4392_v25  ;;  %v1855_v56 = vpop.f32.mrb[17].mxu1  ;;  %v2933_v57 = vpop.f32.mrb[17].mxu0 }
 0x1f0   : > { %3323 = vst.msk [vmem:[%s6195_s8 + $0x34] sm:$0xf] %vm3309_vm5, %v3766_v23  ;;  %vm3098_vm3 = vcmp.ge.f32.partialorder %v3065_v40, 0.0  ;;  %v3131_v22 = vmul.f32 %v6185_v43, %v3065_v40  ;;  %v4687_v63 = vadd.f32 %v2933_v57, %v1855_v56 }
 0x1f1   : > { %3322 = vst.msk [vmem:[%s6195_s8 + $0x30] sm:$0xf] %vm3309_vm5, %v3765_v20  ;;  %v3164_v12 = vsel %vm3099_vm2, %v3066_v52, %v3132_v21  ;;  %v3068_v42 = vadd.f32 %v4686_v49, %v6183_v8 }
 0x1f2   : > { %v3768_v45 = vpack.c.bf16 %v3164_v12, %v3164_v12  ;;  %v3163_v32 = vsel %vm3098_vm3, %v3065_v40, %v3131_v22  ;;  %v3067_v55 = vadd.f32 %v4687_v63, %v6183_v8  ;;  %v4395_v29 = vpop.f32.mrb[18].mxu1  ;;  %v4611_v61 = vpop.f32.mrb[18].mxu0 }
 0x1f3   : > { %v3767_v35 = vpack.c.bf16 %v3163_v32, %v3163_v32  ;;  %vm3101_vm4 = vcmp.ge.f32.partialorder %v3068_v42, 0.0  ;;  %v3134_v4 = vmul.f32 %v6185_v43, %v3068_v42  ;;  %v4688_v30 = vadd.f32 %v4611_v61, %v4395_v29  ;;  %v1865_v59 = vpop.f32.mrb[19].mxu1  ;;  %v2943_v10 = vpop.f32.mrb[19].mxu0 }
 0x1f4   : > { %3325 = vst.msk [vmem:[%s6195_s8 + $0x3c] sm:$0xf] %vm3309_vm5, %v3768_v45  ;;  %vm3100_vm6 = vcmp.ge.f32.partialorder %v3067_v55, 0.0  ;;  %v3133_v33 = vmul.f32 %v6185_v43, %v3067_v55  ;;  %v4689_v38 = vadd.f32 %v2943_v10, %v1865_v59 }
 0x1f5   : > { %3324 = vst.msk [vmem:[%s6195_s8 + $0x38] sm:$0xf] %vm3309_vm5, %v3767_v35  ;;  %v3166_v62 = vsel %vm3101_vm4, %v3068_v42, %v3134_v4  ;;  %v3070_v46 = vadd.f32 %v4688_v30, %v6183_v8 }
 0x1f6   : > { %v3770_v36 = vpack.c.bf16 %v3166_v62, %v3166_v62  ;;  %v3165_v51 = vsel %vm3100_vm6, %v3067_v55, %v3133_v33  ;;  %v3069_v24 = vadd.f32 %v4689_v38, %v6183_v8  ;;  %v4398_v7 = vpop.f32.mrb[20].mxu1  ;;  %v4614_v13 = vpop.f32.mrb[20].mxu0 }
 0x1f7   : > { %v3769_v9 = vpack.c.bf16 %v3165_v51, %v3165_v51  ;;  %vm3103_vm7 = vcmp.ge.f32.partialorder %v3070_v46, 0.0  ;;  %v3136_v0 = vmul.f32 %v6185_v43, %v3070_v46  ;;  %v4690_v26 = vadd.f32 %v4614_v13, %v4398_v7  ;;  %v1875_v44 = vpop.f32.mrb[21].mxu1  ;;  %v2953_v17 = vpop.f32.mrb[21].mxu0 }
 0x1f8   : > { %3327 = vst.msk [vmem:[%s6195_s8 + $0x44] sm:$0xf] %vm3309_vm5, %v3770_v36  ;;  %vm3102_vm8 = vcmp.ge.f32.partialorder %v3069_v24, 0.0  ;;  %v3135_v18 = vmul.f32 %v6185_v43, %v3069_v24  ;;  %v4691_v37 = vadd.f32 %v2953_v17, %v1875_v44 }
 0x1f9   : > { %3326 = vst.msk [vmem:[%s6195_s8 + $0x40] sm:$0xf] %vm3309_vm5, %v3769_v9  ;;  %v3168_v15 = vsel %vm3103_vm7, %v3070_v46, %v3136_v0  ;;  %v3072_v2 = vadd.f32 %v4690_v26, %v6183_v8 }
 0x1fa   : > { %v3772_v3 = vpack.c.bf16 %v3168_v15, %v3168_v15  ;;  %v3167_v11 = vsel %vm3102_vm8, %v3069_v24, %v3135_v18  ;;  %v3071_v53 = vadd.f32 %v4691_v37, %v6183_v8  ;;  %v4401_v47 = vpop.f32.mrb[22].mxu1  ;;  %v4617_v39 = vpop.f32.mrb[22].mxu0 }
 0x1fb   : > { %v3771_v50 = vpack.c.bf16 %v3167_v11, %v3167_v11  ;;  %vm3105_vm9 = vcmp.ge.f32.partialorder %v3072_v2, 0.0  ;;  %v3138_v19 = vmul.f32 %v6185_v43, %v3072_v2  ;;  %v4692_v27 = vadd.f32 %v4617_v39, %v4401_v47  ;;  %v1885_v28 = vpop.f32.mrb[23].mxu1  ;;  %v2963_v48 = vpop.f32.mrb[23].mxu0 }
 0x1fc   : > { %3329 = vst.msk [vmem:[%s6195_s8 + $0x4c] sm:$0xf] %vm3309_vm5, %v3772_v3  ;;  %vm3104_vm10 = vcmp.ge.f32.partialorder %v3071_v53, 0.0  ;;  %v3137_v58 = vmul.f32 %v6185_v43, %v3071_v53  ;;  %v4693_v31 = vadd.f32 %v2963_v48, %v1885_v28 }
 0x1fd   : > { %3328 = vst.msk [vmem:[%s6195_s8 + $0x48] sm:$0xf] %vm3309_vm5, %v3771_v50  ;;  %v3170_v54 = vsel %vm3105_vm9, %v3072_v2, %v3138_v19  ;;  %v3074_v60 = vadd.f32 %v4692_v27, %v6183_v8 }
 0x1fe   : > { %v3774_v1 = vpack.c.bf16 %v3170_v54, %v3170_v54  ;;  %v3169_v6 = vsel %vm3104_vm10, %v3071_v53, %v3137_v58  ;;  %v3073_v41 = vadd.f32 %v4693_v31, %v6183_v8  ;;  %v4404_v16 = vpop.f32.mrb[24].mxu1  ;;  %v4620_v14 = vpop.f32.mrb[24].mxu0 }
 0x1ff   : > { %v3773_v52 = vpack.c.bf16 %v3169_v6, %v3169_v6  ;;  %vm3107_vm11 = vcmp.ge.f32.partialorder %v3074_v60, 0.0  ;;  %v3140_v23 = vmul.f32 %v6185_v43, %v3074_v60  ;;  %v4694_v34 = vadd.f32 %v4620_v14, %v4404_v16  ;;  %v1895_v40 = vpop.f32.mrb[25].mxu1  ;;  %v2973_v25 = vpop.f32.mrb[25].mxu0 }
 0x200   : > { %3331 = vst.msk [vmem:[%s6195_s8 + $0x54] sm:$0xf] %vm3309_vm5, %v3774_v1  ;;  %vm3106_vm12 = vcmp.ge.f32.partialorder %v3073_v41, 0.0  ;;  %v3139_v5 = vmul.f32 %v6185_v43, %v3073_v41  ;;  %v4695_v20 = vadd.f32 %v2973_v25, %v1895_v40 }
 0x201   : > { %3330 = vst.msk [vmem:[%s6195_s8 + $0x50] sm:$0xf] %vm3309_vm5, %v3773_v52  ;;  %v3172_v21 = vsel %vm3107_vm11, %v3074_v60, %v3140_v23  ;;  %v3076_v49 = vadd.f32 %v4694_v34, %v6183_v8 }
 0x202   : > { %v3776_v56 = vpack.c.bf16 %v3172_v21, %v3172_v21  ;;  %v3171_v57 = vsel %vm3106_vm12, %v3073_v41, %v3139_v5  ;;  %v3075_v22 = vadd.f32 %v4695_v20, %v6183_v8  ;;  %v4407_v63 = vpop.f32.mrb[26].mxu1  ;;  %v4623_v12 = vpop.f32.mrb[26].mxu0 }
 0x203   : > { %v3775_v42 = vpack.c.bf16 %v3171_v57, %v3171_v57  ;;  %vm3109_vm13 = vcmp.ge.f32.partialorder %v3076_v49, 0.0  ;;  %v3142_v45 = vmul.f32 %v6185_v43, %v3076_v49  ;;  %v4696_v32 = vadd.f32 %v4623_v12, %v4407_v63  ;;  %v1905_v55 = vpop.f32.mrb[27].mxu1  ;;  %v2983_v29 = vpop.f32.mrb[27].mxu0 }
 0x204   : > { %3333 = vst.msk [vmem:[%s6195_s8 + $0x5c] sm:$0xf] %vm3309_vm5, %v3776_v56  ;;  %vm3108_vm14 = vcmp.ge.f32.partialorder %v3075_v22, 0.0  ;;  %v3141_v61 = vmul.f32 %v6185_v43, %v3075_v22  ;;  %v4697_v35 = vadd.f32 %v2983_v29, %v1905_v55 }
 0x205   : > { %3332 = vst.msk [vmem:[%s6195_s8 + $0x58] sm:$0xf] %vm3309_vm5, %v3775_v42  ;;  %v3174_v4 = vsel %vm3109_vm13, %v3076_v49, %v3142_v45  ;;  %v3078_v30 = vadd.f32 %v4696_v32, %v6183_v8 }
 0x206   : > { %v3778_v59 = vpack.c.bf16 %v3174_v4, %v3174_v4  ;;  %v3173_v10 = vsel %vm3108_vm14, %v3075_v22, %v3141_v61  ;;  %v3077_v33 = vadd.f32 %v4697_v35, %v6183_v8  ;;  %v4410_v38 = vpop.f32.mrb[28].mxu1  ;;  %v4626_v62 = vpop.f32.mrb[28].mxu0 }
 0x207   : > { %v3777_v46 = vpack.c.bf16 %v3173_v10, %v3173_v10  ;;  %vm3111_vm15 = vcmp.ge.f32.partialorder %v3078_v30, 0.0  ;;  %v3144_v36 = vmul.f32 %v6185_v43, %v3078_v30  ;;  %v4698_v51 = vadd.f32 %v4626_v62, %v4410_v38  ;;  %v1915_v24 = vpop.f32.mrb[29].mxu1  ;;  %v2993_v7 = vpop.f32.mrb[29].mxu0 }
 0x208   : > { %3335 = vst.msk [vmem:[%s6195_s8 + $0x64] sm:$0xf] %vm3309_vm5, %v3778_v59  ;;  %vm3110_vm0 = vcmp.ge.f32.partialorder %v3077_v33, 0.0  ;;  %v3143_v13 = vmul.f32 %v6185_v43, %v3077_v33  ;;  %v4699_v9 = vadd.f32 %v2993_v7, %v1915_v24 }
 0x209   : > { %3334 = vst.msk [vmem:[%s6195_s8 + $0x60] sm:$0xf] %vm3309_vm5, %v3777_v46  ;;  %v3176_v0 = vsel %vm3111_vm15, %v3078_v30, %v3144_v36  ;;  %v3080_v26 = vadd.f32 %v4698_v51, %v6183_v8 }
 0x20a   : > { %v3780_v44 = vpack.c.bf16 %v3176_v0, %v3176_v0  ;;  %v3175_v17 = vsel %vm3110_vm0, %v3077_v33, %v3143_v13  ;;  %v3079_v18 = vadd.f32 %v4699_v9, %v6183_v8  ;;  %v4413_v37 = vpop.f32.mrb[30].mxu1  ;;  %v4629_v15 = vpop.f32.mrb[30].mxu0 }
 0x20b   : > { %v3779_v2 = vpack.c.bf16 %v3175_v17, %v3175_v17  ;;  %vm3113_vm1 = vcmp.ge.f32.partialorder %v3080_v26, 0.0  ;;  %v3146_v3 = vmul.f32 %v6185_v43, %v3080_v26  ;;  %v4700_v11 = vadd.f32 %v4629_v15, %v4413_v37  ;;  %v1925_v53 = vpop.f32.mrb[31].mxu1  ;;  %v3003_v47 = vpop.f32.mrb[31].mxu0 }
 0x20c   : > { %3337 = vst.msk [vmem:[%s6195_s8 + $0x6c] sm:$0xf] %vm3309_vm5, %v3780_v44  ;;  %vm3112_vm2 = vcmp.ge.f32.partialorder %v3079_v18, 0.0  ;;  %v3145_v39 = vmul.f32 %v6185_v43, %v3079_v18  ;;  %v4701_v50 = vadd.f32 %v3003_v47, %v1925_v53 }
 0x20d   : > { %3336 = vst.msk [vmem:[%s6195_s8 + $0x68] sm:$0xf] %vm3309_vm5, %v3779_v2  ;;  %v3178_v19 = vsel %vm3113_vm1, %v3080_v26, %v3146_v3  ;;  %v3082_v27 = vadd.f32 %v4700_v11, %v6183_v8 }
 0x20e   : > { %v3782_v28 = vpack.c.bf16 %v3178_v19, %v3178_v19  ;;  %v3177_v48 = vsel %vm3112_vm2, %v3079_v18, %v3145_v39  ;;  %v3081_v58 = vadd.f32 %v4701_v50, %v6183_v8 }
 0x20f   : > { %v3781_v31 = vpack.c.bf16 %v3177_v48, %v3177_v48  ;;  %vm3115_vm3 = vcmp.ge.f32.partialorder %v3082_v27, 0.0  ;;  %v3148_v54 = vmul.f32 %v6185_v43, %v3082_v27 }
 0x210   : > { %3339 = vst.msk [vmem:[%s6195_s8 + $0x74] sm:$0xf] %vm3309_vm5, %v3782_v28  ;;  %vm3114_vm4 = vcmp.ge.f32.partialorder %v3081_v58, 0.0  ;;  %v3147_v60 = vmul.f32 %v6185_v43, %v3081_v58 }
 0x211   : > { %3338 = vst.msk [vmem:[%s6195_s8 + $0x70] sm:$0xf] %vm3309_vm5, %v3781_v31  ;;  %v3180_v1 = vsel %vm3115_vm3, %v3082_v27, %v3148_v54 }
 0x212   : > { %v3784_v6 = vpack.c.bf16 %v3180_v1, %v3180_v1  ;;  %v3179_v41 = vsel %vm3114_vm4, %v3081_v58, %v3147_v60 }
 0x213   : > { %v3783_v16 = vpack.c.bf16 %v3179_v41, %v3179_v41 }
 0x214   : > { %3341 = vst.msk [vmem:[%s6195_s8 + $0x7c] sm:$0xf] %vm3309_vm5, %v3784_v6 }
 0x215   : > { %3340 = vst.msk [vmem:[%s6195_s8 + $0x78] sm:$0xf] %vm3309_vm5, %v3783_v16 }
 0x216 PF: > { %s15_s17 = sadd.s32 1, %s4942_s17  }
 0x217   : > { %p12_p4 = scmp.ge.s32.totalorder %s15_s17, 4  }
 0x219   :  { %14 = sbr.rel (!%p12_p4) target bundleno = 2 (0x2), region = 74 }

</bundles_post_ra>
